<compile_context>
chip_gen: v7x
topology: tpu7x:2x2x1
jax: 0.10.0
libtpu: 0.0.40
codegen_flags: <defaults>
</compile_context>

<pallas_src>
import functools
import math

import numpy as np
import jax
import jax.numpy as jnp
from jax.experimental import pallas as pl
from jax.experimental.pallas import tpu as pltpu

OUT_PAD = 128  # lane-dense padded width of the output head


# ----------------------------------------------------------------------------
# Fused BERT kernel (one pallas_call per BERT forward)
# ----------------------------------------------------------------------------

def _ln(x, g, b, eps=1e-6):
    # TODO(synk): reference Norm class not provided; standard LayerNorm, eps=1e-6 (GBAF default).
    mu = jnp.mean(x, axis=-1, keepdims=True)
    var = jnp.mean(jnp.square(x - mu), axis=-1, keepdims=True)
    return (x - mu) * jax.lax.rsqrt(var + eps) * g + b


def _bert_fused_kernel(n_layers, heads, dh, d_model, out_valid, softmax_out,
                       src_ref, pe_ref, bias_ref, emb_w_ref, emb_b_ref,
                       ln1_g_ref, ln1_b_ref,
                       wq_ref, bq_ref, wk_ref, bk_ref, wv_ref, bv_ref,
                       wo_ref, bo_ref, ln2_g_ref, ln2_b_ref,
                       w1_ref, b1_ref, w2_ref, b2_ref,
                       nf_g_ref, nf_b_ref, out_w_ref, out_b_ref,
                       o_ref):
    f32 = jnp.float32
    scale = 1.0 / math.sqrt(dh)

    # embed + fixed positional encoding (folded into the kernel)
    x = jnp.dot(src_ref[...], emb_w_ref[...], preferred_element_type=f32) + emb_b_ref[...]
    x = x * math.sqrt(d_model) + pe_ref[...]

    bias = bias_ref[...]  # [M, M] additive attention mask (0 / -1e9), block-diagonal per sequence

    for l in range(n_layers):                       # static unroll over layers
        h = _ln(x, ln1_g_ref[l], ln1_b_ref[l])
        attn = jnp.zeros_like(x)
        for hh in range(heads):                     # static unroll over heads
            q = jnp.dot(h, wq_ref[l, hh], preferred_element_type=f32) + bq_ref[l, hh]
            k = jnp.dot(h, wk_ref[l, hh], preferred_element_type=f32) + bk_ref[l, hh]
            v = jnp.dot(h, wv_ref[l, hh], preferred_element_type=f32) + bv_ref[l, hh]
            s = jax.lax.dot_general(q, k, (((1,), (1,)), ((), ())),
                                    preferred_element_type=f32) * scale + bias
            s = s - jnp.max(s, axis=-1, keepdims=True)
            p = jnp.exp(s)
            p = p * pl.reciprocal(jnp.sum(p, axis=-1, keepdims=True), approx=True)
            hv = jnp.dot(p, v, preferred_element_type=f32)          # [M, dh]
            attn = attn + jnp.dot(hv, wo_ref[l, hh], preferred_element_type=f32)
        x = x + attn + bo_ref[l]                    # residual 1
        h = _ln(x, ln2_g_ref[l], ln2_b_ref[l])
        h = jnp.maximum(jnp.dot(h, w1_ref[l], preferred_element_type=f32) + b1_ref[l], 0.0)
        x = x + jnp.dot(h, w2_ref[l], preferred_element_type=f32) + b2_ref[l]   # residual 2

    x = _ln(x, nf_g_ref[...], nf_b_ref[...])
    out = jnp.dot(x, out_w_ref[...], preferred_element_type=f32) + out_b_ref[...]  # [M, OUT_PAD]
    if softmax_out:
        cols = jax.lax.broadcasted_iota(jnp.int32, out.shape, 1)
        out = jnp.where(cols < out_valid, out, -1e30)       # softmax only over valid columns
        out = out - jnp.max(out, axis=-1, keepdims=True)
        e = jnp.exp(out)
        out = e * pl.reciprocal(jnp.sum(e, axis=-1, keepdims=True), approx=True)
    o_ref[...] = out


def _full_spec(shape):
    nd = len(shape)
    return pl.BlockSpec(shape, lambda i, _nd=nd: (0,) * _nd)


@functools.lru_cache(maxsize=None)
def _make_bert(M, F_in, D, L, H, dh, Dff, out_pad, out_valid, softmax_out):
    kern = functools.partial(_bert_fused_kernel, L, H, dh, D, out_valid, softmax_out)
    shapes = [
        (M, F_in), (M, D), (M, M),            # src, pe, attention bias
        (F_in, D), (1, D),                    # embed
        (L, 1, D), (L, 1, D),                 # ln1 g/b
        (L, H, D, dh), (L, H, 1, dh),         # wq, bq (per-head)
        (L, H, D, dh), (L, H, 1, dh),         # wk, bk
        (L, H, D, dh), (L, H, 1, dh),         # wv, bv
        (L, H, dh, D), (L, 1, D),             # wo (per-head rows), bo
        (L, 1, D), (L, 1, D),                 # ln2 g/b
        (L, D, Dff), (L, 1, Dff),             # ff w1, b1
        (L, Dff, D), (L, 1, D),               # ff w2, b2
        (1, D), (1, D),                       # final norm g/b
        (D, out_pad), (1, out_pad),           # output head (padded to 128 lanes)
    ]
    return pl.pallas_call(
        kern,
        out_shape=jax.ShapeDtypeStruct((M, out_pad), jnp.float32),
        grid=(1,),
        in_specs=[_full_spec(s) for s in shapes],
        out_specs=_full_spec((M, out_pad)),
        compiler_params=pltpu.CompilerParams(dimension_semantics=("arbitrary",)),
    )


@functools.lru_cache(maxsize=None)
def _build_attn_bias(BE, S, valid_len):
    """Additive mask [BE*S, BE*S]: query i may attend key j iff same sequence and
    key position < valid_len of that sequence (full bidirectional prefix attention)."""
    M = BE * S
    bias = np.full((M, M), -1e9, np.float32)
    for b in range(BE):
        v = int(valid_len[b])
        bias[b * S:(b + 1) * S, b * S:b * S + v] = 0.0
    return jnp.asarray(bias)


def bert_forward(p, src, pe_table, valid_len, heads, out_valid, softmax_out):
    """src: [BE, S, F_in] -> [BE*S, OUT_PAD] (one fused pallas_call)."""
    BE, S, F_in = src.shape
    D = pe_table.shape[1]
    L = p['w1'].shape[0]
    Dff = p['w1'].shape[2]
    dh = D // heads
    out_pad = p['out_w'].shape[1]
    M = BE * S
    bias = _build_attn_bias(BE, S, tuple(int(v) for v in valid_len))
    pe2d = jnp.tile(pe_table[:S], (BE, 1))
    call = _make_bert(M, F_in, D, L, heads, dh, Dff, out_pad, out_valid, softmax_out)
    return call(src.reshape(M, F_in), pe2d, bias,
                p['embed_w'], p['embed_b'],
                p['ln1_g'], p['ln1_b'],
                p['wq'], p['bq'], p['wk'], p['bk'], p['wv'], p['bv'],
                p['wo'], p['bo'], p['ln2_g'], p['ln2_b'],
                p['w1'], p['b1'], p['w2'], p['b2'],
                p['norm_g'], p['norm_b'], p['out_w'], p['out_b'])


# ----------------------------------------------------------------------------
# Power-constraint kernel (batch normalization, isTraining == 1 branch)
# ----------------------------------------------------------------------------

@functools.lru_cache(maxsize=None)
def _make_power_constraint(B, F):
    # (x - mean_over_batch) / (std_over_batch(unbiased, like torch.std) + 1e-8)
    # NOTE: unbiased std divides by (B-1); B == 1 would be a divide-by-zero, matching torch.std.
    def kern(x_ref, o_ref):
        x = x_ref[...]
        mean = jnp.mean(x, axis=0, keepdims=True)
        var = jnp.sum(jnp.square(x - mean), axis=0, keepdims=True) / (B - 1)
        o_ref[...] = (x - mean) / (jnp.sqrt(var) + 1e-8)

    return pl.pallas_call(
        kern,
        out_shape=jax.ShapeDtypeStruct((B, F), jnp.float32),
        grid=(1,),
        in_specs=[pl.BlockSpec((B, F), lambda i: (0, 0))],
        out_specs=pl.BlockSpec((B, F), lambda i: (0, 0)),
    )


# ----------------------------------------------------------------------------
# SysModel forward (whole thing runs under one jax.jit)
# ----------------------------------------------------------------------------

def sys_model_forward(params, bVec, fwd_noise, fb_noise, args):
    B, K, rate = args['batchSize'], args['K'], args['rate']
    heads = args['heads_trx']
    S = K + 1
    pe = params['pe']                                                   # [S, d_model]

    bVec_add0 = jnp.concatenate(
        [bVec, jnp.zeros((B, 1, 1), jnp.float32)], axis=1)              # [B, S, 1]
    cn = fwd_noise + fb_noise                                           # [B, S, rate]

    # Build the K+1 growing-prefix inputs of the reference loop as ONE batch of padded sequences.
    # Step idx, position t:  t <  idx -> [bVec, cn[t,0], cn[t,1:]]   (full row)
    #                        t == idx -> [bVec, cn[t,0], zeros]      (newest position, no feedback)
    #                        t >  idx -> padding (masked out of attention, outputs discarded)
    full_row = jnp.concatenate([bVec_add0, cn], axis=2)                 # [B, S, rate+1]
    last_row = jnp.concatenate([bVec_add0, cn[:, :, 0:1],
                                jnp.zeros((B, S, rate - 1), jnp.float32)], axis=2)
    step = jnp.arange(S)[:, None, None, None]
    pos = jnp.arange(S)[None, None, :, None]
    src_steps = jnp.where(pos < step, full_row[None],
                          jnp.where(pos == step, last_row[None], 0.0))  # [S, B, S, rate+1]
    BE_T = S * B
    src_T = src_steps.reshape(BE_T, S, rate + 1)
    valid_T = tuple(idx + 1 for idx in range(S) for _ in range(B))      # prefix length per sequence

    # TODO(synk): getmask() not provided; args.mask == 0 path (full attention over the prefix).
    out_T = bert_forward(params['T'], src_T, pe, valid_T, heads,
                         out_valid=rate - 1, softmax_out=False)         # [BE_T*S, OUT_PAD]
    out_T = out_T.reshape(S, B, S, -1)[..., :rate - 1]                  # [step, B, pos, rate-1]
    codes = jnp.einsum('kbsf,ks->bkf', out_T, jnp.eye(S, dtype=jnp.float32))  # pos == step rows

    # power_constraint (isTraining == 1 branch): normalize over the batch dimension.
    Bc, Sc, Fc = codes.shape
    codes = _make_power_constraint(Bc, Sc * Fc)(
        codes.reshape(Bc, Sc * Fc)).reshape(Bc, Sc, Fc)

    codes = jnp.concatenate([2.0 * bVec_add0 - 1.0, codes], axis=2)     # [B, S, rate]
    # TODO(synk): Power_reallocate not provided; args.reloc == 0 path skips it.

    powerOut = jnp.mean(jnp.square(codes))

    src2 = codes + fwd_noise                                            # common == 0 path
    valid_R = tuple(S for _ in range(B))
    dec = bert_forward(params['R'], src2, pe, valid_R, heads,
                       out_valid=2, softmax_out=True)                   # [B*S, OUT_PAD]
    decSeq = dec.reshape(B, S, -1)[..., :2]
    return decSeq, powerOut


# ----------------------------------------------------------------------------
# Deterministic parameter initialization
# ----------------------------------------------------------------------------

def fixed_positional_encoding(max_len, d_model):
    pos = jnp.arange(max_len, dtype=jnp.float32)[:, None]
    div = jnp.exp(jnp.arange(0, d_model, 2, dtype=jnp.float32)
                  * (-math.log(10000.0) / d_model))
    pe = jnp.zeros((max_len, d_model), jnp.float32)
    pe = pe.at[:, 0::2].set(jnp.sin(pos * div))
    pe = pe.at[:, 1::2].set(jnp.cos(pos * div))
    return pe


def init_bert(key, input_size, d_model, n_layers, d_ff, out_dim, heads, out_pad):
    L, H = n_layers, heads
    dh = d_model // heads
    keys = iter(jax.random.split(key, 6 * L + 2))

    def w(shape):
        return jax.random.normal(next(keys), shape, jnp.float32) / math.sqrt(shape[0])

    def stack_w(shape):
        return jnp.stack([w(shape) for _ in range(L)])

    wq = stack_w((d_model, d_model)).reshape(L, d_model, H, dh).transpose(0, 2, 1, 3)
    wk = stack_w((d_model, d_model)).reshape(L, d_model, H, dh).transpose(0, 2, 1, 3)
    wv = stack_w((d_model, d_model)).reshape(L, d_model, H, dh).transpose(0, 2, 1, 3)
    wo = stack_w((d_model, d_model)).reshape(L, H, dh, d_model)
    w1 = stack_w((d_model, d_ff))
    w2 = stack_w((d_ff, d_model))
    out_w_core = w((d_model, out_dim))
    embed_w = w((input_size, d_model))

    out_w = jnp.zeros((d_model, out_pad), jnp.float32).at[:, :out_dim].set(out_w_core)

    zeros = lambda s: jnp.zeros(s, jnp.float32)
    ones = lambda s: jnp.ones(s, jnp.float32)
    return {
        'embed_w': embed_w, 'embed_b': zeros((1, d_model)),
        'ln1_g': ones((L, 1, d_model)), 'ln1_b': zeros((L, 1, d_model)),
        'wq': wq, 'bq': zeros((L, H, 1, dh)),
        'wk': wk, 'bk': zeros((L, H, 1, dh)),
        'wv': wv, 'bv': zeros((L, H, 1, dh)),
        'wo': wo, 'bo': zeros((L, 1, d_model)),
        'ln2_g': ones((L, 1, d_model)), 'ln2_b': zeros((L, 1, d_model)),
        'w1': w1, 'b1': zeros((L, 1, d_ff)),
        'w2': w2, 'b2': zeros((L, 1, d_model)),
        'norm_g': ones((1, d_model)), 'norm_b': zeros((1, d_model)),
        'out_w': out_w, 'out_b': zeros((1, out_pad)),
    }


def init_params(key, args):
    d_model = args['d_model_trx']
    d_ff = 4 * d_model
    rate, common, heads = args['rate'], args['common'], args['heads_trx']
    kT, kR = jax.random.split(key)
    return {
        # Tmodel: BERT(1, rate+1+common, d_model, N_trx, heads) -> out dim rate-1, no softmax
        'T': init_bert(kT, rate + 1 + common, d_model, args['N_trx'], d_ff,
                       rate - 1, heads, OUT_PAD),
        # Rmodel: BERT(0, rate+common, d_model, N_trx+1, heads) -> out dim 2, softmax
        'R': init_bert(kR, rate + common, d_model, args['N_trx'] + 1, d_ff,
                       2, heads, OUT_PAD),
        'pe': fixed_positional_encoding(args['K'] + 1, d_model),
    }


# ----------------------------------------------------------------------------
# Main
# ----------------------------------------------------------------------------

if __name__ == "__main__":
    args = dict(batchSize=2, K=4, rate=3, d_model_trx=32, N_trx=2,
                heads_trx=2, dropout=0.0, common=0, reloc=0, learnpe=0, mask=0)

    key = jax.random.PRNGKey(0)
    kp, kb, kf, kfb = jax.random.split(key, 4)
    params = init_params(kp, args)

    B, K, rate = args['batchSize'], args['K'], args['rate']
    bVec = jax.random.bernoulli(kb, 0.5, (B, K, 1)).astype(jnp.float32)
    fwd_noise = 0.1 * jax.random.normal(kf, (B, K + 1, rate), jnp.float32)
    fb_noise = 0.1 * jax.random.normal(kfb, (B, K + 1, rate), jnp.float32)

    # whole forward under a single jit (args are static, baked in via closure)
    forward = jax.jit(lambda p, b, fn, fb: sys_model_forward(p, b, fn, fb, args))

    decSeq, powerOut = forward(params, bVec, fwd_noise, fb_noise)
    decSeq = jax.block_until_ready(decSeq)
    powerOut = float(powerOut)

    assert decSeq.shape == (B, K + 1, 2)
    assert bool(jnp.all(jnp.isfinite(decSeq)))
    assert math.isfinite(powerOut)
    print("KERNEL_OK")
</pallas_src>

<mosaic_0001>
module attributes {stable_mosaic.version = 11 : i64} {
  func.func @_bert_fused_kernel(%arg0: i32, %arg1: memref<50x4xf32, #tpu.memory_space<vmem>>, %arg2: memref<50x32xf32, #tpu.memory_space<vmem>>, %arg3: memref<50x50xf32, #tpu.memory_space<vmem>>, %arg4: memref<4x32xf32, #tpu.memory_space<vmem>>, %arg5: memref<1x32xf32, #tpu.memory_space<vmem>>, %arg6: memref<2x1x32xf32, #tpu.memory_space<vmem>>, %arg7: memref<2x1x32xf32, #tpu.memory_space<vmem>>, %arg8: memref<2x2x32x16xf32, #tpu.memory_space<vmem>>, %arg9: memref<2x2x1x16xf32, #tpu.memory_space<vmem>>, %arg10: memref<2x2x32x16xf32, #tpu.memory_space<vmem>>, %arg11: memref<2x2x1x16xf32, #tpu.memory_space<vmem>>, %arg12: memref<2x2x32x16xf32, #tpu.memory_space<vmem>>, %arg13: memref<2x2x1x16xf32, #tpu.memory_space<vmem>>, %arg14: memref<2x2x16x32xf32, #tpu.memory_space<vmem>>, %arg15: memref<2x1x32xf32, #tpu.memory_space<vmem>>, %arg16: memref<2x1x32xf32, #tpu.memory_space<vmem>>, %arg17: memref<2x1x32xf32, #tpu.memory_space<vmem>>, %arg18: memref<2x32x128xf32, #tpu.memory_space<vmem>>, %arg19: memref<2x1x128xf32, #tpu.memory_space<vmem>>, %arg20: memref<2x128x32xf32, #tpu.memory_space<vmem>>, %arg21: memref<2x1x32xf32, #tpu.memory_space<vmem>>, %arg22: memref<1x32xf32, #tpu.memory_space<vmem>>, %arg23: memref<1x32xf32, #tpu.memory_space<vmem>>, %arg24: memref<32x128xf32, #tpu.memory_space<vmem>>, %arg25: memref<1x128xf32, #tpu.memory_space<vmem>>, %arg26: memref<50x128xf32, #tpu.memory_space<vmem>>) attributes {dimension_semantics = [#tpu.dimension_semantics<arbitrary>], iteration_bounds = array<i64: 1>, scalar_prefetch = 0 : i64, scratch_operands = 0 : i64, tpu.core_type = #tpu.core_type<tc>, window_params = [{pipeline_mode = #tpu.pipeline_mode<synchronous>, transform_indices = @transform_0, window_bounds = array<i64: 50, 4>}, {pipeline_mode = #tpu.pipeline_mode<synchronous>, transform_indices = @transform_1, window_bounds = array<i64: 50, 32>}, {pipeline_mode = #tpu.pipeline_mode<synchronous>, transform_indices = @transform_2, window_bounds = array<i64: 50, 50>}, {pipeline_mode = #tpu.pipeline_mode<synchronous>, transform_indices = @transform_3, window_bounds = array<i64: 4, 32>}, {pipeline_mode = #tpu.pipeline_mode<synchronous>, transform_indices = @transform_4, window_bounds = array<i64: 1, 32>}, {pipeline_mode = #tpu.pipeline_mode<synchronous>, transform_indices = @transform_5, window_bounds = array<i64: 2, 1, 32>}, {pipeline_mode = #tpu.pipeline_mode<synchronous>, transform_indices = @transform_6, window_bounds = array<i64: 2, 1, 32>}, {pipeline_mode = #tpu.pipeline_mode<synchronous>, transform_indices = @transform_7, window_bounds = array<i64: 2, 2, 32, 16>}, {pipeline_mode = #tpu.pipeline_mode<synchronous>, transform_indices = @transform_8, window_bounds = array<i64: 2, 2, 1, 16>}, {pipeline_mode = #tpu.pipeline_mode<synchronous>, transform_indices = @transform_9, window_bounds = array<i64: 2, 2, 32, 16>}, {pipeline_mode = #tpu.pipeline_mode<synchronous>, transform_indices = @transform_10, window_bounds = array<i64: 2, 2, 1, 16>}, {pipeline_mode = #tpu.pipeline_mode<synchronous>, transform_indices = @transform_11, window_bounds = array<i64: 2, 2, 32, 16>}, {pipeline_mode = #tpu.pipeline_mode<synchronous>, transform_indices = @transform_12, window_bounds = array<i64: 2, 2, 1, 16>}, {pipeline_mode = #tpu.pipeline_mode<synchronous>, transform_indices = @transform_13, window_bounds = array<i64: 2, 2, 16, 32>}, {pipeline_mode = #tpu.pipeline_mode<synchronous>, transform_indices = @transform_14, window_bounds = array<i64: 2, 1, 32>}, {pipeline_mode = #tpu.pipeline_mode<synchronous>, transform_indices = @transform_15, window_bounds = array<i64: 2, 1, 32>}, {pipeline_mode = #tpu.pipeline_mode<synchronous>, transform_indices = @transform_16, window_bounds = array<i64: 2, 1, 32>}, {pipeline_mode = #tpu.pipeline_mode<synchronous>, transform_indices = @transform_17, window_bounds = array<i64: 2, 32, 128>}, {pipeline_mode = #tpu.pipeline_mode<synchronous>, transform_indices = @transform_18, window_bounds = array<i64: 2, 1, 128>}, {pipeline_mode = #tpu.pipeline_mode<synchronous>, transform_indices = @transform_19, window_bounds = array<i64: 2, 128, 32>}, {pipeline_mode = #tpu.pipeline_mode<synchronous>, transform_indices = @transform_20, window_bounds = array<i64: 2, 1, 32>}, {pipeline_mode = #tpu.pipeline_mode<synchronous>, transform_indices = @transform_21, window_bounds = array<i64: 1, 32>}, {pipeline_mode = #tpu.pipeline_mode<synchronous>, transform_indices = @transform_22, window_bounds = array<i64: 1, 32>}, {pipeline_mode = #tpu.pipeline_mode<synchronous>, transform_indices = @transform_23, window_bounds = array<i64: 32, 128>}, {pipeline_mode = #tpu.pipeline_mode<synchronous>, transform_indices = @transform_24, window_bounds = array<i64: 1, 128>}, {pipeline_mode = #tpu.pipeline_mode<synchronous>, transform_indices = @transform_25, window_bounds = array<i64: 50, 128>}]} {
    %c0 = arith.constant 0 : index
    %c0_0 = arith.constant 0 : index
    %0 = vector.load %arg1[%c0, %c0_0] : memref<50x4xf32, #tpu.memory_space<vmem>>, vector<50x4xf32>
    %c0_1 = arith.constant 0 : index
    %c0_2 = arith.constant 0 : index
    %1 = vector.load %arg4[%c0_1, %c0_2] : memref<4x32xf32, #tpu.memory_space<vmem>>, vector<4x32xf32>
    %cst = arith.constant dense<0.000000e+00> : vector<50x32xf32>
    %2 = tpu.matmul %0, %1, %cst {dimension_numbers = #tpu.dot_dimension_numbers<[1], [0], [0], [1], [0, 0, 1, 1], [], []>} : vector<50x4xf32>, vector<4x32xf32>, vector<50x32xf32> -> vector<50x32xf32>
    %c0_3 = arith.constant 0 : index
    %c0_4 = arith.constant 0 : index
    %3 = vector.load %arg5[%c0_3, %c0_4] : memref<1x32xf32, #tpu.memory_space<vmem>>, vector<1x32xf32>
    %4 = vector.broadcast %3 : vector<1x32xf32> to vector<50x32xf32>
    %5 = arith.addf %2, %4 : vector<50x32xf32>
    %cst_5 = arith.constant 5.65685415 : f32
    %6 = vector.broadcast %cst_5 : f32 to vector<50x32xf32>
    %7 = arith.mulf %5, %6 : vector<50x32xf32>
    %c0_6 = arith.constant 0 : index
    %c0_7 = arith.constant 0 : index
    %8 = vector.load %arg2[%c0_6, %c0_7] : memref<50x32xf32, #tpu.memory_space<vmem>>, vector<50x32xf32>
    %9 = arith.addf %7, %8 : vector<50x32xf32>
    %c0_8 = arith.constant 0 : index
    %c0_9 = arith.constant 0 : index
    %10 = vector.load %arg3[%c0_8, %c0_9] : memref<50x50xf32, #tpu.memory_space<vmem>>, vector<50x50xf32>
    %c0_10 = arith.constant 0 : index
    %c0_11 = arith.constant 0 : index
    %c0_12 = arith.constant 0 : index
    %11 = vector.load %arg6[%c0_10, %c0_11, %c0_12] : memref<2x1x32xf32, #tpu.memory_space<vmem>>, vector<1x1x32xf32>
    %12 = vector.shape_cast %11 : vector<1x1x32xf32> to vector<1x32xf32>
    %c0_13 = arith.constant 0 : index
    %c0_14 = arith.constant 0 : index
    %c0_15 = arith.constant 0 : index
    %13 = vector.load %arg7[%c0_13, %c0_14, %c0_15] : memref<2x1x32xf32, #tpu.memory_space<vmem>>, vector<1x1x32xf32>
    %14 = vector.shape_cast %13 : vector<1x1x32xf32> to vector<1x32xf32>
    %cst_16 = arith.constant dense<0.000000e+00> : vector<50xf32>
    %15 = vector.multi_reduction <add>, %9, %cst_16 [1] : vector<50x32xf32> to vector<50xf32>
    %16 = vector.shape_cast %15 : vector<50xf32> to vector<50x1xf32>
    %cst_17 = arith.constant 3.200000e+01 : f32
    %17 = vector.broadcast %cst_17 : f32 to vector<50x1xf32>
    %18 = arith.divf %16, %17 : vector<50x1xf32>
    %19 = vector.broadcast %18 : vector<50x1xf32> to vector<50x32xf32>
    %20 = arith.subf %9, %19 : vector<50x32xf32>
    %21 = arith.mulf %20, %20 : vector<50x32xf32>
    %cst_18 = arith.constant dense<0.000000e+00> : vector<50xf32>
    %22 = vector.multi_reduction <add>, %21, %cst_18 [1] : vector<50x32xf32> to vector<50xf32>
    %23 = vector.shape_cast %22 : vector<50xf32> to vector<50x1xf32>
    %cst_19 = arith.constant 3.200000e+01 : f32
    %24 = vector.broadcast %cst_19 : f32 to vector<50x1xf32>
    %25 = arith.divf %23, %24 : vector<50x1xf32>
    %26 = vector.broadcast %18 : vector<50x1xf32> to vector<50x32xf32>
    %27 = arith.subf %9, %26 : vector<50x32xf32>
    %cst_20 = arith.constant 9.99999997E-7 : f32
    %28 = vector.broadcast %cst_20 : f32 to vector<50x1xf32>
    %29 = arith.addf %25, %28 : vector<50x1xf32>
    %30 = math.rsqrt %29 : vector<50x1xf32>
    %31 = vector.broadcast %30 : vector<50x1xf32> to vector<50x32xf32>
    %32 = arith.mulf %27, %31 : vector<50x32xf32>
    %33 = vector.broadcast %12 : vector<1x32xf32> to vector<50x32xf32>
    %34 = arith.mulf %32, %33 : vector<50x32xf32>
    %35 = vector.broadcast %14 : vector<1x32xf32> to vector<50x32xf32>
    %36 = arith.addf %34, %35 : vector<50x32xf32>
    %cst_21 = arith.constant 0.000000e+00 : f32
    %37 = vector.broadcast %cst_21 : f32 to vector<50x32xf32>
    %c0_22 = arith.constant 0 : index
    %c0_23 = arith.constant 0 : index
    %c0_24 = arith.constant 0 : index
    %c0_25 = arith.constant 0 : index
    %38 = vector.load %arg8[%c0_22, %c0_23, %c0_24, %c0_25] : memref<2x2x32x16xf32, #tpu.memory_space<vmem>>, vector<1x1x32x16xf32>
    %39 = vector.shape_cast %38 : vector<1x1x32x16xf32> to vector<32x16xf32>
    %cst_26 = arith.constant dense<0.000000e+00> : vector<50x16xf32>
    %40 = tpu.matmul %36, %39, %cst_26 {dimension_numbers = #tpu.dot_dimension_numbers<[1], [0], [0], [1], [0, 0, 1, 1], [], []>} : vector<50x32xf32>, vector<32x16xf32>, vector<50x16xf32> -> vector<50x16xf32>
    %c0_27 = arith.constant 0 : index
    %c0_28 = arith.constant 0 : index
    %c0_29 = arith.constant 0 : index
    %c0_30 = arith.constant 0 : index
    %41 = vector.load %arg9[%c0_27, %c0_28, %c0_29, %c0_30] : memref<2x2x1x16xf32, #tpu.memory_space<vmem>>, vector<1x1x1x16xf32>
    %42 = vector.shape_cast %41 : vector<1x1x1x16xf32> to vector<1x16xf32>
    %43 = vector.broadcast %42 : vector<1x16xf32> to vector<50x16xf32>
    %44 = arith.addf %40, %43 : vector<50x16xf32>
    %c0_31 = arith.constant 0 : index
    %c0_32 = arith.constant 0 : index
    %c0_33 = arith.constant 0 : index
    %c0_34 = arith.constant 0 : index
    %45 = vector.load %arg10[%c0_31, %c0_32, %c0_33, %c0_34] : memref<2x2x32x16xf32, #tpu.memory_space<vmem>>, vector<1x1x32x16xf32>
    %46 = vector.shape_cast %45 : vector<1x1x32x16xf32> to vector<32x16xf32>
    %cst_35 = arith.constant dense<0.000000e+00> : vector<50x16xf32>
    %47 = tpu.matmul %36, %46, %cst_35 {dimension_numbers = #tpu.dot_dimension_numbers<[1], [0], [0], [1], [0, 0, 1, 1], [], []>} : vector<50x32xf32>, vector<32x16xf32>, vector<50x16xf32> -> vector<50x16xf32>
    %c0_36 = arith.constant 0 : index
    %c0_37 = arith.constant 0 : index
    %c0_38 = arith.constant 0 : index
    %c0_39 = arith.constant 0 : index
    %48 = vector.load %arg11[%c0_36, %c0_37, %c0_38, %c0_39] : memref<2x2x1x16xf32, #tpu.memory_space<vmem>>, vector<1x1x1x16xf32>
    %49 = vector.shape_cast %48 : vector<1x1x1x16xf32> to vector<1x16xf32>
    %50 = vector.broadcast %49 : vector<1x16xf32> to vector<50x16xf32>
    %51 = arith.addf %47, %50 : vector<50x16xf32>
    %c0_40 = arith.constant 0 : index
    %c0_41 = arith.constant 0 : index
    %c0_42 = arith.constant 0 : index
    %c0_43 = arith.constant 0 : index
    %52 = vector.load %arg12[%c0_40, %c0_41, %c0_42, %c0_43] : memref<2x2x32x16xf32, #tpu.memory_space<vmem>>, vector<1x1x32x16xf32>
    %53 = vector.shape_cast %52 : vector<1x1x32x16xf32> to vector<32x16xf32>
    %cst_44 = arith.constant dense<0.000000e+00> : vector<50x16xf32>
    %54 = tpu.matmul %36, %53, %cst_44 {dimension_numbers = #tpu.dot_dimension_numbers<[1], [0], [0], [1], [0, 0, 1, 1], [], []>} : vector<50x32xf32>, vector<32x16xf32>, vector<50x16xf32> -> vector<50x16xf32>
    %c0_45 = arith.constant 0 : index
    %c0_46 = arith.constant 0 : index
    %c0_47 = arith.constant 0 : index
    %c0_48 = arith.constant 0 : index
    %55 = vector.load %arg13[%c0_45, %c0_46, %c0_47, %c0_48] : memref<2x2x1x16xf32, #tpu.memory_space<vmem>>, vector<1x1x1x16xf32>
    %56 = vector.shape_cast %55 : vector<1x1x1x16xf32> to vector<1x16xf32>
    %57 = vector.broadcast %56 : vector<1x16xf32> to vector<50x16xf32>
    %58 = arith.addf %54, %57 : vector<50x16xf32>
    %cst_49 = arith.constant dense<0.000000e+00> : vector<50x50xf32>
    %59 = tpu.matmul %44, %51, %cst_49 {dimension_numbers = #tpu.dot_dimension_numbers<[1], [1], [0], [0], [0, 0, 1, 0], [], []>} : vector<50x16xf32>, vector<50x16xf32>, vector<50x50xf32> -> vector<50x50xf32>
    %cst_50 = arith.constant 2.500000e-01 : f32
    %60 = vector.broadcast %cst_50 : f32 to vector<50x50xf32>
    %61 = arith.mulf %59, %60 : vector<50x50xf32>
    %62 = arith.addf %61, %10 : vector<50x50xf32>
    %cst_51 = arith.constant dense<0xFF800000> : vector<50xf32>
    %63 = vector.multi_reduction <maximumf>, %62, %cst_51 [1] : vector<50x50xf32> to vector<50xf32>
    %64 = vector.shape_cast %63 : vector<50xf32> to vector<50x1xf32>
    %65 = vector.broadcast %64 : vector<50x1xf32> to vector<50x50xf32>
    %66 = arith.subf %62, %65 : vector<50x50xf32>
    %67 = math.exp %66 : vector<50x50xf32>
    %cst_52 = arith.constant dense<0.000000e+00> : vector<50xf32>
    %68 = vector.multi_reduction <add>, %67, %cst_52 [1] : vector<50x50xf32> to vector<50xf32>
    %69 = vector.shape_cast %68 : vector<50xf32> to vector<50x1xf32>
    %70 = tpu.reciprocal %69 {approx = true} : vector<50x1xf32> -> vector<50x1xf32>
    %71 = vector.broadcast %70 : vector<50x1xf32> to vector<50x50xf32>
    %72 = arith.mulf %67, %71 : vector<50x50xf32>
    %cst_53 = arith.constant dense<0.000000e+00> : vector<50x16xf32>
    %73 = tpu.matmul %72, %58, %cst_53 {dimension_numbers = #tpu.dot_dimension_numbers<[1], [0], [0], [1], [0, 0, 1, 1], [], []>} : vector<50x50xf32>, vector<50x16xf32>, vector<50x16xf32> -> vector<50x16xf32>
    %c0_54 = arith.constant 0 : index
    %c0_55 = arith.constant 0 : index
    %c0_56 = arith.constant 0 : index
    %c0_57 = arith.constant 0 : index
    %74 = vector.load %arg14[%c0_54, %c0_55, %c0_56, %c0_57] : memref<2x2x16x32xf32, #tpu.memory_space<vmem>>, vector<1x1x16x32xf32>
    %75 = vector.shape_cast %74 : vector<1x1x16x32xf32> to vector<16x32xf32>
    %cst_58 = arith.constant dense<0.000000e+00> : vector<50x32xf32>
    %76 = tpu.matmul %73, %75, %cst_58 {dimension_numbers = #tpu.dot_dimension_numbers<[1], [0], [0], [1], [0, 0, 1, 1], [], []>} : vector<50x16xf32>, vector<16x32xf32>, vector<50x32xf32> -> vector<50x32xf32>
    %77 = arith.addf %37, %76 : vector<50x32xf32>
    %c0_59 = arith.constant 0 : index
    %c1 = arith.constant 1 : index
    %c0_60 = arith.constant 0 : index
    %c0_61 = arith.constant 0 : index
    %78 = vector.load %arg8[%c0_59, %c1, %c0_60, %c0_61] : memref<2x2x32x16xf32, #tpu.memory_space<vmem>>, vector<1x1x32x16xf32>
    %79 = vector.shape_cast %78 : vector<1x1x32x16xf32> to vector<32x16xf32>
    %cst_62 = arith.constant dense<0.000000e+00> : vector<50x16xf32>
    %80 = tpu.matmul %36, %79, %cst_62 {dimension_numbers = #tpu.dot_dimension_numbers<[1], [0], [0], [1], [0, 0, 1, 1], [], []>} : vector<50x32xf32>, vector<32x16xf32>, vector<50x16xf32> -> vector<50x16xf32>
    %c0_63 = arith.constant 0 : index
    %c1_64 = arith.constant 1 : index
    %c0_65 = arith.constant 0 : index
    %c0_66 = arith.constant 0 : index
    %81 = vector.load %arg9[%c0_63, %c1_64, %c0_65, %c0_66] : memref<2x2x1x16xf32, #tpu.memory_space<vmem>>, vector<1x1x1x16xf32>
    %82 = vector.shape_cast %81 : vector<1x1x1x16xf32> to vector<1x16xf32>
    %83 = vector.broadcast %82 : vector<1x16xf32> to vector<50x16xf32>
    %84 = arith.addf %80, %83 : vector<50x16xf32>
    %c0_67 = arith.constant 0 : index
    %c1_68 = arith.constant 1 : index
    %c0_69 = arith.constant 0 : index
    %c0_70 = arith.constant 0 : index
    %85 = vector.load %arg10[%c0_67, %c1_68, %c0_69, %c0_70] : memref<2x2x32x16xf32, #tpu.memory_space<vmem>>, vector<1x1x32x16xf32>
    %86 = vector.shape_cast %85 : vector<1x1x32x16xf32> to vector<32x16xf32>
    %cst_71 = arith.constant dense<0.000000e+00> : vector<50x16xf32>
    %87 = tpu.matmul %36, %86, %cst_71 {dimension_numbers = #tpu.dot_dimension_numbers<[1], [0], [0], [1], [0, 0, 1, 1], [], []>} : vector<50x32xf32>, vector<32x16xf32>, vector<50x16xf32> -> vector<50x16xf32>
    %c0_72 = arith.constant 0 : index
    %c1_73 = arith.constant 1 : index
    %c0_74 = arith.constant 0 : index
    %c0_75 = arith.constant 0 : index
    %88 = vector.load %arg11[%c0_72, %c1_73, %c0_74, %c0_75] : memref<2x2x1x16xf32, #tpu.memory_space<vmem>>, vector<1x1x1x16xf32>
    %89 = vector.shape_cast %88 : vector<1x1x1x16xf32> to vector<1x16xf32>
    %90 = vector.broadcast %89 : vector<1x16xf32> to vector<50x16xf32>
    %91 = arith.addf %87, %90 : vector<50x16xf32>
    %c0_76 = arith.constant 0 : index
    %c1_77 = arith.constant 1 : index
    %c0_78 = arith.constant 0 : index
    %c0_79 = arith.constant 0 : index
    %92 = vector.load %arg12[%c0_76, %c1_77, %c0_78, %c0_79] : memref<2x2x32x16xf32, #tpu.memory_space<vmem>>, vector<1x1x32x16xf32>
    %93 = vector.shape_cast %92 : vector<1x1x32x16xf32> to vector<32x16xf32>
    %cst_80 = arith.constant dense<0.000000e+00> : vector<50x16xf32>
    %94 = tpu.matmul %36, %93, %cst_80 {dimension_numbers = #tpu.dot_dimension_numbers<[1], [0], [0], [1], [0, 0, 1, 1], [], []>} : vector<50x32xf32>, vector<32x16xf32>, vector<50x16xf32> -> vector<50x16xf32>
    %c0_81 = arith.constant 0 : index
    %c1_82 = arith.constant 1 : index
    %c0_83 = arith.constant 0 : index
    %c0_84 = arith.constant 0 : index
    %95 = vector.load %arg13[%c0_81, %c1_82, %c0_83, %c0_84] : memref<2x2x1x16xf32, #tpu.memory_space<vmem>>, vector<1x1x1x16xf32>
    %96 = vector.shape_cast %95 : vector<1x1x1x16xf32> to vector<1x16xf32>
    %97 = vector.broadcast %96 : vector<1x16xf32> to vector<50x16xf32>
    %98 = arith.addf %94, %97 : vector<50x16xf32>
    %cst_85 = arith.constant dense<0.000000e+00> : vector<50x50xf32>
    %99 = tpu.matmul %84, %91, %cst_85 {dimension_numbers = #tpu.dot_dimension_numbers<[1], [1], [0], [0], [0, 0, 1, 0], [], []>} : vector<50x16xf32>, vector<50x16xf32>, vector<50x50xf32> -> vector<50x50xf32>
    %cst_86 = arith.constant 2.500000e-01 : f32
    %100 = vector.broadcast %cst_86 : f32 to vector<50x50xf32>
    %101 = arith.mulf %99, %100 : vector<50x50xf32>
    %102 = arith.addf %101, %10 : vector<50x50xf32>
    %cst_87 = arith.constant dense<0xFF800000> : vector<50xf32>
    %103 = vector.multi_reduction <maximumf>, %102, %cst_87 [1] : vector<50x50xf32> to vector<50xf32>
    %104 = vector.shape_cast %103 : vector<50xf32> to vector<50x1xf32>
    %105 = vector.broadcast %104 : vector<50x1xf32> to vector<50x50xf32>
    %106 = arith.subf %102, %105 : vector<50x50xf32>
    %107 = math.exp %106 : vector<50x50xf32>
    %cst_88 = arith.constant dense<0.000000e+00> : vector<50xf32>
    %108 = vector.multi_reduction <add>, %107, %cst_88 [1] : vector<50x50xf32> to vector<50xf32>
    %109 = vector.shape_cast %108 : vector<50xf32> to vector<50x1xf32>
    %110 = tpu.reciprocal %109 {approx = true} : vector<50x1xf32> -> vector<50x1xf32>
    %111 = vector.broadcast %110 : vector<50x1xf32> to vector<50x50xf32>
    %112 = arith.mulf %107, %111 : vector<50x50xf32>
    %cst_89 = arith.constant dense<0.000000e+00> : vector<50x16xf32>
    %113 = tpu.matmul %112, %98, %cst_89 {dimension_numbers = #tpu.dot_dimension_numbers<[1], [0], [0], [1], [0, 0, 1, 1], [], []>} : vector<50x50xf32>, vector<50x16xf32>, vector<50x16xf32> -> vector<50x16xf32>
    %c0_90 = arith.constant 0 : index
    %c1_91 = arith.constant 1 : index
    %c0_92 = arith.constant 0 : index
    %c0_93 = arith.constant 0 : index
    %114 = vector.load %arg14[%c0_90, %c1_91, %c0_92, %c0_93] : memref<2x2x16x32xf32, #tpu.memory_space<vmem>>, vector<1x1x16x32xf32>
    %115 = vector.shape_cast %114 : vector<1x1x16x32xf32> to vector<16x32xf32>
    %cst_94 = arith.constant dense<0.000000e+00> : vector<50x32xf32>
    %116 = tpu.matmul %113, %115, %cst_94 {dimension_numbers = #tpu.dot_dimension_numbers<[1], [0], [0], [1], [0, 0, 1, 1], [], []>} : vector<50x16xf32>, vector<16x32xf32>, vector<50x32xf32> -> vector<50x32xf32>
    %117 = arith.addf %77, %116 : vector<50x32xf32>
    %118 = arith.addf %9, %117 : vector<50x32xf32>
    %c0_95 = arith.constant 0 : index
    %c0_96 = arith.constant 0 : index
    %c0_97 = arith.constant 0 : index
    %119 = vector.load %arg15[%c0_95, %c0_96, %c0_97] : memref<2x1x32xf32, #tpu.memory_space<vmem>>, vector<1x1x32xf32>
    %120 = vector.shape_cast %119 : vector<1x1x32xf32> to vector<1x32xf32>
    %121 = vector.broadcast %120 : vector<1x32xf32> to vector<50x32xf32>
    %122 = arith.addf %118, %121 : vector<50x32xf32>
    %c0_98 = arith.constant 0 : index
    %c0_99 = arith.constant 0 : index
    %c0_100 = arith.constant 0 : index
    %123 = vector.load %arg16[%c0_98, %c0_99, %c0_100] : memref<2x1x32xf32, #tpu.memory_space<vmem>>, vector<1x1x32xf32>
    %124 = vector.shape_cast %123 : vector<1x1x32xf32> to vector<1x32xf32>
    %c0_101 = arith.constant 0 : index
    %c0_102 = arith.constant 0 : index
    %c0_103 = arith.constant 0 : index
    %125 = vector.load %arg17[%c0_101, %c0_102, %c0_103] : memref<2x1x32xf32, #tpu.memory_space<vmem>>, vector<1x1x32xf32>
    %126 = vector.shape_cast %125 : vector<1x1x32xf32> to vector<1x32xf32>
    %cst_104 = arith.constant dense<0.000000e+00> : vector<50xf32>
    %127 = vector.multi_reduction <add>, %122, %cst_104 [1] : vector<50x32xf32> to vector<50xf32>
    %128 = vector.shape_cast %127 : vector<50xf32> to vector<50x1xf32>
    %cst_105 = arith.constant 3.200000e+01 : f32
    %129 = vector.broadcast %cst_105 : f32 to vector<50x1xf32>
    %130 = arith.divf %128, %129 : vector<50x1xf32>
    %131 = vector.broadcast %130 : vector<50x1xf32> to vector<50x32xf32>
    %132 = arith.subf %122, %131 : vector<50x32xf32>
    %133 = arith.mulf %132, %132 : vector<50x32xf32>
    %cst_106 = arith.constant dense<0.000000e+00> : vector<50xf32>
    %134 = vector.multi_reduction <add>, %133, %cst_106 [1] : vector<50x32xf32> to vector<50xf32>
    %135 = vector.shape_cast %134 : vector<50xf32> to vector<50x1xf32>
    %cst_107 = arith.constant 3.200000e+01 : f32
    %136 = vector.broadcast %cst_107 : f32 to vector<50x1xf32>
    %137 = arith.divf %135, %136 : vector<50x1xf32>
    %138 = vector.broadcast %130 : vector<50x1xf32> to vector<50x32xf32>
    %139 = arith.subf %122, %138 : vector<50x32xf32>
    %cst_108 = arith.constant 9.99999997E-7 : f32
    %140 = vector.broadcast %cst_108 : f32 to vector<50x1xf32>
    %141 = arith.addf %137, %140 : vector<50x1xf32>
    %142 = math.rsqrt %141 : vector<50x1xf32>
    %143 = vector.broadcast %142 : vector<50x1xf32> to vector<50x32xf32>
    %144 = arith.mulf %139, %143 : vector<50x32xf32>
    %145 = vector.broadcast %124 : vector<1x32xf32> to vector<50x32xf32>
    %146 = arith.mulf %144, %145 : vector<50x32xf32>
    %147 = vector.broadcast %126 : vector<1x32xf32> to vector<50x32xf32>
    %148 = arith.addf %146, %147 : vector<50x32xf32>
    %c0_109 = arith.constant 0 : index
    %c0_110 = arith.constant 0 : index
    %c0_111 = arith.constant 0 : index
    %149 = vector.load %arg18[%c0_109, %c0_110, %c0_111] : memref<2x32x128xf32, #tpu.memory_space<vmem>>, vector<1x32x128xf32>
    %150 = vector.shape_cast %149 : vector<1x32x128xf32> to vector<32x128xf32>
    %cst_112 = arith.constant dense<0.000000e+00> : vector<50x128xf32>
    %151 = tpu.matmul %148, %150, %cst_112 {dimension_numbers = #tpu.dot_dimension_numbers<[1], [0], [0], [1], [0, 0, 1, 1], [], []>} : vector<50x32xf32>, vector<32x128xf32>, vector<50x128xf32> -> vector<50x128xf32>
    %c0_113 = arith.constant 0 : index
    %c0_114 = arith.constant 0 : index
    %c0_115 = arith.constant 0 : index
    %152 = vector.load %arg19[%c0_113, %c0_114, %c0_115] : memref<2x1x128xf32, #tpu.memory_space<vmem>>, vector<1x1x128xf32>
    %153 = vector.shape_cast %152 : vector<1x1x128xf32> to vector<1x128xf32>
    %154 = vector.broadcast %153 : vector<1x128xf32> to vector<50x128xf32>
    %155 = arith.addf %151, %154 : vector<50x128xf32>
    %cst_116 = arith.constant 0.000000e+00 : f32
    %156 = vector.broadcast %cst_116 : f32 to vector<50x128xf32>
    %157 = arith.maximumf %155, %156 : vector<50x128xf32>
    %c0_117 = arith.constant 0 : index
    %c0_118 = arith.constant 0 : index
    %c0_119 = arith.constant 0 : index
    %158 = vector.load %arg20[%c0_117, %c0_118, %c0_119] : memref<2x128x32xf32, #tpu.memory_space<vmem>>, vector<1x128x32xf32>
    %159 = vector.shape_cast %158 : vector<1x128x32xf32> to vector<128x32xf32>
    %cst_120 = arith.constant dense<0.000000e+00> : vector<50x32xf32>
    %160 = tpu.matmul %157, %159, %cst_120 {dimension_numbers = #tpu.dot_dimension_numbers<[1], [0], [0], [1], [0, 0, 1, 1], [], []>} : vector<50x128xf32>, vector<128x32xf32>, vector<50x32xf32> -> vector<50x32xf32>
    %161 = arith.addf %122, %160 : vector<50x32xf32>
    %c0_121 = arith.constant 0 : index
    %c0_122 = arith.constant 0 : index
    %c0_123 = arith.constant 0 : index
    %162 = vector.load %arg21[%c0_121, %c0_122, %c0_123] : memref<2x1x32xf32, #tpu.memory_space<vmem>>, vector<1x1x32xf32>
    %163 = vector.shape_cast %162 : vector<1x1x32xf32> to vector<1x32xf32>
    %164 = vector.broadcast %163 : vector<1x32xf32> to vector<50x32xf32>
    %165 = arith.addf %161, %164 : vector<50x32xf32>
    %c1_124 = arith.constant 1 : index
    %c0_125 = arith.constant 0 : index
    %c0_126 = arith.constant 0 : index
    %166 = vector.load %arg6[%c1_124, %c0_125, %c0_126] : memref<2x1x32xf32, #tpu.memory_space<vmem>>, vector<1x1x32xf32>
    %167 = vector.shape_cast %166 : vector<1x1x32xf32> to vector<1x32xf32>
    %c1_127 = arith.constant 1 : index
    %c0_128 = arith.constant 0 : index
    %c0_129 = arith.constant 0 : index
    %168 = vector.load %arg7[%c1_127, %c0_128, %c0_129] : memref<2x1x32xf32, #tpu.memory_space<vmem>>, vector<1x1x32xf32>
    %169 = vector.shape_cast %168 : vector<1x1x32xf32> to vector<1x32xf32>
    %cst_130 = arith.constant dense<0.000000e+00> : vector<50xf32>
    %170 = vector.multi_reduction <add>, %165, %cst_130 [1] : vector<50x32xf32> to vector<50xf32>
    %171 = vector.shape_cast %170 : vector<50xf32> to vector<50x1xf32>
    %cst_131 = arith.constant 3.200000e+01 : f32
    %172 = vector.broadcast %cst_131 : f32 to vector<50x1xf32>
    %173 = arith.divf %171, %172 : vector<50x1xf32>
    %174 = vector.broadcast %173 : vector<50x1xf32> to vector<50x32xf32>
    %175 = arith.subf %165, %174 : vector<50x32xf32>
    %176 = arith.mulf %175, %175 : vector<50x32xf32>
    %cst_132 = arith.constant dense<0.000000e+00> : vector<50xf32>
    %177 = vector.multi_reduction <add>, %176, %cst_132 [1] : vector<50x32xf32> to vector<50xf32>
    %178 = vector.shape_cast %177 : vector<50xf32> to vector<50x1xf32>
    %cst_133 = arith.constant 3.200000e+01 : f32
    %179 = vector.broadcast %cst_133 : f32 to vector<50x1xf32>
    %180 = arith.divf %178, %179 : vector<50x1xf32>
    %181 = vector.broadcast %173 : vector<50x1xf32> to vector<50x32xf32>
    %182 = arith.subf %165, %181 : vector<50x32xf32>
    %cst_134 = arith.constant 9.99999997E-7 : f32
    %183 = vector.broadcast %cst_134 : f32 to vector<50x1xf32>
    %184 = arith.addf %180, %183 : vector<50x1xf32>
    %185 = math.rsqrt %184 : vector<50x1xf32>
    %186 = vector.broadcast %185 : vector<50x1xf32> to vector<50x32xf32>
    %187 = arith.mulf %182, %186 : vector<50x32xf32>
    %188 = vector.broadcast %167 : vector<1x32xf32> to vector<50x32xf32>
    %189 = arith.mulf %187, %188 : vector<50x32xf32>
    %190 = vector.broadcast %169 : vector<1x32xf32> to vector<50x32xf32>
    %191 = arith.addf %189, %190 : vector<50x32xf32>
    %cst_135 = arith.constant 0.000000e+00 : f32
    %192 = vector.broadcast %cst_135 : f32 to vector<50x32xf32>
    %c1_136 = arith.constant 1 : index
    %c0_137 = arith.constant 0 : index
    %c0_138 = arith.constant 0 : index
    %c0_139 = arith.constant 0 : index
    %193 = vector.load %arg8[%c1_136, %c0_137, %c0_138, %c0_139] : memref<2x2x32x16xf32, #tpu.memory_space<vmem>>, vector<1x1x32x16xf32>
    %194 = vector.shape_cast %193 : vector<1x1x32x16xf32> to vector<32x16xf32>
    %cst_140 = arith.constant dense<0.000000e+00> : vector<50x16xf32>
    %195 = tpu.matmul %191, %194, %cst_140 {dimension_numbers = #tpu.dot_dimension_numbers<[1], [0], [0], [1], [0, 0, 1, 1], [], []>} : vector<50x32xf32>, vector<32x16xf32>, vector<50x16xf32> -> vector<50x16xf32>
    %c1_141 = arith.constant 1 : index
    %c0_142 = arith.constant 0 : index
    %c0_143 = arith.constant 0 : index
    %c0_144 = arith.constant 0 : index
    %196 = vector.load %arg9[%c1_141, %c0_142, %c0_143, %c0_144] : memref<2x2x1x16xf32, #tpu.memory_space<vmem>>, vector<1x1x1x16xf32>
    %197 = vector.shape_cast %196 : vector<1x1x1x16xf32> to vector<1x16xf32>
    %198 = vector.broadcast %197 : vector<1x16xf32> to vector<50x16xf32>
    %199 = arith.addf %195, %198 : vector<50x16xf32>
    %c1_145 = arith.constant 1 : index
    %c0_146 = arith.constant 0 : index
    %c0_147 = arith.constant 0 : index
    %c0_148 = arith.constant 0 : index
    %200 = vector.load %arg10[%c1_145, %c0_146, %c0_147, %c0_148] : memref<2x2x32x16xf32, #tpu.memory_space<vmem>>, vector<1x1x32x16xf32>
    %201 = vector.shape_cast %200 : vector<1x1x32x16xf32> to vector<32x16xf32>
    %cst_149 = arith.constant dense<0.000000e+00> : vector<50x16xf32>
    %202 = tpu.matmul %191, %201, %cst_149 {dimension_numbers = #tpu.dot_dimension_numbers<[1], [0], [0], [1], [0, 0, 1, 1], [], []>} : vector<50x32xf32>, vector<32x16xf32>, vector<50x16xf32> -> vector<50x16xf32>
    %c1_150 = arith.constant 1 : index
    %c0_151 = arith.constant 0 : index
    %c0_152 = arith.constant 0 : index
    %c0_153 = arith.constant 0 : index
    %203 = vector.load %arg11[%c1_150, %c0_151, %c0_152, %c0_153] : memref<2x2x1x16xf32, #tpu.memory_space<vmem>>, vector<1x1x1x16xf32>
    %204 = vector.shape_cast %203 : vector<1x1x1x16xf32> to vector<1x16xf32>
    %205 = vector.broadcast %204 : vector<1x16xf32> to vector<50x16xf32>
    %206 = arith.addf %202, %205 : vector<50x16xf32>
    %c1_154 = arith.constant 1 : index
    %c0_155 = arith.constant 0 : index
    %c0_156 = arith.constant 0 : index
    %c0_157 = arith.constant 0 : index
    %207 = vector.load %arg12[%c1_154, %c0_155, %c0_156, %c0_157] : memref<2x2x32x16xf32, #tpu.memory_space<vmem>>, vector<1x1x32x16xf32>
    %208 = vector.shape_cast %207 : vector<1x1x32x16xf32> to vector<32x16xf32>
    %cst_158 = arith.constant dense<0.000000e+00> : vector<50x16xf32>
    %209 = tpu.matmul %191, %208, %cst_158 {dimension_numbers = #tpu.dot_dimension_numbers<[1], [0], [0], [1], [0, 0, 1, 1], [], []>} : vector<50x32xf32>, vector<32x16xf32>, vector<50x16xf32> -> vector<50x16xf32>
    %c1_159 = arith.constant 1 : index
    %c0_160 = arith.constant 0 : index
    %c0_161 = arith.constant 0 : index
    %c0_162 = arith.constant 0 : index
    %210 = vector.load %arg13[%c1_159, %c0_160, %c0_161, %c0_162] : memref<2x2x1x16xf32, #tpu.memory_space<vmem>>, vector<1x1x1x16xf32>
    %211 = vector.shape_cast %210 : vector<1x1x1x16xf32> to vector<1x16xf32>
    %212 = vector.broadcast %211 : vector<1x16xf32> to vector<50x16xf32>
    %213 = arith.addf %209, %212 : vector<50x16xf32>
    %cst_163 = arith.constant dense<0.000000e+00> : vector<50x50xf32>
    %214 = tpu.matmul %199, %206, %cst_163 {dimension_numbers = #tpu.dot_dimension_numbers<[1], [1], [0], [0], [0, 0, 1, 0], [], []>} : vector<50x16xf32>, vector<50x16xf32>, vector<50x50xf32> -> vector<50x50xf32>
    %cst_164 = arith.constant 2.500000e-01 : f32
    %215 = vector.broadcast %cst_164 : f32 to vector<50x50xf32>
    %216 = arith.mulf %214, %215 : vector<50x50xf32>
    %217 = arith.addf %216, %10 : vector<50x50xf32>
    %cst_165 = arith.constant dense<0xFF800000> : vector<50xf32>
    %218 = vector.multi_reduction <maximumf>, %217, %cst_165 [1] : vector<50x50xf32> to vector<50xf32>
    %219 = vector.shape_cast %218 : vector<50xf32> to vector<50x1xf32>
    %220 = vector.broadcast %219 : vector<50x1xf32> to vector<50x50xf32>
    %221 = arith.subf %217, %220 : vector<50x50xf32>
    %222 = math.exp %221 : vector<50x50xf32>
    %cst_166 = arith.constant dense<0.000000e+00> : vector<50xf32>
    %223 = vector.multi_reduction <add>, %222, %cst_166 [1] : vector<50x50xf32> to vector<50xf32>
    %224 = vector.shape_cast %223 : vector<50xf32> to vector<50x1xf32>
    %225 = tpu.reciprocal %224 {approx = true} : vector<50x1xf32> -> vector<50x1xf32>
    %226 = vector.broadcast %225 : vector<50x1xf32> to vector<50x50xf32>
    %227 = arith.mulf %222, %226 : vector<50x50xf32>
    %cst_167 = arith.constant dense<0.000000e+00> : vector<50x16xf32>
    %228 = tpu.matmul %227, %213, %cst_167 {dimension_numbers = #tpu.dot_dimension_numbers<[1], [0], [0], [1], [0, 0, 1, 1], [], []>} : vector<50x50xf32>, vector<50x16xf32>, vector<50x16xf32> -> vector<50x16xf32>
    %c1_168 = arith.constant 1 : index
    %c0_169 = arith.constant 0 : index
    %c0_170 = arith.constant 0 : index
    %c0_171 = arith.constant 0 : index
    %229 = vector.load %arg14[%c1_168, %c0_169, %c0_170, %c0_171] : memref<2x2x16x32xf32, #tpu.memory_space<vmem>>, vector<1x1x16x32xf32>
    %230 = vector.shape_cast %229 : vector<1x1x16x32xf32> to vector<16x32xf32>
    %cst_172 = arith.constant dense<0.000000e+00> : vector<50x32xf32>
    %231 = tpu.matmul %228, %230, %cst_172 {dimension_numbers = #tpu.dot_dimension_numbers<[1], [0], [0], [1], [0, 0, 1, 1], [], []>} : vector<50x16xf32>, vector<16x32xf32>, vector<50x32xf32> -> vector<50x32xf32>
    %232 = arith.addf %192, %231 : vector<50x32xf32>
    %c1_173 = arith.constant 1 : index
    %c1_174 = arith.constant 1 : index
    %c0_175 = arith.constant 0 : index
    %c0_176 = arith.constant 0 : index
    %233 = vector.load %arg8[%c1_173, %c1_174, %c0_175, %c0_176] : memref<2x2x32x16xf32, #tpu.memory_space<vmem>>, vector<1x1x32x16xf32>
    %234 = vector.shape_cast %233 : vector<1x1x32x16xf32> to vector<32x16xf32>
    %cst_177 = arith.constant dense<0.000000e+00> : vector<50x16xf32>
    %235 = tpu.matmul %191, %234, %cst_177 {dimension_numbers = #tpu.dot_dimension_numbers<[1], [0], [0], [1], [0, 0, 1, 1], [], []>} : vector<50x32xf32>, vector<32x16xf32>, vector<50x16xf32> -> vector<50x16xf32>
    %c1_178 = arith.constant 1 : index
    %c1_179 = arith.constant 1 : index
    %c0_180 = arith.constant 0 : index
    %c0_181 = arith.constant 0 : index
    %236 = vector.load %arg9[%c1_178, %c1_179, %c0_180, %c0_181] : memref<2x2x1x16xf32, #tpu.memory_space<vmem>>, vector<1x1x1x16xf32>
    %237 = vector.shape_cast %236 : vector<1x1x1x16xf32> to vector<1x16xf32>
    %238 = vector.broadcast %237 : vector<1x16xf32> to vector<50x16xf32>
    %239 = arith.addf %235, %238 : vector<50x16xf32>
    %c1_182 = arith.constant 1 : index
    %c1_183 = arith.constant 1 : index
    %c0_184 = arith.constant 0 : index
    %c0_185 = arith.constant 0 : index
    %240 = vector.load %arg10[%c1_182, %c1_183, %c0_184, %c0_185] : memref<2x2x32x16xf32, #tpu.memory_space<vmem>>, vector<1x1x32x16xf32>
    %241 = vector.shape_cast %240 : vector<1x1x32x16xf32> to vector<32x16xf32>
    %cst_186 = arith.constant dense<0.000000e+00> : vector<50x16xf32>
    %242 = tpu.matmul %191, %241, %cst_186 {dimension_numbers = #tpu.dot_dimension_numbers<[1], [0], [0], [1], [0, 0, 1, 1], [], []>} : vector<50x32xf32>, vector<32x16xf32>, vector<50x16xf32> -> vector<50x16xf32>
    %c1_187 = arith.constant 1 : index
    %c1_188 = arith.constant 1 : index
    %c0_189 = arith.constant 0 : index
    %c0_190 = arith.constant 0 : index
    %243 = vector.load %arg11[%c1_187, %c1_188, %c0_189, %c0_190] : memref<2x2x1x16xf32, #tpu.memory_space<vmem>>, vector<1x1x1x16xf32>
    %244 = vector.shape_cast %243 : vector<1x1x1x16xf32> to vector<1x16xf32>
    %245 = vector.broadcast %244 : vector<1x16xf32> to vector<50x16xf32>
    %246 = arith.addf %242, %245 : vector<50x16xf32>
    %c1_191 = arith.constant 1 : index
    %c1_192 = arith.constant 1 : index
    %c0_193 = arith.constant 0 : index
    %c0_194 = arith.constant 0 : index
    %247 = vector.load %arg12[%c1_191, %c1_192, %c0_193, %c0_194] : memref<2x2x32x16xf32, #tpu.memory_space<vmem>>, vector<1x1x32x16xf32>
    %248 = vector.shape_cast %247 : vector<1x1x32x16xf32> to vector<32x16xf32>
    %cst_195 = arith.constant dense<0.000000e+00> : vector<50x16xf32>
    %249 = tpu.matmul %191, %248, %cst_195 {dimension_numbers = #tpu.dot_dimension_numbers<[1], [0], [0], [1], [0, 0, 1, 1], [], []>} : vector<50x32xf32>, vector<32x16xf32>, vector<50x16xf32> -> vector<50x16xf32>
    %c1_196 = arith.constant 1 : index
    %c1_197 = arith.constant 1 : index
    %c0_198 = arith.constant 0 : index
    %c0_199 = arith.constant 0 : index
    %250 = vector.load %arg13[%c1_196, %c1_197, %c0_198, %c0_199] : memref<2x2x1x16xf32, #tpu.memory_space<vmem>>, vector<1x1x1x16xf32>
    %251 = vector.shape_cast %250 : vector<1x1x1x16xf32> to vector<1x16xf32>
    %252 = vector.broadcast %251 : vector<1x16xf32> to vector<50x16xf32>
    %253 = arith.addf %249, %252 : vector<50x16xf32>
    %cst_200 = arith.constant dense<0.000000e+00> : vector<50x50xf32>
    %254 = tpu.matmul %239, %246, %cst_200 {dimension_numbers = #tpu.dot_dimension_numbers<[1], [1], [0], [0], [0, 0, 1, 0], [], []>} : vector<50x16xf32>, vector<50x16xf32>, vector<50x50xf32> -> vector<50x50xf32>
    %cst_201 = arith.constant 2.500000e-01 : f32
    %255 = vector.broadcast %cst_201 : f32 to vector<50x50xf32>
    %256 = arith.mulf %254, %255 : vector<50x50xf32>
    %257 = arith.addf %256, %10 : vector<50x50xf32>
    %cst_202 = arith.constant dense<0xFF800000> : vector<50xf32>
    %258 = vector.multi_reduction <maximumf>, %257, %cst_202 [1] : vector<50x50xf32> to vector<50xf32>
    %259 = vector.shape_cast %258 : vector<50xf32> to vector<50x1xf32>
    %260 = vector.broadcast %259 : vector<50x1xf32> to vector<50x50xf32>
    %261 = arith.subf %257, %260 : vector<50x50xf32>
    %262 = math.exp %261 : vector<50x50xf32>
    %cst_203 = arith.constant dense<0.000000e+00> : vector<50xf32>
    %263 = vector.multi_reduction <add>, %262, %cst_203 [1] : vector<50x50xf32> to vector<50xf32>
    %264 = vector.shape_cast %263 : vector<50xf32> to vector<50x1xf32>
    %265 = tpu.reciprocal %264 {approx = true} : vector<50x1xf32> -> vector<50x1xf32>
    %266 = vector.broadcast %265 : vector<50x1xf32> to vector<50x50xf32>
    %267 = arith.mulf %262, %266 : vector<50x50xf32>
    %cst_204 = arith.constant dense<0.000000e+00> : vector<50x16xf32>
    %268 = tpu.matmul %267, %253, %cst_204 {dimension_numbers = #tpu.dot_dimension_numbers<[1], [0], [0], [1], [0, 0, 1, 1], [], []>} : vector<50x50xf32>, vector<50x16xf32>, vector<50x16xf32> -> vector<50x16xf32>
    %c1_205 = arith.constant 1 : index
    %c1_206 = arith.constant 1 : index
    %c0_207 = arith.constant 0 : index
    %c0_208 = arith.constant 0 : index
    %269 = vector.load %arg14[%c1_205, %c1_206, %c0_207, %c0_208] : memref<2x2x16x32xf32, #tpu.memory_space<vmem>>, vector<1x1x16x32xf32>
    %270 = vector.shape_cast %269 : vector<1x1x16x32xf32> to vector<16x32xf32>
    %cst_209 = arith.constant dense<0.000000e+00> : vector<50x32xf32>
    %271 = tpu.matmul %268, %270, %cst_209 {dimension_numbers = #tpu.dot_dimension_numbers<[1], [0], [0], [1], [0, 0, 1, 1], [], []>} : vector<50x16xf32>, vector<16x32xf32>, vector<50x32xf32> -> vector<50x32xf32>
    %272 = arith.addf %232, %271 : vector<50x32xf32>
    %273 = arith.addf %165, %272 : vector<50x32xf32>
    %c1_210 = arith.constant 1 : index
    %c0_211 = arith.constant 0 : index
    %c0_212 = arith.constant 0 : index
    %274 = vector.load %arg15[%c1_210, %c0_211, %c0_212] : memref<2x1x32xf32, #tpu.memory_space<vmem>>, vector<1x1x32xf32>
    %275 = vector.shape_cast %274 : vector<1x1x32xf32> to vector<1x32xf32>
    %276 = vector.broadcast %275 : vector<1x32xf32> to vector<50x32xf32>
    %277 = arith.addf %273, %276 : vector<50x32xf32>
    %c1_213 = arith.constant 1 : index
    %c0_214 = arith.constant 0 : index
    %c0_215 = arith.constant 0 : index
    %278 = vector.load %arg16[%c1_213, %c0_214, %c0_215] : memref<2x1x32xf32, #tpu.memory_space<vmem>>, vector<1x1x32xf32>
    %279 = vector.shape_cast %278 : vector<1x1x32xf32> to vector<1x32xf32>
    %c1_216 = arith.constant 1 : index
    %c0_217 = arith.constant 0 : index
    %c0_218 = arith.constant 0 : index
    %280 = vector.load %arg17[%c1_216, %c0_217, %c0_218] : memref<2x1x32xf32, #tpu.memory_space<vmem>>, vector<1x1x32xf32>
    %281 = vector.shape_cast %280 : vector<1x1x32xf32> to vector<1x32xf32>
    %cst_219 = arith.constant dense<0.000000e+00> : vector<50xf32>
    %282 = vector.multi_reduction <add>, %277, %cst_219 [1] : vector<50x32xf32> to vector<50xf32>
    %283 = vector.shape_cast %282 : vector<50xf32> to vector<50x1xf32>
    %cst_220 = arith.constant 3.200000e+01 : f32
    %284 = vector.broadcast %cst_220 : f32 to vector<50x1xf32>
    %285 = arith.divf %283, %284 : vector<50x1xf32>
    %286 = vector.broadcast %285 : vector<50x1xf32> to vector<50x32xf32>
    %287 = arith.subf %277, %286 : vector<50x32xf32>
    %288 = arith.mulf %287, %287 : vector<50x32xf32>
    %cst_221 = arith.constant dense<0.000000e+00> : vector<50xf32>
    %289 = vector.multi_reduction <add>, %288, %cst_221 [1] : vector<50x32xf32> to vector<50xf32>
    %290 = vector.shape_cast %289 : vector<50xf32> to vector<50x1xf32>
    %cst_222 = arith.constant 3.200000e+01 : f32
    %291 = vector.broadcast %cst_222 : f32 to vector<50x1xf32>
    %292 = arith.divf %290, %291 : vector<50x1xf32>
    %293 = vector.broadcast %285 : vector<50x1xf32> to vector<50x32xf32>
    %294 = arith.subf %277, %293 : vector<50x32xf32>
    %cst_223 = arith.constant 9.99999997E-7 : f32
    %295 = vector.broadcast %cst_223 : f32 to vector<50x1xf32>
    %296 = arith.addf %292, %295 : vector<50x1xf32>
    %297 = math.rsqrt %296 : vector<50x1xf32>
    %298 = vector.broadcast %297 : vector<50x1xf32> to vector<50x32xf32>
    %299 = arith.mulf %294, %298 : vector<50x32xf32>
    %300 = vector.broadcast %279 : vector<1x32xf32> to vector<50x32xf32>
    %301 = arith.mulf %299, %300 : vector<50x32xf32>
    %302 = vector.broadcast %281 : vector<1x32xf32> to vector<50x32xf32>
    %303 = arith.addf %301, %302 : vector<50x32xf32>
    %c1_224 = arith.constant 1 : index
    %c0_225 = arith.constant 0 : index
    %c0_226 = arith.constant 0 : index
    %304 = vector.load %arg18[%c1_224, %c0_225, %c0_226] : memref<2x32x128xf32, #tpu.memory_space<vmem>>, vector<1x32x128xf32>
    %305 = vector.shape_cast %304 : vector<1x32x128xf32> to vector<32x128xf32>
    %cst_227 = arith.constant dense<0.000000e+00> : vector<50x128xf32>
    %306 = tpu.matmul %303, %305, %cst_227 {dimension_numbers = #tpu.dot_dimension_numbers<[1], [0], [0], [1], [0, 0, 1, 1], [], []>} : vector<50x32xf32>, vector<32x128xf32>, vector<50x128xf32> -> vector<50x128xf32>
    %c1_228 = arith.constant 1 : index
    %c0_229 = arith.constant 0 : index
    %c0_230 = arith.constant 0 : index
    %307 = vector.load %arg19[%c1_228, %c0_229, %c0_230] : memref<2x1x128xf32, #tpu.memory_space<vmem>>, vector<1x1x128xf32>
    %308 = vector.shape_cast %307 : vector<1x1x128xf32> to vector<1x128xf32>
    %309 = vector.broadcast %308 : vector<1x128xf32> to vector<50x128xf32>
    %310 = arith.addf %306, %309 : vector<50x128xf32>
    %cst_231 = arith.constant 0.000000e+00 : f32
    %311 = vector.broadcast %cst_231 : f32 to vector<50x128xf32>
    %312 = arith.maximumf %310, %311 : vector<50x128xf32>
    %c1_232 = arith.constant 1 : index
    %c0_233 = arith.constant 0 : index
    %c0_234 = arith.constant 0 : index
    %313 = vector.load %arg20[%c1_232, %c0_233, %c0_234] : memref<2x128x32xf32, #tpu.memory_space<vmem>>, vector<1x128x32xf32>
    %314 = vector.shape_cast %313 : vector<1x128x32xf32> to vector<128x32xf32>
    %cst_235 = arith.constant dense<0.000000e+00> : vector<50x32xf32>
    %315 = tpu.matmul %312, %314, %cst_235 {dimension_numbers = #tpu.dot_dimension_numbers<[1], [0], [0], [1], [0, 0, 1, 1], [], []>} : vector<50x128xf32>, vector<128x32xf32>, vector<50x32xf32> -> vector<50x32xf32>
    %316 = arith.addf %277, %315 : vector<50x32xf32>
    %c1_236 = arith.constant 1 : index
    %c0_237 = arith.constant 0 : index
    %c0_238 = arith.constant 0 : index
    %317 = vector.load %arg21[%c1_236, %c0_237, %c0_238] : memref<2x1x32xf32, #tpu.memory_space<vmem>>, vector<1x1x32xf32>
    %318 = vector.shape_cast %317 : vector<1x1x32xf32> to vector<1x32xf32>
    %319 = vector.broadcast %318 : vector<1x32xf32> to vector<50x32xf32>
    %320 = arith.addf %316, %319 : vector<50x32xf32>
    %c0_239 = arith.constant 0 : index
    %c0_240 = arith.constant 0 : index
    %321 = vector.load %arg22[%c0_239, %c0_240] : memref<1x32xf32, #tpu.memory_space<vmem>>, vector<1x32xf32>
    %c0_241 = arith.constant 0 : index
    %c0_242 = arith.constant 0 : index
    %322 = vector.load %arg23[%c0_241, %c0_242] : memref<1x32xf32, #tpu.memory_space<vmem>>, vector<1x32xf32>
    %cst_243 = arith.constant dense<0.000000e+00> : vector<50xf32>
    %323 = vector.multi_reduction <add>, %320, %cst_243 [1] : vector<50x32xf32> to vector<50xf32>
    %324 = vector.shape_cast %323 : vector<50xf32> to vector<50x1xf32>
    %cst_244 = arith.constant 3.200000e+01 : f32
    %325 = vector.broadcast %cst_244 : f32 to vector<50x1xf32>
    %326 = arith.divf %324, %325 : vector<50x1xf32>
    %327 = vector.broadcast %326 : vector<50x1xf32> to vector<50x32xf32>
    %328 = arith.subf %320, %327 : vector<50x32xf32>
    %329 = arith.mulf %328, %328 : vector<50x32xf32>
    %cst_245 = arith.constant dense<0.000000e+00> : vector<50xf32>
    %330 = vector.multi_reduction <add>, %329, %cst_245 [1] : vector<50x32xf32> to vector<50xf32>
    %331 = vector.shape_cast %330 : vector<50xf32> to vector<50x1xf32>
    %cst_246 = arith.constant 3.200000e+01 : f32
    %332 = vector.broadcast %cst_246 : f32 to vector<50x1xf32>
    %333 = arith.divf %331, %332 : vector<50x1xf32>
    %334 = vector.broadcast %326 : vector<50x1xf32> to vector<50x32xf32>
    %335 = arith.subf %320, %334 : vector<50x32xf32>
    %cst_247 = arith.constant 9.99999997E-7 : f32
    %336 = vector.broadcast %cst_247 : f32 to vector<50x1xf32>
    %337 = arith.addf %333, %336 : vector<50x1xf32>
    %338 = math.rsqrt %337 : vector<50x1xf32>
    %339 = vector.broadcast %338 : vector<50x1xf32> to vector<50x32xf32>
    %340 = arith.mulf %335, %339 : vector<50x32xf32>
    %341 = vector.broadcast %321 : vector<1x32xf32> to vector<50x32xf32>
    %342 = arith.mulf %340, %341 : vector<50x32xf32>
    %343 = vector.broadcast %322 : vector<1x32xf32> to vector<50x32xf32>
    %344 = arith.addf %342, %343 : vector<50x32xf32>
    %c0_248 = arith.constant 0 : index
    %c0_249 = arith.constant 0 : index
    %345 = vector.load %arg24[%c0_248, %c0_249] : memref<32x128xf32, #tpu.memory_space<vmem>>, vector<32x128xf32>
    %cst_250 = arith.constant dense<0.000000e+00> : vector<50x128xf32>
    %346 = tpu.matmul %344, %345, %cst_250 {dimension_numbers = #tpu.dot_dimension_numbers<[1], [0], [0], [1], [0, 0, 1, 1], [], []>} : vector<50x32xf32>, vector<32x128xf32>, vector<50x128xf32> -> vector<50x128xf32>
    %c0_251 = arith.constant 0 : index
    %c0_252 = arith.constant 0 : index
    %347 = vector.load %arg25[%c0_251, %c0_252] : memref<1x128xf32, #tpu.memory_space<vmem>>, vector<1x128xf32>
    %348 = vector.broadcast %347 : vector<1x128xf32> to vector<50x128xf32>
    %349 = arith.addf %346, %348 : vector<50x128xf32>
    %c0_253 = arith.constant 0 : index
    %c0_254 = arith.constant 0 : index
    %350 = vector.load %arg26[%c0_253, %c0_254] : memref<50x128xf32, #tpu.memory_space<vmem>>, vector<50x128xf32>
    tpu.vector_store %arg26[%c0_253, %c0_254], %349 {strides = array<i32>} : memref<50x128xf32, #tpu.memory_space<vmem>>, vector<50x128xf32>,
    return
  }
  func.func @transform_0(%arg0: i32) -> (i32, i32) {
    %c0_i32 = arith.constant 0 : i32
    %c0_i32_0 = arith.constant 0 : i32
    %c0_i32_1 = arith.constant 0 : i32
    return %c0_i32, %c0_i32_0 : i32, i32
  }
  func.func @transform_1(%arg0: i32) -> (i32, i32) {
    %c0_i32 = arith.constant 0 : i32
    %c0_i32_0 = arith.constant 0 : i32
    %c0_i32_1 = arith.constant 0 : i32
    return %c0_i32, %c0_i32_0 : i32, i32
  }
  func.func @transform_2(%arg0: i32) -> (i32, i32) {
    %c0_i32 = arith.constant 0 : i32
    %c0_i32_0 = arith.constant 0 : i32
    %c0_i32_1 = arith.constant 0 : i32
    return %c0_i32, %c0_i32_0 : i32, i32
  }
  func.func @transform_3(%arg0: i32) -> (i32, i32) {
    %c0_i32 = arith.constant 0 : i32
    %c0_i32_0 = arith.constant 0 : i32
    %c0_i32_1 = arith.constant 0 : i32
    return %c0_i32, %c0_i32_0 : i32, i32
  }
  func.func @transform_4(%arg0: i32) -> (i32, i32) {
    %c0_i32 = arith.constant 0 : i32
    %c0_i32_0 = arith.constant 0 : i32
    %c0_i32_1 = arith.constant 0 : i32
    return %c0_i32, %c0_i32_0 : i32, i32
  }
  func.func @transform_5(%arg0: i32) -> (i32, i32, i32) {
    %c0_i32 = arith.constant 0 : i32
    %c0_i32_0 = arith.constant 0 : i32
    %c0_i32_1 = arith.constant 0 : i32
    %c0_i32_2 = arith.constant 0 : i32
    return %c0_i32, %c0_i32_0, %c0_i32_1 : i32, i32, i32
  }
  func.func @transform_6(%arg0: i32) -> (i32, i32, i32) {
    %c0_i32 = arith.constant 0 : i32
    %c0_i32_0 = arith.constant 0 : i32
    %c0_i32_1 = arith.constant 0 : i32
    %c0_i32_2 = arith.constant 0 : i32
    return %c0_i32, %c0_i32_0, %c0_i32_1 : i32, i32, i32
  }
  func.func @transform_7(%arg0: i32) -> (i32, i32, i32, i32) {
    %c0_i32 = arith.constant 0 : i32
    %c0_i32_0 = arith.constant 0 : i32
    %c0_i32_1 = arith.constant 0 : i32
    %c0_i32_2 = arith.constant 0 : i32
    %c0_i32_3 = arith.constant 0 : i32
    return %c0_i32, %c0_i32_0, %c0_i32_1, %c0_i32_2 : i32, i32, i32, i32
  }
  func.func @transform_8(%arg0: i32) -> (i32, i32, i32, i32) {
    %c0_i32 = arith.constant 0 : i32
    %c0_i32_0 = arith.constant 0 : i32
    %c0_i32_1 = arith.constant 0 : i32
    %c0_i32_2 = arith.constant 0 : i32
    %c0_i32_3 = arith.constant 0 : i32
    return %c0_i32, %c0_i32_0, %c0_i32_1, %c0_i32_2 : i32, i32, i32, i32
  }
  func.func @transform_9(%arg0: i32) -> (i32, i32, i32, i32) {
    %c0_i32 = arith.constant 0 : i32
    %c0_i32_0 = arith.constant 0 : i32
    %c0_i32_1 = arith.constant 0 : i32
    %c0_i32_2 = arith.constant 0 : i32
    %c0_i32_3 = arith.constant 0 : i32
    return %c0_i32, %c0_i32_0, %c0_i32_1, %c0_i32_2 : i32, i32, i32, i32
  }
  func.func @transform_10(%arg0: i32) -> (i32, i32, i32, i32) {
    %c0_i32 = arith.constant 0 : i32
    %c0_i32_0 = arith.constant 0 : i32
    %c0_i32_1 = arith.constant 0 : i32
    %c0_i32_2 = arith.constant 0 : i32
    %c0_i32_3 = arith.constant 0 : i32
    return %c0_i32, %c0_i32_0, %c0_i32_1, %c0_i32_2 : i32, i32, i32, i32
  }
  func.func @transform_11(%arg0: i32) -> (i32, i32, i32, i32) {
    %c0_i32 = arith.constant 0 : i32
    %c0_i32_0 = arith.constant 0 : i32
    %c0_i32_1 = arith.constant 0 : i32
    %c0_i32_2 = arith.constant 0 : i32
    %c0_i32_3 = arith.constant 0 : i32
    return %c0_i32, %c0_i32_0, %c0_i32_1, %c0_i32_2 : i32, i32, i32, i32
  }
  func.func @transform_12(%arg0: i32) -> (i32, i32, i32, i32) {
    %c0_i32 = arith.constant 0 : i32
    %c0_i32_0 = arith.constant 0 : i32
    %c0_i32_1 = arith.constant 0 : i32
    %c0_i32_2 = arith.constant 0 : i32
    %c0_i32_3 = arith.constant 0 : i32
    return %c0_i32, %c0_i32_0, %c0_i32_1, %c0_i32_2 : i32, i32, i32, i32
  }
  func.func @transform_13(%arg0: i32) -> (i32, i32, i32, i32) {
    %c0_i32 = arith.constant 0 : i32
    %c0_i32_0 = arith.constant 0 : i32
    %c0_i32_1 = arith.constant 0 : i32
    %c0_i32_2 = arith.constant 0 : i32
    %c0_i32_3 = arith.constant 0 : i32
    return %c0_i32, %c0_i32_0, %c0_i32_1, %c0_i32_2 : i32, i32, i32, i32
  }
  func.func @transform_14(%arg0: i32) -> (i32, i32, i32) {
    %c0_i32 = arith.constant 0 : i32
    %c0_i32_0 = arith.constant 0 : i32
    %c0_i32_1 = arith.constant 0 : i32
    %c0_i32_2 = arith.constant 0 : i32
    return %c0_i32, %c0_i32_0, %c0_i32_1 : i32, i32, i32
  }
  func.func @transform_15(%arg0: i32) -> (i32, i32, i32) {
    %c0_i32 = arith.constant 0 : i32
    %c0_i32_0 = arith.constant 0 : i32
    %c0_i32_1 = arith.constant 0 : i32
    %c0_i32_2 = arith.constant 0 : i32
    return %c0_i32, %c0_i32_0, %c0_i32_1 : i32, i32, i32
  }
  func.func @transform_16(%arg0: i32) -> (i32, i32, i32) {
    %c0_i32 = arith.constant 0 : i32
    %c0_i32_0 = arith.constant 0 : i32
    %c0_i32_1 = arith.constant 0 : i32
    %c0_i32_2 = arith.constant 0 : i32
    return %c0_i32, %c0_i32_0, %c0_i32_1 : i32, i32, i32
  }
  func.func @transform_17(%arg0: i32) -> (i32, i32, i32) {
    %c0_i32 = arith.constant 0 : i32
    %c0_i32_0 = arith.constant 0 : i32
    %c0_i32_1 = arith.constant 0 : i32
    %c0_i32_2 = arith.constant 0 : i32
    return %c0_i32, %c0_i32_0, %c0_i32_1 : i32, i32, i32
  }
  func.func @transform_18(%arg0: i32) -> (i32, i32, i32) {
    %c0_i32 = arith.constant 0 : i32
    %c0_i32_0 = arith.constant 0 : i32
    %c0_i32_1 = arith.constant 0 : i32
    %c0_i32_2 = arith.constant 0 : i32
    return %c0_i32, %c0_i32_0, %c0_i32_1 : i32, i32, i32
  }
  func.func @transform_19(%arg0: i32) -> (i32, i32, i32) {
    %c0_i32 = arith.constant 0 : i32
    %c0_i32_0 = arith.constant 0 : i32
    %c0_i32_1 = arith.constant 0 : i32
    %c0_i32_2 = arith.constant 0 : i32
    return %c0_i32, %c0_i32_0, %c0_i32_1 : i32, i32, i32
  }
  func.func @transform_20(%arg0: i32) -> (i32, i32, i32) {
    %c0_i32 = arith.constant 0 : i32
    %c0_i32_0 = arith.constant 0 : i32
    %c0_i32_1 = arith.constant 0 : i32
    %c0_i32_2 = arith.constant 0 : i32
    return %c0_i32, %c0_i32_0, %c0_i32_1 : i32, i32, i32
  }
  func.func @transform_21(%arg0: i32) -> (i32, i32) {
    %c0_i32 = arith.constant 0 : i32
    %c0_i32_0 = arith.constant 0 : i32
    %c0_i32_1 = arith.constant 0 : i32
    return %c0_i32, %c0_i32_0 : i32, i32
  }
  func.func @transform_22(%arg0: i32) -> (i32, i32) {
    %c0_i32 = arith.constant 0 : i32
    %c0_i32_0 = arith.constant 0 : i32
    %c0_i32_1 = arith.constant 0 : i32
    return %c0_i32, %c0_i32_0 : i32, i32
  }
  func.func @transform_23(%arg0: i32) -> (i32, i32) {
    %c0_i32 = arith.constant 0 : i32
    %c0_i32_0 = arith.constant 0 : i32
    %c0_i32_1 = arith.constant 0 : i32
    return %c0_i32, %c0_i32_0 : i32, i32
  }
  func.func @transform_24(%arg0: i32) -> (i32, i32) {
    %c0_i32 = arith.constant 0 : i32
    %c0_i32_0 = arith.constant 0 : i32
    %c0_i32_1 = arith.constant 0 : i32
    return %c0_i32, %c0_i32_0 : i32, i32
  }
  func.func @transform_25(%arg0: i32) -> (i32, i32) {
    %c0_i32 = arith.constant 0 : i32
    %c0_i32_0 = arith.constant 0 : i32
    %c0_i32_1 = arith.constant 0 : i32
    return %c0_i32, %c0_i32_0 : i32, i32
  }
}

module attributes {stable_mosaic.version = 11 : i64} {
  func.func @kern(%arg0: i32, %arg1: memref<2x10xf32, #tpu.memory_space<vmem>>, %arg2: memref<2x10xf32, #tpu.memory_space<vmem>>) attributes {dimension_semantics = [#tpu.dimension_semantics<arbitrary>], iteration_bounds = array<i64: 1>, scalar_prefetch = 0 : i64, scratch_operands = 0 : i64, tpu.core_type = #tpu.core_type<tc>, window_params = [{pipeline_mode = #tpu.pipeline_mode<synchronous>, transform_indices = @transform_0, window_bounds = array<i64: 2, 10>}, {pipeline_mode = #tpu.pipeline_mode<synchronous>, transform_indices = @transform_1, window_bounds = array<i64: 2, 10>}]} {
    %c0 = arith.constant 0 : index
    %c0_0 = arith.constant 0 : index
    %0 = vector.load %arg1[%c0, %c0_0] : memref<2x10xf32, #tpu.memory_space<vmem>>, vector<2x10xf32>
    %cst = arith.constant dense<0.000000e+00> : vector<10xf32>
    %1 = vector.multi_reduction <add>, %0, %cst [0] : vector<2x10xf32> to vector<10xf32>
    %2 = vector.shape_cast %1 : vector<10xf32> to vector<1x10xf32>
    %cst_1 = arith.constant 2.000000e+00 : f32
    %3 = vector.broadcast %cst_1 : f32 to vector<1x10xf32>
    %4 = arith.divf %2, %3 : vector<1x10xf32>
    %5 = vector.broadcast %4 : vector<1x10xf32> to vector<2x10xf32>
    %6 = arith.subf %0, %5 : vector<2x10xf32>
    %7 = arith.mulf %6, %6 : vector<2x10xf32>
    %cst_2 = arith.constant dense<0.000000e+00> : vector<10xf32>
    %8 = vector.multi_reduction <add>, %7, %cst_2 [0] : vector<2x10xf32> to vector<10xf32>
    %9 = vector.shape_cast %8 : vector<10xf32> to vector<1x10xf32>
    %cst_3 = arith.constant 1.000000e+00 : f32
    %10 = vector.broadcast %cst_3 : f32 to vector<1x10xf32>
    %11 = arith.divf %9, %10 : vector<1x10xf32>
    %12 = vector.broadcast %4 : vector<1x10xf32> to vector<2x10xf32>
    %13 = arith.subf %0, %12 : vector<2x10xf32>
    %14 = math.sqrt %11 : vector<1x10xf32>
    %cst_4 = arith.constant 9.99999993E-9 : f32
    %15 = vector.broadcast %cst_4 : f32 to vector<1x10xf32>
    %16 = arith.addf %14, %15 : vector<1x10xf32>
    %17 = vector.broadcast %16 : vector<1x10xf32> to vector<2x10xf32>
    %18 = arith.divf %13, %17 : vector<2x10xf32>
    %c0_5 = arith.constant 0 : index
    %c0_6 = arith.constant 0 : index
    %19 = vector.load %arg2[%c0_5, %c0_6] : memref<2x10xf32, #tpu.memory_space<vmem>>, vector<2x10xf32>
    tpu.vector_store %arg2[%c0_5, %c0_6], %18 {strides = array<i32>} : memref<2x10xf32, #tpu.memory_space<vmem>>, vector<2x10xf32>,
    return
  }
  func.func @transform_0(%arg0: i32) -> (i32, i32) {
    %c0_i32 = arith.constant 0 : i32
    %c0_i32_0 = arith.constant 0 : i32
    %c0_i32_1 = arith.constant 0 : i32
    return %c0_i32, %c0_i32_0 : i32, i32
  }
  func.func @transform_1(%arg0: i32) -> (i32, i32) {
    %c0_i32 = arith.constant 0 : i32
    %c0_i32_0 = arith.constant 0 : i32
    %c0_i32_1 = arith.constant 0 : i32
    return %c0_i32, %c0_i32_0 : i32, i32
  }
}

module attributes {stable_mosaic.version = 11 : i64} {
  func.func @_bert_fused_kernel(%arg0: i32, %arg1: memref<10x3xf32, #tpu.memory_space<vmem>>, %arg2: memref<10x32xf32, #tpu.memory_space<vmem>>, %arg3: memref<10x10xf32, #tpu.memory_space<vmem>>, %arg4: memref<3x32xf32, #tpu.memory_space<vmem>>, %arg5: memref<1x32xf32, #tpu.memory_space<vmem>>, %arg6: memref<3x1x32xf32, #tpu.memory_space<vmem>>, %arg7: memref<3x1x32xf32, #tpu.memory_space<vmem>>, %arg8: memref<3x2x32x16xf32, #tpu.memory_space<vmem>>, %arg9: memref<3x2x1x16xf32, #tpu.memory_space<vmem>>, %arg10: memref<3x2x32x16xf32, #tpu.memory_space<vmem>>, %arg11: memref<3x2x1x16xf32, #tpu.memory_space<vmem>>, %arg12: memref<3x2x32x16xf32, #tpu.memory_space<vmem>>, %arg13: memref<3x2x1x16xf32, #tpu.memory_space<vmem>>, %arg14: memref<3x2x16x32xf32, #tpu.memory_space<vmem>>, %arg15: memref<3x1x32xf32, #tpu.memory_space<vmem>>, %arg16: memref<3x1x32xf32, #tpu.memory_space<vmem>>, %arg17: memref<3x1x32xf32, #tpu.memory_space<vmem>>, %arg18: memref<3x32x128xf32, #tpu.memory_space<vmem>>, %arg19: memref<3x1x128xf32, #tpu.memory_space<vmem>>, %arg20: memref<3x128x32xf32, #tpu.memory_space<vmem>>, %arg21: memref<3x1x32xf32, #tpu.memory_space<vmem>>, %arg22: memref<1x32xf32, #tpu.memory_space<vmem>>, %arg23: memref<1x32xf32, #tpu.memory_space<vmem>>, %arg24: memref<32x128xf32, #tpu.memory_space<vmem>>, %arg25: memref<1x128xf32, #tpu.memory_space<vmem>>, %arg26: memref<10x128xf32, #tpu.memory_space<vmem>>) attributes {dimension_semantics = [#tpu.dimension_semantics<arbitrary>], iteration_bounds = array<i64: 1>, scalar_prefetch = 0 : i64, scratch_operands = 0 : i64, tpu.core_type = #tpu.core_type<tc>, window_params = [{pipeline_mode = #tpu.pipeline_mode<synchronous>, transform_indices = @transform_0, window_bounds = array<i64: 10, 3>}, {pipeline_mode = #tpu.pipeline_mode<synchronous>, transform_indices = @transform_1, window_bounds = array<i64: 10, 32>}, {pipeline_mode = #tpu.pipeline_mode<synchronous>, transform_indices = @transform_2, window_bounds = array<i64: 10, 10>}, {pipeline_mode = #tpu.pipeline_mode<synchronous>, transform_indices = @transform_3, window_bounds = array<i64: 3, 32>}, {pipeline_mode = #tpu.pipeline_mode<synchronous>, transform_indices = @transform_4, window_bounds = array<i64: 1, 32>}, {pipeline_mode = #tpu.pipeline_mode<synchronous>, transform_indices = @transform_5, window_bounds = array<i64: 3, 1, 32>}, {pipeline_mode = #tpu.pipeline_mode<synchronous>, transform_indices = @transform_6, window_bounds = array<i64: 3, 1, 32>}, {pipeline_mode = #tpu.pipeline_mode<synchronous>, transform_indices = @transform_7, window_bounds = array<i64: 3, 2, 32, 16>}, {pipeline_mode = #tpu.pipeline_mode<synchronous>, transform_indices = @transform_8, window_bounds = array<i64: 3, 2, 1, 16>}, {pipeline_mode = #tpu.pipeline_mode<synchronous>, transform_indices = @transform_9, window_bounds = array<i64: 3, 2, 32, 16>}, {pipeline_mode = #tpu.pipeline_mode<synchronous>, transform_indices = @transform_10, window_bounds = array<i64: 3, 2, 1, 16>}, {pipeline_mode = #tpu.pipeline_mode<synchronous>, transform_indices = @transform_11, window_bounds = array<i64: 3, 2, 32, 16>}, {pipeline_mode = #tpu.pipeline_mode<synchronous>, transform_indices = @transform_12, window_bounds = array<i64: 3, 2, 1, 16>}, {pipeline_mode = #tpu.pipeline_mode<synchronous>, transform_indices = @transform_13, window_bounds = array<i64: 3, 2, 16, 32>}, {pipeline_mode = #tpu.pipeline_mode<synchronous>, transform_indices = @transform_14, window_bounds = array<i64: 3, 1, 32>}, {pipeline_mode = #tpu.pipeline_mode<synchronous>, transform_indices = @transform_15, window_bounds = array<i64: 3, 1, 32>}, {pipeline_mode = #tpu.pipeline_mode<synchronous>, transform_indices = @transform_16, window_bounds = array<i64: 3, 1, 32>}, {pipeline_mode = #tpu.pipeline_mode<synchronous>, transform_indices = @transform_17, window_bounds = array<i64: 3, 32, 128>}, {pipeline_mode = #tpu.pipeline_mode<synchronous>, transform_indices = @transform_18, window_bounds = array<i64: 3, 1, 128>}, {pipeline_mode = #tpu.pipeline_mode<synchronous>, transform_indices = @transform_19, window_bounds = array<i64: 3, 128, 32>}, {pipeline_mode = #tpu.pipeline_mode<synchronous>, transform_indices = @transform_20, window_bounds = array<i64: 3, 1, 32>}, {pipeline_mode = #tpu.pipeline_mode<synchronous>, transform_indices = @transform_21, window_bounds = array<i64: 1, 32>}, {pipeline_mode = #tpu.pipeline_mode<synchronous>, transform_indices = @transform_22, window_bounds = array<i64: 1, 32>}, {pipeline_mode = #tpu.pipeline_mode<synchronous>, transform_indices = @transform_23, window_bounds = array<i64: 32, 128>}, {pipeline_mode = #tpu.pipeline_mode<synchronous>, transform_indices = @transform_24, window_bounds = array<i64: 1, 128>}, {pipeline_mode = #tpu.pipeline_mode<synchronous>, transform_indices = @transform_25, window_bounds = array<i64: 10, 128>}]} {
    %c0 = arith.constant 0 : index
    %c0_0 = arith.constant 0 : index
    %0 = vector.load %arg1[%c0, %c0_0] : memref<10x3xf32, #tpu.memory_space<vmem>>, vector<10x3xf32>
    %c0_1 = arith.constant 0 : index
    %c0_2 = arith.constant 0 : index
    %1 = vector.load %arg4[%c0_1, %c0_2] : memref<3x32xf32, #tpu.memory_space<vmem>>, vector<3x32xf32>
    %cst = arith.constant dense<0.000000e+00> : vector<10x32xf32>
    %2 = tpu.matmul %0, %1, %cst {dimension_numbers = #tpu.dot_dimension_numbers<[1], [0], [0], [1], [0, 0, 1, 1], [], []>} : vector<10x3xf32>, vector<3x32xf32>, vector<10x32xf32> -> vector<10x32xf32>
    %c0_3 = arith.constant 0 : index
    %c0_4 = arith.constant 0 : index
    %3 = vector.load %arg5[%c0_3, %c0_4] : memref<1x32xf32, #tpu.memory_space<vmem>>, vector<1x32xf32>
    %4 = vector.broadcast %3 : vector<1x32xf32> to vector<10x32xf32>
    %5 = arith.addf %2, %4 : vector<10x32xf32>
    %cst_5 = arith.constant 5.65685415 : f32
    %6 = vector.broadcast %cst_5 : f32 to vector<10x32xf32>
    %7 = arith.mulf %5, %6 : vector<10x32xf32>
    %c0_6 = arith.constant 0 : index
    %c0_7 = arith.constant 0 : index
    %8 = vector.load %arg2[%c0_6, %c0_7] : memref<10x32xf32, #tpu.memory_space<vmem>>, vector<10x32xf32>
    %9 = arith.addf %7, %8 : vector<10x32xf32>
    %c0_8 = arith.constant 0 : index
    %c0_9 = arith.constant 0 : index
    %10 = vector.load %arg3[%c0_8, %c0_9] : memref<10x10xf32, #tpu.memory_space<vmem>>, vector<10x10xf32>
    %c0_10 = arith.constant 0 : index
    %c0_11 = arith.constant 0 : index
    %c0_12 = arith.constant 0 : index
    %11 = vector.load %arg6[%c0_10, %c0_11, %c0_12] : memref<3x1x32xf32, #tpu.memory_space<vmem>>, vector<1x1x32xf32>
    %12 = vector.shape_cast %11 : vector<1x1x32xf32> to vector<1x32xf32>
    %c0_13 = arith.constant 0 : index
    %c0_14 = arith.constant 0 : index
    %c0_15 = arith.constant 0 : index
    %13 = vector.load %arg7[%c0_13, %c0_14, %c0_15] : memref<3x1x32xf32, #tpu.memory_space<vmem>>, vector<1x1x32xf32>
    %14 = vector.shape_cast %13 : vector<1x1x32xf32> to vector<1x32xf32>
    %cst_16 = arith.constant dense<0.000000e+00> : vector<10xf32>
    %15 = vector.multi_reduction <add>, %9, %cst_16 [1] : vector<10x32xf32> to vector<10xf32>
    %16 = vector.shape_cast %15 : vector<10xf32> to vector<10x1xf32>
    %cst_17 = arith.constant 3.200000e+01 : f32
    %17 = vector.broadcast %cst_17 : f32 to vector<10x1xf32>
    %18 = arith.divf %16, %17 : vector<10x1xf32>
    %19 = vector.broadcast %18 : vector<10x1xf32> to vector<10x32xf32>
    %20 = arith.subf %9, %19 : vector<10x32xf32>
    %21 = arith.mulf %20, %20 : vector<10x32xf32>
    %cst_18 = arith.constant dense<0.000000e+00> : vector<10xf32>
    %22 = vector.multi_reduction <add>, %21, %cst_18 [1] : vector<10x32xf32> to vector<10xf32>
    %23 = vector.shape_cast %22 : vector<10xf32> to vector<10x1xf32>
    %cst_19 = arith.constant 3.200000e+01 : f32
    %24 = vector.broadcast %cst_19 : f32 to vector<10x1xf32>
    %25 = arith.divf %23, %24 : vector<10x1xf32>
    %26 = vector.broadcast %18 : vector<10x1xf32> to vector<10x32xf32>
    %27 = arith.subf %9, %26 : vector<10x32xf32>
    %cst_20 = arith.constant 9.99999997E-7 : f32
    %28 = vector.broadcast %cst_20 : f32 to vector<10x1xf32>
    %29 = arith.addf %25, %28 : vector<10x1xf32>
    %30 = math.rsqrt %29 : vector<10x1xf32>
    %31 = vector.broadcast %30 : vector<10x1xf32> to vector<10x32xf32>
    %32 = arith.mulf %27, %31 : vector<10x32xf32>
    %33 = vector.broadcast %12 : vector<1x32xf32> to vector<10x32xf32>
    %34 = arith.mulf %32, %33 : vector<10x32xf32>
    %35 = vector.broadcast %14 : vector<1x32xf32> to vector<10x32xf32>
    %36 = arith.addf %34, %35 : vector<10x32xf32>
    %cst_21 = arith.constant 0.000000e+00 : f32
    %37 = vector.broadcast %cst_21 : f32 to vector<10x32xf32>
    %c0_22 = arith.constant 0 : index
    %c0_23 = arith.constant 0 : index
    %c0_24 = arith.constant 0 : index
    %c0_25 = arith.constant 0 : index
    %38 = vector.load %arg8[%c0_22, %c0_23, %c0_24, %c0_25] : memref<3x2x32x16xf32, #tpu.memory_space<vmem>>, vector<1x1x32x16xf32>
    %39 = vector.shape_cast %38 : vector<1x1x32x16xf32> to vector<32x16xf32>
    %cst_26 = arith.constant dense<0.000000e+00> : vector<10x16xf32>
    %40 = tpu.matmul %36, %39, %cst_26 {dimension_numbers = #tpu.dot_dimension_numbers<[1], [0], [0], [1], [0, 0, 1, 1], [], []>} : vector<10x32xf32>, vector<32x16xf32>, vector<10x16xf32> -> vector<10x16xf32>
    %c0_27 = arith.constant 0 : index
    %c0_28 = arith.constant 0 : index
    %c0_29 = arith.constant 0 : index
    %c0_30 = arith.constant 0 : index
    %41 = vector.load %arg9[%c0_27, %c0_28, %c0_29, %c0_30] : memref<3x2x1x16xf32, #tpu.memory_space<vmem>>, vector<1x1x1x16xf32>
    %42 = vector.shape_cast %41 : vector<1x1x1x16xf32> to vector<1x16xf32>
    %43 = vector.broadcast %42 : vector<1x16xf32> to vector<10x16xf32>
    %44 = arith.addf %40, %43 : vector<10x16xf32>
    %c0_31 = arith.constant 0 : index
    %c0_32 = arith.constant 0 : index
    %c0_33 = arith.constant 0 : index
    %c0_34 = arith.constant 0 : index
    %45 = vector.load %arg10[%c0_31, %c0_32, %c0_33, %c0_34] : memref<3x2x32x16xf32, #tpu.memory_space<vmem>>, vector<1x1x32x16xf32>
    %46 = vector.shape_cast %45 : vector<1x1x32x16xf32> to vector<32x16xf32>
    %cst_35 = arith.constant dense<0.000000e+00> : vector<10x16xf32>
    %47 = tpu.matmul %36, %46, %cst_35 {dimension_numbers = #tpu.dot_dimension_numbers<[1], [0], [0], [1], [0, 0, 1, 1], [], []>} : vector<10x32xf32>, vector<32x16xf32>, vector<10x16xf32> -> vector<10x16xf32>
    %c0_36 = arith.constant 0 : index
    %c0_37 = arith.constant 0 : index
    %c0_38 = arith.constant 0 : index
    %c0_39 = arith.constant 0 : index
    %48 = vector.load %arg11[%c0_36, %c0_37, %c0_38, %c0_39] : memref<3x2x1x16xf32, #tpu.memory_space<vmem>>, vector<1x1x1x16xf32>
    %49 = vector.shape_cast %48 : vector<1x1x1x16xf32> to vector<1x16xf32>
    %50 = vector.broadcast %49 : vector<1x16xf32> to vector<10x16xf32>
    %51 = arith.addf %47, %50 : vector<10x16xf32>
    %c0_40 = arith.constant 0 : index
    %c0_41 = arith.constant 0 : index
    %c0_42 = arith.constant 0 : index
    %c0_43 = arith.constant 0 : index
    %52 = vector.load %arg12[%c0_40, %c0_41, %c0_42, %c0_43] : memref<3x2x32x16xf32, #tpu.memory_space<vmem>>, vector<1x1x32x16xf32>
    %53 = vector.shape_cast %52 : vector<1x1x32x16xf32> to vector<32x16xf32>
    %cst_44 = arith.constant dense<0.000000e+00> : vector<10x16xf32>
    %54 = tpu.matmul %36, %53, %cst_44 {dimension_numbers = #tpu.dot_dimension_numbers<[1], [0], [0], [1], [0, 0, 1, 1], [], []>} : vector<10x32xf32>, vector<32x16xf32>, vector<10x16xf32> -> vector<10x16xf32>
    %c0_45 = arith.constant 0 : index
    %c0_46 = arith.constant 0 : index
    %c0_47 = arith.constant 0 : index
    %c0_48 = arith.constant 0 : index
    %55 = vector.load %arg13[%c0_45, %c0_46, %c0_47, %c0_48] : memref<3x2x1x16xf32, #tpu.memory_space<vmem>>, vector<1x1x1x16xf32>
    %56 = vector.shape_cast %55 : vector<1x1x1x16xf32> to vector<1x16xf32>
    %57 = vector.broadcast %56 : vector<1x16xf32> to vector<10x16xf32>
    %58 = arith.addf %54, %57 : vector<10x16xf32>
    %cst_49 = arith.constant dense<0.000000e+00> : vector<10x10xf32>
    %59 = tpu.matmul %44, %51, %cst_49 {dimension_numbers = #tpu.dot_dimension_numbers<[1], [1], [0], [0], [0, 0, 1, 0], [], []>} : vector<10x16xf32>, vector<10x16xf32>, vector<10x10xf32> -> vector<10x10xf32>
    %cst_50 = arith.constant 2.500000e-01 : f32
    %60 = vector.broadcast %cst_50 : f32 to vector<10x10xf32>
    %61 = arith.mulf %59, %60 : vector<10x10xf32>
    %62 = arith.addf %61, %10 : vector<10x10xf32>
    %cst_51 = arith.constant dense<0xFF800000> : vector<10xf32>
    %63 = vector.multi_reduction <maximumf>, %62, %cst_51 [1] : vector<10x10xf32> to vector<10xf32>
    %64 = vector.shape_cast %63 : vector<10xf32> to vector<10x1xf32>
    %65 = vector.broadcast %64 : vector<10x1xf32> to vector<10x10xf32>
    %66 = arith.subf %62, %65 : vector<10x10xf32>
    %67 = math.exp %66 : vector<10x10xf32>
    %cst_52 = arith.constant dense<0.000000e+00> : vector<10xf32>
    %68 = vector.multi_reduction <add>, %67, %cst_52 [1] : vector<10x10xf32> to vector<10xf32>
    %69 = vector.shape_cast %68 : vector<10xf32> to vector<10x1xf32>
    %70 = tpu.reciprocal %69 {approx = true} : vector<10x1xf32> -> vector<10x1xf32>
    %71 = vector.broadcast %70 : vector<10x1xf32> to vector<10x10xf32>
    %72 = arith.mulf %67, %71 : vector<10x10xf32>
    %cst_53 = arith.constant dense<0.000000e+00> : vector<10x16xf32>
    %73 = tpu.matmul %72, %58, %cst_53 {dimension_numbers = #tpu.dot_dimension_numbers<[1], [0], [0], [1], [0, 0, 1, 1], [], []>} : vector<10x10xf32>, vector<10x16xf32>, vector<10x16xf32> -> vector<10x16xf32>
    %c0_54 = arith.constant 0 : index
    %c0_55 = arith.constant 0 : index
    %c0_56 = arith.constant 0 : index
    %c0_57 = arith.constant 0 : index
    %74 = vector.load %arg14[%c0_54, %c0_55, %c0_56, %c0_57] : memref<3x2x16x32xf32, #tpu.memory_space<vmem>>, vector<1x1x16x32xf32>
    %75 = vector.shape_cast %74 : vector<1x1x16x32xf32> to vector<16x32xf32>
    %cst_58 = arith.constant dense<0.000000e+00> : vector<10x32xf32>
    %76 = tpu.matmul %73, %75, %cst_58 {dimension_numbers = #tpu.dot_dimension_numbers<[1], [0], [0], [1], [0, 0, 1, 1], [], []>} : vector<10x16xf32>, vector<16x32xf32>, vector<10x32xf32> -> vector<10x32xf32>
    %77 = arith.addf %37, %76 : vector<10x32xf32>
    %c0_59 = arith.constant 0 : index
    %c1 = arith.constant 1 : index
    %c0_60 = arith.constant 0 : index
    %c0_61 = arith.constant 0 : index
    %78 = vector.load %arg8[%c0_59, %c1, %c0_60, %c0_61] : memref<3x2x32x16xf32, #tpu.memory_space<vmem>>, vector<1x1x32x16xf32>
    %79 = vector.shape_cast %78 : vector<1x1x32x16xf32> to vector<32x16xf32>
    %cst_62 = arith.constant dense<0.000000e+00> : vector<10x16xf32>
    %80 = tpu.matmul %36, %79, %cst_62 {dimension_numbers = #tpu.dot_dimension_numbers<[1], [0], [0], [1], [0, 0, 1, 1], [], []>} : vector<10x32xf32>, vector<32x16xf32>, vector<10x16xf32> -> vector<10x16xf32>
    %c0_63 = arith.constant 0 : index
    %c1_64 = arith.constant 1 : index
    %c0_65 = arith.constant 0 : index
    %c0_66 = arith.constant 0 : index
    %81 = vector.load %arg9[%c0_63, %c1_64, %c0_65, %c0_66] : memref<3x2x1x16xf32, #tpu.memory_space<vmem>>, vector<1x1x1x16xf32>
    %82 = vector.shape_cast %81 : vector<1x1x1x16xf32> to vector<1x16xf32>
    %83 = vector.broadcast %82 : vector<1x16xf32> to vector<10x16xf32>
    %84 = arith.addf %80, %83 : vector<10x16xf32>
    %c0_67 = arith.constant 0 : index
    %c1_68 = arith.constant 1 : index
    %c0_69 = arith.constant 0 : index
    %c0_70 = arith.constant 0 : index
    %85 = vector.load %arg10[%c0_67, %c1_68, %c0_69, %c0_70] : memref<3x2x32x16xf32, #tpu.memory_space<vmem>>, vector<1x1x32x16xf32>
    %86 = vector.shape_cast %85 : vector<1x1x32x16xf32> to vector<32x16xf32>
    %cst_71 = arith.constant dense<0.000000e+00> : vector<10x16xf32>
    %87 = tpu.matmul %36, %86, %cst_71 {dimension_numbers = #tpu.dot_dimension_numbers<[1], [0], [0], [1], [0, 0, 1, 1], [], []>} : vector<10x32xf32>, vector<32x16xf32>, vector<10x16xf32> -> vector<10x16xf32>
    %c0_72 = arith.constant 0 : index
    %c1_73 = arith.constant 1 : index
    %c0_74 = arith.constant 0 : index
    %c0_75 = arith.constant 0 : index
    %88 = vector.load %arg11[%c0_72, %c1_73, %c0_74, %c0_75] : memref<3x2x1x16xf32, #tpu.memory_space<vmem>>, vector<1x1x1x16xf32>
    %89 = vector.shape_cast %88 : vector<1x1x1x16xf32> to vector<1x16xf32>
    %90 = vector.broadcast %89 : vector<1x16xf32> to vector<10x16xf32>
    %91 = arith.addf %87, %90 : vector<10x16xf32>
    %c0_76 = arith.constant 0 : index
    %c1_77 = arith.constant 1 : index
    %c0_78 = arith.constant 0 : index
    %c0_79 = arith.constant 0 : index
    %92 = vector.load %arg12[%c0_76, %c1_77, %c0_78, %c0_79] : memref<3x2x32x16xf32, #tpu.memory_space<vmem>>, vector<1x1x32x16xf32>
    %93 = vector.shape_cast %92 : vector<1x1x32x16xf32> to vector<32x16xf32>
    %cst_80 = arith.constant dense<0.000000e+00> : vector<10x16xf32>
    %94 = tpu.matmul %36, %93, %cst_80 {dimension_numbers = #tpu.dot_dimension_numbers<[1], [0], [0], [1], [0, 0, 1, 1], [], []>} : vector<10x32xf32>, vector<32x16xf32>, vector<10x16xf32> -> vector<10x16xf32>
    %c0_81 = arith.constant 0 : index
    %c1_82 = arith.constant 1 : index
    %c0_83 = arith.constant 0 : index
    %c0_84 = arith.constant 0 : index
    %95 = vector.load %arg13[%c0_81, %c1_82, %c0_83, %c0_84] : memref<3x2x1x16xf32, #tpu.memory_space<vmem>>, vector<1x1x1x16xf32>
    %96 = vector.shape_cast %95 : vector<1x1x1x16xf32> to vector<1x16xf32>
    %97 = vector.broadcast %96 : vector<1x16xf32> to vector<10x16xf32>
    %98 = arith.addf %94, %97 : vector<10x16xf32>
    %cst_85 = arith.constant dense<0.000000e+00> : vector<10x10xf32>
    %99 = tpu.matmul %84, %91, %cst_85 {dimension_numbers = #tpu.dot_dimension_numbers<[1], [1], [0], [0], [0, 0, 1, 0], [], []>} : vector<10x16xf32>, vector<10x16xf32>, vector<10x10xf32> -> vector<10x10xf32>
    %cst_86 = arith.constant 2.500000e-01 : f32
    %100 = vector.broadcast %cst_86 : f32 to vector<10x10xf32>
    %101 = arith.mulf %99, %100 : vector<10x10xf32>
    %102 = arith.addf %101, %10 : vector<10x10xf32>
    %cst_87 = arith.constant dense<0xFF800000> : vector<10xf32>
    %103 = vector.multi_reduction <maximumf>, %102, %cst_87 [1] : vector<10x10xf32> to vector<10xf32>
    %104 = vector.shape_cast %103 : vector<10xf32> to vector<10x1xf32>
    %105 = vector.broadcast %104 : vector<10x1xf32> to vector<10x10xf32>
    %106 = arith.subf %102, %105 : vector<10x10xf32>
    %107 = math.exp %106 : vector<10x10xf32>
    %cst_88 = arith.constant dense<0.000000e+00> : vector<10xf32>
    %108 = vector.multi_reduction <add>, %107, %cst_88 [1] : vector<10x10xf32> to vector<10xf32>
    %109 = vector.shape_cast %108 : vector<10xf32> to vector<10x1xf32>
    %110 = tpu.reciprocal %109 {approx = true} : vector<10x1xf32> -> vector<10x1xf32>
    %111 = vector.broadcast %110 : vector<10x1xf32> to vector<10x10xf32>
    %112 = arith.mulf %107, %111 : vector<10x10xf32>
    %cst_89 = arith.constant dense<0.000000e+00> : vector<10x16xf32>
    %113 = tpu.matmul %112, %98, %cst_89 {dimension_numbers = #tpu.dot_dimension_numbers<[1], [0], [0], [1], [0, 0, 1, 1], [], []>} : vector<10x10xf32>, vector<10x16xf32>, vector<10x16xf32> -> vector<10x16xf32>
    %c0_90 = arith.constant 0 : index
    %c1_91 = arith.constant 1 : index
    %c0_92 = arith.constant 0 : index
    %c0_93 = arith.constant 0 : index
    %114 = vector.load %arg14[%c0_90, %c1_91, %c0_92, %c0_93] : memref<3x2x16x32xf32, #tpu.memory_space<vmem>>, vector<1x1x16x32xf32>
    %115 = vector.shape_cast %114 : vector<1x1x16x32xf32> to vector<16x32xf32>
    %cst_94 = arith.constant dense<0.000000e+00> : vector<10x32xf32>
    %116 = tpu.matmul %113, %115, %cst_94 {dimension_numbers = #tpu.dot_dimension_numbers<[1], [0], [0], [1], [0, 0, 1, 1], [], []>} : vector<10x16xf32>, vector<16x32xf32>, vector<10x32xf32> -> vector<10x32xf32>
    %117 = arith.addf %77, %116 : vector<10x32xf32>
    %118 = arith.addf %9, %117 : vector<10x32xf32>
    %c0_95 = arith.constant 0 : index
    %c0_96 = arith.constant 0 : index
    %c0_97 = arith.constant 0 : index
    %119 = vector.load %arg15[%c0_95, %c0_96, %c0_97] : memref<3x1x32xf32, #tpu.memory_space<vmem>>, vector<1x1x32xf32>
    %120 = vector.shape_cast %119 : vector<1x1x32xf32> to vector<1x32xf32>
    %121 = vector.broadcast %120 : vector<1x32xf32> to vector<10x32xf32>
    %122 = arith.addf %118, %121 : vector<10x32xf32>
    %c0_98 = arith.constant 0 : index
    %c0_99 = arith.constant 0 : index
    %c0_100 = arith.constant 0 : index
    %123 = vector.load %arg16[%c0_98, %c0_99, %c0_100] : memref<3x1x32xf32, #tpu.memory_space<vmem>>, vector<1x1x32xf32>
    %124 = vector.shape_cast %123 : vector<1x1x32xf32> to vector<1x32xf32>
    %c0_101 = arith.constant 0 : index
    %c0_102 = arith.constant 0 : index
    %c0_103 = arith.constant 0 : index
    %125 = vector.load %arg17[%c0_101, %c0_102, %c0_103] : memref<3x1x32xf32, #tpu.memory_space<vmem>>, vector<1x1x32xf32>
    %126 = vector.shape_cast %125 : vector<1x1x32xf32> to vector<1x32xf32>
    %cst_104 = arith.constant dense<0.000000e+00> : vector<10xf32>
    %127 = vector.multi_reduction <add>, %122, %cst_104 [1] : vector<10x32xf32> to vector<10xf32>
    %128 = vector.shape_cast %127 : vector<10xf32> to vector<10x1xf32>
    %cst_105 = arith.constant 3.200000e+01 : f32
    %129 = vector.broadcast %cst_105 : f32 to vector<10x1xf32>
    %130 = arith.divf %128, %129 : vector<10x1xf32>
    %131 = vector.broadcast %130 : vector<10x1xf32> to vector<10x32xf32>
    %132 = arith.subf %122, %131 : vector<10x32xf32>
    %133 = arith.mulf %132, %132 : vector<10x32xf32>
    %cst_106 = arith.constant dense<0.000000e+00> : vector<10xf32>
    %134 = vector.multi_reduction <add>, %133, %cst_106 [1] : vector<10x32xf32> to vector<10xf32>
    %135 = vector.shape_cast %134 : vector<10xf32> to vector<10x1xf32>
    %cst_107 = arith.constant 3.200000e+01 : f32
    %136 = vector.broadcast %cst_107 : f32 to vector<10x1xf32>
    %137 = arith.divf %135, %136 : vector<10x1xf32>
    %138 = vector.broadcast %130 : vector<10x1xf32> to vector<10x32xf32>
    %139 = arith.subf %122, %138 : vector<10x32xf32>
    %cst_108 = arith.constant 9.99999997E-7 : f32
    %140 = vector.broadcast %cst_108 : f32 to vector<10x1xf32>
    %141 = arith.addf %137, %140 : vector<10x1xf32>
    %142 = math.rsqrt %141 : vector<10x1xf32>
    %143 = vector.broadcast %142 : vector<10x1xf32> to vector<10x32xf32>
    %144 = arith.mulf %139, %143 : vector<10x32xf32>
    %145 = vector.broadcast %124 : vector<1x32xf32> to vector<10x32xf32>
    %146 = arith.mulf %144, %145 : vector<10x32xf32>
    %147 = vector.broadcast %126 : vector<1x32xf32> to vector<10x32xf32>
    %148 = arith.addf %146, %147 : vector<10x32xf32>
    %c0_109 = arith.constant 0 : index
    %c0_110 = arith.constant 0 : index
    %c0_111 = arith.constant 0 : index
    %149 = vector.load %arg18[%c0_109, %c0_110, %c0_111] : memref<3x32x128xf32, #tpu.memory_space<vmem>>, vector<1x32x128xf32>
    %150 = vector.shape_cast %149 : vector<1x32x128xf32> to vector<32x128xf32>
    %cst_112 = arith.constant dense<0.000000e+00> : vector<10x128xf32>
    %151 = tpu.matmul %148, %150, %cst_112 {dimension_numbers = #tpu.dot_dimension_numbers<[1], [0], [0], [1], [0, 0, 1, 1], [], []>} : vector<10x32xf32>, vector<32x128xf32>, vector<10x128xf32> -> vector<10x128xf32>
    %c0_113 = arith.constant 0 : index
    %c0_114 = arith.constant 0 : index
    %c0_115 = arith.constant 0 : index
    %152 = vector.load %arg19[%c0_113, %c0_114, %c0_115] : memref<3x1x128xf32, #tpu.memory_space<vmem>>, vector<1x1x128xf32>
    %153 = vector.shape_cast %152 : vector<1x1x128xf32> to vector<1x128xf32>
    %154 = vector.broadcast %153 : vector<1x128xf32> to vector<10x128xf32>
    %155 = arith.addf %151, %154 : vector<10x128xf32>
    %cst_116 = arith.constant 0.000000e+00 : f32
    %156 = vector.broadcast %cst_116 : f32 to vector<10x128xf32>
    %157 = arith.maximumf %155, %156 : vector<10x128xf32>
    %c0_117 = arith.constant 0 : index
    %c0_118 = arith.constant 0 : index
    %c0_119 = arith.constant 0 : index
    %158 = vector.load %arg20[%c0_117, %c0_118, %c0_119] : memref<3x128x32xf32, #tpu.memory_space<vmem>>, vector<1x128x32xf32>
    %159 = vector.shape_cast %158 : vector<1x128x32xf32> to vector<128x32xf32>
    %cst_120 = arith.constant dense<0.000000e+00> : vector<10x32xf32>
    %160 = tpu.matmul %157, %159, %cst_120 {dimension_numbers = #tpu.dot_dimension_numbers<[1], [0], [0], [1], [0, 0, 1, 1], [], []>} : vector<10x128xf32>, vector<128x32xf32>, vector<10x32xf32> -> vector<10x32xf32>
    %161 = arith.addf %122, %160 : vector<10x32xf32>
    %c0_121 = arith.constant 0 : index
    %c0_122 = arith.constant 0 : index
    %c0_123 = arith.constant 0 : index
    %162 = vector.load %arg21[%c0_121, %c0_122, %c0_123] : memref<3x1x32xf32, #tpu.memory_space<vmem>>, vector<1x1x32xf32>
    %163 = vector.shape_cast %162 : vector<1x1x32xf32> to vector<1x32xf32>
    %164 = vector.broadcast %163 : vector<1x32xf32> to vector<10x32xf32>
    %165 = arith.addf %161, %164 : vector<10x32xf32>
    %c1_124 = arith.constant 1 : index
    %c0_125 = arith.constant 0 : index
    %c0_126 = arith.constant 0 : index
    %166 = vector.load %arg6[%c1_124, %c0_125, %c0_126] : memref<3x1x32xf32, #tpu.memory_space<vmem>>, vector<1x1x32xf32>
    %167 = vector.shape_cast %166 : vector<1x1x32xf32> to vector<1x32xf32>
    %c1_127 = arith.constant 1 : index
    %c0_128 = arith.constant 0 : index
    %c0_129 = arith.constant 0 : index
    %168 = vector.load %arg7[%c1_127, %c0_128, %c0_129] : memref<3x1x32xf32, #tpu.memory_space<vmem>>, vector<1x1x32xf32>
    %169 = vector.shape_cast %168 : vector<1x1x32xf32> to vector<1x32xf32>
    %cst_130 = arith.constant dense<0.000000e+00> : vector<10xf32>
    %170 = vector.multi_reduction <add>, %165, %cst_130 [1] : vector<10x32xf32> to vector<10xf32>
    %171 = vector.shape_cast %170 : vector<10xf32> to vector<10x1xf32>
    %cst_131 = arith.constant 3.200000e+01 : f32
    %172 = vector.broadcast %cst_131 : f32 to vector<10x1xf32>
    %173 = arith.divf %171, %172 : vector<10x1xf32>
    %174 = vector.broadcast %173 : vector<10x1xf32> to vector<10x32xf32>
    %175 = arith.subf %165, %174 : vector<10x32xf32>
    %176 = arith.mulf %175, %175 : vector<10x32xf32>
    %cst_132 = arith.constant dense<0.000000e+00> : vector<10xf32>
    %177 = vector.multi_reduction <add>, %176, %cst_132 [1] : vector<10x32xf32> to vector<10xf32>
    %178 = vector.shape_cast %177 : vector<10xf32> to vector<10x1xf32>
    %cst_133 = arith.constant 3.200000e+01 : f32
    %179 = vector.broadcast %cst_133 : f32 to vector<10x1xf32>
    %180 = arith.divf %178, %179 : vector<10x1xf32>
    %181 = vector.broadcast %173 : vector<10x1xf32> to vector<10x32xf32>
    %182 = arith.subf %165, %181 : vector<10x32xf32>
    %cst_134 = arith.constant 9.99999997E-7 : f32
    %183 = vector.broadcast %cst_134 : f32 to vector<10x1xf32>
    %184 = arith.addf %180, %183 : vector<10x1xf32>
    %185 = math.rsqrt %184 : vector<10x1xf32>
    %186 = vector.broadcast %185 : vector<10x1xf32> to vector<10x32xf32>
    %187 = arith.mulf %182, %186 : vector<10x32xf32>
    %188 = vector.broadcast %167 : vector<1x32xf32> to vector<10x32xf32>
    %189 = arith.mulf %187, %188 : vector<10x32xf32>
    %190 = vector.broadcast %169 : vector<1x32xf32> to vector<10x32xf32>
    %191 = arith.addf %189, %190 : vector<10x32xf32>
    %cst_135 = arith.constant 0.000000e+00 : f32
    %192 = vector.broadcast %cst_135 : f32 to vector<10x32xf32>
    %c1_136 = arith.constant 1 : index
    %c0_137 = arith.constant 0 : index
    %c0_138 = arith.constant 0 : index
    %c0_139 = arith.constant 0 : index
    %193 = vector.load %arg8[%c1_136, %c0_137, %c0_138, %c0_139] : memref<3x2x32x16xf32, #tpu.memory_space<vmem>>, vector<1x1x32x16xf32>
    %194 = vector.shape_cast %193 : vector<1x1x32x16xf32> to vector<32x16xf32>
    %cst_140 = arith.constant dense<0.000000e+00> : vector<10x16xf32>
    %195 = tpu.matmul %191, %194, %cst_140 {dimension_numbers = #tpu.dot_dimension_numbers<[1], [0], [0], [1], [0, 0, 1, 1], [], []>} : vector<10x32xf32>, vector<32x16xf32>, vector<10x16xf32> -> vector<10x16xf32>
    %c1_141 = arith.constant 1 : index
    %c0_142 = arith.constant 0 : index
    %c0_143 = arith.constant 0 : index
    %c0_144 = arith.constant 0 : index
    %196 = vector.load %arg9[%c1_141, %c0_142, %c0_143, %c0_144] : memref<3x2x1x16xf32, #tpu.memory_space<vmem>>, vector<1x1x1x16xf32>
    %197 = vector.shape_cast %196 : vector<1x1x1x16xf32> to vector<1x16xf32>
    %198 = vector.broadcast %197 : vector<1x16xf32> to vector<10x16xf32>
    %199 = arith.addf %195, %198 : vector<10x16xf32>
    %c1_145 = arith.constant 1 : index
    %c0_146 = arith.constant 0 : index
    %c0_147 = arith.constant 0 : index
    %c0_148 = arith.constant 0 : index
    %200 = vector.load %arg10[%c1_145, %c0_146, %c0_147, %c0_148] : memref<3x2x32x16xf32, #tpu.memory_space<vmem>>, vector<1x1x32x16xf32>
    %201 = vector.shape_cast %200 : vector<1x1x32x16xf32> to vector<32x16xf32>
    %cst_149 = arith.constant dense<0.000000e+00> : vector<10x16xf32>
    %202 = tpu.matmul %191, %201, %cst_149 {dimension_numbers = #tpu.dot_dimension_numbers<[1], [0], [0], [1], [0, 0, 1, 1], [], []>} : vector<10x32xf32>, vector<32x16xf32>, vector<10x16xf32> -> vector<10x16xf32>
    %c1_150 = arith.constant 1 : index
    %c0_151 = arith.constant 0 : index
    %c0_152 = arith.constant 0 : index
    %c0_153 = arith.constant 0 : index
    %203 = vector.load %arg11[%c1_150, %c0_151, %c0_152, %c0_153] : memref<3x2x1x16xf32, #tpu.memory_space<vmem>>, vector<1x1x1x16xf32>
    %204 = vector.shape_cast %203 : vector<1x1x1x16xf32> to vector<1x16xf32>
    %205 = vector.broadcast %204 : vector<1x16xf32> to vector<10x16xf32>
    %206 = arith.addf %202, %205 : vector<10x16xf32>
    %c1_154 = arith.constant 1 : index
    %c0_155 = arith.constant 0 : index
    %c0_156 = arith.constant 0 : index
    %c0_157 = arith.constant 0 : index
    %207 = vector.load %arg12[%c1_154, %c0_155, %c0_156, %c0_157] : memref<3x2x32x16xf32, #tpu.memory_space<vmem>>, vector<1x1x32x16xf32>
    %208 = vector.shape_cast %207 : vector<1x1x32x16xf32> to vector<32x16xf32>
    %cst_158 = arith.constant dense<0.000000e+00> : vector<10x16xf32>
    %209 = tpu.matmul %191, %208, %cst_158 {dimension_numbers = #tpu.dot_dimension_numbers<[1], [0], [0], [1], [0, 0, 1, 1], [], []>} : vector<10x32xf32>, vector<32x16xf32>, vector<10x16xf32> -> vector<10x16xf32>
    %c1_159 = arith.constant 1 : index
    %c0_160 = arith.constant 0 : index
    %c0_161 = arith.constant 0 : index
    %c0_162 = arith.constant 0 : index
    %210 = vector.load %arg13[%c1_159, %c0_160, %c0_161, %c0_162] : memref<3x2x1x16xf32, #tpu.memory_space<vmem>>, vector<1x1x1x16xf32>
    %211 = vector.shape_cast %210 : vector<1x1x1x16xf32> to vector<1x16xf32>
    %212 = vector.broadcast %211 : vector<1x16xf32> to vector<10x16xf32>
    %213 = arith.addf %209, %212 : vector<10x16xf32>
    %cst_163 = arith.constant dense<0.000000e+00> : vector<10x10xf32>
    %214 = tpu.matmul %199, %206, %cst_163 {dimension_numbers = #tpu.dot_dimension_numbers<[1], [1], [0], [0], [0, 0, 1, 0], [], []>} : vector<10x16xf32>, vector<10x16xf32>, vector<10x10xf32> -> vector<10x10xf32>
    %cst_164 = arith.constant 2.500000e-01 : f32
    %215 = vector.broadcast %cst_164 : f32 to vector<10x10xf32>
    %216 = arith.mulf %214, %215 : vector<10x10xf32>
    %217 = arith.addf %216, %10 : vector<10x10xf32>
    %cst_165 = arith.constant dense<0xFF800000> : vector<10xf32>
    %218 = vector.multi_reduction <maximumf>, %217, %cst_165 [1] : vector<10x10xf32> to vector<10xf32>
    %219 = vector.shape_cast %218 : vector<10xf32> to vector<10x1xf32>
    %220 = vector.broadcast %219 : vector<10x1xf32> to vector<10x10xf32>
    %221 = arith.subf %217, %220 : vector<10x10xf32>
    %222 = math.exp %221 : vector<10x10xf32>
    %cst_166 = arith.constant dense<0.000000e+00> : vector<10xf32>
    %223 = vector.multi_reduction <add>, %222, %cst_166 [1] : vector<10x10xf32> to vector<10xf32>
    %224 = vector.shape_cast %223 : vector<10xf32> to vector<10x1xf32>
    %225 = tpu.reciprocal %224 {approx = true} : vector<10x1xf32> -> vector<10x1xf32>
    %226 = vector.broadcast %225 : vector<10x1xf32> to vector<10x10xf32>
    %227 = arith.mulf %222, %226 : vector<10x10xf32>
    %cst_167 = arith.constant dense<0.000000e+00> : vector<10x16xf32>
    %228 = tpu.matmul %227, %213, %cst_167 {dimension_numbers = #tpu.dot_dimension_numbers<[1], [0], [0], [1], [0, 0, 1, 1], [], []>} : vector<10x10xf32>, vector<10x16xf32>, vector<10x16xf32> -> vector<10x16xf32>
    %c1_168 = arith.constant 1 : index
    %c0_169 = arith.constant 0 : index
    %c0_170 = arith.constant 0 : index
    %c0_171 = arith.constant 0 : index
    %229 = vector.load %arg14[%c1_168, %c0_169, %c0_170, %c0_171] : memref<3x2x16x32xf32, #tpu.memory_space<vmem>>, vector<1x1x16x32xf32>
    %230 = vector.shape_cast %229 : vector<1x1x16x32xf32> to vector<16x32xf32>
    %cst_172 = arith.constant dense<0.000000e+00> : vector<10x32xf32>
    %231 = tpu.matmul %228, %230, %cst_172 {dimension_numbers = #tpu.dot_dimension_numbers<[1], [0], [0], [1], [0, 0, 1, 1], [], []>} : vector<10x16xf32>, vector<16x32xf32>, vector<10x32xf32> -> vector<10x32xf32>
    %232 = arith.addf %192, %231 : vector<10x32xf32>
    %c1_173 = arith.constant 1 : index
    %c1_174 = arith.constant 1 : index
    %c0_175 = arith.constant 0 : index
    %c0_176 = arith.constant 0 : index
    %233 = vector.load %arg8[%c1_173, %c1_174, %c0_175, %c0_176] : memref<3x2x32x16xf32, #tpu.memory_space<vmem>>, vector<1x1x32x16xf32>
    %234 = vector.shape_cast %233 : vector<1x1x32x16xf32> to vector<32x16xf32>
    %cst_177 = arith.constant dense<0.000000e+00> : vector<10x16xf32>
    %235 = tpu.matmul %191, %234, %cst_177 {dimension_numbers = #tpu.dot_dimension_numbers<[1], [0], [0], [1], [0, 0, 1, 1], [], []>} : vector<10x32xf32>, vector<32x16xf32>, vector<10x16xf32> -> vector<10x16xf32>
    %c1_178 = arith.constant 1 : index
    %c1_179 = arith.constant 1 : index
    %c0_180 = arith.constant 0 : index
    %c0_181 = arith.constant 0 : index
    %236 = vector.load %arg9[%c1_178, %c1_179, %c0_180, %c0_181] : memref<3x2x1x16xf32, #tpu.memory_space<vmem>>, vector<1x1x1x16xf32>
    %237 = vector.shape_cast %236 : vector<1x1x1x16xf32> to vector<1x16xf32>
    %238 = vector.broadcast %237 : vector<1x16xf32> to vector<10x16xf32>
    %239 = arith.addf %235, %238 : vector<10x16xf32>
    %c1_182 = arith.constant 1 : index
    %c1_183 = arith.constant 1 : index
    %c0_184 = arith.constant 0 : index
    %c0_185 = arith.constant 0 : index
    %240 = vector.load %arg10[%c1_182, %c1_183, %c0_184, %c0_185] : memref<3x2x32x16xf32, #tpu.memory_space<vmem>>, vector<1x1x32x16xf32>
    %241 = vector.shape_cast %240 : vector<1x1x32x16xf32> to vector<32x16xf32>
    %cst_186 = arith.constant dense<0.000000e+00> : vector<10x16xf32>
    %242 = tpu.matmul %191, %241, %cst_186 {dimension_numbers = #tpu.dot_dimension_numbers<[1], [0], [0], [1], [0, 0, 1, 1], [], []>} : vector<10x32xf32>, vector<32x16xf32>, vector<10x16xf32> -> vector<10x16xf32>
    %c1_187 = arith.constant 1 : index
    %c1_188 = arith.constant 1 : index
    %c0_189 = arith.constant 0 : index
    %c0_190 = arith.constant 0 : index
    %243 = vector.load %arg11[%c1_187, %c1_188, %c0_189, %c0_190] : memref<3x2x1x16xf32, #tpu.memory_space<vmem>>, vector<1x1x1x16xf32>
    %244 = vector.shape_cast %243 : vector<1x1x1x16xf32> to vector<1x16xf32>
    %245 = vector.broadcast %244 : vector<1x16xf32> to vector<10x16xf32>
    %246 = arith.addf %242, %245 : vector<10x16xf32>
    %c1_191 = arith.constant 1 : index
    %c1_192 = arith.constant 1 : index
    %c0_193 = arith.constant 0 : index
    %c0_194 = arith.constant 0 : index
    %247 = vector.load %arg12[%c1_191, %c1_192, %c0_193, %c0_194] : memref<3x2x32x16xf32, #tpu.memory_space<vmem>>, vector<1x1x32x16xf32>
    %248 = vector.shape_cast %247 : vector<1x1x32x16xf32> to vector<32x16xf32>
    %cst_195 = arith.constant dense<0.000000e+00> : vector<10x16xf32>
    %249 = tpu.matmul %191, %248, %cst_195 {dimension_numbers = #tpu.dot_dimension_numbers<[1], [0], [0], [1], [0, 0, 1, 1], [], []>} : vector<10x32xf32>, vector<32x16xf32>, vector<10x16xf32> -> vector<10x16xf32>
    %c1_196 = arith.constant 1 : index
    %c1_197 = arith.constant 1 : index
    %c0_198 = arith.constant 0 : index
    %c0_199 = arith.constant 0 : index
    %250 = vector.load %arg13[%c1_196, %c1_197, %c0_198, %c0_199] : memref<3x2x1x16xf32, #tpu.memory_space<vmem>>, vector<1x1x1x16xf32>
    %251 = vector.shape_cast %250 : vector<1x1x1x16xf32> to vector<1x16xf32>
    %252 = vector.broadcast %251 : vector<1x16xf32> to vector<10x16xf32>
    %253 = arith.addf %249, %252 : vector<10x16xf32>
    %cst_200 = arith.constant dense<0.000000e+00> : vector<10x10xf32>
    %254 = tpu.matmul %239, %246, %cst_200 {dimension_numbers = #tpu.dot_dimension_numbers<[1], [1], [0], [0], [0, 0, 1, 0], [], []>} : vector<10x16xf32>, vector<10x16xf32>, vector<10x10xf32> -> vector<10x10xf32>
    %cst_201 = arith.constant 2.500000e-01 : f32
    %255 = vector.broadcast %cst_201 : f32 to vector<10x10xf32>
    %256 = arith.mulf %254, %255 : vector<10x10xf32>
    %257 = arith.addf %256, %10 : vector<10x10xf32>
    %cst_202 = arith.constant dense<0xFF800000> : vector<10xf32>
    %258 = vector.multi_reduction <maximumf>, %257, %cst_202 [1] : vector<10x10xf32> to vector<10xf32>
    %259 = vector.shape_cast %258 : vector<10xf32> to vector<10x1xf32>
    %260 = vector.broadcast %259 : vector<10x1xf32> to vector<10x10xf32>
    %261 = arith.subf %257, %260 : vector<10x10xf32>
    %262 = math.exp %261 : vector<10x10xf32>
    %cst_203 = arith.constant dense<0.000000e+00> : vector<10xf32>
    %263 = vector.multi_reduction <add>, %262, %cst_203 [1] : vector<10x10xf32> to vector<10xf32>
    %264 = vector.shape_cast %263 : vector<10xf32> to vector<10x1xf32>
    %265 = tpu.reciprocal %264 {approx = true} : vector<10x1xf32> -> vector<10x1xf32>
    %266 = vector.broadcast %265 : vector<10x1xf32> to vector<10x10xf32>
    %267 = arith.mulf %262, %266 : vector<10x10xf32>
    %cst_204 = arith.constant dense<0.000000e+00> : vector<10x16xf32>
    %268 = tpu.matmul %267, %253, %cst_204 {dimension_numbers = #tpu.dot_dimension_numbers<[1], [0], [0], [1], [0, 0, 1, 1], [], []>} : vector<10x10xf32>, vector<10x16xf32>, vector<10x16xf32> -> vector<10x16xf32>
    %c1_205 = arith.constant 1 : index
    %c1_206 = arith.constant 1 : index
    %c0_207 = arith.constant 0 : index
    %c0_208 = arith.constant 0 : index
    %269 = vector.load %arg14[%c1_205, %c1_206, %c0_207, %c0_208] : memref<3x2x16x32xf32, #tpu.memory_space<vmem>>, vector<1x1x16x32xf32>
    %270 = vector.shape_cast %269 : vector<1x1x16x32xf32> to vector<16x32xf32>
    %cst_209 = arith.constant dense<0.000000e+00> : vector<10x32xf32>
    %271 = tpu.matmul %268, %270, %cst_209 {dimension_numbers = #tpu.dot_dimension_numbers<[1], [0], [0], [1], [0, 0, 1, 1], [], []>} : vector<10x16xf32>, vector<16x32xf32>, vector<10x32xf32> -> vector<10x32xf32>
    %272 = arith.addf %232, %271 : vector<10x32xf32>
    %273 = arith.addf %165, %272 : vector<10x32xf32>
    %c1_210 = arith.constant 1 : index
    %c0_211 = arith.constant 0 : index
    %c0_212 = arith.constant 0 : index
    %274 = vector.load %arg15[%c1_210, %c0_211, %c0_212] : memref<3x1x32xf32, #tpu.memory_space<vmem>>, vector<1x1x32xf32>
    %275 = vector.shape_cast %274 : vector<1x1x32xf32> to vector<1x32xf32>
    %276 = vector.broadcast %275 : vector<1x32xf32> to vector<10x32xf32>
    %277 = arith.addf %273, %276 : vector<10x32xf32>
    %c1_213 = arith.constant 1 : index
    %c0_214 = arith.constant 0 : index
    %c0_215 = arith.constant 0 : index
    %278 = vector.load %arg16[%c1_213, %c0_214, %c0_215] : memref<3x1x32xf32, #tpu.memory_space<vmem>>, vector<1x1x32xf32>
    %279 = vector.shape_cast %278 : vector<1x1x32xf32> to vector<1x32xf32>
    %c1_216 = arith.constant 1 : index
    %c0_217 = arith.constant 0 : index
    %c0_218 = arith.constant 0 : index
    %280 = vector.load %arg17[%c1_216, %c0_217, %c0_218] : memref<3x1x32xf32, #tpu.memory_space<vmem>>, vector<1x1x32xf32>
    %281 = vector.shape_cast %280 : vector<1x1x32xf32> to vector<1x32xf32>
    %cst_219 = arith.constant dense<0.000000e+00> : vector<10xf32>
    %282 = vector.multi_reduction <add>, %277, %cst_219 [1] : vector<10x32xf32> to vector<10xf32>
    %283 = vector.shape_cast %282 : vector<10xf32> to vector<10x1xf32>
    %cst_220 = arith.constant 3.200000e+01 : f32
    %284 = vector.broadcast %cst_220 : f32 to vector<10x1xf32>
    %285 = arith.divf %283, %284 : vector<10x1xf32>
    %286 = vector.broadcast %285 : vector<10x1xf32> to vector<10x32xf32>
    %287 = arith.subf %277, %286 : vector<10x32xf32>
    %288 = arith.mulf %287, %287 : vector<10x32xf32>
    %cst_221 = arith.constant dense<0.000000e+00> : vector<10xf32>
    %289 = vector.multi_reduction <add>, %288, %cst_221 [1] : vector<10x32xf32> to vector<10xf32>
    %290 = vector.shape_cast %289 : vector<10xf32> to vector<10x1xf32>
    %cst_222 = arith.constant 3.200000e+01 : f32
    %291 = vector.broadcast %cst_222 : f32 to vector<10x1xf32>
    %292 = arith.divf %290, %291 : vector<10x1xf32>
    %293 = vector.broadcast %285 : vector<10x1xf32> to vector<10x32xf32>
    %294 = arith.subf %277, %293 : vector<10x32xf32>
    %cst_223 = arith.constant 9.99999997E-7 : f32
    %295 = vector.broadcast %cst_223 : f32 to vector<10x1xf32>
    %296 = arith.addf %292, %295 : vector<10x1xf32>
    %297 = math.rsqrt %296 : vector<10x1xf32>
    %298 = vector.broadcast %297 : vector<10x1xf32> to vector<10x32xf32>
    %299 = arith.mulf %294, %298 : vector<10x32xf32>
    %300 = vector.broadcast %279 : vector<1x32xf32> to vector<10x32xf32>
    %301 = arith.mulf %299, %300 : vector<10x32xf32>
    %302 = vector.broadcast %281 : vector<1x32xf32> to vector<10x32xf32>
    %303 = arith.addf %301, %302 : vector<10x32xf32>
    %c1_224 = arith.constant 1 : index
    %c0_225 = arith.constant 0 : index
    %c0_226 = arith.constant 0 : index
    %304 = vector.load %arg18[%c1_224, %c0_225, %c0_226] : memref<3x32x128xf32, #tpu.memory_space<vmem>>, vector<1x32x128xf32>
    %305 = vector.shape_cast %304 : vector<1x32x128xf32> to vector<32x128xf32>
    %cst_227 = arith.constant dense<0.000000e+00> : vector<10x128xf32>
    %306 = tpu.matmul %303, %305, %cst_227 {dimension_numbers = #tpu.dot_dimension_numbers<[1], [0], [0], [1], [0, 0, 1, 1], [], []>} : vector<10x32xf32>, vector<32x128xf32>, vector<10x128xf32> -> vector<10x128xf32>
    %c1_228 = arith.constant 1 : index
    %c0_229 = arith.constant 0 : index
    %c0_230 = arith.constant 0 : index
    %307 = vector.load %arg19[%c1_228, %c0_229, %c0_230] : memref<3x1x128xf32, #tpu.memory_space<vmem>>, vector<1x1x128xf32>
    %308 = vector.shape_cast %307 : vector<1x1x128xf32> to vector<1x128xf32>
    %309 = vector.broadcast %308 : vector<1x128xf32> to vector<10x128xf32>
    %310 = arith.addf %306, %309 : vector<10x128xf32>
    %cst_231 = arith.constant 0.000000e+00 : f32
    %311 = vector.broadcast %cst_231 : f32 to vector<10x128xf32>
    %312 = arith.maximumf %310, %311 : vector<10x128xf32>
    %c1_232 = arith.constant 1 : index
    %c0_233 = arith.constant 0 : index
    %c0_234 = arith.constant 0 : index
    %313 = vector.load %arg20[%c1_232, %c0_233, %c0_234] : memref<3x128x32xf32, #tpu.memory_space<vmem>>, vector<1x128x32xf32>
    %314 = vector.shape_cast %313 : vector<1x128x32xf32> to vector<128x32xf32>
    %cst_235 = arith.constant dense<0.000000e+00> : vector<10x32xf32>
    %315 = tpu.matmul %312, %314, %cst_235 {dimension_numbers = #tpu.dot_dimension_numbers<[1], [0], [0], [1], [0, 0, 1, 1], [], []>} : vector<10x128xf32>, vector<128x32xf32>, vector<10x32xf32> -> vector<10x32xf32>
    %316 = arith.addf %277, %315 : vector<10x32xf32>
    %c1_236 = arith.constant 1 : index
    %c0_237 = arith.constant 0 : index
    %c0_238 = arith.constant 0 : index
    %317 = vector.load %arg21[%c1_236, %c0_237, %c0_238] : memref<3x1x32xf32, #tpu.memory_space<vmem>>, vector<1x1x32xf32>
    %318 = vector.shape_cast %317 : vector<1x1x32xf32> to vector<1x32xf32>
    %319 = vector.broadcast %318 : vector<1x32xf32> to vector<10x32xf32>
    %320 = arith.addf %316, %319 : vector<10x32xf32>
    %c2 = arith.constant 2 : index
    %c0_239 = arith.constant 0 : index
    %c0_240 = arith.constant 0 : index
    %321 = vector.load %arg6[%c2, %c0_239, %c0_240] : memref<3x1x32xf32, #tpu.memory_space<vmem>>, vector<1x1x32xf32>
    %322 = vector.shape_cast %321 : vector<1x1x32xf32> to vector<1x32xf32>
    %c2_241 = arith.constant 2 : index
    %c0_242 = arith.constant 0 : index
    %c0_243 = arith.constant 0 : index
    %323 = vector.load %arg7[%c2_241, %c0_242, %c0_243] : memref<3x1x32xf32, #tpu.memory_space<vmem>>, vector<1x1x32xf32>
    %324 = vector.shape_cast %323 : vector<1x1x32xf32> to vector<1x32xf32>
    %cst_244 = arith.constant dense<0.000000e+00> : vector<10xf32>
    %325 = vector.multi_reduction <add>, %320, %cst_244 [1] : vector<10x32xf32> to vector<10xf32>
    %326 = vector.shape_cast %325 : vector<10xf32> to vector<10x1xf32>
    %cst_245 = arith.constant 3.200000e+01 : f32
    %327 = vector.broadcast %cst_245 : f32 to vector<10x1xf32>
    %328 = arith.divf %326, %327 : vector<10x1xf32>
    %329 = vector.broadcast %328 : vector<10x1xf32> to vector<10x32xf32>
    %330 = arith.subf %320, %329 : vector<10x32xf32>
    %331 = arith.mulf %330, %330 : vector<10x32xf32>
    %cst_246 = arith.constant dense<0.000000e+00> : vector<10xf32>
    %332 = vector.multi_reduction <add>, %331, %cst_246 [1] : vector<10x32xf32> to vector<10xf32>
    %333 = vector.shape_cast %332 : vector<10xf32> to vector<10x1xf32>
    %cst_247 = arith.constant 3.200000e+01 : f32
    %334 = vector.broadcast %cst_247 : f32 to vector<10x1xf32>
    %335 = arith.divf %333, %334 : vector<10x1xf32>
    %336 = vector.broadcast %328 : vector<10x1xf32> to vector<10x32xf32>
    %337 = arith.subf %320, %336 : vector<10x32xf32>
    %cst_248 = arith.constant 9.99999997E-7 : f32
    %338 = vector.broadcast %cst_248 : f32 to vector<10x1xf32>
    %339 = arith.addf %335, %338 : vector<10x1xf32>
    %340 = math.rsqrt %339 : vector<10x1xf32>
    %341 = vector.broadcast %340 : vector<10x1xf32> to vector<10x32xf32>
    %342 = arith.mulf %337, %341 : vector<10x32xf32>
    %343 = vector.broadcast %322 : vector<1x32xf32> to vector<10x32xf32>
    %344 = arith.mulf %342, %343 : vector<10x32xf32>
    %345 = vector.broadcast %324 : vector<1x32xf32> to vector<10x32xf32>
    %346 = arith.addf %344, %345 : vector<10x32xf32>
    %cst_249 = arith.constant 0.000000e+00 : f32
    %347 = vector.broadcast %cst_249 : f32 to vector<10x32xf32>
    %c2_250 = arith.constant 2 : index
    %c0_251 = arith.constant 0 : index
    %c0_252 = arith.constant 0 : index
    %c0_253 = arith.constant 0 : index
    %348 = vector.load %arg8[%c2_250, %c0_251, %c0_252, %c0_253] : memref<3x2x32x16xf32, #tpu.memory_space<vmem>>, vector<1x1x32x16xf32>
    %349 = vector.shape_cast %348 : vector<1x1x32x16xf32> to vector<32x16xf32>
    %cst_254 = arith.constant dense<0.000000e+00> : vector<10x16xf32>
    %350 = tpu.matmul %346, %349, %cst_254 {dimension_numbers = #tpu.dot_dimension_numbers<[1], [0], [0], [1], [0, 0, 1, 1], [], []>} : vector<10x32xf32>, vector<32x16xf32>, vector<10x16xf32> -> vector<10x16xf32>
    %c2_255 = arith.constant 2 : index
    %c0_256 = arith.constant 0 : index
    %c0_257 = arith.constant 0 : index
    %c0_258 = arith.constant 0 : index
    %351 = vector.load %arg9[%c2_255, %c0_256, %c0_257, %c0_258] : memref<3x2x1x16xf32, #tpu.memory_space<vmem>>, vector<1x1x1x16xf32>
    %352 = vector.shape_cast %351 : vector<1x1x1x16xf32> to vector<1x16xf32>
    %353 = vector.broadcast %352 : vector<1x16xf32> to vector<10x16xf32>
    %354 = arith.addf %350, %353 : vector<10x16xf32>
    %c2_259 = arith.constant 2 : index
    %c0_260 = arith.constant 0 : index
    %c0_261 = arith.constant 0 : index
    %c0_262 = arith.constant 0 : index
    %355 = vector.load %arg10[%c2_259, %c0_260, %c0_261, %c0_262] : memref<3x2x32x16xf32, #tpu.memory_space<vmem>>, vector<1x1x32x16xf32>
    %356 = vector.shape_cast %355 : vector<1x1x32x16xf32> to vector<32x16xf32>
    %cst_263 = arith.constant dense<0.000000e+00> : vector<10x16xf32>
    %357 = tpu.matmul %346, %356, %cst_263 {dimension_numbers = #tpu.dot_dimension_numbers<[1], [0], [0], [1], [0, 0, 1, 1], [], []>} : vector<10x32xf32>, vector<32x16xf32>, vector<10x16xf32> -> vector<10x16xf32>
    %c2_264 = arith.constant 2 : index
    %c0_265 = arith.constant 0 : index
    %c0_266 = arith.constant 0 : index
    %c0_267 = arith.constant 0 : index
    %358 = vector.load %arg11[%c2_264, %c0_265, %c0_266, %c0_267] : memref<3x2x1x16xf32, #tpu.memory_space<vmem>>, vector<1x1x1x16xf32>
    %359 = vector.shape_cast %358 : vector<1x1x1x16xf32> to vector<1x16xf32>
    %360 = vector.broadcast %359 : vector<1x16xf32> to vector<10x16xf32>
    %361 = arith.addf %357, %360 : vector<10x16xf32>
    %c2_268 = arith.constant 2 : index
    %c0_269 = arith.constant 0 : index
    %c0_270 = arith.constant 0 : index
    %c0_271 = arith.constant 0 : index
    %362 = vector.load %arg12[%c2_268, %c0_269, %c0_270, %c0_271] : memref<3x2x32x16xf32, #tpu.memory_space<vmem>>, vector<1x1x32x16xf32>
    %363 = vector.shape_cast %362 : vector<1x1x32x16xf32> to vector<32x16xf32>
    %cst_272 = arith.constant dense<0.000000e+00> : vector<10x16xf32>
    %364 = tpu.matmul %346, %363, %cst_272 {dimension_numbers = #tpu.dot_dimension_numbers<[1], [0], [0], [1], [0, 0, 1, 1], [], []>} : vector<10x32xf32>, vector<32x16xf32>, vector<10x16xf32> -> vector<10x16xf32>
    %c2_273 = arith.constant 2 : index
    %c0_274 = arith.constant 0 : index
    %c0_275 = arith.constant 0 : index
    %c0_276 = arith.constant 0 : index
    %365 = vector.load %arg13[%c2_273, %c0_274, %c0_275, %c0_276] : memref<3x2x1x16xf32, #tpu.memory_space<vmem>>, vector<1x1x1x16xf32>
    %366 = vector.shape_cast %365 : vector<1x1x1x16xf32> to vector<1x16xf32>
    %367 = vector.broadcast %366 : vector<1x16xf32> to vector<10x16xf32>
    %368 = arith.addf %364, %367 : vector<10x16xf32>
    %cst_277 = arith.constant dense<0.000000e+00> : vector<10x10xf32>
    %369 = tpu.matmul %354, %361, %cst_277 {dimension_numbers = #tpu.dot_dimension_numbers<[1], [1], [0], [0], [0, 0, 1, 0], [], []>} : vector<10x16xf32>, vector<10x16xf32>, vector<10x10xf32> -> vector<10x10xf32>
    %cst_278 = arith.constant 2.500000e-01 : f32
    %370 = vector.broadcast %cst_278 : f32 to vector<10x10xf32>
    %371 = arith.mulf %369, %370 : vector<10x10xf32>
    %372 = arith.addf %371, %10 : vector<10x10xf32>
    %cst_279 = arith.constant dense<0xFF800000> : vector<10xf32>
    %373 = vector.multi_reduction <maximumf>, %372, %cst_279 [1] : vector<10x10xf32> to vector<10xf32>
    %374 = vector.shape_cast %373 : vector<10xf32> to vector<10x1xf32>
    %375 = vector.broadcast %374 : vector<10x1xf32> to vector<10x10xf32>
    %376 = arith.subf %372, %375 : vector<10x10xf32>
    %377 = math.exp %376 : vector<10x10xf32>
    %cst_280 = arith.constant dense<0.000000e+00> : vector<10xf32>
    %378 = vector.multi_reduction <add>, %377, %cst_280 [1] : vector<10x10xf32> to vector<10xf32>
    %379 = vector.shape_cast %378 : vector<10xf32> to vector<10x1xf32>
    %380 = tpu.reciprocal %379 {approx = true} : vector<10x1xf32> -> vector<10x1xf32>
    %381 = vector.broadcast %380 : vector<10x1xf32> to vector<10x10xf32>
    %382 = arith.mulf %377, %381 : vector<10x10xf32>
    %cst_281 = arith.constant dense<0.000000e+00> : vector<10x16xf32>
    %383 = tpu.matmul %382, %368, %cst_281 {dimension_numbers = #tpu.dot_dimension_numbers<[1], [0], [0], [1], [0, 0, 1, 1], [], []>} : vector<10x10xf32>, vector<10x16xf32>, vector<10x16xf32> -> vector<10x16xf32>
    %c2_282 = arith.constant 2 : index
    %c0_283 = arith.constant 0 : index
    %c0_284 = arith.constant 0 : index
    %c0_285 = arith.constant 0 : index
    %384 = vector.load %arg14[%c2_282, %c0_283, %c0_284, %c0_285] : memref<3x2x16x32xf32, #tpu.memory_space<vmem>>, vector<1x1x16x32xf32>
    %385 = vector.shape_cast %384 : vector<1x1x16x32xf32> to vector<16x32xf32>
    %cst_286 = arith.constant dense<0.000000e+00> : vector<10x32xf32>
    %386 = tpu.matmul %383, %385, %cst_286 {dimension_numbers = #tpu.dot_dimension_numbers<[1], [0], [0], [1], [0, 0, 1, 1], [], []>} : vector<10x16xf32>, vector<16x32xf32>, vector<10x32xf32> -> vector<10x32xf32>
    %387 = arith.addf %347, %386 : vector<10x32xf32>
    %c2_287 = arith.constant 2 : index
    %c1_288 = arith.constant 1 : index
    %c0_289 = arith.constant 0 : index
    %c0_290 = arith.constant 0 : index
    %388 = vector.load %arg8[%c2_287, %c1_288, %c0_289, %c0_290] : memref<3x2x32x16xf32, #tpu.memory_space<vmem>>, vector<1x1x32x16xf32>
    %389 = vector.shape_cast %388 : vector<1x1x32x16xf32> to vector<32x16xf32>
    %cst_291 = arith.constant dense<0.000000e+00> : vector<10x16xf32>
    %390 = tpu.matmul %346, %389, %cst_291 {dimension_numbers = #tpu.dot_dimension_numbers<[1], [0], [0], [1], [0, 0, 1, 1], [], []>} : vector<10x32xf32>, vector<32x16xf32>, vector<10x16xf32> -> vector<10x16xf32>
    %c2_292 = arith.constant 2 : index
    %c1_293 = arith.constant 1 : index
    %c0_294 = arith.constant 0 : index
    %c0_295 = arith.constant 0 : index
    %391 = vector.load %arg9[%c2_292, %c1_293, %c0_294, %c0_295] : memref<3x2x1x16xf32, #tpu.memory_space<vmem>>, vector<1x1x1x16xf32>
    %392 = vector.shape_cast %391 : vector<1x1x1x16xf32> to vector<1x16xf32>
    %393 = vector.broadcast %392 : vector<1x16xf32> to vector<10x16xf32>
    %394 = arith.addf %390, %393 : vector<10x16xf32>
    %c2_296 = arith.constant 2 : index
    %c1_297 = arith.constant 1 : index
    %c0_298 = arith.constant 0 : index
    %c0_299 = arith.constant 0 : index
    %395 = vector.load %arg10[%c2_296, %c1_297, %c0_298, %c0_299] : memref<3x2x32x16xf32, #tpu.memory_space<vmem>>, vector<1x1x32x16xf32>
    %396 = vector.shape_cast %395 : vector<1x1x32x16xf32> to vector<32x16xf32>
    %cst_300 = arith.constant dense<0.000000e+00> : vector<10x16xf32>
    %397 = tpu.matmul %346, %396, %cst_300 {dimension_numbers = #tpu.dot_dimension_numbers<[1], [0], [0], [1], [0, 0, 1, 1], [], []>} : vector<10x32xf32>, vector<32x16xf32>, vector<10x16xf32> -> vector<10x16xf32>
    %c2_301 = arith.constant 2 : index
    %c1_302 = arith.constant 1 : index
    %c0_303 = arith.constant 0 : index
    %c0_304 = arith.constant 0 : index
    %398 = vector.load %arg11[%c2_301, %c1_302, %c0_303, %c0_304] : memref<3x2x1x16xf32, #tpu.memory_space<vmem>>, vector<1x1x1x16xf32>
    %399 = vector.shape_cast %398 : vector<1x1x1x16xf32> to vector<1x16xf32>
    %400 = vector.broadcast %399 : vector<1x16xf32> to vector<10x16xf32>
    %401 = arith.addf %397, %400 : vector<10x16xf32>
    %c2_305 = arith.constant 2 : index
    %c1_306 = arith.constant 1 : index
    %c0_307 = arith.constant 0 : index
    %c0_308 = arith.constant 0 : index
    %402 = vector.load %arg12[%c2_305, %c1_306, %c0_307, %c0_308] : memref<3x2x32x16xf32, #tpu.memory_space<vmem>>, vector<1x1x32x16xf32>
    %403 = vector.shape_cast %402 : vector<1x1x32x16xf32> to vector<32x16xf32>
    %cst_309 = arith.constant dense<0.000000e+00> : vector<10x16xf32>
    %404 = tpu.matmul %346, %403, %cst_309 {dimension_numbers = #tpu.dot_dimension_numbers<[1], [0], [0], [1], [0, 0, 1, 1], [], []>} : vector<10x32xf32>, vector<32x16xf32>, vector<10x16xf32> -> vector<10x16xf32>
    %c2_310 = arith.constant 2 : index
    %c1_311 = arith.constant 1 : index
    %c0_312 = arith.constant 0 : index
    %c0_313 = arith.constant 0 : index
    %405 = vector.load %arg13[%c2_310, %c1_311, %c0_312, %c0_313] : memref<3x2x1x16xf32, #tpu.memory_space<vmem>>, vector<1x1x1x16xf32>
    %406 = vector.shape_cast %405 : vector<1x1x1x16xf32> to vector<1x16xf32>
    %407 = vector.broadcast %406 : vector<1x16xf32> to vector<10x16xf32>
    %408 = arith.addf %404, %407 : vector<10x16xf32>
    %cst_314 = arith.constant dense<0.000000e+00> : vector<10x10xf32>
    %409 = tpu.matmul %394, %401, %cst_314 {dimension_numbers = #tpu.dot_dimension_numbers<[1], [1], [0], [0], [0, 0, 1, 0], [], []>} : vector<10x16xf32>, vector<10x16xf32>, vector<10x10xf32> -> vector<10x10xf32>
    %cst_315 = arith.constant 2.500000e-01 : f32
    %410 = vector.broadcast %cst_315 : f32 to vector<10x10xf32>
    %411 = arith.mulf %409, %410 : vector<10x10xf32>
    %412 = arith.addf %411, %10 : vector<10x10xf32>
    %cst_316 = arith.constant dense<0xFF800000> : vector<10xf32>
    %413 = vector.multi_reduction <maximumf>, %412, %cst_316 [1] : vector<10x10xf32> to vector<10xf32>
    %414 = vector.shape_cast %413 : vector<10xf32> to vector<10x1xf32>
    %415 = vector.broadcast %414 : vector<10x1xf32> to vector<10x10xf32>
    %416 = arith.subf %412, %415 : vector<10x10xf32>
    %417 = math.exp %416 : vector<10x10xf32>
    %cst_317 = arith.constant dense<0.000000e+00> : vector<10xf32>
    %418 = vector.multi_reduction <add>, %417, %cst_317 [1] : vector<10x10xf32> to vector<10xf32>
    %419 = vector.shape_cast %418 : vector<10xf32> to vector<10x1xf32>
    %420 = tpu.reciprocal %419 {approx = true} : vector<10x1xf32> -> vector<10x1xf32>
    %421 = vector.broadcast %420 : vector<10x1xf32> to vector<10x10xf32>
    %422 = arith.mulf %417, %421 : vector<10x10xf32>
    %cst_318 = arith.constant dense<0.000000e+00> : vector<10x16xf32>
    %423 = tpu.matmul %422, %408, %cst_318 {dimension_numbers = #tpu.dot_dimension_numbers<[1], [0], [0], [1], [0, 0, 1, 1], [], []>} : vector<10x10xf32>, vector<10x16xf32>, vector<10x16xf32> -> vector<10x16xf32>
    %c2_319 = arith.constant 2 : index
    %c1_320 = arith.constant 1 : index
    %c0_321 = arith.constant 0 : index
    %c0_322 = arith.constant 0 : index
    %424 = vector.load %arg14[%c2_319, %c1_320, %c0_321, %c0_322] : memref<3x2x16x32xf32, #tpu.memory_space<vmem>>, vector<1x1x16x32xf32>
    %425 = vector.shape_cast %424 : vector<1x1x16x32xf32> to vector<16x32xf32>
    %cst_323 = arith.constant dense<0.000000e+00> : vector<10x32xf32>
    %426 = tpu.matmul %423, %425, %cst_323 {dimension_numbers = #tpu.dot_dimension_numbers<[1], [0], [0], [1], [0, 0, 1, 1], [], []>} : vector<10x16xf32>, vector<16x32xf32>, vector<10x32xf32> -> vector<10x32xf32>
    %427 = arith.addf %387, %426 : vector<10x32xf32>
    %428 = arith.addf %320, %427 : vector<10x32xf32>
    %c2_324 = arith.constant 2 : index
    %c0_325 = arith.constant 0 : index
    %c0_326 = arith.constant 0 : index
    %429 = vector.load %arg15[%c2_324, %c0_325, %c0_326] : memref<3x1x32xf32, #tpu.memory_space<vmem>>, vector<1x1x32xf32>
    %430 = vector.shape_cast %429 : vector<1x1x32xf32> to vector<1x32xf32>
    %431 = vector.broadcast %430 : vector<1x32xf32> to vector<10x32xf32>
    %432 = arith.addf %428, %431 : vector<10x32xf32>
    %c2_327 = arith.constant 2 : index
    %c0_328 = arith.constant 0 : index
    %c0_329 = arith.constant 0 : index
    %433 = vector.load %arg16[%c2_327, %c0_328, %c0_329] : memref<3x1x32xf32, #tpu.memory_space<vmem>>, vector<1x1x32xf32>
    %434 = vector.shape_cast %433 : vector<1x1x32xf32> to vector<1x32xf32>
    %c2_330 = arith.constant 2 : index
    %c0_331 = arith.constant 0 : index
    %c0_332 = arith.constant 0 : index
    %435 = vector.load %arg17[%c2_330, %c0_331, %c0_332] : memref<3x1x32xf32, #tpu.memory_space<vmem>>, vector<1x1x32xf32>
    %436 = vector.shape_cast %435 : vector<1x1x32xf32> to vector<1x32xf32>
    %cst_333 = arith.constant dense<0.000000e+00> : vector<10xf32>
    %437 = vector.multi_reduction <add>, %432, %cst_333 [1] : vector<10x32xf32> to vector<10xf32>
    %438 = vector.shape_cast %437 : vector<10xf32> to vector<10x1xf32>
    %cst_334 = arith.constant 3.200000e+01 : f32
    %439 = vector.broadcast %cst_334 : f32 to vector<10x1xf32>
    %440 = arith.divf %438, %439 : vector<10x1xf32>
    %441 = vector.broadcast %440 : vector<10x1xf32> to vector<10x32xf32>
    %442 = arith.subf %432, %441 : vector<10x32xf32>
    %443 = arith.mulf %442, %442 : vector<10x32xf32>
    %cst_335 = arith.constant dense<0.000000e+00> : vector<10xf32>
    %444 = vector.multi_reduction <add>, %443, %cst_335 [1] : vector<10x32xf32> to vector<10xf32>
    %445 = vector.shape_cast %444 : vector<10xf32> to vector<10x1xf32>
    %cst_336 = arith.constant 3.200000e+01 : f32
    %446 = vector.broadcast %cst_336 : f32 to vector<10x1xf32>
    %447 = arith.divf %445, %446 : vector<10x1xf32>
    %448 = vector.broadcast %440 : vector<10x1xf32> to vector<10x32xf32>
    %449 = arith.subf %432, %448 : vector<10x32xf32>
    %cst_337 = arith.constant 9.99999997E-7 : f32
    %450 = vector.broadcast %cst_337 : f32 to vector<10x1xf32>
    %451 = arith.addf %447, %450 : vector<10x1xf32>
    %452 = math.rsqrt %451 : vector<10x1xf32>
    %453 = vector.broadcast %452 : vector<10x1xf32> to vector<10x32xf32>
    %454 = arith.mulf %449, %453 : vector<10x32xf32>
    %455 = vector.broadcast %434 : vector<1x32xf32> to vector<10x32xf32>
    %456 = arith.mulf %454, %455 : vector<10x32xf32>
    %457 = vector.broadcast %436 : vector<1x32xf32> to vector<10x32xf32>
    %458 = arith.addf %456, %457 : vector<10x32xf32>
    %c2_338 = arith.constant 2 : index
    %c0_339 = arith.constant 0 : index
    %c0_340 = arith.constant 0 : index
    %459 = vector.load %arg18[%c2_338, %c0_339, %c0_340] : memref<3x32x128xf32, #tpu.memory_space<vmem>>, vector<1x32x128xf32>
    %460 = vector.shape_cast %459 : vector<1x32x128xf32> to vector<32x128xf32>
    %cst_341 = arith.constant dense<0.000000e+00> : vector<10x128xf32>
    %461 = tpu.matmul %458, %460, %cst_341 {dimension_numbers = #tpu.dot_dimension_numbers<[1], [0], [0], [1], [0, 0, 1, 1], [], []>} : vector<10x32xf32>, vector<32x128xf32>, vector<10x128xf32> -> vector<10x128xf32>
    %c2_342 = arith.constant 2 : index
    %c0_343 = arith.constant 0 : index
    %c0_344 = arith.constant 0 : index
    %462 = vector.load %arg19[%c2_342, %c0_343, %c0_344] : memref<3x1x128xf32, #tpu.memory_space<vmem>>, vector<1x1x128xf32>
    %463 = vector.shape_cast %462 : vector<1x1x128xf32> to vector<1x128xf32>
    %464 = vector.broadcast %463 : vector<1x128xf32> to vector<10x128xf32>
    %465 = arith.addf %461, %464 : vector<10x128xf32>
    %cst_345 = arith.constant 0.000000e+00 : f32
    %466 = vector.broadcast %cst_345 : f32 to vector<10x128xf32>
    %467 = arith.maximumf %465, %466 : vector<10x128xf32>
    %c2_346 = arith.constant 2 : index
    %c0_347 = arith.constant 0 : index
    %c0_348 = arith.constant 0 : index
    %468 = vector.load %arg20[%c2_346, %c0_347, %c0_348] : memref<3x128x32xf32, #tpu.memory_space<vmem>>, vector<1x128x32xf32>
    %469 = vector.shape_cast %468 : vector<1x128x32xf32> to vector<128x32xf32>
    %cst_349 = arith.constant dense<0.000000e+00> : vector<10x32xf32>
    %470 = tpu.matmul %467, %469, %cst_349 {dimension_numbers = #tpu.dot_dimension_numbers<[1], [0], [0], [1], [0, 0, 1, 1], [], []>} : vector<10x128xf32>, vector<128x32xf32>, vector<10x32xf32> -> vector<10x32xf32>
    %471 = arith.addf %432, %470 : vector<10x32xf32>
    %c2_350 = arith.constant 2 : index
    %c0_351 = arith.constant 0 : index
    %c0_352 = arith.constant 0 : index
    %472 = vector.load %arg21[%c2_350, %c0_351, %c0_352] : memref<3x1x32xf32, #tpu.memory_space<vmem>>, vector<1x1x32xf32>
    %473 = vector.shape_cast %472 : vector<1x1x32xf32> to vector<1x32xf32>
    %474 = vector.broadcast %473 : vector<1x32xf32> to vector<10x32xf32>
    %475 = arith.addf %471, %474 : vector<10x32xf32>
    %c0_353 = arith.constant 0 : index
    %c0_354 = arith.constant 0 : index
    %476 = vector.load %arg22[%c0_353, %c0_354] : memref<1x32xf32, #tpu.memory_space<vmem>>, vector<1x32xf32>
    %c0_355 = arith.constant 0 : index
    %c0_356 = arith.constant 0 : index
    %477 = vector.load %arg23[%c0_355, %c0_356] : memref<1x32xf32, #tpu.memory_space<vmem>>, vector<1x32xf32>
    %cst_357 = arith.constant dense<0.000000e+00> : vector<10xf32>
    %478 = vector.multi_reduction <add>, %475, %cst_357 [1] : vector<10x32xf32> to vector<10xf32>
    %479 = vector.shape_cast %478 : vector<10xf32> to vector<10x1xf32>
    %cst_358 = arith.constant 3.200000e+01 : f32
    %480 = vector.broadcast %cst_358 : f32 to vector<10x1xf32>
    %481 = arith.divf %479, %480 : vector<10x1xf32>
    %482 = vector.broadcast %481 : vector<10x1xf32> to vector<10x32xf32>
    %483 = arith.subf %475, %482 : vector<10x32xf32>
    %484 = arith.mulf %483, %483 : vector<10x32xf32>
    %cst_359 = arith.constant dense<0.000000e+00> : vector<10xf32>
    %485 = vector.multi_reduction <add>, %484, %cst_359 [1] : vector<10x32xf32> to vector<10xf32>
    %486 = vector.shape_cast %485 : vector<10xf32> to vector<10x1xf32>
    %cst_360 = arith.constant 3.200000e+01 : f32
    %487 = vector.broadcast %cst_360 : f32 to vector<10x1xf32>
    %488 = arith.divf %486, %487 : vector<10x1xf32>
    %489 = vector.broadcast %481 : vector<10x1xf32> to vector<10x32xf32>
    %490 = arith.subf %475, %489 : vector<10x32xf32>
    %cst_361 = arith.constant 9.99999997E-7 : f32
    %491 = vector.broadcast %cst_361 : f32 to vector<10x1xf32>
    %492 = arith.addf %488, %491 : vector<10x1xf32>
    %493 = math.rsqrt %492 : vector<10x1xf32>
    %494 = vector.broadcast %493 : vector<10x1xf32> to vector<10x32xf32>
    %495 = arith.mulf %490, %494 : vector<10x32xf32>
    %496 = vector.broadcast %476 : vector<1x32xf32> to vector<10x32xf32>
    %497 = arith.mulf %495, %496 : vector<10x32xf32>
    %498 = vector.broadcast %477 : vector<1x32xf32> to vector<10x32xf32>
    %499 = arith.addf %497, %498 : vector<10x32xf32>
    %c0_362 = arith.constant 0 : index
    %c0_363 = arith.constant 0 : index
    %500 = vector.load %arg24[%c0_362, %c0_363] : memref<32x128xf32, #tpu.memory_space<vmem>>, vector<32x128xf32>
    %cst_364 = arith.constant dense<0.000000e+00> : vector<10x128xf32>
    %501 = tpu.matmul %499, %500, %cst_364 {dimension_numbers = #tpu.dot_dimension_numbers<[1], [0], [0], [1], [0, 0, 1, 1], [], []>} : vector<10x32xf32>, vector<32x128xf32>, vector<10x128xf32> -> vector<10x128xf32>
    %c0_365 = arith.constant 0 : index
    %c0_366 = arith.constant 0 : index
    %502 = vector.load %arg25[%c0_365, %c0_366] : memref<1x128xf32, #tpu.memory_space<vmem>>, vector<1x128xf32>
    %503 = vector.broadcast %502 : vector<1x128xf32> to vector<10x128xf32>
    %504 = arith.addf %501, %503 : vector<10x128xf32>
    %505 = tpu.iota {dimensions = array<i32: 1>} : vector<10x128xi32>
    %c2_i32 = arith.constant 2 : i32
    %506 = vector.broadcast %c2_i32 : i32 to vector<10x128xi32>
    %507 = arith.cmpi slt, %505, %506 : vector<10x128xi32>
    %cst_367 = arith.constant -1.000000e+30 : f32
    %508 = vector.broadcast %cst_367 : f32 to vector<10x128xf32>
    %509 = arith.select %507, %504, %508 : vector<10x128xi1>, vector<10x128xf32>
    %cst_368 = arith.constant dense<0xFF800000> : vector<10xf32>
    %510 = vector.multi_reduction <maximumf>, %509, %cst_368 [1] : vector<10x128xf32> to vector<10xf32>
    %511 = vector.shape_cast %510 : vector<10xf32> to vector<10x1xf32>
    %512 = vector.broadcast %511 : vector<10x1xf32> to vector<10x128xf32>
    %513 = arith.subf %509, %512 : vector<10x128xf32>
    %514 = math.exp %513 : vector<10x128xf32>
    %cst_369 = arith.constant dense<0.000000e+00> : vector<10xf32>
    %515 = vector.multi_reduction <add>, %514, %cst_369 [1] : vector<10x128xf32> to vector<10xf32>
    %516 = vector.shape_cast %515 : vector<10xf32> to vector<10x1xf32>
    %517 = tpu.reciprocal %516 {approx = true} : vector<10x1xf32> -> vector<10x1xf32>
    %518 = vector.broadcast %517 : vector<10x1xf32> to vector<10x128xf32>
    %519 = arith.mulf %514, %518 : vector<10x128xf32>
    %c0_370 = arith.constant 0 : index
    %c0_371 = arith.constant 0 : index
    %520 = vector.load %arg26[%c0_370, %c0_371] : memref<10x128xf32, #tpu.memory_space<vmem>>, vector<10x128xf32>
    tpu.vector_store %arg26[%c0_370, %c0_371], %519 {strides = array<i32>} : memref<10x128xf32, #tpu.memory_space<vmem>>, vector<10x128xf32>,
    return
  }
  func.func @transform_0(%arg0: i32) -> (i32, i32) {
    %c0_i32 = arith.constant 0 : i32
    %c0_i32_0 = arith.constant 0 : i32
    %c0_i32_1 = arith.constant 0 : i32
    return %c0_i32, %c0_i32_0 : i32, i32
  }
  func.func @transform_1(%arg0: i32) -> (i32, i32) {
    %c0_i32 = arith.constant 0 : i32
    %c0_i32_0 = arith.constant 0 : i32
    %c0_i32_1 = arith.constant 0 : i32
    return %c0_i32, %c0_i32_0 : i32, i32
  }
  func.func @transform_2(%arg0: i32) -> (i32, i32) {
    %c0_i32 = arith.constant 0 : i32
    %c0_i32_0 = arith.constant 0 : i32
    %c0_i32_1 = arith.constant 0 : i32
    return %c0_i32, %c0_i32_0 : i32, i32
  }
  func.func @transform_3(%arg0: i32) -> (i32, i32) {
    %c0_i32 = arith.constant 0 : i32
    %c0_i32_0 = arith.constant 0 : i32
    %c0_i32_1 = arith.constant 0 : i32
    return %c0_i32, %c0_i32_0 : i32, i32
  }
  func.func @transform_4(%arg0: i32) -> (i32, i32) {
    %c0_i32 = arith.constant 0 : i32
    %c0_i32_0 = arith.constant 0 : i32
    %c0_i32_1 = arith.constant 0 : i32
    return %c0_i32, %c0_i32_0 : i32, i32
  }
  func.func @transform_5(%arg0: i32) -> (i32, i32, i32) {
    %c0_i32 = arith.constant 0 : i32
    %c0_i32_0 = arith.constant 0 : i32
    %c0_i32_1 = arith.constant 0 : i32
    %c0_i32_2 = arith.constant 0 : i32
    return %c0_i32, %c0_i32_0, %c0_i32_1 : i32, i32, i32
  }
  func.func @transform_6(%arg0: i32) -> (i32, i32, i32) {
    %c0_i32 = arith.constant 0 : i32
    %c0_i32_0 = arith.constant 0 : i32
    %c0_i32_1 = arith.constant 0 : i32
    %c0_i32_2 = arith.constant 0 : i32
    return %c0_i32, %c0_i32_0, %c0_i32_1 : i32, i32, i32
  }
  func.func @transform_7(%arg0: i32) -> (i32, i32, i32, i32) {
    %c0_i32 = arith.constant 0 : i32
    %c0_i32_0 = arith.constant 0 : i32
    %c0_i32_1 = arith.constant 0 : i32
    %c0_i32_2 = arith.constant 0 : i32
    %c0_i32_3 = arith.constant 0 : i32
    return %c0_i32, %c0_i32_0, %c0_i32_1, %c0_i32_2 : i32, i32, i32, i32
  }
  func.func @transform_8(%arg0: i32) -> (i32, i32, i32, i32) {
    %c0_i32 = arith.constant 0 : i32
    %c0_i32_0 = arith.constant 0 : i32
    %c0_i32_1 = arith.constant 0 : i32
    %c0_i32_2 = arith.constant 0 : i32
    %c0_i32_3 = arith.constant 0 : i32
    return %c0_i32, %c0_i32_0, %c0_i32_1, %c0_i32_2 : i32, i32, i32, i32
  }
  func.func @transform_9(%arg0: i32) -> (i32, i32, i32, i32) {
    %c0_i32 = arith.constant 0 : i32
    %c0_i32_0 = arith.constant 0 : i32
    %c0_i32_1 = arith.constant 0 : i32
    %c0_i32_2 = arith.constant 0 : i32
    %c0_i32_3 = arith.constant 0 : i32
    return %c0_i32, %c0_i32_0, %c0_i32_1, %c0_i32_2 : i32, i32, i32, i32
  }
  func.func @transform_10(%arg0: i32) -> (i32, i32, i32, i32) {
    %c0_i32 = arith.constant 0 : i32
    %c0_i32_0 = arith.constant 0 : i32
    %c0_i32_1 = arith.constant 0 : i32
    %c0_i32_2 = arith.constant 0 : i32
    %c0_i32_3 = arith.constant 0 : i32
    return %c0_i32, %c0_i32_0, %c0_i32_1, %c0_i32_2 : i32, i32, i32, i32
  }
  func.func @transform_11(%arg0: i32) -> (i32, i32, i32, i32) {
    %c0_i32 = arith.constant 0 : i32
    %c0_i32_0 = arith.constant 0 : i32
    %c0_i32_1 = arith.constant 0 : i32
    %c0_i32_2 = arith.constant 0 : i32
    %c0_i32_3 = arith.constant 0 : i32
    return %c0_i32, %c0_i32_0, %c0_i32_1, %c0_i32_2 : i32, i32, i32, i32
  }
  func.func @transform_12(%arg0: i32) -> (i32, i32, i32, i32) {
    %c0_i32 = arith.constant 0 : i32
    %c0_i32_0 = arith.constant 0 : i32
    %c0_i32_1 = arith.constant 0 : i32
    %c0_i32_2 = arith.constant 0 : i32
    %c0_i32_3 = arith.constant 0 : i32
    return %c0_i32, %c0_i32_0, %c0_i32_1, %c0_i32_2 : i32, i32, i32, i32
  }
  func.func @transform_13(%arg0: i32) -> (i32, i32, i32, i32) {
    %c0_i32 = arith.constant 0 : i32
    %c0_i32_0 = arith.constant 0 : i32
    %c0_i32_1 = arith.constant 0 : i32
    %c0_i32_2 = arith.constant 0 : i32
    %c0_i32_3 = arith.constant 0 : i32
    return %c0_i32, %c0_i32_0, %c0_i32_1, %c0_i32_2 : i32, i32, i32, i32
  }
  func.func @transform_14(%arg0: i32) -> (i32, i32, i32) {
    %c0_i32 = arith.constant 0 : i32
    %c0_i32_0 = arith.constant 0 : i32
    %c0_i32_1 = arith.constant 0 : i32
    %c0_i32_2 = arith.constant 0 : i32
    return %c0_i32, %c0_i32_0, %c0_i32_1 : i32, i32, i32
  }
  func.func @transform_15(%arg0: i32) -> (i32, i32, i32) {
    %c0_i32 = arith.constant 0 : i32
    %c0_i32_0 = arith.constant 0 : i32
    %c0_i32_1 = arith.constant 0 : i32
    %c0_i32_2 = arith.constant 0 : i32
    return %c0_i32, %c0_i32_0, %c0_i32_1 : i32, i32, i32
  }
  func.func @transform_16(%arg0: i32) -> (i32, i32, i32) {
    %c0_i32 = arith.constant 0 : i32
    %c0_i32_0 = arith.constant 0 : i32
    %c0_i32_1 = arith.constant 0 : i32
    %c0_i32_2 = arith.constant 0 : i32
    return %c0_i32, %c0_i32_0, %c0_i32_1 : i32, i32, i32
  }
  func.func @transform_17(%arg0: i32) -> (i32, i32, i32) {
    %c0_i32 = arith.constant 0 : i32
    %c0_i32_0 = arith.constant 0 : i32
    %c0_i32_1 = arith.constant 0 : i32
    %c0_i32_2 = arith.constant 0 : i32
    return %c0_i32, %c0_i32_0, %c0_i32_1 : i32, i32, i32
  }
  func.func @transform_18(%arg0: i32) -> (i32, i32, i32) {
    %c0_i32 = arith.constant 0 : i32
    %c0_i32_0 = arith.constant 0 : i32
    %c0_i32_1 = arith.constant 0 : i32
    %c0_i32_2 = arith.constant 0 : i32
    return %c0_i32, %c0_i32_0, %c0_i32_1 : i32, i32, i32
  }
  func.func @transform_19(%arg0: i32) -> (i32, i32, i32) {
    %c0_i32 = arith.constant 0 : i32
    %c0_i32_0 = arith.constant 0 : i32
    %c0_i32_1 = arith.constant 0 : i32
    %c0_i32_2 = arith.constant 0 : i32
    return %c0_i32, %c0_i32_0, %c0_i32_1 : i32, i32, i32
  }
  func.func @transform_20(%arg0: i32) -> (i32, i32, i32) {
    %c0_i32 = arith.constant 0 : i32
    %c0_i32_0 = arith.constant 0 : i32
    %c0_i32_1 = arith.constant 0 : i32
    %c0_i32_2 = arith.constant 0 : i32
    return %c0_i32, %c0_i32_0, %c0_i32_1 : i32, i32, i32
  }
  func.func @transform_21(%arg0: i32) -> (i32, i32) {
    %c0_i32 = arith.constant 0 : i32
    %c0_i32_0 = arith.constant 0 : i32
    %c0_i32_1 = arith.constant 0 : i32
    return %c0_i32, %c0_i32_0 : i32, i32
  }
  func.func @transform_22(%arg0: i32) -> (i32, i32) {
    %c0_i32 = arith.constant 0 : i32
    %c0_i32_0 = arith.constant 0 : i32
    %c0_i32_1 = arith.constant 0 : i32
    return %c0_i32, %c0_i32_0 : i32, i32
  }
  func.func @transform_23(%arg0: i32) -> (i32, i32) {
    %c0_i32 = arith.constant 0 : i32
    %c0_i32_0 = arith.constant 0 : i32
    %c0_i32_1 = arith.constant 0 : i32
    return %c0_i32, %c0_i32_0 : i32, i32
  }
  func.func @transform_24(%arg0: i32) -> (i32, i32) {
    %c0_i32 = arith.constant 0 : i32
    %c0_i32_0 = arith.constant 0 : i32
    %c0_i32_1 = arith.constant 0 : i32
    return %c0_i32, %c0_i32_0 : i32, i32
  }
  func.func @transform_25(%arg0: i32) -> (i32, i32) {
    %c0_i32 = arith.constant 0 : i32
    %c0_i32_0 = arith.constant 0 : i32
    %c0_i32_1 = arith.constant 0 : i32
    return %c0_i32, %c0_i32_0 : i32, i32
  }
}

</mosaic_0001>

<bundles_post_ra>
// kernel: tile.14
= control target key start
LH: loop header
LB: loop body
LE: loop exit
PB: predicated region body
PF: predicated region fallthrough
CT: control target
= control target key end

     0   :  { %vm3_vm0 = vcmask 261120   ;;  %s148_s0 = inlined_call_operand.vmem [shape: f32[10,5,32], index: 0, kind: input, shape index: {}]   ;;  %s149_s1 = inlined_call_operand.vmem [shape: f32[50,32], index: 1, kind: output, shape index: {}]  }
   0x1   :  { %v2_v0 = vld [vmem:[%s148_s0] sm:$0x1f]   ;;  %v50_v1 = vld [vmem:[%s148_s0 + $0x8] sm:$0x1f]   ;;  %v52_v2 = vld [vmem:[%s148_s0 + $0x10] sm:$0x1f]  }
   0x2   :  { %4 = vst.msk [vmem:[%s149_s1] sm:$0x1f] %vm3_vm0, %v2_v0   ;;  %51 = vst.msk [vmem:[%s149_s1 + $0x5] sm:$0x1f] %vm3_vm0, %v50_v1   ;;  %v54_v3 = vld [vmem:[%s148_s0 + $0x18] sm:$0x1f]  }
   0x3   :  { %53 = vst.msk [vmem:[%s149_s1 + $0xa] sm:$0x1f] %vm3_vm0, %v52_v2   ;;  %v56_v4 = vld [vmem:[%s148_s0 + $0x20] sm:$0x1f]   ;;  %v58_v5 = vld [vmem:[%s148_s0 + $0x28] sm:$0x1f]  }
   0x4   :  { %55 = vst.msk [vmem:[%s149_s1 + $0xf] sm:$0x1f] %vm3_vm0, %v54_v3   ;;  %57 = vst.msk [vmem:[%s149_s1 + $0x14] sm:$0x1f] %vm3_vm0, %v56_v4   ;;  %v60_v6 = vld [vmem:[%s148_s0 + $0x30] sm:$0x1f]  }
   0x5   :  { %59 = vst.msk [vmem:[%s149_s1 + $0x19] sm:$0x1f] %vm3_vm0, %v58_v5   ;;  %v62_v7 = vld [vmem:[%s148_s0 + $0x38] sm:$0x1f]   ;;  %v64_v8 = vld [vmem:[%s148_s0 + $0x40] sm:$0x1f]  }
   0x6   :  { %61 = vst.msk [vmem:[%s149_s1 + $0x1e] sm:$0x1f] %vm3_vm0, %v60_v6   ;;  %63 = vst.msk [vmem:[%s149_s1 + $0x23] sm:$0x1f] %vm3_vm0, %v62_v7   ;;  %v66_v9 = vld [vmem:[%s148_s0 + $0x48] sm:$0x1f]  }
   0x7   :  { %65 = vst.msk [vmem:[%s149_s1 + $0x28] sm:$0x1f] %vm3_vm0, %v64_v8   ;;  %67 = vst.msk [vmem:[%s149_s1 + $0x2d] sm:$0x1f] %vm3_vm0, %v66_v9  }

// kernel: tile.19
= control target key start
LH: loop header
LB: loop body
LE: loop exit
PB: predicated region body
PF: predicated region fallthrough
CT: control target
= control target key end

     0   :  { %vm3_vm0 = vcmask 261120   ;;  %s34_s0 = inlined_call_operand.vmem [shape: f32[2,5,32], index: 0, kind: input, shape index: {}]   ;;  %s35_s1 = inlined_call_operand.vmem [shape: f32[10,32], index: 1, kind: output, shape index: {}]  }
   0x1   :  { %v2_v0 = vld [vmem:[%s34_s0] sm:$0x1f]   ;;  %v10_v1 = vld [vmem:[%s34_s0 + $0x8] sm:$0x1f]  }
   0x2   :  { %4 = vst.msk [vmem:[%s35_s1] sm:$0x1f] %vm3_vm0, %v2_v0   ;;  %11 = vst.msk [vmem:[%s35_s1 + $0x5] sm:$0x1f] %vm3_vm0, %v10_v1  }

// kernel: _lambda_.4
= control target key start
LH: loop header
LB: loop body
LE: loop exit
PB: predicated region body
PF: predicated region fallthrough
CT: control target
= control target key end

     0   :  { %vm9_vm0 = vcmask 74752   ;;  %s66_s0 = inlined_call_operand.vmem [shape: f32[2,10], index: 0, kind: input, shape index: {}]   ;;  %s67_s1 = inlined_call_operand.vmem [shape: f32[2,10], index: 1, kind: output, shape index: {}]  }
   0x1   :  { %v8_v0 = vld [vmem:[%s66_s0] sm:$0x3] }
   0x2   :  { %v10_v1 = vsel %vm9_vm0, %v8_v0, 0.0 }
   0x3   :  { %v11_v2 = vrot.slane %v10_v1, 4 }
   0x5   :  { %v12_v3 = vadd.f32 %v11_v2, %v10_v1 }
   0x7   :  { %v13_v4 = vrot.slane %v12_v3, 2 }
   0x9   :  { %v14_v5 = vadd.f32 %v13_v4, %v12_v3 }
   0xb   :  { %v15_v6 = vrot.slane %v14_v5, 1 }
   0xd   :  { %v16_v7 = vadd.f32 %v15_v6, %v14_v5 }
   0xf   :  { %v18_v8 = vmul.f32 0.5, %v16_v7 }
  0x11   :  { %v19_v9 = vsub.f32 %v8_v0, %v18_v8 }
  0x13   :  { %v20_v10 = vmul.f32 %v19_v9, %v19_v9 }
  0x15   :  { %v21_v11 = vsel %vm9_vm0, %v20_v10, 0.0 }
  0x16   :  { %v22_v12 = vrot.slane %v21_v11, 4 }
  0x18   :  { %v23_v13 = vadd.f32 %v22_v12, %v21_v11 }
  0x1a   :  { %v24_v14 = vrot.slane %v23_v13, 2 }
  0x1c   :  { %v25_v15 = vadd.f32 %v24_v14, %v23_v13 }
  0x1e   :  { %v26_v16 = vrot.slane %v25_v15, 1 }
  0x20   :  { %v27_v17 = vadd.f32 %v26_v16, %v25_v15 }
  0x22   :  { %43 = vrsqrt.f32 %v27_v17  ;;  %vm30_vm1 = vcmp.eq.f32.partialorder %v27_v17, inf  ;;  %v33_v19 = vand.u32 2147483648, %v27_v17  ;;  %vm32_vm2 = vcmp.eq.f32.partialorder %v27_v17, 0.0 }
  0x2c   :  { %v44_v18 = vpop.eup %43 }
  0x2d   :  { %v29_v20 = vmul.f32 %v44_v18, %v27_v17 }
  0x2f   :  { %v31_v21 = vsel %vm30_vm1, %v27_v17, %v29_v20 }
  0x30   :  { %v34_v22 = vsel %vm32_vm2, %v33_v19, %v31_v21 }
  0x31   :  { %v35_v23 = vadd.f32 1e-08, %v34_v22 }
  0x33   :  { %45 = vrcp.f32 %v35_v23 }
  0x3d   :  { %v46_v24 = vpop.eup %45 }
  0x3e   :  { %v37_v25 = vmul.f32 %v46_v24, %v19_v9 }
  0x40   :  { %38 = vst.msk [vmem:[%s67_s1] sm:$0x3] %vm9_vm0, %v37_v25 }

// kernel: _lambda_.3
= control target key start
LH: loop header
LB: loop body
LE: loop exit
PB: predicated region body
PF: predicated region fallthrough
CT: control target
= control target key end

     0   :  { %vm117_vm0 = vcmask 1043456   ;;  %vm95_vm1 = vcmask 31744   ;;  %v6986_v0 = vmov 0.0   ;;  %vm6987_vm2 = vmmov 0   ;;  %s9172_s3 = inlined_call_operand.vmem [shape: f32[4,32], index: 3, kind: input, shape index: {}]   ;;  %s9173_s0 = inlined_call_operand.vmem [shape: f32[50,4], index: 0, kind: input, shape index: {}]   ;;  %s9174_s4 = inlined_call_operand.vmem [shape: f32[1,32], index: 4, kind: input, shape index: {}]   ;;  %s9175_s1 = inlined_call_operand.vmem [shape: f32[50,32], index: 1, kind: input, shape index: {}]   ;;  %s9176_s9 = inlined_call_operand.vmem [shape: f32[2,2,32,16], index: 9, kind: input, shape index: {}]   ;;  %s9177_s7 = inlined_call_operand.vmem [shape: f32[2,2,32,16], index: 7, kind: input, shape index: {}]   ;;  %s9178_s5 = inlined_call_operand.vmem [shape: f32[2,1,32], index: 5, kind: input, shape index: {}]   ;;  %s9179_s6 = inlined_call_operand.vmem [shape: f32[2,1,32], index: 6, kind: input, shape index: {}]   ;;  %s9180_s11 = inlined_call_operand.vmem [shape: f32[2,2,32,16], index: 11, kind: input, shape index: {}]   ;;  %s9181_s10 = inlined_call_operand.vmem [shape: f32[2,2,1,16], index: 10, kind: input, shape index: {}]   ;;  %s9182_s12 = inlined_call_operand.vmem [shape: f32[2,2,1,16], index: 12, kind: input, shape index: {}]   ;;  %s9183_s8 = inlined_call_operand.vmem [shape: f32[2,2,1,16], index: 8, kind: input, shape index: {}]   ;;  %s9184_s2 = inlined_call_operand.vmem [shape: f32[50,50], index: 2, kind: input, shape index: {}]   ;;  %s9185_s13 = inlined_call_operand.vmem [shape: f32[2,2,16,32], index: 13, kind: input, shape index: {}]   ;;  %s9186_s14 = inlined_call_operand.vmem [shape: f32[2,1,32], index: 14, kind: input, shape index: {}]   ;;  %s9187_s17 = inlined_call_operand.vmem [shape: f32[2,32,128], index: 17, kind: input, shape index: {}]   ;;  %s9188_s19 = inlined_call_operand.vmem [shape: f32[2,128,32], index: 19, kind: input, shape index: {}]   ;;  %s9189_s15 = inlined_call_operand.vmem [shape: f32[2,1,32], index: 15, kind: input, shape index: {}]   ;;  %s9190_s16 = inlined_call_operand.vmem [shape: f32[2,1,32], index: 16, kind: input, shape index: {}]   ;;  %s9191_s18 = inlined_call_operand.vmem [shape: f32[2,1,128], index: 18, kind: input, shape index: {}]   ;;  %s9192_s20 = inlined_call_operand.vmem [shape: f32[2,1,32], index: 20, kind: input, shape index: {}]   ;;  %s9193_s23 = inlined_call_operand.vmem [shape: f32[32,128], index: 23, kind: input, shape index: {}]   ;;  %s9194_s21 = inlined_call_operand.vmem [shape: f32[1,32], index: 21, kind: input, shape index: {}]   ;;  %s9195_s22 = inlined_call_operand.vmem [shape: f32[1,32], index: 22, kind: input, shape index: {}]   ;;  %s9196_s24 = inlined_call_operand.vmem [shape: f32[1,128], index: 24, kind: input, shape index: {}]   ;;  %s9197_s25 = inlined_call_operand.vmem [shape: f32[50,128], index: 25, kind: output, shape index: {}]  }
   0x1   :  { %9207 = sst [smem:[#allocation2_spill]] %s9172_s3  ;;  %5616 = vmatprep.subr.mxu0 %v6986_v0  ;;  %5618 = vmatprep.mubr.msk.f32.mxu0 %vm6987_vm2, %v6986_v0  ;;  %vm251_vm3 = vcmask 261120   ;;  %vm270_vm4 = vcmask 254976   ;;  %v6988_v59 = vmov 0.0|0.0   ;;  %vm725_vm5 = vcmask 130048  }
   0x2   :  { %9208 = sst [smem:[#allocation3_spill]] %s9173_s0  ;;  %5647 = vmatprep.mubr.msk.f32.mxu1 %vm6987_vm2, %v6986_v0  ;;  %6560 = vmatprep.subr.bf16.mxu1 %v6988_v59  ;;  %vm7443_vm6 = vmpackc.low %vm725_vm5, %vm725_vm5  ;;  %vm982_vm7 = vcmask 1041408   ;;  %vm882_vm8 = vcmask 408576   ;;  %vm901_vm9 = vcmask 402432  }
   0x3   :  { %9209 = sst [smem:[#allocation4_spill]] %s9174_s4 }
   0x4   :  { %9210 = sst [smem:[#allocation5_spill]] %s9175_s1  ;;  %s9219_s1 = sld [smem:[#allocation3_spill]] }
   0x5   :  { %9211 = sst [smem:[#allocation6_spill]] %s9176_s9  ;;  %s9220_s26 = sld [smem:[#allocation4_spill]] }
   0x6   :  { %9212 = sst [smem:[#allocation7_spill]] %s9177_s7  ;;  %s9221_s27 = sld [smem:[#allocation5_spill]] }
   0x7   :  { %9213 = sst [smem:[#allocation8_spill]] %s9178_s5  ;;  %s9218_s5 = sld [smem:[#allocation2_spill]] }
   0x8   :  { %9214 = sst [smem:[#allocation9_spill]] %s9179_s6  ;;  %s9223_s7 = sld [smem:[#allocation7_spill]] }
   0x9   :  { %9215 = sst [smem:[#allocation10_spill]] %s9180_s11  ;;  %s9225_s4 = sld [smem:[#allocation9_spill]] }
   0xa   :  { %9216 = sst [smem:[#allocation11_spill]] %s9181_s10  ;;  %v80_v2 = vld [vmem:[%s9219_s1] sm:$0xff]  ;;  %v81_v3 = vld [vmem:[%s9219_s1 + $0x8] sm:$0xff]  ;;  %v82_v4 = vld [vmem:[%s9219_s1 + $0x10] sm:$0xff]  ;;  %s9224_s10 = sld [smem:[#allocation8_spill]] }
   0xb   :  { %9217 = sst [smem:[#allocation12_spill]] %s9197_s25  ;;  %v83_v5 = vld [vmem:[%s9219_s1 + $0x18] sm:$0xff]  ;;  %v84_v6 = vld [vmem:[%s9219_s1 + $0x20] sm:$0xff]  ;;  %v85_v7 = vld [vmem:[%s9219_s1 + $0x28] sm:$0xff]  ;;  %s9226_s6 = sld [smem:[#allocation10_spill]] }
   0xc   :  { %v86_v8 = vld [vmem:[%s9219_s1 + $0x30] sm:$0x3]  ;;  %v4912_v9 = vld [vmem:[%s9220_s26] ss:$0 sm:$0xff]  ;;  %v229_v19 = vld [vmem:[%s9221_s27 + $0x8] sm:$0xff]  ;;  %s9222_s1 = sld [smem:[#allocation6_spill]] }
   0xd   :  { %v87_v1 = vld [vmem:[%s9218_s5] sm:$0xf]  ;;  %v230_v26 = vld [vmem:[%s9221_s27 + $0x10] sm:$0xff]  ;;  %v231_v33 = vld [vmem:[%s9221_s27 + $0x18] sm:$0xff]  ;;  %s9227_s5 = sld [smem:[#allocation11_spill]] }
   0xe   :  { %5617 = vmatpush3.msk.msra.mxu0 %vm117_vm0, %v87_v1  ;;  %v228_v13 = vld [vmem:[%s9221_s27] sm:$0xff]  ;;  %v233_v47 = vld [vmem:[%s9221_s27 + $0x28] sm:$0xff]  ;;  %v234_v54 = vld [vmem:[%s9221_s27 + $0x30] sm:$0x3] }
   0xf   :  { %5619 = vmatmul.mubr.msk.f32.vlgmr.msra.gmra.mrb[0].mxu0 %vm95_vm1, %v80_v2  ;;  %v232_v40 = vld [vmem:[%s9221_s27 + $0x20] sm:$0xff]  ;;  %6566 = vmatprep.subr.bf16.mxu0 %v6988_v59  ;;  %s9230_s27 = sld [smem:[#allocation12_spill]] }
  0x10   :  { %5621 = vmatprep.mubr.msk.f32.mxu0 %vm6987_vm2, %v6986_v0 }
  0x12   :  { %v503_v60 = vld [vmem:[%s9222_s1] sm:$0xff]  ;;  %v504_v61 = vld [vmem:[%s9222_s1 + $0x8] sm:$0xff] }
  0x13   :  { %5622 = vmatmul.mubr.msk.f32.gmra.mrb[2].mxu0 %vm95_vm1, %v81_v3  ;;  %v6567_v62 = vpack.c.bf16 %v504_v61, %v503_v60 }
  0x14   :  { %5624 = vmatprep.mubr.msk.f32.mxu0 %vm6987_vm2, %v6986_v0 }
  0x15   :  { %6568 = vmatpush3.bf16.msra.mxu0 %v6567_v62 }
  0x16   :  { %6569 = vmatprep.subr.bf16.mxu0 %v6988_v59 }
  0x17   :  { %5625 = vmatmul.mubr.msk.f32.gmra.mrb[4].mxu0 %vm95_vm1, %v82_v4 }
  0x18   :  { %5627 = vmatprep.mubr.msk.f32.mxu0 %vm6987_vm2, %v6986_v0 }
  0x1b   :  { %5628 = vmatmul.mubr.msk.f32.gmra.mrb[6].mxu0 %vm95_vm1, %v83_v5 }
  0x1c   :  { %5630 = vmatprep.mubr.msk.f32.mxu0 %vm6987_vm2, %v6986_v0 }
  0x1f   :  { %5631 = vmatmul.mubr.msk.f32.gmra.mrb[8].mxu0 %vm95_vm1, %v84_v6 }
  0x20   :  { %5633 = vmatprep.mubr.msk.f32.mxu0 %vm6987_vm2, %v6986_v0 }
  0x23   :  { %5634 = vmatmul.mubr.msk.f32.gmra.mrb[10].mxu0 %vm95_vm1, %v85_v7 }
  0x24   :  { %5636 = vmatprep.mubr.msk.f32.mxu0 %vm6987_vm2, %v6986_v0 }
  0x27   :  { %5637 = vmatmul.mubr.msk.f32.gmra.mrb[12].mxu0 %vm95_vm1, %v86_v8 }
  0x28   :  { %5676 = vmatprep.mubr.msk.f32.mxu0 %vm6987_vm2, %v6986_v0 }
  0xe2   :  { %v187_v10 = vpop.f32.mrb[0].mxu0 }
  0xe3   :  { %v188_v11 = vadd.f32 %v4912_v9, %v187_v10  ;;  %v5620_v12 = vpop.f32.mrb[1].mxu0 }
  0xe5   :  { %v221_v14 = vmul.f32 5.656854, %v188_v11 }
  0xe6   :  { %v192_v15 = vpop.f32.mrb[2].mxu0 }
  0xe7   :  { %v7175_v16 = vadd.f32 %v228_v13, %v221_v14  ;;  %v193_v17 = vadd.f32 %v4912_v9, %v192_v15  ;;  %v5623_v18 = vpop.f32.mrb[3].mxu0 }
  0xe9   :  { %v222_v20 = vmul.f32 5.656854, %v193_v17  ;;  %v252_v21 = vsel %vm251_vm3, %v7175_v16, 0.0 }
  0xea   :  { %253 = vadd.xlane.f32.xlu0 %v252_v21  ;;  %v197_v22 = vpop.f32.mrb[4].mxu0 }
  0xeb   :  { %v7182_v23 = vadd.f32 %v229_v19, %v222_v20  ;;  %v198_v24 = vadd.f32 %v4912_v9, %v197_v22  ;;  %v5626_v25 = vpop.f32.mrb[5].mxu0 }
  0xed   :  { %v223_v27 = vmul.f32 5.656854, %v198_v24  ;;  %v255_v28 = vsel %vm251_vm3, %v7182_v23, 0.0 }
  0xee   :  { %256 = vadd.xlane.f32.xlu0 %v255_v28  ;;  %v202_v29 = vpop.f32.mrb[6].mxu0 }
  0xef   :  { %v7189_v30 = vadd.f32 %v230_v26, %v223_v27  ;;  %v203_v31 = vadd.f32 %v4912_v9, %v202_v29  ;;  %v5629_v32 = vpop.f32.mrb[7].mxu0 }
  0xf1   :  { %v224_v34 = vmul.f32 5.656854, %v203_v31  ;;  %v258_v35 = vsel %vm251_vm3, %v7189_v30, 0.0 }
  0xf2   :  { %259 = vadd.xlane.f32.xlu1 %v258_v35  ;;  %v207_v36 = vpop.f32.mrb[8].mxu0 }
  0xf3   :  { %v7196_v37 = vadd.f32 %v231_v33, %v224_v34  ;;  %v208_v38 = vadd.f32 %v4912_v9, %v207_v36  ;;  %v5632_v39 = vpop.f32.mrb[9].mxu0 }
  0xf4   :  { %v371_v39 = vld [vmem:[%s9223_s7] sm:$0xff] }
  0xf5   :  { %v225_v41 = vmul.f32 5.656854, %v208_v38  ;;  %v261_v42 = vsel %vm251_vm3, %v7196_v37, 0.0 }
  0xf6   :  { %262 = vadd.xlane.f32.xlu1 %v261_v42  ;;  %v212_v43 = vpop.f32.mrb[10].mxu0  ;;  %v505_v42 = vld [vmem:[%s9222_s1 + $0x10] sm:$0xff] }
  0xf7   :  { %v7203_v44 = vadd.f32 %v232_v40, %v225_v41  ;;  %v213_v45 = vadd.f32 %v4912_v9, %v212_v43  ;;  %v5635_v46 = vpop.f32.mrb[11].mxu0  ;;  %v372_v40 = vld [vmem:[%s9223_s7 + $0x8] sm:$0xff]  ;;  %v506_v43 = vld [vmem:[%s9222_s1 + $0x18] sm:$0xff] }
  0xf8   :  { %v6561_v41 = vpack.c.bf16 %v372_v40, %v371_v39  ;;  %v6570_v46 = vpack.c.bf16 %v506_v43, %v505_v42 }
  0xf9   :  { %v226_v48 = vmul.f32 5.656854, %v213_v45  ;;  %v264_v49 = vsel %vm251_vm3, %v7203_v44, 0.0  ;;  %v373_v45 = vld [vmem:[%s9223_s7 + $0x10] sm:$0xff] }
  0xfa   :  { %265 = vadd.xlane.f32.xlu0 %v264_v49  ;;  %v217_v50 = vpop.f32.mrb[12].mxu0  ;;  %6562 = vmatpush3.bf16.msra.mxu1 %v6561_v41 }
  0xfb   :  { %v7210_v51 = vadd.f32 %v233_v47, %v226_v48  ;;  %v218_v52 = vadd.f32 %v4912_v9, %v217_v50  ;;  %v5638_v53 = vpop.f32.mrb[13].mxu0  ;;  %6563 = vmatprep.subr.bf16.mxu1 %v6988_v59  ;;  %v374_v47 = vld [vmem:[%s9223_s7 + $0x18] sm:$0xff]  ;;  %6571 = vmatpush3.bf16.msra.mxu0 %v6570_v46 }
  0xfc   :  { %v6564_v48 = vpack.c.bf16 %v374_v47, %v373_v45  ;;  %6578 = vmatprep.subr.bf16.mxu0 %v6988_v59 }
  0xfd   :  { %v227_v55 = vmul.f32 5.656854, %v218_v52  ;;  %v267_v56 = vsel %vm251_vm3, %v7210_v51, 0.0 }
  0xfe   :  { %268 = vadd.xlane.f32.xlu1 %v267_v56  ;;  %6565 = vmatpush3.bf16.msra.mxu1 %v6564_v48 }
  0xff   :  { %v7217_v57 = vadd.f32 %v234_v54, %v227_v55  ;;  %6572 = vmatprep.subr.bf16.mxu1 %v6988_v59 }
 0x101   :  { %v271_v58 = vsel %vm270_vm4, %v7217_v57, 0.0 }
 0x102   :  { %272 = vadd.xlane.f32.xlu0 %v271_v58 }
 0x177   :  { %v254_v63 = vpop.xlane.xlu0 %253 }
 0x178   :  { %v275_v1 = vmul.f32 0.03125, %v254_v63 }
 0x17a   :  { %v7231_v2 = vsub.f32 %v7175_v16, %v275_v1  ;;  %v7296_v1 = vld [vmem:[%s9224_s10] ss:$0 sm:$0xff] }
 0x17b   :  { %v257_v3 = vpop.xlane.xlu0 %256 }
 0x17c   :  { %v276_v4 = vmul.f32 0.03125, %v257_v3  ;;  %v289_v5 = vmul.f32 %v7231_v2, %v7231_v2 }
 0x17e   :  { %v7236_v6 = vsub.f32 %v7182_v23, %v276_v4  ;;  %v296_v7 = vsel %vm251_vm3, %v289_v5, 0.0 }
 0x17f   :  { %v260_v8 = vpop.xlane.xlu1 %259  ;;  %297 = vadd.xlane.f32.xlu1 %v296_v7 }
 0x180   :  { %v277_v9 = vmul.f32 0.03125, %v260_v8  ;;  %v290_v10 = vmul.f32 %v7236_v6, %v7236_v6  ;;  %v7302_v8 = vld [vmem:[%s9225_s4] ss:$0 sm:$0xff] }
 0x182   :  { %v7242_v11 = vsub.f32 %v7189_v30, %v277_v9  ;;  %v299_v12 = vsel %vm251_vm3, %v290_v10, 0.0  ;;  %v614_v9 = vld [vmem:[%s9226_s6] sm:$0xff]  ;;  %v615_v10 = vld [vmem:[%s9226_s6 + $0x8] sm:$0xff] }
 0x183   :  { %v263_v13 = vpop.xlane.xlu1 %262  ;;  %300 = vadd.xlane.f32.xlu0 %v299_v12 }
 0x184   :  { %v278_v14 = vmul.f32 0.03125, %v263_v13  ;;  %v291_v15 = vmul.f32 %v7242_v11, %v7242_v11 }
 0x186   :  { %v7248_v17 = vsub.f32 %v7196_v37, %v278_v14  ;;  %v302_v18 = vsel %vm251_vm3, %v291_v15, 0.0 }
 0x187   :  { %v266_v19 = vpop.xlane.xlu0 %265  ;;  %303 = vadd.xlane.f32.xlu1 %v302_v18 }
 0x188   :  { %v279_v20 = vmul.f32 0.03125, %v266_v19  ;;  %v292_v21 = vmul.f32 %v7248_v17, %v7248_v17  ;;  %v6573_v19 = vpack.c.bf16 %v615_v10, %v614_v9 }
 0x18a   :  { %v7254_v22 = vsub.f32 %v7203_v44, %v279_v20  ;;  %v305_v24 = vsel %vm251_vm3, %v292_v21, 0.0  ;;  %v616_v21 = vld [vmem:[%s9226_s6 + $0x10] sm:$0xff] }
 0x18b   :  { %v269_v25 = vpop.xlane.xlu1 %268  ;;  %306 = vadd.xlane.f32.xlu0 %v305_v24  ;;  %v617_v24 = vld [vmem:[%s9226_s6 + $0x18] sm:$0xff] }
 0x18c   :  { %v280_v26 = vmul.f32 0.03125, %v269_v25  ;;  %v293_v27 = vmul.f32 %v7254_v22, %v7254_v22 }
 0x18e   :  { %v7260_v28 = vsub.f32 %v7210_v51, %v280_v26  ;;  %v308_v29 = vsel %vm251_vm3, %v293_v27, 0.0 }
 0x18f   :  { %309 = vadd.xlane.f32.xlu1 %v308_v29  ;;  %v273_v31 = vpop.xlane.xlu0 %272 }
 0x190   :  { %v281_v32 = vmul.f32 0.03125, %v273_v31  ;;  %v294_v33 = vmul.f32 %v7260_v28, %v7260_v28 }
 0x192   :  { %v7266_v34 = vsub.f32 %v7217_v57, %v281_v32  ;;  %v311_v35 = vsel %vm251_vm3, %v294_v33, 0.0  ;;  %v6576_v32 = vpack.c.bf16 %v617_v24, %v616_v21 }
 0x193   :  { %312 = vadd.xlane.f32.xlu0 %v311_v35 }
 0x194   :  { %v295_v36 = vmul.f32 %v7266_v34, %v7266_v34 }
 0x196   :  { %v314_v38 = vsel %vm270_vm4, %v295_v36, 0.0 }
 0x197   :  { %315 = vadd.xlane.f32.xlu1 %v314_v38 }
 0x20c   :  { %v298_v49 = vpop.xlane.xlu1 %297 }
 0x20d   :  { %v317_v50 = vmul.f32 0.03125, %v298_v49 }
 0x20f   :  { %v324_v52 = vadd.f32 1e-06, %v317_v50 }
 0x210   :  { %v301_v53 = vpop.xlane.xlu0 %300 }
 0x211   :  { %6797 = vrsqrt.f32 %v324_v52  ;;  %v318_v54 = vmul.f32 0.03125, %v301_v53 }
 0x213   :  { %v325_v55 = vadd.f32 1e-06, %v318_v54 }
 0x214   :  { %v304_v56 = vpop.xlane.xlu1 %303 }
 0x215   :  { %6799 = vrsqrt.f32 %v325_v55  ;;  %v319_v58 = vmul.f32 0.03125, %v304_v56  ;;  %v4931_v56 = vld [vmem:[%s9227_s5] ss:$0 sm:$0xff] }
 0x217   :  { %v326_v60 = vadd.f32 1e-06, %v319_v58 }
 0x218   :  { %v307_v61 = vpop.xlane.xlu0 %306 }
 0x219   :  { %6801 = vrsqrt.f32 %v326_v60  ;;  %v320_v62 = vmul.f32 0.03125, %v307_v61 }
 0x21b   :  { %v6798_v63 = vpop.eup %6797  ;;  %v327_v3 = vadd.f32 1e-06, %v320_v62 }
 0x21c   :  { %v338_v4 = vmul.f32 %v6798_v63, %v7231_v2  ;;  %v310_v5 = vpop.xlane.xlu1 %309 }
 0x21d   :  { %6803 = vrsqrt.f32 %v327_v3  ;;  %v321_v7 = vmul.f32 0.03125, %v310_v5 }
 0x21e   :  { %v351_v12 = vmul.f32 %v7296_v1, %v338_v4 }
 0x21f   :  { %v6800_v13 = vpop.eup %6799  ;;  %v328_v2 = vadd.f32 1e-06, %v321_v7 }
 0x220   :  { %v339_v14 = vmul.f32 %v6800_v13, %v7236_v6  ;;  %v313_v15 = vpop.xlane.xlu0 %312  ;;  %v7313_v18 = vadd.f32 %v7302_v8, %v351_v12 }
 0x221   :  { %6805 = vrsqrt.f32 %v328_v2  ;;  %v322_v20 = vmul.f32 0.03125, %v313_v15 }
 0x222   :  { %v352_v25 = vmul.f32 %v7296_v1, %v339_v14  ;;  %5648 = vmatmul.mubr.msk.f32.vlgmr.msra.gmra.mrb[0].mxu1 %vm251_vm3, %v7313_v18  ;;  %5677 = vmatmul.mubr.msk.f32.vlgmr.msra.gmra.mrb[14].mxu0 %vm251_vm3, %v7313_v18 }
 0x223   :  { %v6802_v6 = vpop.eup %6801  ;;  %v329_v26 = vadd.f32 1e-06, %v322_v20  ;;  %5650 = vmatprep.mubr.msk.f32.mxu1 %vm6987_vm2, %v6986_v0  ;;  %5679 = vmatprep.mubr.msk.f32.mxu0 %vm6987_vm2, %v6986_v0 }
 0x224   :  { %v340_v27 = vmul.f32 %v6802_v6, %v7242_v11  ;;  %v316_v29 = vpop.xlane.xlu1 %315  ;;  %v7332_v31 = vadd.f32 %v7302_v8, %v352_v25  ;;  %6574 = vmatpush3.bf16.msra.mxu1 %v6573_v19 }
 0x225   :  { %6807 = vrsqrt.f32 %v329_v26  ;;  %v323_v33 = vmul.f32 0.03125, %v316_v29  ;;  %6575 = vmatprep.subr.bf16.mxu1 %v6988_v59 }
 0x226   :  { %v353_v35 = vmul.f32 %v7296_v1, %v340_v27  ;;  %5651 = vmatmul.mubr.msk.f32.gmra.mrb[2].mxu1 %vm251_vm3, %v7332_v31  ;;  %5680 = vmatmul.mubr.msk.f32.gmra.mrb[16].mxu0 %vm251_vm3, %v7332_v31 }
 0x227   :  { %v6804_v36 = vpop.eup %6803  ;;  %v330_v11 = vadd.f32 1e-06, %v323_v33  ;;  %5653 = vmatprep.mubr.msk.f32.mxu1 %vm6987_vm2, %v6986_v0  ;;  %5682 = vmatprep.mubr.msk.f32.mxu0 %vm6987_vm2, %v6986_v0 }
 0x228   :  { %v341_v38 = vmul.f32 %v6804_v36, %v7248_v17  ;;  %v7346_v39 = vadd.f32 %v7302_v8, %v353_v35  ;;  %6577 = vmatpush3.bf16.msra.mxu1 %v6576_v32 }
 0x229   :  { %6809 = vrsqrt.f32 %v330_v11  ;;  %6590 = vmatprep.subr.bf16.mxu1 %v6988_v59 }
 0x22a   :  { %v354_v40 = vmul.f32 %v7296_v1, %v341_v38  ;;  %5654 = vmatmul.mubr.msk.f32.gmra.mrb[4].mxu1 %vm251_vm3, %v7346_v39  ;;  %5683 = vmatmul.mubr.msk.f32.gmra.mrb[18].mxu0 %vm251_vm3, %v7346_v39 }
 0x22b   :  { %v6806_v41 = vpop.eup %6805  ;;  %5656 = vmatprep.mubr.msk.f32.mxu1 %vm6987_vm2, %v6986_v0  ;;  %5685 = vmatprep.mubr.msk.f32.mxu0 %vm6987_vm2, %v6986_v0 }
 0x22c   :  { %v342_v17 = vmul.f32 %v6806_v41, %v7254_v22  ;;  %v7360_v42 = vadd.f32 %v7302_v8, %v354_v40 }
 0x22e   :  { %v355_v43 = vmul.f32 %v7296_v1, %v342_v17  ;;  %5657 = vmatmul.mubr.msk.f32.gmra.mrb[6].mxu1 %vm251_vm3, %v7360_v42  ;;  %5686 = vmatmul.mubr.msk.f32.gmra.mrb[20].mxu0 %vm251_vm3, %v7360_v42 }
 0x22f   :  { %v6808_v45 = vpop.eup %6807  ;;  %5659 = vmatprep.mubr.msk.f32.mxu1 %vm6987_vm2, %v6986_v0  ;;  %5688 = vmatprep.mubr.msk.f32.mxu0 %vm6987_vm2, %v6986_v0 }
 0x230   :  { %v343_v22 = vmul.f32 %v6808_v45, %v7260_v28  ;;  %v7373_v46 = vadd.f32 %v7302_v8, %v355_v43  ;;  %v4939_v43 = vld [vmem:[%s9182_s12] ss:$0 sm:$0xff] }
 0x231   :  { %v4923_v45 = vld [vmem:[%s9183_s8] ss:$0 sm:$0xff] }
 0x232   :  { %v356_v47 = vmul.f32 %v7296_v1, %v343_v22  ;;  %5660 = vmatmul.mubr.msk.f32.gmra.mrb[8].mxu1 %vm251_vm3, %v7373_v46  ;;  %5689 = vmatmul.mubr.msk.f32.gmra.mrb[22].mxu0 %vm251_vm3, %v7373_v46 }
 0x233   :  { %v6810_v48 = vpop.eup %6809  ;;  %5662 = vmatprep.mubr.msk.f32.mxu1 %vm6987_vm2, %v6986_v0  ;;  %5691 = vmatprep.mubr.msk.f32.mxu0 %vm6987_vm2, %v6986_v0 }
 0x234   :  { %v344_v28 = vmul.f32 %v6810_v48, %v7266_v34  ;;  %v7386_v49 = vadd.f32 %v7302_v8, %v356_v47  ;;  %v4969_v47 = vld [vmem:[%s9223_s7 + $0x20] sm:$0xff]  ;;  %v4970_v48 = vld [vmem:[%s9223_s7 + $0x28] sm:$0xff] }
 0x236   :  { %v357_v50 = vmul.f32 %v7296_v1, %v344_v28  ;;  %5663 = vmatmul.mubr.msk.f32.gmra.mrb[10].mxu1 %vm251_vm3, %v7386_v49  ;;  %5692 = vmatmul.mubr.msk.f32.gmra.mrb[24].mxu0 %vm251_vm3, %v7386_v49 }
 0x237   :  { %5665 = vmatprep.mubr.msk.f32.mxu1 %vm6987_vm2, %v6986_v0  ;;  %5694 = vmatprep.mubr.msk.f32.mxu0 %vm6987_vm2, %v6986_v0 }
 0x238   :  { %v7398_v52 = vadd.f32 %v7302_v8, %v357_v50 }
 0x23a   :  { %5666 = vmatmul.mubr.msk.f32.gmra.mrb[12].mxu1 %vm251_vm3, %v7398_v52  ;;  %5695 = vmatmul.mubr.msk.f32.gmra.mrb[26].mxu0 %vm251_vm3, %v7398_v52 }
 0x23b   :  { %5705 = vmatprep.mubr.msk.f32.mxu1 %vm6987_vm2, %v6986_v0  ;;  %5740 = vmatprep.mubr.msk.f32.mxu0 %vm6987_vm2, %v6986_v0 }
 0x23e   :  { %5706 = vmatmul.mubr.msk.f32.vlgmr.msra.gmra.mrb[14].mxu1 %vm251_vm3, %v7313_v18 }
 0x23f   :  { %5708 = vmatprep.mubr.msk.f32.mxu1 %vm6987_vm2, %v6986_v0 }
 0x242   :  { %5709 = vmatmul.mubr.msk.f32.gmra.mrb[16].mxu1 %vm251_vm3, %v7332_v31 }
 0x243   :  { %5711 = vmatprep.mubr.msk.f32.mxu1 %vm6987_vm2, %v6986_v0 }
 0x246   :  { %5712 = vmatmul.mubr.msk.f32.gmra.mrb[18].mxu1 %vm251_vm3, %v7346_v39 }
 0x247   :  { %5714 = vmatprep.mubr.msk.f32.mxu1 %vm6987_vm2, %v6986_v0 }
 0x24a   :  { %5715 = vmatmul.mubr.msk.f32.gmra.mrb[20].mxu1 %vm251_vm3, %v7360_v42 }
 0x24b   :  { %5717 = vmatprep.mubr.msk.f32.mxu1 %vm6987_vm2, %v6986_v0 }
 0x24e   :  { %5718 = vmatmul.mubr.msk.f32.gmra.mrb[22].mxu1 %vm251_vm3, %v7373_v46 }
 0x24f   :  { %5720 = vmatprep.mubr.msk.f32.mxu1 %vm6987_vm2, %v6986_v0 }
 0x252   :  { %5721 = vmatmul.mubr.msk.f32.gmra.mrb[24].mxu1 %vm251_vm3, %v7386_v49 }
 0x253   :  { %5723 = vmatprep.mubr.msk.f32.mxu1 %vm6987_vm2, %v6986_v0 }
 0x256   :  { %5724 = vmatmul.mubr.msk.f32.gmra.mrb[26].mxu1 %vm251_vm3, %v7398_v52 }
 0x257   :  { %5775 = vmatprep.mubr.msk.f32.mxu1 %vm6987_vm2, %v6986_v0 }
 0x2f5   :  { %v469_v34 = vpop.f32.mrb[0].mxu1  ;;  %v580_v53 = vpop.f32.mrb[14].mxu0 }
 0x2f6   :  { %v5649_v54 = vpop.f32.mrb[1].mxu1  ;;  %v5678_v55 = vpop.f32.mrb[15].mxu0  ;;  %v581_v61 = vadd.f32 %v4931_v56, %v580_v53 }
 0x2f7   :  { %v470_v55 = vadd.f32 %v4923_v45, %v469_v34 }
 0x2f9   :  { %v7439_v58 = vpop.f32.mrb[2].mxu1  ;;  %v585_v60 = vpop.f32.mrb[16].mxu0 }
 0x2fa   :  { %v586_v62 = vadd.f32 %v4931_v56, %v585_v60  ;;  %v5652_v63 = vpop.f32.mrb[3].mxu1  ;;  %v5681_v1 = vpop.f32.mrb[17].mxu0  ;;  %v6600_v60 = vpack.c.bf16 %v4970_v48, %v4969_v47  ;;  %v475_v34 = vadd.f32 %v4923_v45, %v7439_v58  ;;  %v7601_v47 = vld [vmem:[%s9184_s2 + $0x8] sm:$0xff] }
 0x2fc   :  { %v6579_v4 = vpack.c.bf16 %v586_v62, %v581_v61  ;;  %v4972_v62 = vld [vmem:[%s9223_s7 + $0x38] sm:$0xff] }
 0x2fd   :  { %v7447_v5 = vpop.f32.mrb[4].mxu1  ;;  %v590_v7 = vpop.f32.mrb[18].mxu0 }
 0x2fe   :  { %v5655_v8 = vpop.f32.mrb[5].mxu1  ;;  %v5684_v9 = vpop.f32.mrb[19].mxu0  ;;  %6581 = vmatpush3.bf16.xpose.msk.msra.mxu0 %vm7443_vm6, %v6579_v4  ;;  %v591_v13 = vadd.f32 %v4931_v56, %v590_v7 }
 0x2ff   :  { %6582 = vmatprep.subr.bf16.mxu0 %v6988_v59 }
 0x301   :  { %v7452_v10 = vpop.f32.mrb[6].mxu1  ;;  %v595_v12 = vpop.f32.mrb[20].mxu0 }
 0x302   :  { %v596_v2 = vadd.f32 %v4931_v56, %v595_v12  ;;  %v5658_v14 = vpop.f32.mrb[7].mxu1  ;;  %v5687_v15 = vpop.f32.mrb[21].mxu0 }
 0x303   :  { %v485_v15 = vadd.f32 %v4923_v45, %v7452_v10 }
 0x304   :  { %v6583_v19 = vpack.c.bf16 %v596_v2, %v591_v13  ;;  %v480_v13 = vadd.f32 %v4923_v45, %v7447_v5 }
 0x305   :  { %v7454_v20 = vpop.f32.mrb[8].mxu1  ;;  %v600_v21 = vpop.f32.mrb[22].mxu0 }
 0x306   :  { %v5661_v24 = vpop.f32.mrb[9].mxu1  ;;  %v5690_v25 = vpop.f32.mrb[23].mxu0  ;;  %6585 = vmatpush3.bf16.xpose.msk.msra.mxu0 %vm7443_vm6, %v6583_v19  ;;  %v601_v27 = vadd.f32 %v4931_v56, %v600_v21 }
 0x307   :  { %6586 = vmatprep.subr.bf16.mxu0 %v6988_v59  ;;  %v490_v25 = vadd.f32 %v4923_v45, %v7454_v20 }
 0x309   :  { %v7459_v6 = vpop.f32.mrb[10].mxu1  ;;  %v605_v26 = vpop.f32.mrb[24].mxu0 }
 0x30a   :  { %v606_v29 = vadd.f32 %v4931_v56, %v605_v26  ;;  %v5664_v32 = vpop.f32.mrb[11].mxu1  ;;  %v5693_v33 = vpop.f32.mrb[25].mxu0  ;;  %v495_v10 = vadd.f32 %v4923_v45, %v7459_v6  ;;  %v4996_v6 = vld [vmem:[%s9226_s6 + $0x28] sm:$0xff] }
 0x30b   :  { %v4995_v33 = vld [vmem:[%s9226_s6 + $0x20] sm:$0xff] }
 0x30c   :  { %v6587_v35 = vpack.c.bf16 %v606_v29, %v601_v27 }
 0x30d   :  { %v7461_v36 = vpop.f32.mrb[12].mxu1  ;;  %v610_v11 = vpop.f32.mrb[26].mxu0 }
 0x30e   :  { %v5667_v38 = vpop.f32.mrb[13].mxu1  ;;  %v5696_v40 = vpop.f32.mrb[27].mxu0  ;;  %6589 = vmatpush3.bf16.xpose.msk.msra.mxu0 %vm7443_vm6, %v6587_v35  ;;  %v611_v22 = vadd.f32 %v4931_v56, %v610_v11  ;;  %v4971_v56 = vld [vmem:[%s9223_s7 + $0x30] sm:$0xff]  ;;  %v500_v20 = vadd.f32 %v4923_v45, %v7461_v36  ;;  %v6612_v35 = vpack.c.bf16 %v4996_v6, %v4995_v33  ;;  %v4998_v11 = vld [vmem:[%s9226_s6 + $0x38] sm:$0xff] }
 0x30f   :  { %5738 = vmatprep.subr.mxu0 %v6986_v0  ;;  %v6603_v4 = vpack.c.bf16 %v4972_v62, %v4971_v56  ;;  %v4997_v36 = vld [vmem:[%s9226_s6 + $0x30] sm:$0xff] }
 0x310   :  { %v6615_v38 = vpack.c.bf16 %v4998_v11, %v4997_v36 }
 0x311   :  { %v691_v41 = vpop.f32.mrb[14].mxu1 }
 0x312   :  { %v5707_v17 = vpop.f32.mrb[15].mxu1  ;;  %v692_v50 = vadd.f32 %v4939_v43, %v691_v41  ;;  %v7593_v41 = vld [vmem:[%s9184_s2] sm:$0xff] }
 0x315   :  { %v696_v28 = vpop.f32.mrb[16].mxu1 }
 0x316   :  { %v697_v53 = vadd.f32 %v4939_v43, %v696_v28  ;;  %v5710_v54 = vpop.f32.mrb[17].mxu1  ;;  %5739 = vmatpush3.xpose.msk.msra.mxu0 %vm725_vm5, %v611_v22 }
 0x317   :  { %6599 = vmatprep.subr.bf16.mxu0 %v6988_v59 }
 0x318   :  { %v6591_v61 = vpack.c.bf16 %v697_v53, %v692_v50 }
 0x319   :  { %v701_v63 = vpop.f32.mrb[18].mxu1  ;;  %5741 = vmatmul.mubr.msk.f32.vlgmr.msra.gmra.mrb[28].mxu0 %vm725_vm5, %v470_v55  ;;  %v7611_v55 = vld [vmem:[%s9184_s2 + $0x10] sm:$0xff] }
 0x31a   :  { %v5713_v1 = vpop.f32.mrb[19].mxu1  ;;  %6592 = vmatpush3.bf16.msra.mxu1 %v6591_v61  ;;  %5743 = vmatprep.mubr.msk.f32.mxu0 %vm6987_vm2, %v6986_v0  ;;  %v702_v8 = vadd.f32 %v4939_v43, %v701_v63 }
 0x31b   :  { %6593 = vmatprep.subr.bf16.mxu1 %v6988_v59  ;;  %6601 = vmatpush3.bf16.msra.mxu0 %v6600_v60  ;;  %v7621_v1 = vld [vmem:[%s9184_s2 + $0x18] sm:$0xff] }
 0x31c   :  { %6602 = vmatprep.subr.bf16.mxu0 %v6988_v59 }
 0x31d   :  { %v706_v7 = vpop.f32.mrb[20].mxu1  ;;  %5744 = vmatmul.mubr.msk.f32.gmra.mrb[30].mxu0 %vm725_vm5, %v475_v34 }
 0x31e   :  { %v707_v9 = vadd.f32 %v4939_v43, %v706_v7  ;;  %v5716_v12 = vpop.f32.mrb[21].mxu1  ;;  %5746 = vmatprep.mubr.msk.f32.mxu0 %vm6987_vm2, %v6986_v0 }
 0x31f   :  { %6604 = vmatpush3.bf16.msra.mxu0 %v6603_v4  ;;  %v7631_v12 = vld [vmem:[%s9184_s2 + $0x20] sm:$0xff] }
 0x320   :  { %v6594_v2 = vpack.c.bf16 %v707_v9, %v702_v8  ;;  %6611 = vmatprep.subr.bf16.mxu0 %v6988_v59 }
 0x321   :  { %v711_v58 = vpop.f32.mrb[22].mxu1  ;;  %5747 = vmatmul.mubr.msk.f32.gmra.mrb[32].mxu0 %vm725_vm5, %v480_v13 }
 0x322   :  { %v5719_v14 = vpop.f32.mrb[23].mxu1  ;;  %6595 = vmatpush3.bf16.msra.mxu1 %v6594_v2  ;;  %5749 = vmatprep.mubr.msk.f32.mxu0 %vm6987_vm2, %v6986_v0  ;;  %v712_v5 = vadd.f32 %v4939_v43, %v711_v58 }
 0x323   :  { %6596 = vmatprep.subr.bf16.mxu1 %v6988_v59 }
 0x325   :  { %v716_v19 = vpop.f32.mrb[24].mxu1  ;;  %5750 = vmatmul.mubr.msk.f32.gmra.mrb[34].mxu0 %vm725_vm5, %v485_v15 }
 0x326   :  { %v717_v21 = vadd.f32 %v4939_v43, %v716_v19  ;;  %v5722_v24 = vpop.f32.mrb[25].mxu1  ;;  %5752 = vmatprep.mubr.msk.f32.mxu0 %vm6987_vm2, %v6986_v0  ;;  %v7641_v19 = vld [vmem:[%s9184_s2 + $0x28] sm:$0xff] }
 0x328   :  { %v6597_v26 = vpack.c.bf16 %v717_v21, %v712_v5 }
 0x329   :  { %v721_v27 = vpop.f32.mrb[26].mxu1  ;;  %5753 = vmatmul.mubr.msk.f32.gmra.mrb[36].mxu0 %vm725_vm5, %v490_v25 }
 0x32a   :  { %v5725_v29 = vpop.f32.mrb[27].mxu1  ;;  %6598 = vmatpush3.bf16.msra.mxu1 %v6597_v26  ;;  %5755 = vmatprep.mubr.msk.f32.mxu0 %vm6987_vm2, %v6986_v0  ;;  %v722_v32 = vadd.f32 %v4939_v43, %v721_v27  ;;  %v7651_v27 = vld [vmem:[%s9184_s2 + $0x30] sm:$0x3] }
 0x32b   :  { %5773 = vmatprep.subr.mxu1 %v6986_v0 }
 0x32d   :  { %5756 = vmatmul.mubr.msk.f32.gmra.mrb[38].mxu0 %vm725_vm5, %v495_v10 }
 0x32e   :  { %5774 = vmatpush3.msk.msra.mxu1 %vm982_vm7, %v722_v32  ;;  %5758 = vmatprep.mubr.msk.f32.mxu0 %vm6987_vm2, %v6986_v0 }
 0x32f   :  { %6605 = vmatprep.subr.bf16.mxu1 %v6988_v59 }
 0x331   :  { %5759 = vmatmul.mubr.msk.f32.gmra.mrb[40].mxu0 %vm725_vm5, %v500_v20 }
 0x332   :  { %5804 = vmatprep.mubr.msk.f32.mxu0 %vm6987_vm2, %v6986_v0 }
 0x335   :  { %5805 = vmatmul.mubr.msk.f32.vlgmr.msra.gmra.mrb[42].mxu0 %vm251_vm3, %v7313_v18 }
 0x336   :  { %5807 = vmatprep.mubr.msk.f32.mxu0 %vm6987_vm2, %v6986_v0  ;;  %6613 = vmatpush3.bf16.msra.mxu0 %v6612_v35 }
 0x337   :  { %6614 = vmatprep.subr.bf16.mxu0 %v6988_v59 }
 0x339   :  { %5808 = vmatmul.mubr.msk.f32.gmra.mrb[44].mxu0 %vm251_vm3, %v7332_v31 }
 0x33a   :  { %5810 = vmatprep.mubr.msk.f32.mxu0 %vm6987_vm2, %v6986_v0  ;;  %6616 = vmatpush3.bf16.msra.mxu0 %v6615_v38 }
 0x33b   :  { %6629 = vmatprep.subr.bf16.mxu0 %v6988_v59 }
 0x33d   :  { %5811 = vmatmul.mubr.msk.f32.gmra.mrb[46].mxu0 %vm251_vm3, %v7346_v39 }
 0x33e   :  { %5813 = vmatprep.mubr.msk.f32.mxu0 %vm6987_vm2, %v6986_v0 }
 0x341   :  { %5814 = vmatmul.mubr.msk.f32.gmra.mrb[48].mxu0 %vm251_vm3, %v7360_v42 }
 0x342   :  { %5816 = vmatprep.mubr.msk.f32.mxu0 %vm6987_vm2, %v6986_v0 }
 0x345   :  { %5817 = vmatmul.mubr.msk.f32.gmra.mrb[50].mxu0 %vm251_vm3, %v7373_v46 }
 0x346   :  { %5819 = vmatprep.mubr.msk.f32.mxu0 %vm6987_vm2, %v6986_v0 }
 0x349   :  { %5820 = vmatmul.mubr.msk.f32.gmra.mrb[52].mxu0 %vm251_vm3, %v7386_v49 }
 0x34a   :  { %5822 = vmatprep.mubr.msk.f32.mxu0 %vm6987_vm2, %v6986_v0 }
 0x34d   :  { %5823 = vmatmul.mubr.msk.f32.gmra.mrb[54].mxu0 %vm251_vm3, %v7398_v52 }
 0x34e   :  { %5862 = vmatprep.mubr.msk.f32.mxu0 %vm6987_vm2, %v6986_v0 }
 0x351   :  { %5863 = vmatmul.mubr.msk.f32.vlgmr.msra.gmra.mrb[56].mxu0 %vm251_vm3, %v7313_v18 }
 0x352   :  { %5865 = vmatprep.mubr.msk.f32.mxu0 %vm6987_vm2, %v6986_v0 }
 0x355   :  { %5866 = vmatmul.mubr.msk.f32.gmra.mrb[58].mxu0 %vm251_vm3, %v7332_v31 }
 0x356   :  { %5868 = vmatprep.mubr.msk.f32.mxu0 %vm6987_vm2, %v6986_v0 }
 0x359   :  { %5869 = vmatmul.mubr.msk.f32.gmra.mrb[60].mxu0 %vm251_vm3, %v7346_v39 }
 0x35a   :  { %5871 = vmatprep.mubr.msk.f32.mxu0 %vm6987_vm2, %v6986_v0 }
 0x35d   :  { %5872 = vmatmul.mubr.msk.f32.gmra.mrb[62].mxu0 %vm251_vm3, %v7360_v42 }
 0x35e   :  { %5874 = vmatprep.mubr.msk.f32.mxu0 %vm6987_vm2, %v6986_v0 }
 0x361   :  { %5875 = vmatmul.mubr.msk.f32.gmra.mrb[64].mxu0 %vm251_vm3, %v7373_v46 }
 0x362   :  { %5877 = vmatprep.mubr.msk.f32.mxu0 %vm6987_vm2, %v6986_v0 }
 0x365   :  { %5878 = vmatmul.mubr.msk.f32.gmra.mrb[66].mxu0 %vm251_vm3, %v7386_v49 }
 0x366   :  { %5880 = vmatprep.mubr.msk.f32.mxu0 %vm6987_vm2, %v6986_v0 }
 0x369   :  { %5881 = vmatmul.mubr.msk.f32.gmra.mrb[68].mxu0 %vm251_vm3, %v7398_v52 }
 0x36a   :  { %5932 = vmatprep.mubr.msk.f32.mxu0 %vm6987_vm2, %v6986_v0 }
 0x3ec   :  { %v834_v40 = vpop.f32.mrb[28].mxu0 }
 0x3ed   :  { %v868_v17 = vmul.f32 0.25, %v834_v40  ;;  %v5742_v43 = vpop.f32.mrb[29].mxu0 }
 0x3ef   :  { %v7596_v45 = vadd.f32 %v868_v17, %v7593_v41 }
 0x3f0   :  { %v839_v22 = vpop.f32.mrb[30].mxu0 }
 0x3f1   :  { %v869_v48 = vmul.f32 0.25, %v839_v22  ;;  %v5745_v28 = vpop.f32.mrb[31].mxu0  ;;  %v883_v50 = vsel %vm882_vm8, %v7596_v45, -inf }
 0x3f2   :  { %884 = vmax.xlane.f32.xlu0 %v883_v50 }
 0x3f3   :  { %v7606_v53 = vadd.f32 %v869_v48, %v7601_v47 }
 0x3f4   :  { %v844_v54 = vpop.f32.mrb[32].mxu0 }
 0x3f5   :  { %v870_v60 = vmul.f32 0.25, %v844_v54  ;;  %v5748_v61 = vpop.f32.mrb[33].mxu0  ;;  %v886_v56 = vsel %vm882_vm8, %v7606_v53, -inf }
 0x3f6   :  { %887 = vmax.xlane.f32.xlu1 %v886_v56 }
 0x3f7   :  { %v7616_v62 = vadd.f32 %v870_v60, %v7611_v55 }
 0x3f8   :  { %v849_v63 = vpop.f32.mrb[34].mxu0 }
 0x3f9   :  { %v871_v34 = vmul.f32 0.25, %v849_v63  ;;  %v5751_v4 = vpop.f32.mrb[35].mxu0  ;;  %v889_v7 = vsel %vm882_vm8, %v7616_v62, -inf  ;;  %v5000_v63 = vld [vmem:[%s9182_s12 + $0x1] ss:$0 sm:$0xff] }
 0x3fa   :  { %890 = vmax.xlane.f32.xlu0 %v889_v7 }
 0x3fb   :  { %v7626_v8 = vadd.f32 %v871_v34, %v7621_v1 }
 0x3fc   :  { %v854_v9 = vpop.f32.mrb[36].mxu0 }
 0x3fd   :  { %v872_v13 = vmul.f32 0.25, %v854_v9  ;;  %v5754_v2 = vpop.f32.mrb[37].mxu0  ;;  %v892_v58 = vsel %vm882_vm8, %v7626_v8, -inf }
 0x3fe   :  { %893 = vmax.xlane.f32.xlu1 %v892_v58 }
 0x3ff   :  { %v7636_v14 = vadd.f32 %v872_v13, %v7631_v12 }
 0x400   :  { %v859_v15 = vpop.f32.mrb[38].mxu0 }
 0x401   :  { %v873_v5 = vmul.f32 0.25, %v859_v15  ;;  %v5757_v21 = vpop.f32.mrb[39].mxu0  ;;  %v895_v24 = vsel %vm882_vm8, %v7636_v14, -inf }
 0x402   :  { %896 = vmax.xlane.f32.xlu0 %v895_v24 }
 0x403   :  { %v7646_v25 = vadd.f32 %v873_v5, %v7641_v19 }
 0x404   :  { %v864_v26 = vpop.f32.mrb[40].mxu0 }
 0x405   :  { %v874_v29 = vmul.f32 0.25, %v864_v26  ;;  %v5760_v10 = vpop.f32.mrb[41].mxu0  ;;  %v898_v32 = vsel %vm882_vm8, %v7646_v25, -inf }
 0x406   :  { %899 = vmax.xlane.f32.xlu1 %v898_v32 }
 0x407   :  { %v7656_v20 = vadd.f32 %v874_v29, %v7651_v27 }
 0x408   :  { %v7658_v33 = vpop.f32.mrb[42].mxu0 }
 0x409   :  { %v5806_v6 = vpop.f32.mrb[43].mxu0  ;;  %v902_v35 = vsel %vm901_vm9, %v7656_v20, -inf }
 0x40a   :  { %903 = vmax.xlane.f32.xlu0 %v902_v35 }
 0x40c   :  { %v7662_v36 = vpop.f32.mrb[44].mxu0 }
 0x40d   :  { %v5809_v11 = vpop.f32.mrb[45].mxu0 }
 0x410   :  { %v7664_v38 = vpop.f32.mrb[46].mxu0 }
 0x411   :  { %v5812_v40 = vpop.f32.mrb[47].mxu0 }
 0x414   :  { %v7666_v17 = vpop.f32.mrb[48].mxu0 }
 0x415   :  { %v5815_v43 = vpop.f32.mrb[49].mxu0 }
 0x418   :  { %v7668_v22 = vpop.f32.mrb[50].mxu0 }
 0x419   :  { %v5818_v48 = vpop.f32.mrb[51].mxu0 }
 0x41c   :  { %v7670_v28 = vpop.f32.mrb[52].mxu0 }
 0x41d   :  { %v5821_v50 = vpop.f32.mrb[53].mxu0 }
 0x420   :  { %v7672_v54 = vpop.f32.mrb[54].mxu0 }
 0x421   :  { %v5824_v60 = vpop.f32.mrb[55].mxu0 }
 0x424   :  { %v1393_v61 = vpop.f32.mrb[56].mxu0 }
 0x425   :  { %v5864_v56 = vpop.f32.mrb[57].mxu0  ;;  %v1394_v4 = vadd.f32 %v5000_v63, %v1393_v61 }
 0x428   :  { %v1398_v34 = vpop.f32.mrb[58].mxu0 }
 0x429   :  { %v1399_v7 = vadd.f32 %v5000_v63, %v1398_v34  ;;  %v5867_v9 = vpop.f32.mrb[59].mxu0 }
 0x42b   :  { %v6630_v13 = vpack.c.bf16 %v1399_v7, %v1394_v4 }
 0x42c   :  { %v1403_v2 = vpop.f32.mrb[60].mxu0 }
 0x42d   :  { %v5870_v58 = vpop.f32.mrb[61].mxu0  ;;  %6631 = vmatpush3.bf16.msra.mxu0 %v6630_v13  ;;  %v1404_v5 = vadd.f32 %v5000_v63, %v1403_v2 }
 0x42e   :  { %6632 = vmatprep.subr.bf16.mxu0 %v6988_v59 }
 0x430   :  { %v1408_v15 = vpop.f32.mrb[62].mxu0 }
 0x431   :  { %v1409_v21 = vadd.f32 %v5000_v63, %v1408_v15  ;;  %v5873_v24 = vpop.f32.mrb[63].mxu0 }
 0x433   :  { %v6633_v26 = vpack.c.bf16 %v1409_v21, %v1404_v5 }
 0x434   :  { %v1413_v29 = vpop.f32.mrb[64].mxu0 }
 0x435   :  { %v5876_v10 = vpop.f32.mrb[65].mxu0  ;;  %6634 = vmatpush3.bf16.msra.mxu0 %v6633_v26  ;;  %v1414_v6 = vadd.f32 %v5000_v63, %v1413_v29 }
 0x436   :  { %6635 = vmatprep.subr.bf16.mxu0 %v6988_v59 }
 0x438   :  { %v1418_v32 = vpop.f32.mrb[66].mxu0 }
 0x439   :  { %v1419_v35 = vadd.f32 %v5000_v63, %v1418_v32  ;;  %v5879_v11 = vpop.f32.mrb[67].mxu0 }
 0x43b   :  { %v6636_v40 = vpack.c.bf16 %v1419_v35, %v1414_v6 }
 0x43c   :  { %v1423_v43 = vpop.f32.mrb[68].mxu0 }
 0x43d   :  { %v5882_v48 = vpop.f32.mrb[69].mxu0  ;;  %6637 = vmatpush3.bf16.msra.mxu0 %v6636_v40  ;;  %v1424_v50 = vadd.f32 %v5000_v63, %v1423_v43 }
 0x43e   :  { %5930 = vmatprep.subr.mxu0 %v6986_v0 }
 0x441   :  { %5931 = vmatpush3.msk.msra.mxu0 %vm982_vm7, %v1424_v50 }
 0x442   :  { %6641 = vmatprep.subr.bf16.mxu0 %v6988_v59 }
 0x47f   :  { %v885_v60 = vpop.xlane.xlu0 %884 }
 0x480   :  { %v905_v61 = vsub.f32 %v7596_v45, %v885_v60 }
 0x482   :  { %v912_v56 = vmul.f32 1.442695, %v905_v61 }
 0x483   :  { %v888_v34 = vpop.xlane.xlu1 %887 }
 0x484   :  { %6811 = vpow2.f32 %v912_v56  ;;  %v906_v4 = vsub.f32 %v7606_v53, %v888_v34 }
 0x486   :  { %v914_v7 = vmul.f32 1.442695, %v906_v4 }
 0x487   :  { %v891_v9 = vpop.xlane.xlu0 %890 }
 0x488   :  { %6813 = vpow2.f32 %v914_v7  ;;  %v907_v13 = vsub.f32 %v7616_v62, %v891_v9  ;;  %v4982_v7 = vld [vmem:[%s9222_s1 + $0x20] sm:$0xff]  ;;  %v4983_v9 = vld [vmem:[%s9222_s1 + $0x28] sm:$0xff] }
 0x48a   :  { %v916_v2 = vmul.f32 1.442695, %v907_v13 }
 0x48b   :  { %v894_v58 = vpop.xlane.xlu1 %893 }
 0x48c   :  { %6815 = vpow2.f32 %v916_v2  ;;  %v908_v63 = vsub.f32 %v7626_v8, %v894_v58  ;;  %v6606_v2 = vpack.c.bf16 %v4983_v9, %v4982_v7  ;;  %v4987_v7 = vld [vmem:[%s9227_s5 + $0x1] ss:$0 sm:$0xff] }
 0x48e   :  { %v6812_v15 = vpop.eup %6811  ;;  %v918_v5 = vmul.f32 1.442695, %v908_v63 }
 0x48f   :  { %v897_v21 = vpop.xlane.xlu0 %896  ;;  %v926_v45 = vsel %vm882_vm8, %v6812_v15, 0.0 }
 0x490   :  { %6817 = vpow2.f32 %v918_v5  ;;  %v909_v24 = vsub.f32 %v7636_v14, %v897_v21  ;;  %927 = vadd.xlane.f32.xlu1 %v926_v45  ;;  %v4984_v5 = vld [vmem:[%s9222_s1 + $0x30] sm:$0xff]  ;;  %v4985_v21 = vld [vmem:[%s9222_s1 + $0x38] sm:$0xff] }
 0x492   :  { %v6814_v53 = vpop.eup %6813  ;;  %v920_v26 = vmul.f32 1.442695, %v909_v24  ;;  %v6609_v24 = vpack.c.bf16 %v4985_v21, %v4984_v5 }
 0x493   :  { %v900_v29 = vpop.xlane.xlu1 %899  ;;  %v929_v10 = vsel %vm882_vm8, %v6814_v53, 0.0 }
 0x494   :  { %6819 = vpow2.f32 %v920_v26  ;;  %v910_v62 = vsub.f32 %v7646_v25, %v900_v29  ;;  %930 = vadd.xlane.f32.xlu0 %v929_v10 }
 0x496   :  { %v6816_v32 = vpop.eup %6815  ;;  %v922_v8 = vmul.f32 1.442695, %v910_v62 }
 0x497   :  { %v904_v6 = vpop.xlane.xlu0 %903  ;;  %v932_v35 = vsel %vm882_vm8, %v6816_v32, 0.0 }
 0x498   :  { %6821 = vpow2.f32 %v922_v8  ;;  %v911_v11 = vsub.f32 %v7656_v20, %v904_v6  ;;  %933 = vadd.xlane.f32.xlu1 %v932_v35 }
 0x49a   :  { %v6818_v14 = vpop.eup %6817  ;;  %v924_v40 = vmul.f32 1.442695, %v911_v11 }
 0x49b   :  { %v935_v43 = vsel %vm882_vm8, %v6818_v14, 0.0 }
 0x49c   :  { %6823 = vpow2.f32 %v924_v40  ;;  %936 = vadd.xlane.f32.xlu0 %v935_v43 }
 0x49e   :  { %v6820_v48 = vpop.eup %6819 }
 0x49f   :  { %v938_v50 = vsel %vm882_vm8, %v6820_v48, 0.0 }
 0x4a0   :  { %939 = vadd.xlane.f32.xlu1 %v938_v50 }
 0x4a2   :  { %v6822_v25 = vpop.eup %6821 }
 0x4a3   :  { %v941_v60 = vsel %vm882_vm8, %v6822_v25, 0.0 }
 0x4a4   :  { %942 = vadd.xlane.f32.xlu0 %v941_v60 }
 0x4a6   :  { %v6824_v61 = vpop.eup %6823 }
 0x4a7   :  { %v944_v56 = vsel %vm901_vm9, %v6824_v61, 0.0 }
 0x4a8   :  { %945 = vadd.xlane.f32.xlu1 %v944_v56 }
 0x51d   :  { %v928_v20 = vpop.xlane.xlu1 %927 }
 0x51e   :  { %6825 = vrcp.f32 %v928_v20 }
 0x521   :  { %v931_v34 = vpop.xlane.xlu0 %930 }
 0x522   :  { %6827 = vrcp.f32 %v931_v34 }
 0x525   :  { %v934_v4 = vpop.xlane.xlu1 %933 }
 0x526   :  { %6829 = vrcp.f32 %v934_v4 }
 0x528   :  { %v6826_v13 = vpop.eup %6825 }
 0x529   :  { %v954_v58 = vmul.f32 %v6826_v13, %v6812_v15  ;;  %v937_v63 = vpop.xlane.xlu0 %936 }
 0x52a   :  { %6831 = vrcp.f32 %v937_v63 }
 0x52b   :  { %5776 = vmatmul.mubr.msk.f32.vlgmr.msra.gmra.mrb[28].mxu1 %vm882_vm8, %v954_v58 }
 0x52c   :  { %v6828_v45 = vpop.eup %6827  ;;  %5778 = vmatprep.mubr.msk.f32.mxu1 %vm6987_vm2, %v6986_v0  ;;  %6607 = vmatpush3.bf16.msra.mxu1 %v6606_v2 }
 0x52d   :  { %v940_v26 = vpop.xlane.xlu1 %939  ;;  %v955_v15 = vmul.f32 %v6828_v45, %v6814_v53  ;;  %6608 = vmatprep.subr.bf16.mxu1 %v6988_v59 }
 0x52e   :  { %6833 = vrcp.f32 %v940_v26 }
 0x52f   :  { %5779 = vmatmul.mubr.msk.f32.gmra.mrb[30].mxu1 %vm882_vm8, %v955_v15 }
 0x530   :  { %v6830_v29 = vpop.eup %6829  ;;  %5781 = vmatprep.mubr.msk.f32.mxu1 %vm6987_vm2, %v6986_v0  ;;  %6610 = vmatpush3.bf16.msra.mxu1 %v6609_v24 }
 0x531   :  { %v943_v10 = vpop.xlane.xlu0 %942  ;;  %v956_v62 = vmul.f32 %v6830_v29, %v6816_v32  ;;  %6617 = vmatprep.subr.bf16.mxu1 %v6988_v59 }
 0x532   :  { %6835 = vrcp.f32 %v943_v10 }
 0x533   :  { %5782 = vmatmul.mubr.msk.f32.gmra.mrb[32].mxu1 %vm882_vm8, %v956_v62 }
 0x534   :  { %v6832_v8 = vpop.eup %6831  ;;  %5784 = vmatprep.mubr.msk.f32.mxu1 %vm6987_vm2, %v6986_v0 }
 0x535   :  { %v946_v53 = vpop.xlane.xlu1 %945  ;;  %v957_v6 = vmul.f32 %v6832_v8, %v6818_v14 }
 0x536   :  { %6837 = vrcp.f32 %v946_v53 }
 0x537   :  { %5785 = vmatmul.mubr.msk.f32.gmra.mrb[34].mxu1 %vm882_vm8, %v957_v6 }
 0x538   :  { %v6834_v35 = vpop.eup %6833  ;;  %5787 = vmatprep.mubr.msk.f32.mxu1 %vm6987_vm2, %v6986_v0 }
 0x539   :  { %v958_v11 = vmul.f32 %v6834_v35, %v6820_v48 }
 0x53b   :  { %5788 = vmatmul.mubr.msk.f32.gmra.mrb[36].mxu1 %vm882_vm8, %v958_v11 }
 0x53c   :  { %v6836_v32 = vpop.eup %6835  ;;  %5790 = vmatprep.mubr.msk.f32.mxu1 %vm6987_vm2, %v6986_v0 }
 0x53d   :  { %v959_v40 = vmul.f32 %v6836_v32, %v6822_v25 }
 0x53f   :  { %5791 = vmatmul.mubr.msk.f32.gmra.mrb[38].mxu1 %vm882_vm8, %v959_v40 }
 0x540   :  { %v6838_v43 = vpop.eup %6837  ;;  %5793 = vmatprep.mubr.msk.f32.mxu1 %vm6987_vm2, %v6986_v0 }
 0x541   :  { %v960_v14 = vmul.f32 %v6838_v43, %v6824_v61  ;;  %v4974_v43 = vld [vmem:[%s9183_s8 + $0x1] ss:$0 sm:$0xff] }
 0x543   :  { %5794 = vmatmul.mubr.msk.f32.gmra.mrb[40].mxu1 %vm882_vm8, %v960_v14 }
 0x544   :  { %5833 = vmatprep.mubr.msk.f32.mxu1 %vm6987_vm2, %v6986_v0 }
 0x547   :  { %5834 = vmatmul.mubr.msk.f32.vlgmr.msra.gmra.mrb[42].mxu1 %vm251_vm3, %v7313_v18 }
 0x548   :  { %5836 = vmatprep.mubr.msk.f32.mxu1 %vm6987_vm2, %v6986_v0 }
 0x54b   :  { %5837 = vmatmul.mubr.msk.f32.gmra.mrb[44].mxu1 %vm251_vm3, %v7332_v31 }
 0x54c   :  { %5839 = vmatprep.mubr.msk.f32.mxu1 %vm6987_vm2, %v6986_v0 }
 0x54f   :  { %5840 = vmatmul.mubr.msk.f32.gmra.mrb[46].mxu1 %vm251_vm3, %v7346_v39 }
 0x550   :  { %5842 = vmatprep.mubr.msk.f32.mxu1 %vm6987_vm2, %v6986_v0 }
 0x553   :  { %5843 = vmatmul.mubr.msk.f32.gmra.mrb[48].mxu1 %vm251_vm3, %v7360_v42 }
 0x554   :  { %5845 = vmatprep.mubr.msk.f32.mxu1 %vm6987_vm2, %v6986_v0 }
 0x557   :  { %5846 = vmatmul.mubr.msk.f32.gmra.mrb[50].mxu1 %vm251_vm3, %v7373_v46 }
 0x558   :  { %5848 = vmatprep.mubr.msk.f32.mxu1 %vm6987_vm2, %v6986_v0 }
 0x55b   :  { %5849 = vmatmul.mubr.msk.f32.gmra.mrb[52].mxu1 %vm251_vm3, %v7386_v49 }
 0x55c   :  { %5851 = vmatprep.mubr.msk.f32.mxu1 %vm6987_vm2, %v6986_v0 }
 0x55f   :  { %5852 = vmatmul.mubr.msk.f32.gmra.mrb[54].mxu1 %vm251_vm3, %v7398_v52 }
 0x560   :  { %5897 = vmatprep.mubr.msk.f32.mxu1 %vm6987_vm2, %v6986_v0 }
 0x5fe   :  { %v7759_v18 = vpop.f32.mrb[28].mxu1 }
 0x5ff   :  { %v5777_v31 = vpop.f32.mrb[29].mxu1 }
 0x600   :  { %v1168_v31 = vadd.f32 %v4974_v43, %v7658_v33  ;;  %v1183_v33 = vadd.f32 %v4974_v43, %v7666_v17  ;;  %v1198_v17 = vadd.f32 %v4974_v43, %v7672_v54 }
 0x602   :  { %v7761_v39 = vpop.f32.mrb[30].mxu1 }
 0x603   :  { %v5780_v42 = vpop.f32.mrb[31].mxu1 }
 0x604   :  { %v1173_v42 = vadd.f32 %v4974_v43, %v7662_v36  ;;  %v1188_v36 = vadd.f32 %v4974_v43, %v7668_v22 }
 0x606   :  { %v7763_v46 = vpop.f32.mrb[32].mxu1 }
 0x607   :  { %v5783_v48 = vpop.f32.mrb[33].mxu1 }
 0x608   :  { %v1178_v48 = vadd.f32 %v4974_v43, %v7664_v38  ;;  %v1193_v38 = vadd.f32 %v4974_v43, %v7670_v28 }
 0x60a   :  { %v7765_v50 = vpop.f32.mrb[34].mxu1 }
 0x60b   :  { %v5786_v49 = vpop.f32.mrb[35].mxu1 }
 0x60e   :  { %v7767_v25 = vpop.f32.mrb[36].mxu1 }
 0x60f   :  { %v5789_v60 = vpop.f32.mrb[37].mxu1 }
 0x612   :  { %v7769_v61 = vpop.f32.mrb[38].mxu1 }
 0x613   :  { %v5792_v52 = vpop.f32.mrb[39].mxu1 }
 0x616   :  { %v7771_v56 = vpop.f32.mrb[40].mxu1 }
 0x617   :  { %v5795_v20 = vpop.f32.mrb[41].mxu1 }
 0x61a   :  { %v1280_v34 = vpop.f32.mrb[42].mxu1 }
 0x61b   :  { %v5835_v4 = vpop.f32.mrb[43].mxu1  ;;  %v1281_v13 = vadd.f32 %v4987_v7, %v1280_v34 }
 0x61e   :  { %v1285_v9 = vpop.f32.mrb[44].mxu1 }
 0x61f   :  { %v1286_v2 = vadd.f32 %v4987_v7, %v1285_v9  ;;  %v5838_v58 = vpop.f32.mrb[45].mxu1 }
 0x621   :  { %v6618_v63 = vpack.c.bf16 %v1286_v2, %v1281_v13 }
 0x622   :  { %v1290_v5 = vpop.f32.mrb[46].mxu1 }
 0x623   :  { %v5841_v21 = vpop.f32.mrb[47].mxu1  ;;  %6620 = vmatpush3.bf16.xpose.msk.msra.mxu1 %vm7443_vm6, %v6618_v63  ;;  %v1291_v24 = vadd.f32 %v4987_v7, %v1290_v5 }
 0x624   :  { %6621 = vmatprep.subr.bf16.mxu1 %v6988_v59 }
 0x626   :  { %v1295_v45 = vpop.f32.mrb[48].mxu1 }
 0x627   :  { %v1296_v26 = vadd.f32 %v4987_v7, %v1295_v45  ;;  %v5844_v15 = vpop.f32.mrb[49].mxu1 }
 0x629   :  { %v6622_v29 = vpack.c.bf16 %v1296_v26, %v1291_v24 }
 0x62a   :  { %v1300_v10 = vpop.f32.mrb[50].mxu1 }
 0x62b   :  { %v5847_v62 = vpop.f32.mrb[51].mxu1  ;;  %6624 = vmatpush3.bf16.xpose.msk.msra.mxu1 %vm7443_vm6, %v6622_v29  ;;  %v1301_v53 = vadd.f32 %v4987_v7, %v1300_v10 }
 0x62c   :  { %6625 = vmatprep.subr.bf16.mxu1 %v6988_v59 }
 0x62e   :  { %v1305_v8 = vpop.f32.mrb[52].mxu1 }
 0x62f   :  { %v1306_v6 = vadd.f32 %v4987_v7, %v1305_v8  ;;  %v5850_v35 = vpop.f32.mrb[53].mxu1 }
 0x631   :  { %v6626_v11 = vpack.c.bf16 %v1306_v6, %v1301_v53 }
 0x632   :  { %v1310_v32 = vpop.f32.mrb[54].mxu1 }
 0x633   :  { %v5853_v40 = vpop.f32.mrb[55].mxu1  ;;  %6628 = vmatpush3.bf16.xpose.msk.msra.mxu1 %vm7443_vm6, %v6626_v11  ;;  %v1311_v14 = vadd.f32 %v4987_v7, %v1310_v32 }
 0x634   :  { %5895 = vmatprep.subr.mxu1 %v6986_v0 }
 0x63b   :  { %5896 = vmatpush3.xpose.msk.msra.mxu1 %vm725_vm5, %v1311_v14 }
 0x63c   :  { %6638 = vmatprep.subr.bf16.mxu1 %v6988_v59 }
 0x63e   :  { %5898 = vmatmul.mubr.msk.f32.vlgmr.msra.gmra.mrb[56].mxu1 %vm725_vm5, %v1168_v31 }
 0x63f   :  { %5900 = vmatprep.mubr.msk.f32.mxu1 %vm6987_vm2, %v6986_v0 }
 0x642   :  { %5901 = vmatmul.mubr.msk.f32.gmra.mrb[58].mxu1 %vm725_vm5, %v1173_v42 }
 0x643   :  { %5903 = vmatprep.mubr.msk.f32.mxu1 %vm6987_vm2, %v6986_v0 }
 0x646   :  { %5904 = vmatmul.mubr.msk.f32.gmra.mrb[60].mxu1 %vm725_vm5, %v1178_v48 }
 0x647   :  { %5906 = vmatprep.mubr.msk.f32.mxu1 %vm6987_vm2, %v6986_v0 }
 0x64a   :  { %5907 = vmatmul.mubr.msk.f32.gmra.mrb[62].mxu1 %vm725_vm5, %v1183_v33 }
 0x64b   :  { %5909 = vmatprep.mubr.msk.f32.mxu1 %vm6987_vm2, %v6986_v0 }
 0x64e   :  { %5910 = vmatmul.mubr.msk.f32.gmra.mrb[64].mxu1 %vm725_vm5, %v1188_v36 }
 0x64f   :  { %5912 = vmatprep.mubr.msk.f32.mxu1 %vm6987_vm2, %v6986_v0 }
 0x652   :  { %5913 = vmatmul.mubr.msk.f32.gmra.mrb[66].mxu1 %vm725_vm5, %v1193_v38 }
 0x653   :  { %5915 = vmatprep.mubr.msk.f32.mxu1 %vm6987_vm2, %v6986_v0 }
 0x656   :  { %5916 = vmatmul.mubr.msk.f32.gmra.mrb[68].mxu1 %vm725_vm5, %v1198_v17 }
 0x657   :  { %5957 = vmatprep.mubr.msk.f32.mxu1 %vm6987_vm2, %v6986_v0 }
 0x711   :  { %v1535_v22 = vpop.f32.mrb[56].mxu1 }
 0x712   :  { %v1569_v49 = vmul.f32 0.25, %v1535_v22  ;;  %v5899_v60 = vpop.f32.mrb[57].mxu1 }
 0x714   :  { %v1576_v52 = vadd.f32 %v1569_v49, %v7593_v41 }
 0x715   :  { %v1540_v20 = vpop.f32.mrb[58].mxu1 }
 0x716   :  { %v1570_v34 = vmul.f32 0.25, %v1540_v20  ;;  %v5902_v28 = vpop.f32.mrb[59].mxu1  ;;  %v1583_v4 = vsel %vm882_vm8, %v1576_v52, -inf }
 0x717   :  { %1584 = vmax.xlane.f32.xlu0 %v1583_v4 }
 0x718   :  { %v1577_v7 = vadd.f32 %v1570_v34, %v7601_v47 }
 0x719   :  { %v1545_v9 = vpop.f32.mrb[60].mxu1 }
 0x71a   :  { %v1571_v54 = vmul.f32 0.25, %v1545_v9  ;;  %v5905_v13 = vpop.f32.mrb[61].mxu1  ;;  %v1586_v2 = vsel %vm882_vm8, %v1577_v7, -inf }
 0x71b   :  { %1587 = vmax.xlane.f32.xlu1 %v1586_v2 }
 0x71c   :  { %v1578_v58 = vadd.f32 %v1571_v54, %v7611_v55 }
 0x71d   :  { %v1550_v63 = vpop.f32.mrb[62].mxu1 }
 0x71e   :  { %v1572_v5 = vmul.f32 0.25, %v1550_v63  ;;  %v5908_v21 = vpop.f32.mrb[63].mxu1  ;;  %v1589_v41 = vsel %vm882_vm8, %v1578_v58, -inf }
 0x71f   :  { %1590 = vmax.xlane.f32.xlu0 %v1589_v41 }
 0x720   :  { %v1579_v45 = vadd.f32 %v1572_v5, %v7621_v1 }
 0x721   :  { %v1555_v24 = vpop.f32.mrb[64].mxu1 }
 0x722   :  { %v1573_v26 = vmul.f32 0.25, %v1555_v24  ;;  %v5911_v15 = vpop.f32.mrb[65].mxu1  ;;  %v1592_v47 = vsel %vm882_vm8, %v1579_v45, -inf }
 0x723   :  { %1593 = vmax.xlane.f32.xlu1 %v1592_v47 }
 0x724   :  { %v1580_v29 = vadd.f32 %v1573_v26, %v7631_v12 }
 0x725   :  { %v1560_v10 = vpop.f32.mrb[66].mxu1 }
 0x726   :  { %v1574_v62 = vmul.f32 0.25, %v1560_v10  ;;  %v5914_v8 = vpop.f32.mrb[67].mxu1  ;;  %v1595_v55 = vsel %vm882_vm8, %v1580_v29, -inf  ;;  %v5031_v10 = vld [vmem:[%s9185_s13 + $0x18] sm:$0xff] }
 0x727   :  { %1596 = vmax.xlane.f32.xlu0 %v1595_v55 }
 0x728   :  { %v1581_v53 = vadd.f32 %v1574_v62, %v7641_v19 }
 0x729   :  { %v1565_v6 = vpop.f32.mrb[68].mxu1 }
 0x72a   :  { %v1575_v35 = vmul.f32 0.25, %v1565_v6  ;;  %v5917_v11 = vpop.f32.mrb[69].mxu1  ;;  %v1598_v1 = vsel %vm882_vm8, %v1581_v53, -inf  ;;  %v1086_v6 = vld [vmem:[%s9185_s13] sm:$0xff] }
 0x72b   :  { %1599 = vmax.xlane.f32.xlu1 %v1598_v1 }
 0x72c   :  { %v1582_v32 = vadd.f32 %v1575_v35, %v7651_v27  ;;  %v1087_v35 = vld [vmem:[%s9185_s13 + $0x8] sm:$0xff] }
 0x72d   :  { %v6642_v1 = vpack.c.bf16 %v1087_v35, %v1086_v6 }
 0x72e   :  { %v1601_v40 = vsel %vm901_vm9, %v1582_v32, -inf }
 0x72f   :  { %1602 = vmax.xlane.f32.xlu0 %v1601_v40 }
 0x7a4   :  { %v1585_v12 = vpop.xlane.xlu0 %1584 }
 0x7a5   :  { %v1604_v43 = vsub.f32 %v1576_v52, %v1585_v12 }
 0x7a7   :  { %v1611_v14 = vmul.f32 1.442695, %v1604_v43 }
 0x7a8   :  { %v1588_v31 = vpop.xlane.xlu1 %1587 }
 0x7a9   :  { %6839 = vpow2.f32 %v1611_v14  ;;  %v1605_v42 = vsub.f32 %v1577_v7, %v1588_v31 }
 0x7ab   :  { %v1613_v48 = vmul.f32 1.442695, %v1605_v42 }
 0x7ac   :  { %v1591_v33 = vpop.xlane.xlu0 %1590 }
 0x7ad   :  { %6841 = vpow2.f32 %v1613_v48  ;;  %v1606_v19 = vsub.f32 %v1578_v58, %v1591_v33 }
 0x7af   :  { %v1615_v36 = vmul.f32 1.442695, %v1606_v19 }
 0x7b0   :  { %v1594_v38 = vpop.xlane.xlu1 %1593 }
 0x7b1   :  { %6843 = vpow2.f32 %v1615_v36  ;;  %v1607_v17 = vsub.f32 %v1579_v45, %v1594_v38 }
 0x7b3   :  { %v6840_v22 = vpop.eup %6839  ;;  %v1617_v49 = vmul.f32 1.442695, %v1607_v17 }
 0x7b4   :  { %v1597_v27 = vpop.xlane.xlu0 %1596  ;;  %v1625_v60 = vsel %vm882_vm8, %v6840_v22, 0.0 }
 0x7b5   :  { %6845 = vpow2.f32 %v1617_v49  ;;  %v1608_v20 = vsub.f32 %v1580_v29, %v1597_v27  ;;  %1626 = vadd.xlane.f32.xlu1 %v1625_v60  ;;  %v5030_v29 = vld [vmem:[%s9185_s13 + $0x10] sm:$0xff] }
 0x7b6   :  { %v6639_v62 = vpack.c.bf16 %v5031_v10, %v5030_v29 }
 0x7b7   :  { %v6842_v52 = vpop.eup %6841  ;;  %v1619_v34 = vmul.f32 1.442695, %v1608_v20 }
 0x7b8   :  { %v1600_v28 = vpop.xlane.xlu1 %1599  ;;  %v1628_v4 = vsel %vm882_vm8, %v6842_v52, 0.0  ;;  %6640 = vmatpush3.bf16.msra.mxu1 %v6639_v62 }
 0x7b9   :  { %6847 = vpow2.f32 %v1619_v34  ;;  %v1609_v7 = vsub.f32 %v1581_v53, %v1600_v28  ;;  %1629 = vadd.xlane.f32.xlu0 %v1628_v4  ;;  %6644 = vmatprep.subr.bf16.mxu1 %v6988_v59 }
 0x7bb   :  { %v6844_v9 = vpop.eup %6843  ;;  %v1621_v54 = vmul.f32 1.442695, %v1609_v7 }
 0x7bc   :  { %v1603_v13 = vpop.xlane.xlu0 %1602  ;;  %v1631_v2 = vsel %vm882_vm8, %v6844_v9, 0.0 }
 0x7bd   :  { %6849 = vpow2.f32 %v1621_v54  ;;  %v1610_v58 = vsub.f32 %v1582_v32, %v1603_v13  ;;  %1632 = vadd.xlane.f32.xlu1 %v1631_v2 }
 0x7bf   :  { %v6846_v63 = vpop.eup %6845  ;;  %v1623_v5 = vmul.f32 1.442695, %v1610_v58 }
 0x7c0   :  { %v1634_v21 = vsel %vm882_vm8, %v6846_v63, 0.0 }
 0x7c1   :  { %6851 = vpow2.f32 %v1623_v5  ;;  %1635 = vadd.xlane.f32.xlu0 %v1634_v21 }
 0x7c3   :  { %v6848_v41 = vpop.eup %6847 }
 0x7c4   :  { %v1637_v45 = vsel %vm882_vm8, %v6848_v41, 0.0 }
 0x7c5   :  { %1638 = vadd.xlane.f32.xlu1 %v1637_v45 }
 0x7c7   :  { %v6850_v24 = vpop.eup %6849 }
 0x7c8   :  { %v1640_v26 = vsel %vm882_vm8, %v6850_v24, 0.0 }
 0x7c9   :  { %1641 = vadd.xlane.f32.xlu0 %v1640_v26 }
 0x7cb   :  { %v6852_v15 = vpop.eup %6851 }
 0x7cc   :  { %v1643_v47 = vsel %vm901_vm9, %v6852_v15, 0.0 }
 0x7cd   :  { %1644 = vadd.xlane.f32.xlu1 %v1643_v47 }
 0x842   :  { %v1627_v8 = vpop.xlane.xlu1 %1626 }
 0x843   :  { %6853 = vrcp.f32 %v1627_v8 }
 0x846   :  { %v1630_v55 = vpop.xlane.xlu0 %1629 }
 0x847   :  { %6855 = vrcp.f32 %v1630_v55  ;;  %v5046_v55 = vld [vmem:[%s9186_s14] ss:$0 sm:$0xff] }
 0x84a   :  { %v1633_v53 = vpop.xlane.xlu1 %1632 }
 0x84b   :  { %6857 = vrcp.f32 %v1633_v53 }
 0x84d   :  { %v6854_v11 = vpop.eup %6853 }
 0x84e   :  { %v1653_v32 = vmul.f32 %v6854_v11, %v6840_v22  ;;  %v1636_v40 = vpop.xlane.xlu0 %1635 }
 0x84f   :  { %6859 = vrcp.f32 %v1636_v40 }
 0x850   :  { %5933 = vmatmul.mubr.msk.f32.vlgmr.msra.gmra.mrb[70].mxu0 %vm882_vm8, %v1653_v32 }
 0x851   :  { %v6856_v12 = vpop.eup %6855  ;;  %5935 = vmatprep.mubr.msk.f32.mxu0 %vm6987_vm2, %v6986_v0  ;;  %6643 = vmatpush3.bf16.msra.mxu0 %v6642_v1 }
 0x852   :  { %v1639_v43 = vpop.xlane.xlu1 %1638  ;;  %v1654_v14 = vmul.f32 %v6856_v12, %v6842_v52  ;;  %6650 = vmatprep.subr.bf16.mxu0 %v6988_v59 }
 0x853   :  { %6861 = vrcp.f32 %v1639_v43 }
 0x854   :  { %5936 = vmatmul.mubr.msk.f32.gmra.mrb[72].mxu0 %vm882_vm8, %v1654_v14 }
 0x855   :  { %v6858_v31 = vpop.eup %6857  ;;  %5938 = vmatprep.mubr.msk.f32.mxu0 %vm6987_vm2, %v6986_v0 }
 0x856   :  { %v1642_v42 = vpop.xlane.xlu0 %1641  ;;  %v1655_v48 = vmul.f32 %v6858_v31, %v6844_v9 }
 0x857   :  { %6863 = vrcp.f32 %v1642_v42 }
 0x858   :  { %5939 = vmatmul.mubr.msk.f32.gmra.mrb[74].mxu0 %vm882_vm8, %v1655_v48 }
 0x859   :  { %v6860_v33 = vpop.eup %6859  ;;  %5941 = vmatprep.mubr.msk.f32.mxu0 %vm6987_vm2, %v6986_v0 }
 0x85a   :  { %v1645_v19 = vpop.xlane.xlu1 %1644  ;;  %v1656_v36 = vmul.f32 %v6860_v33, %v6846_v63 }
 0x85b   :  { %6865 = vrcp.f32 %v1645_v19 }
 0x85c   :  { %5942 = vmatmul.mubr.msk.f32.gmra.mrb[76].mxu0 %vm882_vm8, %v1656_v36 }
 0x85d   :  { %v6862_v38 = vpop.eup %6861  ;;  %5944 = vmatprep.mubr.msk.f32.mxu0 %vm6987_vm2, %v6986_v0 }
 0x85e   :  { %v1657_v17 = vmul.f32 %v6862_v38, %v6848_v41 }
 0x860   :  { %5945 = vmatmul.mubr.msk.f32.gmra.mrb[78].mxu0 %vm882_vm8, %v1657_v17 }
 0x861   :  { %v6864_v22 = vpop.eup %6863  ;;  %5947 = vmatprep.mubr.msk.f32.mxu0 %vm6987_vm2, %v6986_v0 }
 0x862   :  { %v1658_v49 = vmul.f32 %v6864_v22, %v6850_v24 }
 0x864   :  { %5948 = vmatmul.mubr.msk.f32.gmra.mrb[80].mxu0 %vm882_vm8, %v1658_v49 }
 0x865   :  { %v6866_v27 = vpop.eup %6865  ;;  %5950 = vmatprep.mubr.msk.f32.mxu0 %vm6987_vm2, %v6986_v0 }
 0x866   :  { %v1659_v60 = vmul.f32 %v6866_v27, %v6852_v15 }
 0x868   :  { %5951 = vmatmul.mubr.msk.f32.gmra.mrb[82].mxu0 %vm882_vm8, %v1659_v60 }
 0x869   :  { %5982 = vmatprep.mubr.msk.f32.mxu0 %vm6987_vm2, %v6986_v0 }
 0x86c   :  { %5983 = vmatmul.mubr.msk.f32.vlgmr.msra.gmra.mrb[84].mxu0 %vm725_vm5, %v7759_v18 }
 0x86d   :  { %5985 = vmatprep.mubr.msk.f32.mxu0 %vm6987_vm2, %v6986_v0 }
 0x870   :  { %5986 = vmatmul.mubr.msk.f32.gmra.mrb[86].mxu0 %vm725_vm5, %v7761_v39 }
 0x871   :  { %5988 = vmatprep.mubr.msk.f32.mxu0 %vm6987_vm2, %v6986_v0 }
 0x874   :  { %5989 = vmatmul.mubr.msk.f32.gmra.mrb[88].mxu0 %vm725_vm5, %v7763_v46 }
 0x875   :  { %5991 = vmatprep.mubr.msk.f32.mxu0 %vm6987_vm2, %v6986_v0 }
 0x878   :  { %5992 = vmatmul.mubr.msk.f32.gmra.mrb[90].mxu0 %vm725_vm5, %v7765_v50 }
 0x879   :  { %5994 = vmatprep.mubr.msk.f32.mxu0 %vm6987_vm2, %v6986_v0 }
 0x87c   :  { %5995 = vmatmul.mubr.msk.f32.gmra.mrb[92].mxu0 %vm725_vm5, %v7767_v25 }
 0x87d   :  { %5997 = vmatprep.mubr.msk.f32.mxu0 %vm6987_vm2, %v6986_v0 }
 0x880   :  { %5998 = vmatmul.mubr.msk.f32.gmra.mrb[94].mxu0 %vm725_vm5, %v7769_v61 }
 0x881   :  { %6000 = vmatprep.mubr.msk.f32.mxu0 %vm6987_vm2, %v6986_v0 }
 0x884   :  { %6001 = vmatmul.mubr.msk.f32.gmra.mrb[96].mxu0 %vm725_vm5, %v7771_v56 }
 0x885   :  { %6064 = vmatprep.mubr.msk.f32.mxu0 %vm6987_vm2, %v6986_v0 }
 0x923   :  { %v1750_v18 = vpop.f32.mrb[70].mxu0 }
 0x924   :  { %v5934_v39 = vpop.f32.mrb[71].mxu0  ;;  %5958 = vmatmul.mubr.msk.f32.vlgmr.msra.gmra.mrb[70].mxu1 %vm725_vm5, %v1750_v18 }
 0x925   :  { %5960 = vmatprep.mubr.msk.f32.mxu1 %vm6987_vm2, %v6986_v0 }
 0x927   :  { %v1755_v46 = vpop.f32.mrb[72].mxu0 }
 0x928   :  { %v5937_v50 = vpop.f32.mrb[73].mxu0  ;;  %5961 = vmatmul.mubr.msk.f32.gmra.mrb[72].mxu1 %vm725_vm5, %v1755_v46 }
 0x929   :  { %5963 = vmatprep.mubr.msk.f32.mxu1 %vm6987_vm2, %v6986_v0 }
 0x92b   :  { %v1760_v25 = vpop.f32.mrb[74].mxu0 }
 0x92c   :  { %v5940_v61 = vpop.f32.mrb[75].mxu0  ;;  %5964 = vmatmul.mubr.msk.f32.gmra.mrb[74].mxu1 %vm725_vm5, %v1760_v25 }
 0x92d   :  { %5966 = vmatprep.mubr.msk.f32.mxu1 %vm6987_vm2, %v6986_v0 }
 0x92f   :  { %v1765_v56 = vpop.f32.mrb[76].mxu0 }
 0x930   :  { %v5943_v20 = vpop.f32.mrb[77].mxu0  ;;  %5967 = vmatmul.mubr.msk.f32.gmra.mrb[76].mxu1 %vm725_vm5, %v1765_v56 }
 0x931   :  { %5969 = vmatprep.mubr.msk.f32.mxu1 %vm6987_vm2, %v6986_v0 }
 0x933   :  { %v1770_v52 = vpop.f32.mrb[78].mxu0 }
 0x934   :  { %v5946_v34 = vpop.f32.mrb[79].mxu0  ;;  %5970 = vmatmul.mubr.msk.f32.gmra.mrb[78].mxu1 %vm725_vm5, %v1770_v52 }
 0x935   :  { %5972 = vmatprep.mubr.msk.f32.mxu1 %vm6987_vm2, %v6986_v0 }
 0x937   :  { %v1775_v28 = vpop.f32.mrb[80].mxu0 }
 0x938   :  { %v5949_v4 = vpop.f32.mrb[81].mxu0  ;;  %5973 = vmatmul.mubr.msk.f32.gmra.mrb[80].mxu1 %vm725_vm5, %v1775_v28 }
 0x939   :  { %5975 = vmatprep.mubr.msk.f32.mxu1 %vm6987_vm2, %v6986_v0  ;;  %v2169_v4 = vld [vmem:[%s9187_s17] sm:$0xff] }
 0x93b   :  { %v1780_v7 = vpop.f32.mrb[82].mxu0 }
 0x93c   :  { %v5952_v9 = vpop.f32.mrb[83].mxu0  ;;  %5976 = vmatmul.mubr.msk.f32.gmra.mrb[82].mxu1 %vm725_vm5, %v1780_v7  ;;  %v2170_v7 = vld [vmem:[%s9187_s17 + $0x8] sm:$0xff] }
 0x93d   :  { %6011 = vmatprep.mubr.msk.f32.mxu1 %vm6987_vm2, %v6986_v0  ;;  %v6645_v9 = vpack.c.bf16 %v2170_v7, %v2169_v4  ;;  %v2317_v4 = vld [vmem:[%s9188_s19 + $0x48] sm:$0xff] }
 0x93f   :  { %v1995_v54 = vpop.f32.mrb[84].mxu0  ;;  %6646 = vmatpush3.bf16.msra.mxu1 %v6645_v9  ;;  %v2318_v9 = vld [vmem:[%s9188_s19 + $0x50] sm:$0xff] }
 0x940   :  { %v5984_v13 = vpop.f32.mrb[85].mxu0  ;;  %6647 = vmatprep.subr.bf16.mxu1 %v6988_v59 }
 0x943   :  { %v2000_v2 = vpop.f32.mrb[86].mxu0 }
 0x944   :  { %v5987_v58 = vpop.f32.mrb[87].mxu0 }
 0x947   :  { %v2005_v63 = vpop.f32.mrb[88].mxu0 }
 0x948   :  { %v5990_v5 = vpop.f32.mrb[89].mxu0 }
 0x94b   :  { %v2010_v21 = vpop.f32.mrb[90].mxu0 }
 0x94c   :  { %v5993_v41 = vpop.f32.mrb[91].mxu0 }
 0x94f   :  { %v2015_v45 = vpop.f32.mrb[92].mxu0 }
 0x950   :  { %v5996_v24 = vpop.f32.mrb[93].mxu0 }
 0x953   :  { %v2020_v26 = vpop.f32.mrb[94].mxu0 }
 0x954   :  { %v5999_v15 = vpop.f32.mrb[95].mxu0 }
 0x957   :  { %v2025_v47 = vpop.f32.mrb[96].mxu0 }
 0x958   :  { %v6002_v29 = vpop.f32.mrb[97].mxu0 }
 0x9f7   :  { %v1874_v10 = vpop.f32.mrb[70].mxu1 }
 0x9f8   :  { %v1996_v62 = vadd.f32 %v1995_v54, %v1874_v10  ;;  %v5959_v8 = vpop.f32.mrb[71].mxu1 }
 0x9fa   :  { %v2029_v53 = vadd.f32 %v1996_v62, %v7175_v16 }
 0x9fb   :  { %v1879_v6 = vpop.f32.mrb[72].mxu1 }
 0x9fc   :  { %v7927_v35 = vadd.f32 %v5046_v55, %v2029_v53  ;;  %v2001_v11 = vadd.f32 %v2000_v2, %v1879_v6  ;;  %v5962_v1 = vpop.f32.mrb[73].mxu1 }
 0x9fe   :  { %v2030_v32 = vadd.f32 %v2001_v11, %v7182_v23  ;;  %v2052_v40 = vsel %vm251_vm3, %v7927_v35, 0.0 }
 0x9ff   :  { %v1884_v12 = vpop.f32.mrb[74].mxu1  ;;  %2053 = vadd.xlane.f32.xlu0 %v2052_v40 }
 0xa00   :  { %v7932_v43 = vadd.f32 %v5046_v55, %v2030_v32  ;;  %v2006_v14 = vadd.f32 %v2005_v63, %v1884_v12  ;;  %v5965_v31 = vpop.f32.mrb[75].mxu1 }
 0xa02   :  { %v2031_v42 = vadd.f32 %v2006_v14, %v7189_v30  ;;  %v2055_v16 = vsel %vm251_vm3, %v7932_v43, 0.0 }
 0xa03   :  { %v1889_v48 = vpop.f32.mrb[76].mxu1  ;;  %2056 = vadd.xlane.f32.xlu1 %v2055_v16 }
 0xa04   :  { %v7937_v33 = vadd.f32 %v5046_v55, %v2031_v42  ;;  %v2011_v19 = vadd.f32 %v2010_v21, %v1889_v48  ;;  %v5968_v23 = vpop.f32.mrb[77].mxu1 }
 0xa06   :  { %v2032_v36 = vadd.f32 %v2011_v19, %v7196_v37  ;;  %v2058_v38 = vsel %vm251_vm3, %v7937_v33, 0.0 }
 0xa07   :  { %v1894_v17 = vpop.f32.mrb[78].mxu1  ;;  %2059 = vadd.xlane.f32.xlu0 %v2058_v38 }
 0xa08   :  { %v7942_v22 = vadd.f32 %v5046_v55, %v2032_v36  ;;  %v2016_v49 = vadd.f32 %v2015_v45, %v1894_v17  ;;  %v5971_v30 = vpop.f32.mrb[79].mxu1  ;;  %v2171_v17 = vld [vmem:[%s9187_s17 + $0x10] sm:$0xff] }
 0xa0a   :  { %v2033_v27 = vadd.f32 %v2016_v49, %v7203_v44  ;;  %v2061_v60 = vsel %vm251_vm3, %v7942_v22, 0.0  ;;  %v2172_v49 = vld [vmem:[%s9187_s17 + $0x18] sm:$0xff] }
 0xa0b   :  { %v1899_v18 = vpop.f32.mrb[80].mxu1  ;;  %2062 = vadd.xlane.f32.xlu1 %v2061_v60  ;;  %v6648_v30 = vpack.c.bf16 %v2172_v49, %v2171_v17  ;;  %v2309_v60 = vld [vmem:[%s9188_s19 + $0x8] sm:$0xff] }
 0xa0c   :  { %v7947_v39 = vadd.f32 %v5046_v55, %v2033_v27  ;;  %v2021_v46 = vadd.f32 %v2020_v26, %v1899_v18  ;;  %v5974_v37 = vpop.f32.mrb[81].mxu1  ;;  %v2308_v27 = vld [vmem:[%s9188_s19] sm:$0xff]  ;;  %v2310_v18 = vld [vmem:[%s9188_s19 + $0x10] sm:$0xff] }
 0xa0d   :  { %6649 = vmatpush3.bf16.msra.mxu1 %v6648_v30  ;;  %v2311_v37 = vld [vmem:[%s9188_s19 + $0x18] sm:$0xff] }
 0xa0e   :  { %v2034_v50 = vadd.f32 %v2021_v46, %v7210_v51  ;;  %v2064_v25 = vsel %vm251_vm3, %v7947_v39, 0.0  ;;  %6674 = vmatprep.subr.bf16.mxu1 %v6988_v59  ;;  %v6651_v46 = vpack.c.bf16 %v2309_v60, %v2308_v27 }
 0xa0f   :  { %v1904_v61 = vpop.f32.mrb[82].mxu1  ;;  %2065 = vadd.xlane.f32.xlu0 %v2064_v25  ;;  %v2312_v25 = vld [vmem:[%s9188_s19 + $0x20] sm:$0xff] }
 0xa10   :  { %v7952_v56 = vadd.f32 %v5046_v55, %v2034_v50  ;;  %v2026_v20 = vadd.f32 %v2025_v47, %v1904_v61  ;;  %v5977_v44 = vpop.f32.mrb[83].mxu1  ;;  %6652 = vmatpush3.bf16.msra.mxu0 %v6651_v46  ;;  %v6654_v50 = vpack.c.bf16 %v2311_v37, %v2310_v18  ;;  %v2313_v61 = vld [vmem:[%s9188_s19 + $0x28] sm:$0xff] }
 0xa11   :  { %6653 = vmatprep.subr.bf16.mxu0 %v6988_v59  ;;  %v2314_v44 = vld [vmem:[%s9188_s19 + $0x30] sm:$0xff] }
 0xa12   :  { %v2035_v52 = vadd.f32 %v2026_v20, %v7217_v57  ;;  %v2067_v34 = vsel %vm251_vm3, %v7952_v56, 0.0  ;;  %v6657_v20 = vpack.c.bf16 %v2313_v61, %v2312_v25 }
 0xa13   :  { %2068 = vadd.xlane.f32.xlu1 %v2067_v34 }
 0xa14   :  { %v7957_v28 = vadd.f32 %v5046_v55, %v2035_v52  ;;  %6655 = vmatpush3.bf16.msra.mxu0 %v6654_v50  ;;  %v2315_v52 = vld [vmem:[%s9188_s19 + $0x38] sm:$0xff] }
 0xa15   :  { %6656 = vmatprep.subr.bf16.mxu0 %v6988_v59  ;;  %v6660_v34 = vpack.c.bf16 %v2315_v52, %v2314_v44 }
 0xa16   :  { %v2070_v51 = vsel %vm270_vm4, %v7957_v28, 0.0 }
 0xa17   :  { %2071 = vadd.xlane.f32.xlu0 %v2070_v51  ;;  %v2316_v51 = vld [vmem:[%s9188_s19 + $0x40] sm:$0xff] }
 0xa18   :  { %6658 = vmatpush3.bf16.msra.mxu0 %v6657_v20  ;;  %v6663_v7 = vpack.c.bf16 %v2317_v4, %v2316_v51 }
 0xa19   :  { %6659 = vmatprep.subr.bf16.mxu0 %v6988_v59 }
 0xa1c   :  { %6661 = vmatpush3.bf16.msra.mxu0 %v6660_v34 }
 0xa1d   :  { %6662 = vmatprep.subr.bf16.mxu0 %v6988_v59 }
 0xa20   :  { %6664 = vmatpush3.bf16.msra.mxu0 %v6663_v7 }
 0xa21   :  { %6665 = vmatprep.subr.bf16.mxu0 %v6988_v59 }
 0xa8c   :  { %v2054_v57 = vpop.xlane.xlu0 %2053 }
 0xa8d   :  { %v2073_v54 = vmul.f32 0.03125, %v2054_v57  ;;  %v2319_v57 = vld [vmem:[%s9188_s19 + $0x58] sm:$0xff] }
 0xa8f   :  { %v7969_v13 = vsub.f32 %v7927_v35, %v2073_v54  ;;  %v6666_v54 = vpack.c.bf16 %v2319_v57, %v2318_v9 }
 0xa90   :  { %v2057_v2 = vpop.xlane.xlu1 %2056 }
 0xa91   :  { %v2074_v58 = vmul.f32 0.03125, %v2057_v2  ;;  %v2087_v63 = vmul.f32 %v7969_v13, %v7969_v13  ;;  %v2320_v2 = vld [vmem:[%s9188_s19 + $0x60] sm:$0xff]  ;;  %6667 = vmatpush3.bf16.msra.mxu0 %v6666_v54 }
 0xa92   :  { %6668 = vmatprep.subr.bf16.mxu0 %v6988_v59 }
 0xa93   :  { %v7974_v5 = vsub.f32 %v7932_v43, %v2074_v58  ;;  %v2094_v21 = vsel %vm251_vm3, %v2087_v63, 0.0  ;;  %v2321_v58 = vld [vmem:[%s9188_s19 + $0x68] sm:$0xff] }
 0xa94   :  { %v2060_v41 = vpop.xlane.xlu0 %2059  ;;  %2095 = vadd.xlane.f32.xlu1 %v2094_v21  ;;  %v6669_v63 = vpack.c.bf16 %v2321_v58, %v2320_v2 }
 0xa95   :  { %v2075_v45 = vmul.f32 0.03125, %v2060_v41  ;;  %v2088_v24 = vmul.f32 %v7974_v5, %v7974_v5 }
 0xa96   :  { %6670 = vmatpush3.bf16.msra.mxu0 %v6669_v63 }
 0xa97   :  { %v7980_v26 = vsub.f32 %v7937_v33, %v2075_v45  ;;  %v2097_v15 = vsel %vm251_vm3, %v2088_v24, 0.0  ;;  %6671 = vmatprep.subr.bf16.mxu0 %v6988_v59 }
 0xa98   :  { %v2063_v47 = vpop.xlane.xlu1 %2062  ;;  %2098 = vadd.xlane.f32.xlu0 %v2097_v15 }
 0xa99   :  { %v2076_v29 = vmul.f32 0.03125, %v2063_v47  ;;  %v2089_v10 = vmul.f32 %v7980_v26, %v7980_v26 }
 0xa9b   :  { %v7986_v62 = vsub.f32 %v7942_v22, %v2076_v29  ;;  %v2100_v8 = vsel %vm251_vm3, %v2089_v10, 0.0 }
 0xa9c   :  { %v2066_v55 = vpop.xlane.xlu0 %2065  ;;  %2101 = vadd.xlane.f32.xlu1 %v2100_v8 }
 0xa9d   :  { %v2077_v53 = vmul.f32 0.03125, %v2066_v55  ;;  %v2090_v6 = vmul.f32 %v7986_v62, %v7986_v62 }
 0xa9f   :  { %v7992_v11 = vsub.f32 %v7947_v39, %v2077_v53  ;;  %v2103_v1 = vsel %vm251_vm3, %v2090_v6, 0.0 }
 0xaa0   :  { %v2069_v32 = vpop.xlane.xlu1 %2068  ;;  %2104 = vadd.xlane.f32.xlu0 %v2103_v1  ;;  %v5047_v1 = vld [vmem:[%s9189_s15] ss:$0 sm:$0xff] }
 0xaa1   :  { %v2078_v40 = vmul.f32 0.03125, %v2069_v32  ;;  %v2091_v12 = vmul.f32 %v7992_v11, %v7992_v11 }
 0xaa3   :  { %v7998_v14 = vsub.f32 %v7952_v56, %v2078_v40  ;;  %v2106_v31 = vsel %vm251_vm3, %v2091_v12, 0.0 }
 0xaa4   :  { %2107 = vadd.xlane.f32.xlu1 %v2106_v31  ;;  %v2072_v42 = vpop.xlane.xlu0 %2071  ;;  %v5048_v31 = vld [vmem:[%s9190_s16] ss:$0 sm:$0xff] }
 0xaa5   :  { %v2079_v16 = vmul.f32 0.03125, %v2072_v42  ;;  %v2092_v48 = vmul.f32 %v7998_v14, %v7998_v14 }
 0xaa7   :  { %v8004_v19 = vsub.f32 %v7957_v28, %v2079_v16  ;;  %v2109_v23 = vsel %vm251_vm3, %v2092_v48, 0.0 }
 0xaa8   :  { %2110 = vadd.xlane.f32.xlu0 %v2109_v23 }
 0xaa9   :  { %v2093_v36 = vmul.f32 %v8004_v19, %v8004_v19 }
 0xaab   :  { %v2112_v38 = vsel %vm270_vm4, %v2093_v36, 0.0 }
 0xaac   :  { %2113 = vadd.xlane.f32.xlu1 %v2112_v38 }
 0xb21   :  { %v2096_v21 = vpop.xlane.xlu1 %2095 }
 0xb22   :  { %v2115_v41 = vmul.f32 0.03125, %v2096_v21  ;;  %v5049_v21 = vld [vmem:[%s9191_s18] ss:$0 sm:$0xff] }
 0xb24   :  { %v2122_v45 = vadd.f32 1e-06, %v2115_v41 }
 0xb25   :  { %v2099_v24 = vpop.xlane.xlu0 %2098 }
 0xb26   :  { %6867 = vrsqrt.f32 %v2122_v45  ;;  %v2116_v15 = vmul.f32 0.03125, %v2099_v24 }
 0xb28   :  { %v2123_v47 = vadd.f32 1e-06, %v2116_v15 }
 0xb29   :  { %v2102_v29 = vpop.xlane.xlu1 %2101 }
 0xb2a   :  { %6869 = vrsqrt.f32 %v2123_v47  ;;  %v2117_v10 = vmul.f32 0.03125, %v2102_v29 }
 0xb2c   :  { %v2124_v8 = vadd.f32 1e-06, %v2117_v10 }
 0xb2d   :  { %v2105_v55 = vpop.xlane.xlu0 %2104 }
 0xb2e   :  { %6871 = vrsqrt.f32 %v2124_v8  ;;  %v2118_v53 = vmul.f32 0.03125, %v2105_v55 }
 0xb30   :  { %v6868_v6 = vpop.eup %6867  ;;  %v2125_v32 = vadd.f32 1e-06, %v2118_v53 }
 0xb31   :  { %v2136_v40 = vmul.f32 %v6868_v6, %v7969_v13  ;;  %v2108_v12 = vpop.xlane.xlu1 %2107 }
 0xb32   :  { %6873 = vrsqrt.f32 %v2125_v32  ;;  %v2119_v42 = vmul.f32 0.03125, %v2108_v12 }
 0xb33   :  { %v2149_v16 = vmul.f32 %v5047_v1, %v2136_v40 }
 0xb34   :  { %v6870_v48 = vpop.eup %6869  ;;  %v2126_v23 = vadd.f32 1e-06, %v2119_v42 }
 0xb35   :  { %v2162_v36 = vadd.f32 %v5048_v31, %v2149_v16  ;;  %v2111_v38 = vpop.xlane.xlu0 %2110  ;;  %v2137_v17 = vmul.f32 %v6870_v48, %v7974_v5 }
 0xb36   :  { %6875 = vrsqrt.f32 %v2126_v23  ;;  %v2120_v49 = vmul.f32 0.03125, %v2111_v38 }
 0xb37   :  { %6012 = vmatmul.mubr.msk.f32.vlgmr.msra.gmra.mrb[84].mxu1 %vm251_vm3, %v2162_v36  ;;  %v2150_v30 = vmul.f32 %v5047_v1, %v2137_v17 }
 0xb38   :  { %v6872_v13 = vpop.eup %6871  ;;  %v2127_v27 = vadd.f32 1e-06, %v2120_v49  ;;  %6014 = vmatprep.mubr.msk.f32.mxu1 %vm6987_vm2, %v6986_v0 }
 0xb39   :  { %v2114_v60 = vpop.xlane.xlu1 %2113  ;;  %v2163_v18 = vadd.f32 %v5048_v31, %v2150_v30  ;;  %v2138_v46 = vmul.f32 %v6872_v13, %v7980_v26 }
 0xb3a   :  { %6877 = vrsqrt.f32 %v2127_v27  ;;  %v2121_v37 = vmul.f32 0.03125, %v2114_v60 }
 0xb3b   :  { %6015 = vmatmul.mubr.msk.f32.gmra.mrb[86].mxu1 %vm251_vm3, %v2163_v18  ;;  %v2151_v50 = vmul.f32 %v5047_v1, %v2138_v46  ;;  %v5057_v46 = vld [vmem:[%s9192_s20] ss:$0 sm:$0xff] }
 0xb3c   :  { %v6874_v5 = vpop.eup %6873  ;;  %v2128_v25 = vadd.f32 1e-06, %v2121_v37  ;;  %6017 = vmatprep.mubr.msk.f32.mxu1 %vm6987_vm2, %v6986_v0 }
 0xb3d   :  { %v2164_v61 = vadd.f32 %v5048_v31, %v2151_v50  ;;  %v2139_v20 = vmul.f32 %v6874_v5, %v7986_v62 }
 0xb3e   :  { %6879 = vrsqrt.f32 %v2128_v25 }
 0xb3f   :  { %6018 = vmatmul.mubr.msk.f32.gmra.mrb[88].mxu1 %vm251_vm3, %v2164_v61  ;;  %v2152_v44 = vmul.f32 %v5047_v1, %v2139_v20 }
 0xb40   :  { %v6876_v52 = vpop.eup %6875  ;;  %6020 = vmatprep.mubr.msk.f32.mxu1 %vm6987_vm2, %v6986_v0 }
 0xb41   :  { %v2165_v26 = vadd.f32 %v5048_v31, %v2152_v44  ;;  %v2140_v34 = vmul.f32 %v6876_v52, %v7992_v11 }
 0xb43   :  { %6021 = vmatmul.mubr.msk.f32.gmra.mrb[90].mxu1 %vm251_vm3, %v2165_v26  ;;  %v2153_v51 = vmul.f32 %v5047_v1, %v2140_v34 }
 0xb44   :  { %v6878_v4 = vpop.eup %6877  ;;  %6023 = vmatprep.mubr.msk.f32.mxu1 %vm6987_vm2, %v6986_v0 }
 0xb45   :  { %v2166_v7 = vadd.f32 %v5048_v31, %v2153_v51  ;;  %v2141_v62 = vmul.f32 %v6878_v4, %v7998_v14  ;;  %v2322_v14 = vld [vmem:[%s9188_s19 + $0x70] sm:$0xff] }
 0xb47   :  { %6024 = vmatmul.mubr.msk.f32.gmra.mrb[92].mxu1 %vm251_vm3, %v2166_v7  ;;  %v2154_v9 = vmul.f32 %v5047_v1, %v2141_v62 }
 0xb48   :  { %v6880_v57 = vpop.eup %6879  ;;  %6026 = vmatprep.mubr.msk.f32.mxu1 %vm6987_vm2, %v6986_v0 }
 0xb49   :  { %v2167_v54 = vadd.f32 %v5048_v31, %v2154_v9  ;;  %v2142_v11 = vmul.f32 %v6880_v57, %v8004_v19  ;;  %v2323_v19 = vld [vmem:[%s9188_s19 + $0x78] sm:$0xff] }
 0xb4a   :  { %v6672_v63 = vpack.c.bf16 %v2323_v19, %v2322_v14 }
 0xb4b   :  { %6027 = vmatmul.mubr.msk.f32.gmra.mrb[94].mxu1 %vm251_vm3, %v2167_v54  ;;  %v2155_v2 = vmul.f32 %v5047_v1, %v2142_v11 }
 0xb4c   :  { %6029 = vmatprep.mubr.msk.f32.mxu1 %vm6987_vm2, %v6986_v0  ;;  %6673 = vmatpush3.bf16.msra.mxu0 %v6672_v63 }
 0xb4d   :  { %v2168_v58 = vadd.f32 %v5048_v31, %v2155_v2  ;;  %6680 = vmatprep.subr.bf16.mxu0 %v6988_v59 }
 0xb4f   :  { %6030 = vmatmul.mubr.msk.f32.gmra.mrb[96].mxu1 %vm251_vm3, %v2168_v58 }
 0xb50   :  { %6093 = vmatprep.mubr.msk.f32.mxu1 %vm6987_vm2, %v6986_v0 }
 0xc0a   :  { %v2267_v41 = vpop.f32.mrb[84].mxu1 }
 0xc0b   :  { %v2268_v45 = vadd.f32 %v5049_v21, %v2267_v41  ;;  %v6013_v24 = vpop.f32.mrb[85].mxu1 }
 0xc0d   :  { %v2301_v15 = vmax.f32 %v2268_v45, 0.0 }
 0xc0e   :  { %v2272_v47 = vpop.f32.mrb[86].mxu1 }
 0xc0f   :  { %v2273_v29 = vadd.f32 %v5049_v21, %v2272_v47  ;;  %v6016_v10 = vpop.f32.mrb[87].mxu1  ;;  %6065 = vmatmul.mubr.f32.vlgmr.msra.gmra.mrb[98].mxu0 %v2301_v15  ;;  %v5075_v47 = vld [vmem:[%s9222_s1 + $0x40] sm:$0xff] }
 0xc10   :  { %6067 = vmatprep.mubr.msk.f32.mxu0 %vm6987_vm2, %v6986_v0 }
 0xc11   :  { %v2302_v8 = vmax.f32 %v2273_v29, 0.0  ;;  %v5076_v29 = vld [vmem:[%s9222_s1 + $0x48] sm:$0xff] }
 0xc12   :  { %v2277_v55 = vpop.f32.mrb[88].mxu1 }
 0xc13   :  { %v2278_v53 = vadd.f32 %v5049_v21, %v2277_v55  ;;  %v6019_v6 = vpop.f32.mrb[89].mxu1  ;;  %6068 = vmatmul.mubr.f32.gmra.mrb[100].mxu0 %v2302_v8 }
 0xc14   :  { %6070 = vmatprep.mubr.msk.f32.mxu0 %vm6987_vm2, %v6986_v0 }
 0xc15   :  { %v2303_v1 = vmax.f32 %v2278_v53, 0.0 }
 0xc16   :  { %v2282_v32 = vpop.f32.mrb[90].mxu1 }
 0xc17   :  { %v2283_v40 = vadd.f32 %v5049_v21, %v2282_v32  ;;  %v6022_v12 = vpop.f32.mrb[91].mxu1  ;;  %6071 = vmatmul.mubr.f32.gmra.mrb[102].mxu0 %v2303_v1 }
 0xc18   :  { %6073 = vmatprep.mubr.msk.f32.mxu0 %vm6987_vm2, %v6986_v0 }
 0xc19   :  { %v2304_v31 = vmax.f32 %v2283_v40, 0.0 }
 0xc1a   :  { %v2287_v42 = vpop.f32.mrb[92].mxu1 }
 0xc1b   :  { %v2288_v16 = vadd.f32 %v5049_v21, %v2287_v42  ;;  %v6025_v48 = vpop.f32.mrb[93].mxu1  ;;  %6074 = vmatmul.mubr.f32.gmra.mrb[104].mxu0 %v2304_v31 }
 0xc1c   :  { %6076 = vmatprep.mubr.msk.f32.mxu0 %vm6987_vm2, %v6986_v0 }
 0xc1d   :  { %v2305_v23 = vmax.f32 %v2288_v16, 0.0 }
 0xc1e   :  { %v2292_v36 = vpop.f32.mrb[94].mxu1 }
 0xc1f   :  { %v2293_v38 = vadd.f32 %v5049_v21, %v2292_v36  ;;  %v6028_v17 = vpop.f32.mrb[95].mxu1  ;;  %6077 = vmatmul.mubr.f32.gmra.mrb[106].mxu0 %v2305_v23 }
 0xc20   :  { %6079 = vmatprep.mubr.msk.f32.mxu0 %vm6987_vm2, %v6986_v0 }
 0xc21   :  { %v2306_v49 = vmax.f32 %v2293_v38, 0.0 }
 0xc22   :  { %v2297_v30 = vpop.f32.mrb[96].mxu1 }
 0xc23   :  { %v2298_v13 = vadd.f32 %v5049_v21, %v2297_v30  ;;  %v6031_v27 = vpop.f32.mrb[97].mxu1  ;;  %6080 = vmatmul.mubr.f32.gmra.mrb[108].mxu0 %v2306_v49 }
 0xc24   :  { %6082 = vmatprep.mubr.msk.f32.mxu0 %vm6987_vm2, %v6986_v0 }
 0xc25   :  { %v2307_v60 = vmax.f32 %v2298_v13, 0.0 }
 0xc27   :  { %6083 = vmatmul.mubr.f32.gmra.mrb[110].mxu0 %v2307_v60 }
 0xc28   :  { %6122 = vmatprep.mubr.msk.f32.mxu0 %vm6987_vm2, %v6986_v0 }
 0xce2   :  { %v2390_v18 = vpop.f32.mrb[98].mxu0 }
 0xce3   :  { %v2424_v37 = vadd.f32 %v2390_v18, %v7927_v35  ;;  %v6066_v50 = vpop.f32.mrb[99].mxu0 }
 0xce5   :  { %v8128_v5 = vadd.f32 %v5057_v46, %v2424_v37 }
 0xce6   :  { %v2395_v25 = vpop.f32.mrb[100].mxu0 }
 0xce7   :  { %v2425_v61 = vadd.f32 %v2395_v25, %v7932_v43  ;;  %v6069_v20 = vpop.f32.mrb[101].mxu0  ;;  %v2449_v44 = vsel %vm251_vm3, %v8128_v5, 0.0 }
 0xce8   :  { %2450 = vadd.xlane.f32.xlu0 %v2449_v44 }
 0xce9   :  { %v8133_v52 = vadd.f32 %v5057_v46, %v2425_v61 }
 0xcea   :  { %v2400_v26 = vpop.f32.mrb[102].mxu0 }
 0xceb   :  { %v2426_v34 = vadd.f32 %v2400_v26, %v7937_v33  ;;  %v6072_v51 = vpop.f32.mrb[103].mxu0  ;;  %v2452_v35 = vsel %vm251_vm3, %v8133_v52, 0.0 }
 0xcec   :  { %2453 = vadd.xlane.f32.xlu1 %v2452_v35 }
 0xced   :  { %v8138_v4 = vadd.f32 %v5057_v46, %v2426_v34 }
 0xcee   :  { %v2405_v7 = vpop.f32.mrb[104].mxu0 }
 0xcef   :  { %v2427_v43 = vadd.f32 %v2405_v7, %v7942_v22  ;;  %v6075_v62 = vpop.f32.mrb[105].mxu0  ;;  %v2455_v9 = vsel %vm251_vm3, %v8138_v4, 0.0 }
 0xcf0   :  { %2456 = vadd.xlane.f32.xlu0 %v2455_v9  ;;  %v5063_v62 = vld [vmem:[%s9223_s7 + $0x48] sm:$0xff] }
 0xcf1   :  { %v8143_v57 = vadd.f32 %v5057_v46, %v2427_v43  ;;  %v5062_v43 = vld [vmem:[%s9223_s7 + $0x40] sm:$0xff] }
 0xcf2   :  { %v2410_v54 = vpop.f32.mrb[106].mxu0  ;;  %v6675_v9 = vpack.c.bf16 %v5063_v62, %v5062_v43 }
 0xcf3   :  { %v2428_v33 = vadd.f32 %v2410_v54, %v7947_v39  ;;  %v6078_v11 = vpop.f32.mrb[107].mxu0  ;;  %v2458_v2 = vsel %vm251_vm3, %v8143_v57, 0.0  ;;  %v5077_v54 = vld [vmem:[%s9222_s1 + $0x50] sm:$0xff] }
 0xcf4   :  { %2459 = vadd.xlane.f32.xlu1 %v2458_v2  ;;  %6676 = vmatpush3.bf16.msra.mxu1 %v6675_v9  ;;  %v5064_v11 = vld [vmem:[%s9223_s7 + $0x50] sm:$0xff] }
 0xcf5   :  { %v8148_v58 = vadd.f32 %v5057_v46, %v2428_v33  ;;  %v5078_v33 = vld [vmem:[%s9222_s1 + $0x58] sm:$0xff]  ;;  %6677 = vmatprep.subr.bf16.mxu1 %v6988_v59 }
 0xcf6   :  { %v2415_v14 = vpop.f32.mrb[108].mxu0  ;;  %v6684_v2 = vpack.c.bf16 %v5078_v33, %v5077_v54 }
 0xcf7   :  { %v2429_v22 = vadd.f32 %v2415_v14, %v7952_v56  ;;  %v6081_v19 = vpop.f32.mrb[109].mxu0  ;;  %v2461_v63 = vsel %vm251_vm3, %v8148_v58, 0.0  ;;  %v5065_v14 = vld [vmem:[%s9223_s7 + $0x58] sm:$0xff] }
 0xcf8   :  { %2462 = vadd.xlane.f32.xlu0 %v2461_v63 }
 0xcf9   :  { %v8153_v21 = vadd.f32 %v5057_v46, %v2429_v22  ;;  %v6678_v22 = vpack.c.bf16 %v5065_v14, %v5064_v11 }
 0xcfa   :  { %v2420_v41 = vpop.f32.mrb[110].mxu0 }
 0xcfb   :  { %v2430_v39 = vadd.f32 %v2420_v41, %v7957_v28  ;;  %v6084_v45 = vpop.f32.mrb[111].mxu0  ;;  %v2464_v24 = vsel %vm251_vm3, %v8153_v21, 0.0  ;;  %v6681_v28 = vpack.c.bf16 %v5076_v29, %v5075_v47  ;;  %6679 = vmatpush3.bf16.msra.mxu1 %v6678_v22 }
 0xcfc   :  { %2465 = vadd.xlane.f32.xlu1 %v2464_v24  ;;  %6686 = vmatprep.subr.bf16.mxu1 %v6988_v59 }
 0xcfd   :  { %v8158_v15 = vadd.f32 %v5057_v46, %v2430_v39  ;;  %6682 = vmatpush3.bf16.msra.mxu0 %v6681_v28 }
 0xcfe   :  { %6683 = vmatprep.subr.bf16.mxu0 %v6988_v59 }
 0xcff   :  { %v2467_v56 = vsel %vm270_vm4, %v8158_v15, 0.0 }
 0xd00   :  { %2468 = vadd.xlane.f32.xlu0 %v2467_v56 }
 0xd01   :  { %6685 = vmatpush3.bf16.msra.mxu0 %v6684_v2 }
 0xd02   :  { %6692 = vmatprep.subr.bf16.mxu0 %v6988_v59 }
 0xd75   :  { %v2451_v10 = vpop.xlane.xlu0 %2450 }
 0xd76   :  { %v2470_v8 = vmul.f32 0.03125, %v2451_v10 }
 0xd78   :  { %v8170_v55 = vsub.f32 %v8128_v5, %v2470_v8 }
 0xd79   :  { %v2454_v53 = vpop.xlane.xlu1 %2453 }
 0xd7a   :  { %v2471_v6 = vmul.f32 0.03125, %v2454_v53  ;;  %v2484_v1 = vmul.f32 %v8170_v55, %v8170_v55  ;;  %v8235_v53 = vld [vmem:[%s9224_s10 + $0x1] ss:$0 sm:$0xff] }
 0xd7c   :  { %v8175_v32 = vsub.f32 %v8133_v52, %v2471_v6  ;;  %v2491_v40 = vsel %vm251_vm3, %v2484_v1, 0.0 }
 0xd7d   :  { %v2457_v12 = vpop.xlane.xlu0 %2456  ;;  %2492 = vadd.xlane.f32.xlu1 %v2491_v40 }
 0xd7e   :  { %v2472_v31 = vmul.f32 0.03125, %v2457_v12  ;;  %v2485_v42 = vmul.f32 %v8175_v32, %v8175_v32  ;;  %v8241_v12 = vld [vmem:[%s9225_s4 + $0x1] ss:$0 sm:$0xff] }
 0xd80   :  { %v8181_v16 = vsub.f32 %v8138_v4, %v2472_v31  ;;  %v2494_v48 = vsel %vm251_vm3, %v2485_v42, 0.0  ;;  %v5088_v42 = vld [vmem:[%s9226_s6 + $0x40] sm:$0xff] }
 0xd81   :  { %v2460_v23 = vpop.xlane.xlu1 %2459  ;;  %2495 = vadd.xlane.f32.xlu0 %v2494_v48  ;;  %v5089_v48 = vld [vmem:[%s9226_s6 + $0x48] sm:$0xff] }
 0xd82   :  { %v2473_v36 = vmul.f32 0.03125, %v2460_v23  ;;  %v2486_v38 = vmul.f32 %v8181_v16, %v8181_v16 }
 0xd84   :  { %v8187_v17 = vsub.f32 %v8143_v57, %v2473_v36  ;;  %v2497_v49 = vsel %vm251_vm3, %v2486_v38, 0.0 }
 0xd85   :  { %v2463_v30 = vpop.xlane.xlu0 %2462  ;;  %2498 = vadd.xlane.f32.xlu1 %v2497_v49 }
 0xd86   :  { %v2474_v13 = vmul.f32 0.03125, %v2463_v30  ;;  %v2487_v27 = vmul.f32 %v8187_v17, %v8187_v17 }
 0xd88   :  { %v8193_v60 = vsub.f32 %v8148_v58, %v2474_v13  ;;  %v2500_v18 = vsel %vm251_vm3, %v2487_v27, 0.0  ;;  %v6687_v13 = vpack.c.bf16 %v5089_v48, %v5088_v42 }
 0xd89   :  { %v2466_v46 = vpop.xlane.xlu1 %2465  ;;  %2501 = vadd.xlane.f32.xlu0 %v2500_v18  ;;  %v5090_v18 = vld [vmem:[%s9226_s6 + $0x50] sm:$0xff] }
 0xd8a   :  { %v2475_v37 = vmul.f32 0.03125, %v2466_v46  ;;  %v2488_v50 = vmul.f32 %v8193_v60, %v8193_v60  ;;  %v5091_v46 = vld [vmem:[%s9226_s6 + $0x58] sm:$0xff] }
 0xd8c   :  { %v8199_v25 = vsub.f32 %v8153_v21, %v2475_v37  ;;  %v2503_v61 = vsel %vm251_vm3, %v2488_v50, 0.0 }
 0xd8d   :  { %2504 = vadd.xlane.f32.xlu1 %v2503_v61  ;;  %v2469_v20 = vpop.xlane.xlu0 %2468 }
 0xd8e   :  { %v2476_v44 = vmul.f32 0.03125, %v2469_v20  ;;  %v2489_v26 = vmul.f32 %v8199_v25, %v8199_v25 }
 0xd90   :  { %v8205_v34 = vsub.f32 %v8158_v15, %v2476_v44  ;;  %v2506_v51 = vsel %vm251_vm3, %v2489_v26, 0.0  ;;  %v6690_v26 = vpack.c.bf16 %v5091_v46, %v5090_v18 }
 0xd91   :  { %2507 = vadd.xlane.f32.xlu0 %v2506_v51 }
 0xd92   :  { %v2490_v35 = vmul.f32 %v8205_v34, %v8205_v34 }
 0xd94   :  { %v2509_v7 = vsel %vm270_vm4, %v2490_v35, 0.0 }
 0xd95   :  { %2510 = vadd.xlane.f32.xlu1 %v2509_v7 }
 0xe0a   :  { %v2493_v19 = vpop.xlane.xlu1 %2492 }
 0xe0b   :  { %v2512_v63 = vmul.f32 0.03125, %v2493_v19 }
 0xe0d   :  { %v2519_v41 = vadd.f32 1e-06, %v2512_v63 }
 0xe0e   :  { %v2496_v39 = vpop.xlane.xlu0 %2495 }
 0xe0f   :  { %6881 = vrsqrt.f32 %v2519_v41  ;;  %v2513_v45 = vmul.f32 0.03125, %v2496_v39 }
 0xe11   :  { %v2520_v24 = vadd.f32 1e-06, %v2513_v45 }
 0xe12   :  { %v2499_v56 = vpop.xlane.xlu1 %2498 }
 0xe13   :  { %6883 = vrsqrt.f32 %v2520_v24  ;;  %v2514_v47 = vmul.f32 0.03125, %v2499_v56 }
 0xe15   :  { %v2521_v29 = vadd.f32 1e-06, %v2514_v47  ;;  %v5080_v47 = vld [vmem:[%s9227_s5 + $0x2] ss:$0 sm:$0xff] }
 0xe16   :  { %v2502_v28 = vpop.xlane.xlu0 %2501 }
 0xe17   :  { %6885 = vrsqrt.f32 %v2521_v29  ;;  %v2515_v10 = vmul.f32 0.03125, %v2502_v28 }
 0xe19   :  { %v6882_v8 = vpop.eup %6881  ;;  %v2522_v6 = vadd.f32 1e-06, %v2515_v10 }
 0xe1a   :  { %v2533_v1 = vmul.f32 %v6882_v8, %v8170_v55  ;;  %v2505_v40 = vpop.xlane.xlu1 %2504 }
 0xe1b   :  { %6887 = vrsqrt.f32 %v2522_v6  ;;  %v2516_v31 = vmul.f32 0.03125, %v2505_v40 }
 0xe1c   :  { %v2546_v23 = vmul.f32 %v8235_v53, %v2533_v1 }
 0xe1d   :  { %v6884_v36 = vpop.eup %6883  ;;  %v2523_v55 = vadd.f32 1e-06, %v2516_v31 }
 0xe1e   :  { %v8251_v38 = vadd.f32 %v8241_v12, %v2546_v23  ;;  %v2534_v49 = vmul.f32 %v6884_v36, %v8175_v32  ;;  %v2508_v30 = vpop.xlane.xlu0 %2507 }
 0xe1f   :  { %6889 = vrsqrt.f32 %v2523_v55  ;;  %v2517_v27 = vmul.f32 0.03125, %v2508_v30 }
 0xe20   :  { %v2547_v37 = vmul.f32 %v8235_v53, %v2534_v49  ;;  %6094 = vmatmul.mubr.msk.f32.vlgmr.msra.gmra.mrb[98].mxu1 %vm251_vm3, %v8251_v38  ;;  %6123 = vmatmul.mubr.msk.f32.vlgmr.msra.gmra.mrb[112].mxu0 %vm251_vm3, %v8251_v38 }
 0xe21   :  { %v6886_v32 = vpop.eup %6885  ;;  %v2524_v50 = vadd.f32 1e-06, %v2517_v27  ;;  %6096 = vmatprep.mubr.msk.f32.mxu1 %vm6987_vm2, %v6986_v0  ;;  %6125 = vmatprep.mubr.msk.f32.mxu0 %vm6987_vm2, %v6986_v0 }
 0xe22   :  { %v8270_v61 = vadd.f32 %v8241_v12, %v2547_v37  ;;  %v2535_v20 = vmul.f32 %v6886_v32, %v8181_v16  ;;  %v2511_v44 = vpop.xlane.xlu1 %2510  ;;  %6688 = vmatpush3.bf16.msra.mxu1 %v6687_v13 }
 0xe23   :  { %6891 = vrsqrt.f32 %v2524_v50  ;;  %v2518_v51 = vmul.f32 0.03125, %v2511_v44  ;;  %6689 = vmatprep.subr.bf16.mxu1 %v6988_v59 }
 0xe24   :  { %v2548_v35 = vmul.f32 %v8235_v53, %v2535_v20  ;;  %6097 = vmatmul.mubr.msk.f32.gmra.mrb[100].mxu1 %vm251_vm3, %v8270_v61  ;;  %6126 = vmatmul.mubr.msk.f32.gmra.mrb[114].mxu0 %vm251_vm3, %v8270_v61 }
 0xe25   :  { %v6888_v7 = vpop.eup %6887  ;;  %v2525_v43 = vadd.f32 1e-06, %v2518_v51  ;;  %6099 = vmatprep.mubr.msk.f32.mxu1 %vm6987_vm2, %v6986_v0  ;;  %6128 = vmatprep.mubr.msk.f32.mxu0 %vm6987_vm2, %v6986_v0 }
 0xe26   :  { %v8284_v16 = vadd.f32 %v8241_v12, %v2548_v35  ;;  %v2536_v62 = vmul.f32 %v6888_v7, %v8187_v17  ;;  %6691 = vmatpush3.bf16.msra.mxu1 %v6690_v26 }
 0xe27   :  { %6893 = vrsqrt.f32 %v2525_v43  ;;  %6704 = vmatprep.subr.bf16.mxu1 %v6988_v59 }
 0xe28   :  { %v2549_v9 = vmul.f32 %v8235_v53, %v2536_v62  ;;  %6100 = vmatmul.mubr.msk.f32.gmra.mrb[102].mxu1 %vm251_vm3, %v8284_v16  ;;  %6129 = vmatmul.mubr.msk.f32.gmra.mrb[116].mxu0 %vm251_vm3, %v8284_v16 }
 0xe29   :  { %v6890_v54 = vpop.eup %6889  ;;  %6102 = vmatprep.mubr.msk.f32.mxu1 %vm6987_vm2, %v6986_v0  ;;  %6131 = vmatprep.mubr.msk.f32.mxu0 %vm6987_vm2, %v6986_v0 }
 0xe2a   :  { %v8298_v17 = vadd.f32 %v8241_v12, %v2549_v9  ;;  %v2537_v33 = vmul.f32 %v6890_v54, %v8193_v60 }
 0xe2c   :  { %v2550_v11 = vmul.f32 %v8235_v53, %v2537_v33  ;;  %6103 = vmatmul.mubr.msk.f32.gmra.mrb[104].mxu1 %vm251_vm3, %v8298_v17  ;;  %6132 = vmatmul.mubr.msk.f32.gmra.mrb[118].mxu0 %vm251_vm3, %v8298_v17 }
 0xe2d   :  { %v6892_v2 = vpop.eup %6891  ;;  %6105 = vmatprep.mubr.msk.f32.mxu1 %vm6987_vm2, %v6986_v0  ;;  %6134 = vmatprep.mubr.msk.f32.mxu0 %vm6987_vm2, %v6986_v0 }
 0xe2e   :  { %v8311_v14 = vadd.f32 %v8241_v12, %v2550_v11  ;;  %v2538_v60 = vmul.f32 %v6892_v2, %v8199_v25  ;;  %v5093_v11 = vld [vmem:[%s9182_s12 + $0x2] ss:$0 sm:$0xff] }
 0xe2f   :  { %v5067_v2 = vld [vmem:[%s9183_s8 + $0x2] ss:$0 sm:$0xff] }
 0xe30   :  { %v2551_v22 = vmul.f32 %v8235_v53, %v2538_v60  ;;  %6106 = vmatmul.mubr.msk.f32.gmra.mrb[106].mxu1 %vm251_vm3, %v8311_v14  ;;  %6135 = vmatmul.mubr.msk.f32.gmra.mrb[120].mxu0 %vm251_vm3, %v8311_v14 }
 0xe31   :  { %v6894_v19 = vpop.eup %6893  ;;  %6108 = vmatprep.mubr.msk.f32.mxu1 %vm6987_vm2, %v6986_v0  ;;  %6137 = vmatprep.mubr.msk.f32.mxu0 %vm6987_vm2, %v6986_v0 }
 0xe32   :  { %v8324_v63 = vadd.f32 %v8241_v12, %v2551_v22  ;;  %v2539_v25 = vmul.f32 %v6894_v19, %v8205_v34  ;;  %v5125_v22 = vld [vmem:[%s9223_s7 + $0x60] sm:$0xff]  ;;  %v5126_v19 = vld [vmem:[%s9223_s7 + $0x68] sm:$0xff] }
 0xe34   :  { %v2552_v41 = vmul.f32 %v8235_v53, %v2539_v25  ;;  %6109 = vmatmul.mubr.msk.f32.gmra.mrb[108].mxu1 %vm251_vm3, %v8324_v63  ;;  %6138 = vmatmul.mubr.msk.f32.gmra.mrb[122].mxu0 %vm251_vm3, %v8324_v63 }
 0xe35   :  { %6111 = vmatprep.mubr.msk.f32.mxu1 %vm6987_vm2, %v6986_v0  ;;  %6140 = vmatprep.mubr.msk.f32.mxu0 %vm6987_vm2, %v6986_v0 }
 0xe36   :  { %v8337_v39 = vadd.f32 %v8241_v12, %v2552_v41 }
 0xe38   :  { %6112 = vmatmul.mubr.msk.f32.gmra.mrb[110].mxu1 %vm251_vm3, %v8337_v39  ;;  %6141 = vmatmul.mubr.msk.f32.gmra.mrb[124].mxu0 %vm251_vm3, %v8337_v39 }
 0xe39   :  { %6151 = vmatprep.mubr.msk.f32.mxu1 %vm6987_vm2, %v6986_v0  ;;  %6186 = vmatprep.mubr.msk.f32.mxu0 %vm6987_vm2, %v6986_v0 }
 0xe3c   :  { %6152 = vmatmul.mubr.msk.f32.vlgmr.msra.gmra.mrb[112].mxu1 %vm251_vm3, %v8251_v38 }
 0xe3d   :  { %6154 = vmatprep.mubr.msk.f32.mxu1 %vm6987_vm2, %v6986_v0 }
 0xe40   :  { %6155 = vmatmul.mubr.msk.f32.gmra.mrb[114].mxu1 %vm251_vm3, %v8270_v61 }
 0xe41   :  { %6157 = vmatprep.mubr.msk.f32.mxu1 %vm6987_vm2, %v6986_v0 }
 0xe44   :  { %6158 = vmatmul.mubr.msk.f32.gmra.mrb[116].mxu1 %vm251_vm3, %v8284_v16 }
 0xe45   :  { %6160 = vmatprep.mubr.msk.f32.mxu1 %vm6987_vm2, %v6986_v0 }
 0xe48   :  { %6161 = vmatmul.mubr.msk.f32.gmra.mrb[118].mxu1 %vm251_vm3, %v8298_v17 }
 0xe49   :  { %6163 = vmatprep.mubr.msk.f32.mxu1 %vm6987_vm2, %v6986_v0 }
 0xe4c   :  { %6164 = vmatmul.mubr.msk.f32.gmra.mrb[120].mxu1 %vm251_vm3, %v8311_v14 }
 0xe4d   :  { %6166 = vmatprep.mubr.msk.f32.mxu1 %vm6987_vm2, %v6986_v0 }
 0xe50   :  { %6167 = vmatmul.mubr.msk.f32.gmra.mrb[122].mxu1 %vm251_vm3, %v8324_v63 }
 0xe51   :  { %6169 = vmatprep.mubr.msk.f32.mxu1 %vm6987_vm2, %v6986_v0 }
 0xe54   :  { %6170 = vmatmul.mubr.msk.f32.gmra.mrb[124].mxu1 %vm251_vm3, %v8337_v39 }
 0xe55   :  { %6221 = vmatprep.mubr.msk.f32.mxu1 %vm6987_vm2, %v6986_v0 }
 0xef3   :  { %v2666_v34 = vpop.f32.mrb[98].mxu1  ;;  %v2779_v45 = vpop.f32.mrb[112].mxu0 }
 0xef4   :  { %v6095_v24 = vpop.f32.mrb[99].mxu1  ;;  %v6124_v56 = vpop.f32.mrb[113].mxu0  ;;  %v2780_v10 = vadd.f32 %v5080_v47, %v2779_v45 }
 0xef5   :  { %v2667_v56 = vadd.f32 %v5067_v2, %v2666_v34 }
 0xef7   :  { %v2671_v29 = vpop.f32.mrb[100].mxu1  ;;  %v2784_v28 = vpop.f32.mrb[114].mxu0 }
 0xef8   :  { %v2785_v8 = vadd.f32 %v5080_v47, %v2784_v28  ;;  %v6098_v53 = vpop.f32.mrb[101].mxu1  ;;  %v6127_v6 = vpop.f32.mrb[115].mxu0  ;;  %v6714_v28 = vpack.c.bf16 %v5126_v19, %v5125_v22  ;;  %v2672_v34 = vadd.f32 %v5067_v2, %v2671_v29 }
 0xefa   :  { %v6693_v1 = vpack.c.bf16 %v2785_v8, %v2780_v10  ;;  %v5128_v8 = vld [vmem:[%s9223_s7 + $0x78] sm:$0xff] }
 0xefb   :  { %v8378_v40 = vpop.f32.mrb[102].mxu1  ;;  %v2789_v12 = vpop.f32.mrb[116].mxu0 }
 0xefc   :  { %v6101_v31 = vpop.f32.mrb[103].mxu1  ;;  %v6130_v42 = vpop.f32.mrb[117].mxu0  ;;  %6695 = vmatpush3.bf16.xpose.msk.msra.mxu0 %vm7443_vm6, %v6693_v1  ;;  %v2790_v36 = vadd.f32 %v5080_v47, %v2789_v12 }
 0xefd   :  { %6696 = vmatprep.subr.bf16.mxu0 %v6988_v59 }
 0xeff   :  { %v8383_v48 = vpop.f32.mrb[104].mxu1  ;;  %v2794_v23 = vpop.f32.mrb[118].mxu0 }
 0xf00   :  { %v2795_v55 = vadd.f32 %v5080_v47, %v2794_v23  ;;  %v6104_v49 = vpop.f32.mrb[105].mxu1  ;;  %v6133_v30 = vpop.f32.mrb[119].mxu0 }
 0xf01   :  { %v2682_v30 = vadd.f32 %v5067_v2, %v8383_v48 }
 0xf02   :  { %v6697_v13 = vpack.c.bf16 %v2795_v55, %v2790_v36  ;;  %v2677_v36 = vadd.f32 %v5067_v2, %v8378_v40 }
 0xf03   :  { %v8385_v27 = vpop.f32.mrb[106].mxu1  ;;  %v2799_v18 = vpop.f32.mrb[120].mxu0 }
 0xf04   :  { %v6107_v46 = vpop.f32.mrb[107].mxu1  ;;  %v6136_v37 = vpop.f32.mrb[121].mxu0  ;;  %6699 = vmatpush3.bf16.xpose.msk.msra.mxu0 %vm7443_vm6, %v6697_v13  ;;  %v2800_v20 = vadd.f32 %v5080_v47, %v2799_v18 }
 0xf05   :  { %6700 = vmatprep.subr.bf16.mxu0 %v6988_v59  ;;  %v2687_v37 = vadd.f32 %v5067_v2, %v8385_v27 }
 0xf07   :  { %v8390_v32 = vpop.f32.mrb[108].mxu1  ;;  %v2804_v50 = vpop.f32.mrb[122].mxu0 }
 0xf08   :  { %v2805_v44 = vadd.f32 %v5080_v47, %v2804_v50  ;;  %v6110_v26 = vpop.f32.mrb[109].mxu1  ;;  %v6139_v51 = vpop.f32.mrb[123].mxu0  ;;  %v2692_v48 = vadd.f32 %v5067_v2, %v8390_v32  ;;  %v5152_v32 = vld [vmem:[%s9226_s6 + $0x68] sm:$0xff] }
 0xf09   :  { %v5151_v51 = vld [vmem:[%s9226_s6 + $0x60] sm:$0xff] }
 0xf0a   :  { %v6701_v35 = vpack.c.bf16 %v2805_v44, %v2800_v20 }
 0xf0b   :  { %v8392_v7 = vpop.f32.mrb[110].mxu1  ;;  %v2809_v43 = vpop.f32.mrb[124].mxu0 }
 0xf0c   :  { %v6113_v62 = vpop.f32.mrb[111].mxu1  ;;  %v6142_v9 = vpop.f32.mrb[125].mxu0  ;;  %6703 = vmatpush3.bf16.xpose.msk.msra.mxu0 %vm7443_vm6, %v6701_v35  ;;  %v2810_v60 = vadd.f32 %v5080_v47, %v2809_v43  ;;  %v5127_v47 = vld [vmem:[%s9223_s7 + $0x70] sm:$0xff]  ;;  %v2697_v27 = vadd.f32 %v5067_v2, %v8392_v7  ;;  %v6726_v35 = vpack.c.bf16 %v5152_v32, %v5151_v51  ;;  %v5154_v43 = vld [vmem:[%s9226_s6 + $0x78] sm:$0xff] }
 0xf0d   :  { %6184 = vmatprep.subr.mxu0 %v6986_v0  ;;  %v6717_v1 = vpack.c.bf16 %v5128_v8, %v5127_v47  ;;  %v5153_v7 = vld [vmem:[%s9226_s6 + $0x70] sm:$0xff] }
 0xf0e   :  { %v6729_v62 = vpack.c.bf16 %v5154_v43, %v5153_v7  ;;  %v8543_v47 = vld [vmem:[%s9184_s2 + $0x10] sm:$0xff] }
 0xf0f   :  { %v2892_v54 = vpop.f32.mrb[112].mxu1 }
 0xf10   :  { %v6153_v33 = vpop.f32.mrb[113].mxu1  ;;  %v2893_v41 = vadd.f32 %v5093_v11, %v2892_v54 }
 0xf13   :  { %v2897_v25 = vpop.f32.mrb[114].mxu1 }
 0xf14   :  { %v2898_v45 = vadd.f32 %v5093_v11, %v2897_v25  ;;  %v6156_v24 = vpop.f32.mrb[115].mxu1  ;;  %6185 = vmatpush3.xpose.msk.msra.mxu0 %vm725_vm5, %v2810_v60 }
 0xf15   :  { %6713 = vmatprep.subr.bf16.mxu0 %v6988_v59 }
 0xf16   :  { %v6705_v10 = vpack.c.bf16 %v2898_v45, %v2893_v41  ;;  %v8533_v41 = vld [vmem:[%s9184_s2 + $0x8] sm:$0xff] }
 0xf17   :  { %v2902_v53 = vpop.f32.mrb[116].mxu1  ;;  %6187 = vmatmul.mubr.msk.f32.vlgmr.msra.gmra.mrb[126].mxu0 %vm725_vm5, %v2667_v56 }
 0xf18   :  { %v6159_v6 = vpop.f32.mrb[117].mxu1  ;;  %6706 = vmatpush3.bf16.msra.mxu1 %v6705_v10  ;;  %6189 = vmatprep.mubr.msk.f32.mxu0 %vm6987_vm2, %v6986_v0  ;;  %v2903_v31 = vadd.f32 %v5093_v11, %v2902_v53 }
 0xf19   :  { %6707 = vmatprep.subr.bf16.mxu1 %v6988_v59  ;;  %6715 = vmatpush3.bf16.msra.mxu0 %v6714_v28 }
 0xf1a   :  { %6716 = vmatprep.subr.bf16.mxu0 %v6988_v59 }
 0xf1b   :  { %v2907_v12 = vpop.f32.mrb[118].mxu1  ;;  %6190 = vmatmul.mubr.msk.f32.gmra.mrb[128].mxu0 %vm725_vm5, %v2672_v34 }
 0xf1c   :  { %v2908_v42 = vadd.f32 %v5093_v11, %v2907_v12  ;;  %v6162_v23 = vpop.f32.mrb[119].mxu1  ;;  %6192 = vmatprep.mubr.msk.f32.mxu0 %vm6987_vm2, %v6986_v0  ;;  %v8553_v12 = vld [vmem:[%s9184_s2 + $0x18] sm:$0xff] }
 0xf1d   :  { %6718 = vmatpush3.bf16.msra.mxu0 %v6717_v1 }
 0xf1e   :  { %v6708_v55 = vpack.c.bf16 %v2908_v42, %v2903_v31  ;;  %6725 = vmatprep.subr.bf16.mxu0 %v6988_v59 }
 0xf1f   :  { %v2912_v29 = vpop.f32.mrb[120].mxu1  ;;  %6193 = vmatmul.mubr.msk.f32.gmra.mrb[130].mxu0 %vm725_vm5, %v2677_v36 }
 0xf20   :  { %v6165_v49 = vpop.f32.mrb[121].mxu1  ;;  %6709 = vmatpush3.bf16.msra.mxu1 %v6708_v55  ;;  %6195 = vmatprep.mubr.msk.f32.mxu0 %vm6987_vm2, %v6986_v0  ;;  %v2913_v40 = vadd.f32 %v5093_v11, %v2912_v29  ;;  %v8563_v29 = vld [vmem:[%s9184_s2 + $0x20] sm:$0xff] }
 0xf21   :  { %6710 = vmatprep.subr.bf16.mxu1 %v6988_v59 }
 0xf23   :  { %v2917_v13 = vpop.f32.mrb[122].mxu1  ;;  %6196 = vmatmul.mubr.msk.f32.gmra.mrb[132].mxu0 %vm725_vm5, %v2682_v30 }
 0xf24   :  { %v2918_v18 = vadd.f32 %v5093_v11, %v2917_v13  ;;  %v6168_v46 = vpop.f32.mrb[123].mxu1  ;;  %6198 = vmatprep.mubr.msk.f32.mxu0 %vm6987_vm2, %v6986_v0 }
 0xf25   :  { %v8573_v46 = vld [vmem:[%s9184_s2 + $0x28] sm:$0xff] }
 0xf26   :  { %v6711_v50 = vpack.c.bf16 %v2918_v18, %v2913_v40 }
 0xf27   :  { %v2922_v20 = vpop.f32.mrb[124].mxu1  ;;  %6199 = vmatmul.mubr.msk.f32.gmra.mrb[134].mxu0 %vm725_vm5, %v2687_v37 }
 0xf28   :  { %v6171_v44 = vpop.f32.mrb[125].mxu1  ;;  %6712 = vmatpush3.bf16.msra.mxu1 %v6711_v50  ;;  %6201 = vmatprep.mubr.msk.f32.mxu0 %vm6987_vm2, %v6986_v0  ;;  %v2923_v26 = vadd.f32 %v5093_v11, %v2922_v20  ;;  %v8523_v11 = vld [vmem:[%s9184_s2] sm:$0xff] }
 0xf29   :  { %6219 = vmatprep.subr.mxu1 %v6986_v0 }
 0xf2b   :  { %6202 = vmatmul.mubr.msk.f32.gmra.mrb[136].mxu0 %vm725_vm5, %v2692_v48 }
 0xf2c   :  { %6220 = vmatpush3.msk.msra.mxu1 %vm982_vm7, %v2923_v26  ;;  %6204 = vmatprep.mubr.msk.f32.mxu0 %vm6987_vm2, %v6986_v0  ;;  %v8583_v26 = vld [vmem:[%s9184_s2 + $0x30] sm:$0x3] }
 0xf2d   :  { %6719 = vmatprep.subr.bf16.mxu1 %v6988_v59 }
 0xf2f   :  { %6205 = vmatmul.mubr.msk.f32.gmra.mrb[138].mxu0 %vm725_vm5, %v2697_v27 }
 0xf30   :  { %6250 = vmatprep.mubr.msk.f32.mxu0 %vm6987_vm2, %v6986_v0 }
 0xf33   :  { %6251 = vmatmul.mubr.msk.f32.vlgmr.msra.gmra.mrb[140].mxu0 %vm251_vm3, %v8251_v38 }
 0xf34   :  { %6253 = vmatprep.mubr.msk.f32.mxu0 %vm6987_vm2, %v6986_v0  ;;  %6727 = vmatpush3.bf16.msra.mxu0 %v6726_v35 }
 0xf35   :  { %6728 = vmatprep.subr.bf16.mxu0 %v6988_v59 }
 0xf37   :  { %6254 = vmatmul.mubr.msk.f32.gmra.mrb[142].mxu0 %vm251_vm3, %v8270_v61 }
 0xf38   :  { %6256 = vmatprep.mubr.msk.f32.mxu0 %vm6987_vm2, %v6986_v0  ;;  %6730 = vmatpush3.bf16.msra.mxu0 %v6729_v62 }
 0xf39   :  { %6743 = vmatprep.subr.bf16.mxu0 %v6988_v59 }
 0xf3b   :  { %6257 = vmatmul.mubr.msk.f32.gmra.mrb[144].mxu0 %vm251_vm3, %v8284_v16 }
 0xf3c   :  { %6259 = vmatprep.mubr.msk.f32.mxu0 %vm6987_vm2, %v6986_v0 }
 0xf3f   :  { %6260 = vmatmul.mubr.msk.f32.gmra.mrb[146].mxu0 %vm251_vm3, %v8298_v17 }
 0xf40   :  { %6262 = vmatprep.mubr.msk.f32.mxu0 %vm6987_vm2, %v6986_v0 }
 0xf43   :  { %6263 = vmatmul.mubr.msk.f32.gmra.mrb[148].mxu0 %vm251_vm3, %v8311_v14 }
 0xf44   :  { %6265 = vmatprep.mubr.msk.f32.mxu0 %vm6987_vm2, %v6986_v0 }
 0xf47   :  { %6266 = vmatmul.mubr.msk.f32.gmra.mrb[150].mxu0 %vm251_vm3, %v8324_v63 }
 0xf48   :  { %6268 = vmatprep.mubr.msk.f32.mxu0 %vm6987_vm2, %v6986_v0 }
 0xf4b   :  { %6269 = vmatmul.mubr.msk.f32.gmra.mrb[152].mxu0 %vm251_vm3, %v8337_v39 }
 0xf4c   :  { %6308 = vmatprep.mubr.msk.f32.mxu0 %vm6987_vm2, %v6986_v0 }
 0xf4f   :  { %6309 = vmatmul.mubr.msk.f32.vlgmr.msra.gmra.mrb[154].mxu0 %vm251_vm3, %v8251_v38 }
 0xf50   :  { %6311 = vmatprep.mubr.msk.f32.mxu0 %vm6987_vm2, %v6986_v0 }
 0xf53   :  { %6312 = vmatmul.mubr.msk.f32.gmra.mrb[156].mxu0 %vm251_vm3, %v8270_v61 }
 0xf54   :  { %6314 = vmatprep.mubr.msk.f32.mxu0 %vm6987_vm2, %v6986_v0 }
 0xf57   :  { %6315 = vmatmul.mubr.msk.f32.gmra.mrb[158].mxu0 %vm251_vm3, %v8284_v16 }
 0xf58   :  { %6317 = vmatprep.mubr.msk.f32.mxu0 %vm6987_vm2, %v6986_v0 }
 0xf5b   :  { %6318 = vmatmul.mubr.msk.f32.gmra.mrb[160].mxu0 %vm251_vm3, %v8298_v17 }
 0xf5c   :  { %6320 = vmatprep.mubr.msk.f32.mxu0 %vm6987_vm2, %v6986_v0 }
 0xf5f   :  { %6321 = vmatmul.mubr.msk.f32.gmra.mrb[162].mxu0 %vm251_vm3, %v8311_v14 }
 0xf60   :  { %6323 = vmatprep.mubr.msk.f32.mxu0 %vm6987_vm2, %v6986_v0 }
 0xf63   :  { %6324 = vmatmul.mubr.msk.f32.gmra.mrb[164].mxu0 %vm251_vm3, %v8324_v63 }
 0xf64   :  { %6326 = vmatprep.mubr.msk.f32.mxu0 %vm6987_vm2, %v6986_v0 }
 0xf67   :  { %6327 = vmatmul.mubr.msk.f32.gmra.mrb[166].mxu0 %vm251_vm3, %v8337_v39 }
 0xf68   :  { %6378 = vmatprep.mubr.msk.f32.mxu0 %vm6987_vm2, %v6986_v0 }
 0xfea   :  { %v3034_v9 = vpop.f32.mrb[126].mxu0 }
 0xfeb   :  { %v3068_v54 = vmul.f32 0.25, %v3034_v9  ;;  %v6188_v33 = vpop.f32.mrb[127].mxu0 }
 0xfed   :  { %v8526_v2 = vadd.f32 %v8523_v11, %v3068_v54 }
 0xfee   :  { %v3039_v60 = vpop.f32.mrb[128].mxu0 }
 0xfef   :  { %v3069_v22 = vmul.f32 0.25, %v3039_v60  ;;  %v6191_v19 = vpop.f32.mrb[129].mxu0  ;;  %v3082_v25 = vsel %vm882_vm8, %v8526_v2, -inf }
 0xff0   :  { %3083 = vmax.xlane.f32.xlu0 %v3082_v25 }
 0xff1   :  { %v8536_v45 = vadd.f32 %v8533_v41, %v3069_v22 }
 0xff2   :  { %v3044_v24 = vpop.f32.mrb[130].mxu0 }
 0xff3   :  { %v3070_v56 = vmul.f32 0.25, %v3044_v24  ;;  %v6194_v28 = vpop.f32.mrb[131].mxu0  ;;  %v3085_v10 = vsel %vm882_vm8, %v8536_v45, -inf }
 0xff4   :  { %3086 = vmax.xlane.f32.xlu1 %v3085_v10 }
 0xff5   :  { %v8546_v8 = vadd.f32 %v8543_v47, %v3070_v56 }
 0xff6   :  { %v3049_v53 = vpop.f32.mrb[132].mxu0 }
 0xff7   :  { %v3071_v6 = vmul.f32 0.25, %v3049_v53  ;;  %v6197_v34 = vpop.f32.mrb[133].mxu0  ;;  %v3088_v1 = vsel %vm882_vm8, %v8546_v8, -inf  ;;  %v5156_v53 = vld [vmem:[%s9182_s12 + $0x3] ss:$0 sm:$0xff] }
 0xff8   :  { %3089 = vmax.xlane.f32.xlu0 %v3088_v1 }
 0xff9   :  { %v8556_v31 = vadd.f32 %v8553_v12, %v3071_v6 }
 0xffa   :  { %v3054_v42 = vpop.f32.mrb[134].mxu0 }
 0xffb   :  { %v3072_v23 = vmul.f32 0.25, %v3054_v42  ;;  %v6200_v36 = vpop.f32.mrb[135].mxu0  ;;  %v3091_v55 = vsel %vm882_vm8, %v8556_v31, -inf }
 0xffc   :  { %3092 = vmax.xlane.f32.xlu1 %v3091_v55 }
 0xffd   :  { %v8566_v49 = vadd.f32 %v8563_v29, %v3072_v23 }
 0xffe   :  { %v3059_v30 = vpop.f32.mrb[136].mxu0 }
 0xfff   :  { %v3073_v13 = vmul.f32 0.25, %v3059_v30  ;;  %v6203_v40 = vpop.f32.mrb[137].mxu0  ;;  %v3094_v18 = vsel %vm882_vm8, %v8566_v49, -inf }
0x1000   :  { %3095 = vmax.xlane.f32.xlu0 %v3094_v18 }
0x1001   :  { %v8576_v37 = vadd.f32 %v8573_v46, %v3073_v13 }
0x1002   :  { %v3064_v50 = vpop.f32.mrb[138].mxu0 }
0x1003   :  { %v3074_v20 = vmul.f32 0.25, %v3064_v50  ;;  %v6206_v44 = vpop.f32.mrb[139].mxu0  ;;  %v3097_v48 = vsel %vm882_vm8, %v8576_v37, -inf }
0x1004   :  { %3098 = vmax.xlane.f32.xlu1 %v3097_v48 }
0x1005   :  { %v8586_v27 = vadd.f32 %v8583_v26, %v3074_v20 }
0x1006   :  { %v8588_v51 = vpop.f32.mrb[140].mxu0 }
0x1007   :  { %v6252_v32 = vpop.f32.mrb[141].mxu0  ;;  %v3100_v35 = vsel %vm901_vm9, %v8586_v27, -inf }
0x1008   :  { %3101 = vmax.xlane.f32.xlu0 %v3100_v35 }
0x100a   :  { %v8592_v7 = vpop.f32.mrb[142].mxu0 }
0x100b   :  { %v6255_v43 = vpop.f32.mrb[143].mxu0 }
0x100e   :  { %v8594_v62 = vpop.f32.mrb[144].mxu0 }
0x100f   :  { %v6258_v9 = vpop.f32.mrb[145].mxu0 }
0x1012   :  { %v8596_v54 = vpop.f32.mrb[146].mxu0 }
0x1013   :  { %v6261_v33 = vpop.f32.mrb[147].mxu0 }
0x1016   :  { %v8598_v60 = vpop.f32.mrb[148].mxu0 }
0x1017   :  { %v6264_v22 = vpop.f32.mrb[149].mxu0 }
0x101a   :  { %v8600_v19 = vpop.f32.mrb[150].mxu0 }
0x101b   :  { %v6267_v25 = vpop.f32.mrb[151].mxu0 }
0x101e   :  { %v8602_v24 = vpop.f32.mrb[152].mxu0 }
0x101f   :  { %v6270_v56 = vpop.f32.mrb[153].mxu0 }
0x1022   :  { %v3591_v28 = vpop.f32.mrb[154].mxu0 }
0x1023   :  { %v6310_v10 = vpop.f32.mrb[155].mxu0  ;;  %v3592_v34 = vadd.f32 %v5156_v53, %v3591_v28 }
0x1026   :  { %v3596_v6 = vpop.f32.mrb[156].mxu0 }
0x1027   :  { %v3597_v1 = vadd.f32 %v5156_v53, %v3596_v6  ;;  %v6313_v42 = vpop.f32.mrb[157].mxu0 }
0x1029   :  { %v6744_v23 = vpack.c.bf16 %v3597_v1, %v3592_v34 }
0x102a   :  { %v3601_v36 = vpop.f32.mrb[158].mxu0 }
0x102b   :  { %v6316_v55 = vpop.f32.mrb[159].mxu0  ;;  %6745 = vmatpush3.bf16.msra.mxu0 %v6744_v23  ;;  %v3602_v13 = vadd.f32 %v5156_v53, %v3601_v36 }
0x102c   :  { %6746 = vmatprep.subr.bf16.mxu0 %v6988_v59 }
0x102e   :  { %v3606_v30 = vpop.f32.mrb[160].mxu0 }
0x102f   :  { %v3607_v40 = vadd.f32 %v5156_v53, %v3606_v30  ;;  %v6319_v18 = vpop.f32.mrb[161].mxu0 }
0x1031   :  { %v6747_v50 = vpack.c.bf16 %v3607_v40, %v3602_v13 }
0x1032   :  { %v3611_v20 = vpop.f32.mrb[162].mxu0 }
0x1033   :  { %v6322_v44 = vpop.f32.mrb[163].mxu0  ;;  %6748 = vmatpush3.bf16.msra.mxu0 %v6747_v50  ;;  %v3612_v32 = vadd.f32 %v5156_v53, %v3611_v20 }
0x1034   :  { %6749 = vmatprep.subr.bf16.mxu0 %v6988_v59 }
0x1036   :  { %v3616_v48 = vpop.f32.mrb[164].mxu0 }
0x1037   :  { %v3617_v35 = vadd.f32 %v5156_v53, %v3616_v48  ;;  %v6325_v43 = vpop.f32.mrb[165].mxu0 }
0x1039   :  { %v6750_v9 = vpack.c.bf16 %v3617_v35, %v3612_v32 }
0x103a   :  { %v3621_v33 = vpop.f32.mrb[166].mxu0 }
0x103b   :  { %v6328_v22 = vpop.f32.mrb[167].mxu0  ;;  %6751 = vmatpush3.bf16.msra.mxu0 %v6750_v9  ;;  %v3622_v25 = vadd.f32 %v5156_v53, %v3621_v33 }
0x103c   :  { %6376 = vmatprep.subr.mxu0 %v6986_v0 }
0x103f   :  { %6377 = vmatpush3.msk.msra.mxu0 %vm982_vm7, %v3622_v25 }
0x1040   :  { %6755 = vmatprep.subr.bf16.mxu0 %v6988_v59 }
0x107d   :  { %v3084_v56 = vpop.xlane.xlu0 %3083 }
0x107e   :  { %v3103_v28 = vsub.f32 %v8526_v2, %v3084_v56 }
0x1080   :  { %v3110_v10 = vmul.f32 1.442695, %v3103_v28 }
0x1081   :  { %v3087_v6 = vpop.xlane.xlu1 %3086 }
0x1082   :  { %6895 = vpow2.f32 %v3110_v10  ;;  %v3104_v34 = vsub.f32 %v8536_v45, %v3087_v6 }
0x1084   :  { %v3112_v1 = vmul.f32 1.442695, %v3104_v34 }
0x1085   :  { %v3090_v42 = vpop.xlane.xlu0 %3089 }
0x1086   :  { %6897 = vpow2.f32 %v3112_v1  ;;  %v3105_v23 = vsub.f32 %v8546_v8, %v3090_v42  ;;  %v5138_v1 = vld [vmem:[%s9222_s1 + $0x60] sm:$0xff]  ;;  %v5139_v42 = vld [vmem:[%s9222_s1 + $0x68] sm:$0xff] }
0x1088   :  { %v3114_v36 = vmul.f32 1.442695, %v3105_v23 }
0x1089   :  { %v3093_v55 = vpop.xlane.xlu1 %3092 }
0x108a   :  { %6899 = vpow2.f32 %v3114_v36  ;;  %v3106_v53 = vsub.f32 %v8556_v31, %v3093_v55  ;;  %v6720_v36 = vpack.c.bf16 %v5139_v42, %v5138_v1  ;;  %v5143_v1 = vld [vmem:[%s9227_s5 + $0x3] ss:$0 sm:$0xff] }
0x108c   :  { %v6896_v30 = vpop.eup %6895  ;;  %v3116_v13 = vmul.f32 1.442695, %v3106_v53 }
0x108d   :  { %v3096_v40 = vpop.xlane.xlu0 %3095  ;;  %v3124_v2 = vsel %vm882_vm8, %v6896_v30, 0.0 }
0x108e   :  { %6901 = vpow2.f32 %v3116_v13  ;;  %v3107_v18 = vsub.f32 %v8566_v49, %v3096_v40  ;;  %3125 = vadd.xlane.f32.xlu1 %v3124_v2  ;;  %v5140_v13 = vld [vmem:[%s9222_s1 + $0x70] sm:$0xff]  ;;  %v5141_v40 = vld [vmem:[%s9222_s1 + $0x78] sm:$0xff] }
0x1090   :  { %v6898_v45 = vpop.eup %6897  ;;  %v3118_v50 = vmul.f32 1.442695, %v3107_v18  ;;  %v6723_v18 = vpack.c.bf16 %v5141_v40, %v5140_v13 }
0x1091   :  { %v3099_v20 = vpop.xlane.xlu1 %3098  ;;  %v3127_v44 = vsel %vm882_vm8, %v6898_v45, 0.0 }
0x1092   :  { %6903 = vpow2.f32 %v3118_v50  ;;  %v3108_v8 = vsub.f32 %v8576_v37, %v3099_v20  ;;  %3128 = vadd.xlane.f32.xlu0 %v3127_v44 }
0x1094   :  { %v6900_v48 = vpop.eup %6899  ;;  %v3120_v31 = vmul.f32 1.442695, %v3108_v8 }
0x1095   :  { %v3102_v32 = vpop.xlane.xlu0 %3101  ;;  %v3130_v35 = vsel %vm882_vm8, %v6900_v48, 0.0 }
0x1096   :  { %6905 = vpow2.f32 %v3120_v31  ;;  %v3109_v43 = vsub.f32 %v8586_v27, %v3102_v32  ;;  %3131 = vadd.xlane.f32.xlu1 %v3130_v35 }
0x1098   :  { %v6902_v49 = vpop.eup %6901  ;;  %v3122_v9 = vmul.f32 1.442695, %v3109_v43 }
0x1099   :  { %v3133_v33 = vsel %vm882_vm8, %v6902_v49, 0.0 }
0x109a   :  { %6907 = vpow2.f32 %v3122_v9  ;;  %3134 = vadd.xlane.f32.xlu0 %v3133_v33 }
0x109c   :  { %v6904_v22 = vpop.eup %6903 }
0x109d   :  { %v3136_v25 = vsel %vm882_vm8, %v6904_v22, 0.0 }
0x109e   :  { %3137 = vadd.xlane.f32.xlu1 %v3136_v25 }
0x10a0   :  { %v6906_v37 = vpop.eup %6905 }
0x10a1   :  { %v3139_v56 = vsel %vm882_vm8, %v6906_v37, 0.0 }
0x10a2   :  { %3140 = vadd.xlane.f32.xlu0 %v3139_v56 }
0x10a4   :  { %v6908_v28 = vpop.eup %6907 }
0x10a5   :  { %v3142_v10 = vsel %vm901_vm9, %v6908_v28, 0.0 }
0x10a6   :  { %3143 = vadd.xlane.f32.xlu1 %v3142_v10 }
0x111b   :  { %v3126_v27 = vpop.xlane.xlu1 %3125 }
0x111c   :  { %6909 = vrcp.f32 %v3126_v27 }
0x111f   :  { %v3129_v6 = vpop.xlane.xlu0 %3128 }
0x1120   :  { %6911 = vrcp.f32 %v3129_v6 }
0x1123   :  { %v3132_v34 = vpop.xlane.xlu1 %3131 }
0x1124   :  { %6913 = vrcp.f32 %v3132_v34 }
0x1126   :  { %v6910_v23 = vpop.eup %6909 }
0x1127   :  { %v3152_v55 = vmul.f32 %v6910_v23, %v6896_v30  ;;  %v3135_v53 = vpop.xlane.xlu0 %3134 }
0x1128   :  { %6915 = vrcp.f32 %v3135_v53 }
0x1129   :  { %6222 = vmatmul.mubr.msk.f32.vlgmr.msra.gmra.mrb[126].mxu1 %vm882_vm8, %v3152_v55 }
0x112a   :  { %v6912_v2 = vpop.eup %6911  ;;  %6224 = vmatprep.mubr.msk.f32.mxu1 %vm6987_vm2, %v6986_v0  ;;  %6721 = vmatpush3.bf16.msra.mxu1 %v6720_v36 }
0x112b   :  { %v3138_v50 = vpop.xlane.xlu1 %3137  ;;  %v3153_v30 = vmul.f32 %v6912_v2, %v6898_v45  ;;  %6722 = vmatprep.subr.bf16.mxu1 %v6988_v59 }
0x112c   :  { %6917 = vrcp.f32 %v3138_v50 }
0x112d   :  { %6225 = vmatmul.mubr.msk.f32.gmra.mrb[128].mxu1 %vm882_vm8, %v3153_v30 }
0x112e   :  { %v6914_v20 = vpop.eup %6913  ;;  %6227 = vmatprep.mubr.msk.f32.mxu1 %vm6987_vm2, %v6986_v0  ;;  %6724 = vmatpush3.bf16.msra.mxu1 %v6723_v18 }
0x112f   :  { %v3141_v44 = vpop.xlane.xlu0 %3140  ;;  %v3154_v8 = vmul.f32 %v6914_v20, %v6900_v48  ;;  %6731 = vmatprep.subr.bf16.mxu1 %v6988_v59 }
0x1130   :  { %6919 = vrcp.f32 %v3141_v44 }
0x1131   :  { %6228 = vmatmul.mubr.msk.f32.gmra.mrb[130].mxu1 %vm882_vm8, %v3154_v8 }
0x1132   :  { %v6916_v31 = vpop.eup %6915  ;;  %6230 = vmatprep.mubr.msk.f32.mxu1 %vm6987_vm2, %v6986_v0 }
0x1133   :  { %v3144_v45 = vpop.xlane.xlu1 %3143  ;;  %v3155_v32 = vmul.f32 %v6916_v31, %v6902_v49 }
0x1134   :  { %6921 = vrcp.f32 %v3144_v45 }
0x1135   :  { %6231 = vmatmul.mubr.msk.f32.gmra.mrb[132].mxu1 %vm882_vm8, %v3155_v32 }
0x1136   :  { %v6918_v35 = vpop.eup %6917  ;;  %6233 = vmatprep.mubr.msk.f32.mxu1 %vm6987_vm2, %v6986_v0 }
0x1137   :  { %v3156_v43 = vmul.f32 %v6918_v35, %v6904_v22 }
0x1139   :  { %6234 = vmatmul.mubr.msk.f32.gmra.mrb[134].mxu1 %vm882_vm8, %v3156_v43 }
0x113a   :  { %v6920_v48 = vpop.eup %6919  ;;  %6236 = vmatprep.mubr.msk.f32.mxu1 %vm6987_vm2, %v6986_v0 }
0x113b   :  { %v3157_v9 = vmul.f32 %v6920_v48, %v6906_v37 }
0x113d   :  { %6237 = vmatmul.mubr.msk.f32.gmra.mrb[136].mxu1 %vm882_vm8, %v3157_v9 }
0x113e   :  { %v6922_v33 = vpop.eup %6921  ;;  %6239 = vmatprep.mubr.msk.f32.mxu1 %vm6987_vm2, %v6986_v0 }
0x113f   :  { %v3158_v49 = vmul.f32 %v6922_v33, %v6908_v28  ;;  %v5130_v33 = vld [vmem:[%s9183_s8 + $0x3] ss:$0 sm:$0xff] }
0x1140   :  { %v3371_v3 = vadd.f32 %v5130_v33, %v8592_v7  ;;  %v3386_v7 = vadd.f32 %v5130_v33, %v8598_v60 }
0x1141   :  { %6240 = vmatmul.mubr.msk.f32.gmra.mrb[138].mxu1 %vm882_vm8, %v3158_v49 }
0x1142   :  { %6279 = vmatprep.mubr.msk.f32.mxu1 %vm6987_vm2, %v6986_v0 }
0x1145   :  { %6280 = vmatmul.mubr.msk.f32.vlgmr.msra.gmra.mrb[140].mxu1 %vm251_vm3, %v8251_v38 }
0x1146   :  { %6282 = vmatprep.mubr.msk.f32.mxu1 %vm6987_vm2, %v6986_v0 }
0x1149   :  { %6283 = vmatmul.mubr.msk.f32.gmra.mrb[142].mxu1 %vm251_vm3, %v8270_v61 }
0x114a   :  { %6285 = vmatprep.mubr.msk.f32.mxu1 %vm6987_vm2, %v6986_v0 }
0x114d   :  { %6286 = vmatmul.mubr.msk.f32.gmra.mrb[144].mxu1 %vm251_vm3, %v8284_v16 }
0x114e   :  { %6288 = vmatprep.mubr.msk.f32.mxu1 %vm6987_vm2, %v6986_v0 }
0x1151   :  { %6289 = vmatmul.mubr.msk.f32.gmra.mrb[146].mxu1 %vm251_vm3, %v8298_v17 }
0x1152   :  { %6291 = vmatprep.mubr.msk.f32.mxu1 %vm6987_vm2, %v6986_v0 }
0x1155   :  { %6292 = vmatmul.mubr.msk.f32.gmra.mrb[148].mxu1 %vm251_vm3, %v8311_v14 }
0x1156   :  { %6294 = vmatprep.mubr.msk.f32.mxu1 %vm6987_vm2, %v6986_v0 }
0x1159   :  { %6295 = vmatmul.mubr.msk.f32.gmra.mrb[150].mxu1 %vm251_vm3, %v8324_v63 }
0x115a   :  { %6297 = vmatprep.mubr.msk.f32.mxu1 %vm6987_vm2, %v6986_v0 }
0x115d   :  { %6298 = vmatmul.mubr.msk.f32.gmra.mrb[152].mxu1 %vm251_vm3, %v8337_v39 }
0x115e   :  { %6343 = vmatprep.mubr.msk.f32.mxu1 %vm6987_vm2, %v6986_v0 }
0x11fc   :  { %v8689_v38 = vpop.f32.mrb[126].mxu1 }
0x11fd   :  { %v6223_v61 = vpop.f32.mrb[127].mxu1 }
0x11fe   :  { %v3366_v61 = vadd.f32 %v5130_v33, %v8588_v51  ;;  %v3381_v51 = vadd.f32 %v5130_v33, %v8596_v54  ;;  %v3396_v54 = vadd.f32 %v5130_v33, %v8602_v24 }
0x1200   :  { %v8691_v16 = vpop.f32.mrb[128].mxu1 }
0x1201   :  { %v6226_v17 = vpop.f32.mrb[129].mxu1 }
0x1202   :  { %v3376_v17 = vadd.f32 %v5130_v33, %v8594_v62  ;;  %v3391_v62 = vadd.f32 %v5130_v33, %v8600_v19 }
0x1204   :  { %v8693_v14 = vpop.f32.mrb[130].mxu1 }
0x1205   :  { %v6229_v22 = vpop.f32.mrb[131].mxu1 }
0x1208   :  { %v8695_v25 = vpop.f32.mrb[132].mxu1 }
0x1209   :  { %v6232_v63 = vpop.f32.mrb[133].mxu1 }
0x120c   :  { %v8697_v37 = vpop.f32.mrb[134].mxu1 }
0x120d   :  { %v6235_v56 = vpop.f32.mrb[135].mxu1 }
0x1210   :  { %v8699_v28 = vpop.f32.mrb[136].mxu1 }
0x1211   :  { %v6238_v39 = vpop.f32.mrb[137].mxu1 }
0x1214   :  { %v8701_v10 = vpop.f32.mrb[138].mxu1 }
0x1215   :  { %v6241_v27 = vpop.f32.mrb[139].mxu1 }
0x1218   :  { %v3478_v6 = vpop.f32.mrb[140].mxu1 }
0x1219   :  { %v6281_v34 = vpop.f32.mrb[141].mxu1  ;;  %v3479_v23 = vadd.f32 %v5143_v1, %v3478_v6 }
0x121c   :  { %v3483_v42 = vpop.f32.mrb[142].mxu1 }
0x121d   :  { %v3484_v36 = vadd.f32 %v5143_v1, %v3483_v42  ;;  %v6284_v55 = vpop.f32.mrb[143].mxu1 }
0x121f   :  { %v6732_v53 = vpack.c.bf16 %v3484_v36, %v3479_v23 }
0x1220   :  { %v3488_v13 = vpop.f32.mrb[144].mxu1 }
0x1221   :  { %v6287_v40 = vpop.f32.mrb[145].mxu1  ;;  %6734 = vmatpush3.bf16.xpose.msk.msra.mxu1 %vm7443_vm6, %v6732_v53  ;;  %v3489_v18 = vadd.f32 %v5143_v1, %v3488_v13 }
0x1222   :  { %6735 = vmatprep.subr.bf16.mxu1 %v6988_v59 }
0x1224   :  { %v3493_v2 = vpop.f32.mrb[146].mxu1 }
0x1225   :  { %v3494_v50 = vadd.f32 %v5143_v1, %v3493_v2  ;;  %v6290_v30 = vpop.f32.mrb[147].mxu1 }
0x1227   :  { %v6736_v20 = vpack.c.bf16 %v3494_v50, %v3489_v18 }
0x1228   :  { %v3498_v44 = vpop.f32.mrb[148].mxu1 }
0x1229   :  { %v6293_v8 = vpop.f32.mrb[149].mxu1  ;;  %6738 = vmatpush3.bf16.xpose.msk.msra.mxu1 %vm7443_vm6, %v6736_v20  ;;  %v3499_v45 = vadd.f32 %v5143_v1, %v3498_v44 }
0x122a   :  { %6739 = vmatprep.subr.bf16.mxu1 %v6988_v59 }
0x122c   :  { %v3503_v31 = vpop.f32.mrb[150].mxu1 }
0x122d   :  { %v3504_v32 = vadd.f32 %v5143_v1, %v3503_v31  ;;  %v6296_v35 = vpop.f32.mrb[151].mxu1 }
0x122f   :  { %v6740_v43 = vpack.c.bf16 %v3504_v32, %v3499_v45 }
0x1230   :  { %v3508_v48 = vpop.f32.mrb[152].mxu1 }
0x1231   :  { %v6299_v9 = vpop.f32.mrb[153].mxu1  ;;  %6742 = vmatpush3.bf16.xpose.msk.msra.mxu1 %vm7443_vm6, %v6740_v43  ;;  %v3509_v49 = vadd.f32 %v5143_v1, %v3508_v48 }
0x1232   :  { %6341 = vmatprep.subr.mxu1 %v6986_v0 }
0x1239   :  { %6342 = vmatpush3.xpose.msk.msra.mxu1 %vm725_vm5, %v3509_v49 }
0x123a   :  { %6752 = vmatprep.subr.bf16.mxu1 %v6988_v59 }
0x123c   :  { %6344 = vmatmul.mubr.msk.f32.vlgmr.msra.gmra.mrb[154].mxu1 %vm725_vm5, %v3366_v61 }
0x123d   :  { %6346 = vmatprep.mubr.msk.f32.mxu1 %vm6987_vm2, %v6986_v0 }
0x1240   :  { %6347 = vmatmul.mubr.msk.f32.gmra.mrb[156].mxu1 %vm725_vm5, %v3371_v3 }
0x1241   :  { %6349 = vmatprep.mubr.msk.f32.mxu1 %vm6987_vm2, %v6986_v0 }
0x1244   :  { %6350 = vmatmul.mubr.msk.f32.gmra.mrb[158].mxu1 %vm725_vm5, %v3376_v17 }
0x1245   :  { %6352 = vmatprep.mubr.msk.f32.mxu1 %vm6987_vm2, %v6986_v0 }
0x1248   :  { %6353 = vmatmul.mubr.msk.f32.gmra.mrb[160].mxu1 %vm725_vm5, %v3381_v51 }
0x1249   :  { %6355 = vmatprep.mubr.msk.f32.mxu1 %vm6987_vm2, %v6986_v0 }
0x124c   :  { %6356 = vmatmul.mubr.msk.f32.gmra.mrb[162].mxu1 %vm725_vm5, %v3386_v7 }
0x124d   :  { %6358 = vmatprep.mubr.msk.f32.mxu1 %vm6987_vm2, %v6986_v0 }
0x1250   :  { %6359 = vmatmul.mubr.msk.f32.gmra.mrb[164].mxu1 %vm725_vm5, %v3391_v62 }
0x1251   :  { %6361 = vmatprep.mubr.msk.f32.mxu1 %vm6987_vm2, %v6986_v0 }
0x1254   :  { %6362 = vmatmul.mubr.msk.f32.gmra.mrb[166].mxu1 %vm725_vm5, %v3396_v54 }
0x1255   :  { %6403 = vmatprep.mubr.msk.f32.mxu1 %vm6987_vm2, %v6986_v0 }
0x130f   :  { %v3733_v60 = vpop.f32.mrb[154].mxu1 }
0x1310   :  { %v3767_v22 = vmul.f32 0.25, %v3733_v60  ;;  %v6345_v63 = vpop.f32.mrb[155].mxu1 }
0x1312   :  { %v3774_v56 = vadd.f32 %v8523_v11, %v3767_v22 }
0x1313   :  { %v3738_v39 = vpop.f32.mrb[156].mxu1 }
0x1314   :  { %v3768_v27 = vmul.f32 0.25, %v3738_v39  ;;  %v6348_v19 = vpop.f32.mrb[157].mxu1  ;;  %v3781_v6 = vsel %vm882_vm8, %v3774_v56, -inf }
0x1315   :  { %3782 = vmax.xlane.f32.xlu0 %v3781_v6 }
0x1316   :  { %v3775_v34 = vadd.f32 %v8533_v41, %v3768_v27 }
0x1317   :  { %v3743_v1 = vpop.f32.mrb[158].mxu1 }
0x1318   :  { %v3769_v24 = vmul.f32 0.25, %v3743_v1  ;;  %v6351_v42 = vpop.f32.mrb[159].mxu1  ;;  %v3784_v23 = vsel %vm882_vm8, %v3775_v34, -inf }
0x1319   :  { %3785 = vmax.xlane.f32.xlu1 %v3784_v23 }
0x131a   :  { %v3776_v36 = vadd.f32 %v8543_v47, %v3769_v24 }
0x131b   :  { %v3748_v55 = vpop.f32.mrb[160].mxu1 }
0x131c   :  { %v3770_v53 = vmul.f32 0.25, %v3748_v55  ;;  %v6354_v13 = vpop.f32.mrb[161].mxu1  ;;  %v3787_v11 = vsel %vm882_vm8, %v3776_v36, -inf }
0x131d   :  { %3788 = vmax.xlane.f32.xlu0 %v3787_v11 }
0x131e   :  { %v3777_v40 = vadd.f32 %v8553_v12, %v3770_v53 }
0x131f   :  { %v3753_v2 = vpop.f32.mrb[162].mxu1 }
0x1320   :  { %v3771_v18 = vmul.f32 0.25, %v3753_v2  ;;  %v6357_v50 = vpop.f32.mrb[163].mxu1  ;;  %v3790_v41 = vsel %vm882_vm8, %v3777_v40, -inf }
0x1321   :  { %3791 = vmax.xlane.f32.xlu1 %v3790_v41  ;;  %v5186_v41 = vld [vmem:[%s9185_s13 + $0x30] sm:$0xff] }
0x1322   :  { %v3778_v30 = vadd.f32 %v8563_v29, %v3771_v18 }
0x1323   :  { %v3758_v20 = vpop.f32.mrb[164].mxu1 }
0x1324   :  { %v3772_v44 = vmul.f32 0.25, %v3758_v20  ;;  %v6360_v8 = vpop.f32.mrb[165].mxu1  ;;  %v3793_v47 = vsel %vm882_vm8, %v3778_v30, -inf }
0x1325   :  { %3794 = vmax.xlane.f32.xlu0 %v3793_v47 }
0x1326   :  { %v3779_v31 = vadd.f32 %v8573_v46, %v3772_v44 }
0x1327   :  { %v3763_v45 = vpop.f32.mrb[166].mxu1 }
0x1328   :  { %v3773_v32 = vmul.f32 0.25, %v3763_v45  ;;  %v6363_v35 = vpop.f32.mrb[167].mxu1  ;;  %v3796_v12 = vsel %vm882_vm8, %v3779_v31, -inf  ;;  %v5124_v45 = vld [vmem:[%s9185_s13 + $0x28] sm:$0xff] }
0x1329   :  { %3797 = vmax.xlane.f32.xlu1 %v3796_v12 }
0x132a   :  { %v3780_v43 = vadd.f32 %v8583_v26, %v3773_v32 }
0x132c   :  { %v3799_v48 = vsel %vm901_vm9, %v3780_v43, -inf }
0x132d   :  { %3800 = vmax.xlane.f32.xlu0 %v3799_v48 }
0x13a2   :  { %v3783_v29 = vpop.xlane.xlu0 %3782 }
0x13a3   :  { %v3802_v9 = vsub.f32 %v3774_v56, %v3783_v29 }
0x13a5   :  { %v3809_v33 = vmul.f32 1.442695, %v3802_v9 }
0x13a6   :  { %v3786_v49 = vpop.xlane.xlu1 %3785 }
0x13a7   :  { %6923 = vpow2.f32 %v3809_v33  ;;  %v3803_v61 = vsub.f32 %v3775_v34, %v3786_v49 }
0x13a9   :  { %v3811_v3 = vmul.f32 1.442695, %v3803_v61 }
0x13aa   :  { %v3789_v17 = vpop.xlane.xlu0 %3788 }
0x13ab   :  { %6925 = vpow2.f32 %v3811_v3  ;;  %v3804_v46 = vsub.f32 %v3776_v36, %v3789_v17 }
0x13ad   :  { %v3813_v51 = vmul.f32 1.442695, %v3804_v46 }
0x13ae   :  { %v3792_v7 = vpop.xlane.xlu1 %3791 }
0x13af   :  { %6927 = vpow2.f32 %v3813_v51  ;;  %v3805_v62 = vsub.f32 %v3777_v40, %v3792_v7 }
0x13b1   :  { %v6924_v54 = vpop.eup %6923  ;;  %v3815_v60 = vmul.f32 1.442695, %v3805_v62 }
0x13b2   :  { %v3795_v26 = vpop.xlane.xlu0 %3794  ;;  %v3823_v22 = vsel %vm882_vm8, %v6924_v54, 0.0 }
0x13b3   :  { %6929 = vpow2.f32 %v3815_v60  ;;  %v3806_v63 = vsub.f32 %v3778_v30, %v3795_v26  ;;  %3824 = vadd.xlane.f32.xlu1 %v3823_v22  ;;  %v5187_v30 = vld [vmem:[%s9185_s13 + $0x38] sm:$0xff] }
0x13b4   :  { %v6753_v20 = vpack.c.bf16 %v5187_v30, %v5186_v41 }
0x13b5   :  { %v6926_v56 = vpop.eup %6925  ;;  %v3817_v39 = vmul.f32 1.442695, %v3806_v63 }
0x13b6   :  { %v3798_v27 = vpop.xlane.xlu1 %3797  ;;  %v3826_v19 = vsel %vm882_vm8, %v6926_v56, 0.0  ;;  %6754 = vmatpush3.bf16.msra.mxu1 %v6753_v20 }
0x13b7   :  { %6931 = vpow2.f32 %v3817_v39  ;;  %v3807_v6 = vsub.f32 %v3779_v31, %v3798_v27  ;;  %3827 = vadd.xlane.f32.xlu0 %v3826_v19  ;;  %6758 = vmatprep.subr.bf16.mxu1 %v6988_v59  ;;  %v5123_v31 = vld [vmem:[%s9185_s13 + $0x20] sm:$0xff] }
0x13b8   :  { %v6756_v35 = vpack.c.bf16 %v5124_v45, %v5123_v31 }
0x13b9   :  { %v6928_v34 = vpop.eup %6927  ;;  %v3819_v1 = vmul.f32 1.442695, %v3807_v6 }
0x13ba   :  { %v3801_v24 = vpop.xlane.xlu0 %3800  ;;  %v3829_v42 = vsel %vm882_vm8, %v6928_v34, 0.0 }
0x13bb   :  { %6933 = vpow2.f32 %v3819_v1  ;;  %v3808_v23 = vsub.f32 %v3780_v43, %v3801_v24  ;;  %3830 = vadd.xlane.f32.xlu1 %v3829_v42 }
0x13bd   :  { %v6930_v36 = vpop.eup %6929  ;;  %v3821_v55 = vmul.f32 1.442695, %v3808_v23 }
0x13be   :  { %v3832_v53 = vsel %vm882_vm8, %v6930_v36, 0.0 }
0x13bf   :  { %6935 = vpow2.f32 %v3821_v55  ;;  %3833 = vadd.xlane.f32.xlu0 %v3832_v53 }
0x13c1   :  { %v6932_v13 = vpop.eup %6931 }
0x13c2   :  { %v3835_v11 = vsel %vm882_vm8, %v6932_v13, 0.0 }
0x13c3   :  { %3836 = vadd.xlane.f32.xlu1 %v3835_v11 }
0x13c5   :  { %v6934_v40 = vpop.eup %6933 }
0x13c6   :  { %v3838_v2 = vsel %vm882_vm8, %v6934_v40, 0.0 }
0x13c7   :  { %3839 = vadd.xlane.f32.xlu0 %v3838_v2 }
0x13c9   :  { %v6936_v18 = vpop.eup %6935 }
0x13ca   :  { %v3841_v50 = vsel %vm901_vm9, %v6936_v18, 0.0 }
0x13cb   :  { %3842 = vadd.xlane.f32.xlu1 %v3841_v50 }
0x1440   :  { %v3825_v44 = vpop.xlane.xlu1 %3824 }
0x1441   :  { %6937 = vrcp.f32 %v3825_v44  ;;  %v5203_v44 = vld [vmem:[%s9186_s14 + $0x1] ss:$0 sm:$0xff] }
0x1444   :  { %v3828_v8 = vpop.xlane.xlu0 %3827 }
0x1445   :  { %6939 = vrcp.f32 %v3828_v8 }
0x1448   :  { %v3831_v47 = vpop.xlane.xlu1 %3830 }
0x1449   :  { %6941 = vrcp.f32 %v3831_v47 }
0x144b   :  { %v6938_v32 = vpop.eup %6937 }
0x144c   :  { %v3851_v12 = vmul.f32 %v6938_v32, %v6924_v54  ;;  %v3834_v43 = vpop.xlane.xlu0 %3833 }
0x144d   :  { %6943 = vrcp.f32 %v3834_v43 }
0x144e   :  { %6379 = vmatmul.mubr.msk.f32.vlgmr.msra.gmra.mrb[168].mxu0 %vm882_vm8, %v3851_v12 }
0x144f   :  { %v6940_v48 = vpop.eup %6939  ;;  %6381 = vmatprep.mubr.msk.f32.mxu0 %vm6987_vm2, %v6986_v0  ;;  %6757 = vmatpush3.bf16.msra.mxu0 %v6756_v35 }
0x1450   :  { %v3837_v29 = vpop.xlane.xlu1 %3836  ;;  %v3852_v9 = vmul.f32 %v6940_v48, %v6926_v56  ;;  %6764 = vmatprep.subr.bf16.mxu0 %v6988_v59 }
0x1451   :  { %6945 = vrcp.f32 %v3837_v29 }
0x1452   :  { %6382 = vmatmul.mubr.msk.f32.gmra.mrb[170].mxu0 %vm882_vm8, %v3852_v9 }
0x1453   :  { %v6942_v33 = vpop.eup %6941  ;;  %6384 = vmatprep.mubr.msk.f32.mxu0 %vm6987_vm2, %v6986_v0 }
0x1454   :  { %v3840_v49 = vpop.xlane.xlu0 %3839  ;;  %v3853_v61 = vmul.f32 %v6942_v33, %v6928_v34 }
0x1455   :  { %6947 = vrcp.f32 %v3840_v49 }
0x1456   :  { %6385 = vmatmul.mubr.msk.f32.gmra.mrb[172].mxu0 %vm882_vm8, %v3853_v61 }
0x1457   :  { %v6944_v3 = vpop.eup %6943  ;;  %6387 = vmatprep.mubr.msk.f32.mxu0 %vm6987_vm2, %v6986_v0 }
0x1458   :  { %v3843_v17 = vpop.xlane.xlu1 %3842  ;;  %v3854_v46 = vmul.f32 %v6944_v3, %v6930_v36 }
0x1459   :  { %6949 = vrcp.f32 %v3843_v17 }
0x145a   :  { %6388 = vmatmul.mubr.msk.f32.gmra.mrb[174].mxu0 %vm882_vm8, %v3854_v46 }
0x145b   :  { %v6946_v51 = vpop.eup %6945  ;;  %6390 = vmatprep.mubr.msk.f32.mxu0 %vm6987_vm2, %v6986_v0 }
0x145c   :  { %v3855_v7 = vmul.f32 %v6946_v51, %v6932_v13 }
0x145e   :  { %6391 = vmatmul.mubr.msk.f32.gmra.mrb[176].mxu0 %vm882_vm8, %v3855_v7 }
0x145f   :  { %v6948_v62 = vpop.eup %6947  ;;  %6393 = vmatprep.mubr.msk.f32.mxu0 %vm6987_vm2, %v6986_v0 }
0x1460   :  { %v3856_v54 = vmul.f32 %v6948_v62, %v6934_v40 }
0x1462   :  { %6394 = vmatmul.mubr.msk.f32.gmra.mrb[178].mxu0 %vm882_vm8, %v3856_v54 }
0x1463   :  { %v6950_v60 = vpop.eup %6949  ;;  %6396 = vmatprep.mubr.msk.f32.mxu0 %vm6987_vm2, %v6986_v0 }
0x1464   :  { %v3857_v26 = vmul.f32 %v6950_v60, %v6936_v18 }
0x1466   :  { %6397 = vmatmul.mubr.msk.f32.gmra.mrb[180].mxu0 %vm882_vm8, %v3857_v26 }
0x1467   :  { %6428 = vmatprep.mubr.msk.f32.mxu0 %vm6987_vm2, %v6986_v0 }
0x146a   :  { %6429 = vmatmul.mubr.msk.f32.vlgmr.msra.gmra.mrb[182].mxu0 %vm725_vm5, %v8689_v38 }
0x146b   :  { %6431 = vmatprep.mubr.msk.f32.mxu0 %vm6987_vm2, %v6986_v0 }
0x146e   :  { %6432 = vmatmul.mubr.msk.f32.gmra.mrb[184].mxu0 %vm725_vm5, %v8691_v16 }
0x146f   :  { %6434 = vmatprep.mubr.msk.f32.mxu0 %vm6987_vm2, %v6986_v0 }
0x1472   :  { %6435 = vmatmul.mubr.msk.f32.gmra.mrb[186].mxu0 %vm725_vm5, %v8693_v14 }
0x1473   :  { %6437 = vmatprep.mubr.msk.f32.mxu0 %vm6987_vm2, %v6986_v0 }
0x1476   :  { %6438 = vmatmul.mubr.msk.f32.gmra.mrb[188].mxu0 %vm725_vm5, %v8695_v25 }
0x1477   :  { %6440 = vmatprep.mubr.msk.f32.mxu0 %vm6987_vm2, %v6986_v0 }
0x147a   :  { %6441 = vmatmul.mubr.msk.f32.gmra.mrb[190].mxu0 %vm725_vm5, %v8697_v37 }
0x147b   :  { %6443 = vmatprep.mubr.msk.f32.mxu0 %vm6987_vm2, %v6986_v0 }
0x147e   :  { %6444 = vmatmul.mubr.msk.f32.gmra.mrb[192].mxu0 %vm725_vm5, %v8699_v28 }
0x147f   :  { %6446 = vmatprep.mubr.msk.f32.mxu0 %vm6987_vm2, %v6986_v0 }
0x1482   :  { %6447 = vmatmul.mubr.msk.f32.gmra.mrb[194].mxu0 %vm725_vm5, %v8701_v10 }
0x1483   :  { %6510 = vmatprep.mubr.msk.f32.mxu0 %vm6987_vm2, %v6986_v0 }
0x1521   :  { %v3948_v38 = vpop.f32.mrb[168].mxu0 }
0x1522   :  { %v6380_v16 = vpop.f32.mrb[169].mxu0  ;;  %6404 = vmatmul.mubr.msk.f32.vlgmr.msra.gmra.mrb[168].mxu1 %vm725_vm5, %v3948_v38 }
0x1523   :  { %6406 = vmatprep.mubr.msk.f32.mxu1 %vm6987_vm2, %v6986_v0 }
0x1525   :  { %v3953_v14 = vpop.f32.mrb[170].mxu0 }
0x1526   :  { %v6383_v25 = vpop.f32.mrb[171].mxu0  ;;  %6407 = vmatmul.mubr.msk.f32.gmra.mrb[170].mxu1 %vm725_vm5, %v3953_v14 }
0x1527   :  { %6409 = vmatprep.mubr.msk.f32.mxu1 %vm6987_vm2, %v6986_v0 }
0x1529   :  { %v3958_v37 = vpop.f32.mrb[172].mxu0 }
0x152a   :  { %v6386_v28 = vpop.f32.mrb[173].mxu0  ;;  %6410 = vmatmul.mubr.msk.f32.gmra.mrb[172].mxu1 %vm725_vm5, %v3958_v37 }
0x152b   :  { %6412 = vmatprep.mubr.msk.f32.mxu1 %vm6987_vm2, %v6986_v0 }
0x152d   :  { %v3963_v10 = vpop.f32.mrb[174].mxu0 }
0x152e   :  { %v6389_v22 = vpop.f32.mrb[175].mxu0  ;;  %6413 = vmatmul.mubr.msk.f32.gmra.mrb[174].mxu1 %vm725_vm5, %v3963_v10 }
0x152f   :  { %6415 = vmatprep.mubr.msk.f32.mxu1 %vm6987_vm2, %v6986_v0 }
0x1531   :  { %v3968_v63 = vpop.f32.mrb[176].mxu0 }
0x1532   :  { %v6392_v56 = vpop.f32.mrb[177].mxu0  ;;  %6416 = vmatmul.mubr.msk.f32.gmra.mrb[176].mxu1 %vm725_vm5, %v3968_v63 }
0x1533   :  { %6418 = vmatprep.mubr.msk.f32.mxu1 %vm6987_vm2, %v6986_v0 }
0x1535   :  { %v3973_v39 = vpop.f32.mrb[178].mxu0 }
0x1536   :  { %v6395_v27 = vpop.f32.mrb[179].mxu0  ;;  %6419 = vmatmul.mubr.msk.f32.gmra.mrb[178].mxu1 %vm725_vm5, %v3973_v39  ;;  %v5208_v39 = vld [vmem:[%s9187_s17 + $0x20] sm:$0xff] }
0x1537   :  { %6421 = vmatprep.mubr.msk.f32.mxu1 %vm6987_vm2, %v6986_v0  ;;  %v5209_v27 = vld [vmem:[%s9187_s17 + $0x28] sm:$0xff] }
0x1539   :  { %v3978_v19 = vpop.f32.mrb[180].mxu0 }
0x153a   :  { %v6398_v6 = vpop.f32.mrb[181].mxu0  ;;  %6422 = vmatmul.mubr.msk.f32.gmra.mrb[180].mxu1 %vm725_vm5, %v3978_v19  ;;  %v6759_v19 = vpack.c.bf16 %v5209_v27, %v5208_v39  ;;  %v5231_v27 = vld [vmem:[%s9188_s19 + $0xd0] sm:$0xff] }
0x153b   :  { %6457 = vmatprep.mubr.msk.f32.mxu1 %vm6987_vm2, %v6986_v0 }
0x153c   :  { %6760 = vmatpush3.bf16.msra.mxu1 %v6759_v19  ;;  %v5232_v19 = vld [vmem:[%s9188_s19 + $0xd8] sm:$0xff] }
0x153d   :  { %v4193_v34 = vpop.f32.mrb[182].mxu0  ;;  %6761 = vmatprep.subr.bf16.mxu1 %v6988_v59 }
0x153e   :  { %v6430_v1 = vpop.f32.mrb[183].mxu0 }
0x1541   :  { %v4198_v24 = vpop.f32.mrb[184].mxu0 }
0x1542   :  { %v6433_v42 = vpop.f32.mrb[185].mxu0 }
0x1545   :  { %v4203_v23 = vpop.f32.mrb[186].mxu0 }
0x1546   :  { %v6436_v36 = vpop.f32.mrb[187].mxu0 }
0x1549   :  { %v4208_v55 = vpop.f32.mrb[188].mxu0 }
0x154a   :  { %v6439_v53 = vpop.f32.mrb[189].mxu0 }
0x154d   :  { %v4213_v13 = vpop.f32.mrb[190].mxu0 }
0x154e   :  { %v6442_v11 = vpop.f32.mrb[191].mxu0 }
0x1551   :  { %v4218_v40 = vpop.f32.mrb[192].mxu0 }
0x1552   :  { %v6445_v2 = vpop.f32.mrb[193].mxu0 }
0x1555   :  { %v4223_v18 = vpop.f32.mrb[194].mxu0 }
0x1556   :  { %v6448_v50 = vpop.f32.mrb[195].mxu0 }
0x15f5   :  { %v4072_v41 = vpop.f32.mrb[168].mxu1 }
0x15f6   :  { %v4194_v30 = vadd.f32 %v4193_v34, %v4072_v41  ;;  %v6405_v20 = vpop.f32.mrb[169].mxu1 }
0x15f8   :  { %v4227_v8 = vadd.f32 %v4194_v30, %v8128_v5 }
0x15f9   :  { %v4077_v47 = vpop.f32.mrb[170].mxu1 }
0x15fa   :  { %v8857_v31 = vadd.f32 %v5203_v44, %v4227_v8  ;;  %v4199_v45 = vadd.f32 %v4198_v24, %v4077_v47  ;;  %v6408_v32 = vpop.f32.mrb[171].mxu1 }
0x15fc   :  { %v4228_v35 = vadd.f32 %v4199_v45, %v8133_v52  ;;  %v4253_v12 = vsel %vm251_vm3, %v8857_v31, 0.0 }
0x15fd   :  { %v4082_v43 = vpop.f32.mrb[172].mxu1  ;;  %4254 = vadd.xlane.f32.xlu0 %v4253_v12 }
0x15fe   :  { %v8862_v48 = vadd.f32 %v5203_v44, %v4228_v35  ;;  %v4204_v29 = vadd.f32 %v4203_v23, %v4082_v43  ;;  %v6411_v9 = vpop.f32.mrb[173].mxu1 }
0x1600   :  { %v4229_v33 = vadd.f32 %v4204_v29, %v8138_v4  ;;  %v4256_v5 = vsel %vm251_vm3, %v8862_v48, 0.0 }
0x1601   :  { %v4087_v49 = vpop.f32.mrb[174].mxu1  ;;  %4257 = vadd.xlane.f32.xlu1 %v4256_v5 }
0x1602   :  { %v8867_v61 = vadd.f32 %v5203_v44, %v4229_v33  ;;  %v4209_v3 = vadd.f32 %v4208_v55, %v4087_v49  ;;  %v6414_v52 = vpop.f32.mrb[175].mxu1 }
0x1604   :  { %v4230_v17 = vadd.f32 %v4209_v3, %v8143_v57  ;;  %v4259_v46 = vsel %vm251_vm3, %v8867_v61, 0.0 }
0x1605   :  { %v4092_v51 = vpop.f32.mrb[176].mxu1  ;;  %4260 = vadd.xlane.f32.xlu0 %v4259_v46  ;;  %v5210_v46 = vld [vmem:[%s9187_s17 + $0x30] sm:$0xff] }
0x1606   :  { %v8872_v7 = vadd.f32 %v5203_v44, %v4230_v17  ;;  %v4214_v62 = vadd.f32 %v4213_v13, %v4092_v51  ;;  %v6417_v4 = vpop.f32.mrb[177].mxu1  ;;  %v5211_v51 = vld [vmem:[%s9187_s17 + $0x38] sm:$0xff] }
0x1607   :  { %v5221_v4 = vld [vmem:[%s9188_s19 + $0x80] sm:$0xff] }
0x1608   :  { %v4231_v54 = vadd.f32 %v4214_v62, %v8148_v58  ;;  %v4262_v60 = vsel %vm251_vm3, %v8872_v7, 0.0  ;;  %v6762_v62 = vpack.c.bf16 %v5211_v51, %v5210_v46 }
0x1609   :  { %v4097_v26 = vpop.f32.mrb[178].mxu1  ;;  %4263 = vadd.xlane.f32.xlu1 %v4262_v60  ;;  %v5223_v60 = vld [vmem:[%s9188_s19 + $0x90] sm:$0xff] }
0x160a   :  { %v8877_v38 = vadd.f32 %v5203_v44, %v4231_v54  ;;  %v4219_v16 = vadd.f32 %v4218_v40, %v4097_v26  ;;  %v6420_v57 = vpop.f32.mrb[179].mxu1  ;;  %6763 = vmatpush3.bf16.msra.mxu1 %v6762_v62  ;;  %v5222_v54 = vld [vmem:[%s9188_s19 + $0x88] sm:$0xff] }
0x160b   :  { %6788 = vmatprep.subr.bf16.mxu1 %v6988_v59  ;;  %v6765_v26 = vpack.c.bf16 %v5222_v54, %v5221_v4 }
0x160c   :  { %v4232_v14 = vadd.f32 %v4219_v16, %v8153_v21  ;;  %v4265_v25 = vsel %vm251_vm3, %v8877_v38, 0.0  ;;  %v5224_v16 = vld [vmem:[%s9188_s19 + $0x98] sm:$0xff] }
0x160d   :  { %v4102_v37 = vpop.f32.mrb[180].mxu1  ;;  %4266 = vadd.xlane.f32.xlu0 %v4265_v25  ;;  %6766 = vmatpush3.bf16.msra.mxu0 %v6765_v26  ;;  %v6768_v57 = vpack.c.bf16 %v5224_v16, %v5223_v60  ;;  %v5226_v25 = vld [vmem:[%s9188_s19 + $0xa8] sm:$0xff] }
0x160e   :  { %v8882_v28 = vadd.f32 %v5203_v44, %v4232_v14  ;;  %v4224_v10 = vadd.f32 %v4223_v18, %v4102_v37  ;;  %v6423_v58 = vpop.f32.mrb[181].mxu1  ;;  %6767 = vmatprep.subr.bf16.mxu0 %v6988_v59  ;;  %v5225_v14 = vld [vmem:[%s9188_s19 + $0xa0] sm:$0xff] }
0x160f   :  { %v6771_v37 = vpack.c.bf16 %v5226_v25, %v5225_v14  ;;  %v5228_v58 = vld [vmem:[%s9188_s19 + $0xb8] sm:$0xff] }
0x1610   :  { %v4233_v22 = vadd.f32 %v4224_v10, %v8158_v15  ;;  %v4268_v63 = vsel %vm251_vm3, %v8882_v28, 0.0  ;;  %v5227_v10 = vld [vmem:[%s9188_s19 + $0xb0] sm:$0xff] }
0x1611   :  { %4269 = vadd.xlane.f32.xlu1 %v4268_v63  ;;  %6769 = vmatpush3.bf16.msra.mxu0 %v6768_v57  ;;  %v5229_v63 = vld [vmem:[%s9188_s19 + $0xc0] sm:$0xff] }
0x1612   :  { %v8887_v56 = vadd.f32 %v5203_v44, %v4233_v22  ;;  %6770 = vmatprep.subr.bf16.mxu0 %v6988_v59  ;;  %v6774_v22 = vpack.c.bf16 %v5228_v58, %v5227_v10 }
0x1614   :  { %v4271_v21 = vsel %vm270_vm4, %v8887_v56, 0.0 }
0x1615   :  { %4272 = vadd.xlane.f32.xlu0 %v4271_v21  ;;  %6772 = vmatpush3.bf16.msra.mxu0 %v6771_v37  ;;  %v5230_v21 = vld [vmem:[%s9188_s19 + $0xc8] sm:$0xff] }
0x1616   :  { %6773 = vmatprep.subr.bf16.mxu0 %v6988_v59  ;;  %v6777_v39 = vpack.c.bf16 %v5230_v21, %v5229_v63 }
0x1619   :  { %6775 = vmatpush3.bf16.msra.mxu0 %v6774_v22 }
0x161a   :  { %6776 = vmatprep.subr.bf16.mxu0 %v6988_v59 }
0x161d   :  { %6778 = vmatpush3.bf16.msra.mxu0 %v6777_v39 }
0x161e   :  { %6779 = vmatprep.subr.bf16.mxu0 %v6988_v59 }
0x168a   :  { %v4255_v15 = vpop.xlane.xlu0 %4254 }
0x168b   :  { %v4274_v6 = vmul.f32 0.03125, %v4255_v15  ;;  %v6780_v15 = vpack.c.bf16 %v5232_v19, %v5231_v27 }
0x168d   :  { %v8899_v34 = vsub.f32 %v8857_v31, %v4274_v6  ;;  %v5233_v6 = vld [vmem:[%s9188_s19 + $0xe0] sm:$0xff]  ;;  %6781 = vmatpush3.bf16.msra.mxu0 %v6780_v15 }
0x168e   :  { %v4258_v1 = vpop.xlane.xlu1 %4257  ;;  %6782 = vmatprep.subr.bf16.mxu0 %v6988_v59 }
0x168f   :  { %v4275_v24 = vmul.f32 0.03125, %v4258_v1  ;;  %v4288_v42 = vmul.f32 %v8899_v34, %v8899_v34  ;;  %v5234_v1 = vld [vmem:[%s9188_s19 + $0xe8] sm:$0xff] }
0x1691   :  { %v8904_v23 = vsub.f32 %v8862_v48, %v4275_v24  ;;  %v4295_v36 = vsel %vm251_vm3, %v4288_v42, 0.0  ;;  %v6783_v24 = vpack.c.bf16 %v5234_v1, %v5233_v6 }
0x1692   :  { %v4261_v55 = vpop.xlane.xlu0 %4260  ;;  %4296 = vadd.xlane.f32.xlu1 %v4295_v36 }
0x1693   :  { %v4276_v53 = vmul.f32 0.03125, %v4261_v55  ;;  %v4289_v13 = vmul.f32 %v8904_v23, %v8904_v23  ;;  %6784 = vmatpush3.bf16.msra.mxu0 %v6783_v24  ;;  %v5213_v24 = vld [vmem:[%s9191_s18 + $0x1] ss:$0 sm:$0xff] }
0x1694   :  { %6785 = vmatprep.subr.bf16.mxu0 %v6988_v59 }
0x1695   :  { %v8910_v11 = vsub.f32 %v8867_v61, %v4276_v53  ;;  %v4298_v40 = vsel %vm251_vm3, %v4289_v13, 0.0 }
0x1696   :  { %v4264_v2 = vpop.xlane.xlu1 %4263  ;;  %4299 = vadd.xlane.f32.xlu0 %v4298_v40 }
0x1697   :  { %v4277_v18 = vmul.f32 0.03125, %v4264_v2  ;;  %v4290_v50 = vmul.f32 %v8910_v11, %v8910_v11 }
0x1699   :  { %v8916_v41 = vsub.f32 %v8872_v7, %v4277_v18  ;;  %v4301_v30 = vsel %vm251_vm3, %v4290_v50, 0.0 }
0x169a   :  { %v4267_v20 = vpop.xlane.xlu0 %4266  ;;  %4302 = vadd.xlane.f32.xlu1 %v4301_v30 }
0x169b   :  { %v4278_v44 = vmul.f32 0.03125, %v4267_v20  ;;  %v4291_v8 = vmul.f32 %v8916_v41, %v8916_v41 }
0x169d   :  { %v8922_v47 = vsub.f32 %v8877_v38, %v4278_v44  ;;  %v4304_v45 = vsel %vm251_vm3, %v4291_v8, 0.0  ;;  %v5206_v8 = vld [vmem:[%s9189_s15 + $0x1] ss:$0 sm:$0xff] }
0x169e   :  { %v4270_v32 = vpop.xlane.xlu1 %4269  ;;  %4305 = vadd.xlane.f32.xlu0 %v4304_v45 }
0x169f   :  { %v4279_v35 = vmul.f32 0.03125, %v4270_v32  ;;  %v4292_v12 = vmul.f32 %v8922_v47, %v8922_v47 }
0x16a1   :  { %v8928_v43 = vsub.f32 %v8882_v28, %v4279_v35  ;;  %v4307_v29 = vsel %vm251_vm3, %v4292_v12, 0.0  ;;  %v5207_v12 = vld [vmem:[%s9190_s16 + $0x1] ss:$0 sm:$0xff] }
0x16a2   :  { %4308 = vadd.xlane.f32.xlu1 %v4307_v29  ;;  %v4273_v9 = vpop.xlane.xlu0 %4272 }
0x16a3   :  { %v4280_v33 = vmul.f32 0.03125, %v4273_v9  ;;  %v4293_v5 = vmul.f32 %v8928_v43, %v8928_v43 }
0x16a5   :  { %v8934_v49 = vsub.f32 %v8887_v56, %v4280_v33  ;;  %v4310_v3 = vsel %vm251_vm3, %v4293_v5, 0.0 }
0x16a6   :  { %4311 = vadd.xlane.f32.xlu0 %v4310_v3 }
0x16a7   :  { %v4294_v52 = vmul.f32 %v8934_v49, %v8934_v49 }
0x16a9   :  { %v4313_v17 = vsel %vm270_vm4, %v4294_v52, 0.0 }
0x16aa   :  { %4314 = vadd.xlane.f32.xlu1 %v4313_v17 }
0x171f   :  { %v4297_v42 = vpop.xlane.xlu1 %4296 }
0x1720   :  { %v4316_v36 = vmul.f32 0.03125, %v4297_v42 }
0x1722   :  { %v4323_v55 = vadd.f32 1e-06, %v4316_v36 }
0x1723   :  { %v4300_v53 = vpop.xlane.xlu0 %4299 }
0x1724   :  { %6951 = vrsqrt.f32 %v4323_v55  ;;  %v4317_v13 = vmul.f32 0.03125, %v4300_v53 }
0x1726   :  { %v4324_v40 = vadd.f32 1e-06, %v4317_v13 }
0x1727   :  { %v4303_v2 = vpop.xlane.xlu1 %4302 }
0x1728   :  { %6953 = vrsqrt.f32 %v4324_v40  ;;  %v4318_v18 = vmul.f32 0.03125, %v4303_v2 }
0x172a   :  { %v4325_v50 = vadd.f32 1e-06, %v4318_v18 }
0x172b   :  { %v4306_v30 = vpop.xlane.xlu0 %4305 }
0x172c   :  { %6955 = vrsqrt.f32 %v4325_v50  ;;  %v4319_v20 = vmul.f32 0.03125, %v4306_v30 }
0x172e   :  { %v6952_v44 = vpop.eup %6951  ;;  %v4326_v45 = vadd.f32 1e-06, %v4319_v20 }
0x172f   :  { %v4337_v32 = vmul.f32 %v6952_v44, %v8899_v34  ;;  %v4309_v35 = vpop.xlane.xlu1 %4308 }
0x1730   :  { %6957 = vrsqrt.f32 %v4326_v45  ;;  %v4320_v29 = vmul.f32 0.03125, %v4309_v35 }
0x1731   :  { %v4350_v9 = vmul.f32 %v5206_v8, %v4337_v32 }
0x1732   :  { %v6954_v33 = vpop.eup %6953  ;;  %v4327_v5 = vadd.f32 1e-06, %v4320_v29 }
0x1733   :  { %v4363_v3 = vadd.f32 %v5207_v12, %v4350_v9  ;;  %v4312_v52 = vpop.xlane.xlu0 %4311  ;;  %v4338_v17 = vmul.f32 %v6954_v33, %v8904_v23 }
0x1734   :  { %6959 = vrsqrt.f32 %v4327_v5  ;;  %v4321_v46 = vmul.f32 0.03125, %v4312_v52 }
0x1735   :  { %6458 = vmatmul.mubr.msk.f32.vlgmr.msra.gmra.mrb[182].mxu1 %vm251_vm3, %v4363_v3  ;;  %v4351_v51 = vmul.f32 %v5206_v8, %v4338_v17 }
0x1736   :  { %v6956_v34 = vpop.eup %6955  ;;  %v4328_v62 = vadd.f32 1e-06, %v4321_v46  ;;  %6460 = vmatprep.mubr.msk.f32.mxu1 %vm6987_vm2, %v6986_v0 }
0x1737   :  { %v4315_v4 = vpop.xlane.xlu1 %4314  ;;  %v4364_v54 = vadd.f32 %v5207_v12, %v4351_v51  ;;  %v4339_v60 = vmul.f32 %v6956_v34, %v8910_v11 }
0x1738   :  { %6961 = vrsqrt.f32 %v4328_v62  ;;  %v4322_v26 = vmul.f32 0.03125, %v4315_v4 }
0x1739   :  { %6461 = vmatmul.mubr.msk.f32.gmra.mrb[184].mxu1 %vm251_vm3, %v4364_v54  ;;  %v4352_v16 = vmul.f32 %v5206_v8, %v4339_v60  ;;  %v5238_v54 = vld [vmem:[%s9192_s20 + $0x1] ss:$0 sm:$0xff] }
0x173a   :  { %v6958_v23 = vpop.eup %6957  ;;  %v4329_v57 = vadd.f32 1e-06, %v4322_v26  ;;  %6463 = vmatprep.mubr.msk.f32.mxu1 %vm6987_vm2, %v6986_v0 }
0x173b   :  { %v4365_v14 = vadd.f32 %v5207_v12, %v4352_v16  ;;  %v4340_v25 = vmul.f32 %v6958_v23, %v8916_v41 }
0x173c   :  { %6963 = vrsqrt.f32 %v4329_v57 }
0x173d   :  { %6464 = vmatmul.mubr.msk.f32.gmra.mrb[186].mxu1 %vm251_vm3, %v4365_v14  ;;  %v4353_v37 = vmul.f32 %v5206_v8, %v4340_v25 }
0x173e   :  { %v6960_v10 = vpop.eup %6959  ;;  %6466 = vmatprep.mubr.msk.f32.mxu1 %vm6987_vm2, %v6986_v0 }
0x173f   :  { %v4366_v11 = vadd.f32 %v5207_v12, %v4353_v37  ;;  %v4341_v58 = vmul.f32 %v6960_v10, %v8922_v47 }
0x1741   :  { %6467 = vmatmul.mubr.msk.f32.gmra.mrb[188].mxu1 %vm251_vm3, %v4366_v11  ;;  %v4354_v22 = vmul.f32 %v5206_v8, %v4341_v58 }
0x1742   :  { %v6962_v63 = vpop.eup %6961  ;;  %6469 = vmatprep.mubr.msk.f32.mxu1 %vm6987_vm2, %v6986_v0 }
0x1743   :  { %v4367_v21 = vadd.f32 %v5207_v12, %v4354_v22  ;;  %v4342_v41 = vmul.f32 %v6962_v63, %v8928_v43  ;;  %v5235_v43 = vld [vmem:[%s9188_s19 + $0xf0] sm:$0xff] }
0x1745   :  { %6470 = vmatmul.mubr.msk.f32.gmra.mrb[190].mxu1 %vm251_vm3, %v4367_v21  ;;  %v4355_v39 = vmul.f32 %v5206_v8, %v4342_v41 }
0x1746   :  { %v6964_v27 = vpop.eup %6963  ;;  %6472 = vmatprep.mubr.msk.f32.mxu1 %vm6987_vm2, %v6986_v0 }
0x1747   :  { %v4368_v19 = vadd.f32 %v5207_v12, %v4355_v39  ;;  %v4343_v47 = vmul.f32 %v6964_v27, %v8934_v49  ;;  %v5236_v49 = vld [vmem:[%s9188_s19 + $0xf8] sm:$0xff] }
0x1748   :  { %v6786_v1 = vpack.c.bf16 %v5236_v49, %v5235_v43 }
0x1749   :  { %6473 = vmatmul.mubr.msk.f32.gmra.mrb[192].mxu1 %vm251_vm3, %v4368_v19  ;;  %v4356_v15 = vmul.f32 %v5206_v8, %v4343_v47 }
0x174a   :  { %6475 = vmatprep.mubr.msk.f32.mxu1 %vm6987_vm2, %v6986_v0  ;;  %6787 = vmatpush3.bf16.msra.mxu0 %v6786_v1 }
0x174b   :  { %v4369_v6 = vadd.f32 %v5207_v12, %v4356_v15 }
0x174d   :  { %6476 = vmatmul.mubr.msk.f32.gmra.mrb[194].mxu1 %vm251_vm3, %v4369_v6 }
0x174e   :  { %6539 = vmatprep.mubr.msk.f32.mxu1 %vm6987_vm2, %v6986_v0 }
0x1808   :  { %v4470_v42 = vpop.f32.mrb[182].mxu1 }
0x1809   :  { %v4471_v36 = vadd.f32 %v5213_v24, %v4470_v42  ;;  %v6459_v55 = vpop.f32.mrb[183].mxu1 }
0x180b   :  { %v4504_v53 = vmax.f32 %v4471_v36, 0.0 }
0x180c   :  { %v4475_v13 = vpop.f32.mrb[184].mxu1 }
0x180d   :  { %v4476_v40 = vadd.f32 %v5213_v24, %v4475_v13  ;;  %v6462_v2 = vpop.f32.mrb[185].mxu1  ;;  %6511 = vmatmul.mubr.f32.vlgmr.msra.gmra.mrb[196].mxu0 %v4504_v53  ;;  %v4770_v13 = vld [vmem:[%s9193_s23 + $0x8] sm:$0xff] }
0x180e   :  { %6513 = vmatprep.mubr.msk.f32.mxu0 %vm6987_vm2, %v6986_v0 }
0x180f   :  { %v4505_v18 = vmax.f32 %v4476_v40, 0.0 }
0x1810   :  { %v4480_v50 = vpop.f32.mrb[186].mxu1 }
0x1811   :  { %v4481_v30 = vadd.f32 %v5213_v24, %v4480_v50  ;;  %v6465_v20 = vpop.f32.mrb[187].mxu1  ;;  %6514 = vmatmul.mubr.f32.gmra.mrb[198].mxu0 %v4505_v18 }
0x1812   :  { %6516 = vmatprep.mubr.msk.f32.mxu0 %vm6987_vm2, %v6986_v0 }
0x1813   :  { %v4506_v44 = vmax.f32 %v4481_v30, 0.0 }
0x1814   :  { %v4485_v8 = vpop.f32.mrb[188].mxu1 }
0x1815   :  { %v4486_v45 = vadd.f32 %v5213_v24, %v4485_v8  ;;  %v6468_v32 = vpop.f32.mrb[189].mxu1  ;;  %6517 = vmatmul.mubr.f32.gmra.mrb[200].mxu0 %v4506_v44 }
0x1816   :  { %6519 = vmatprep.mubr.msk.f32.mxu0 %vm6987_vm2, %v6986_v0 }
0x1817   :  { %v4507_v35 = vmax.f32 %v4486_v45, 0.0 }
0x1818   :  { %v4490_v12 = vpop.f32.mrb[190].mxu1 }
0x1819   :  { %v4491_v29 = vadd.f32 %v5213_v24, %v4490_v12  ;;  %v6471_v9 = vpop.f32.mrb[191].mxu1  ;;  %6520 = vmatmul.mubr.f32.gmra.mrb[202].mxu0 %v4507_v35 }
0x181a   :  { %6522 = vmatprep.mubr.msk.f32.mxu0 %vm6987_vm2, %v6986_v0 }
0x181b   :  { %v4508_v33 = vmax.f32 %v4491_v29, 0.0 }
0x181c   :  { %v4495_v5 = vpop.f32.mrb[192].mxu1 }
0x181d   :  { %v4496_v3 = vadd.f32 %v5213_v24, %v4495_v5  ;;  %v6474_v52 = vpop.f32.mrb[193].mxu1  ;;  %6523 = vmatmul.mubr.f32.gmra.mrb[204].mxu0 %v4508_v33 }
0x181e   :  { %6525 = vmatprep.mubr.msk.f32.mxu0 %vm6987_vm2, %v6986_v0 }
0x181f   :  { %v4509_v17 = vmax.f32 %v4496_v3, 0.0 }
0x1820   :  { %v4500_v46 = vpop.f32.mrb[194].mxu1 }
0x1821   :  { %v4501_v51 = vadd.f32 %v5213_v24, %v4500_v46  ;;  %v6477_v34 = vpop.f32.mrb[195].mxu1  ;;  %6526 = vmatmul.mubr.f32.gmra.mrb[206].mxu0 %v4509_v17 }
0x1822   :  { %6528 = vmatprep.mubr.msk.f32.mxu0 %vm6987_vm2, %v6986_v0 }
0x1823   :  { %v4510_v62 = vmax.f32 %v4501_v51, 0.0 }
0x1825   :  { %6529 = vmatmul.mubr.f32.gmra.mrb[208].mxu0 %v4510_v62 }
0x18e0   :  { %v4594_v4 = vpop.f32.mrb[196].mxu0 }
0x18e1   :  { %v4628_v60 = vadd.f32 %v4594_v4, %v8857_v31  ;;  %v6512_v26 = vpop.f32.mrb[197].mxu0 }
0x18e3   :  { %v4643_v16 = vadd.f32 %v5238_v54, %v4628_v60 }
0x18e4   :  { %v4599_v23 = vpop.f32.mrb[198].mxu0 }
0x18e5   :  { %v4629_v57 = vadd.f32 %v4599_v23, %v8862_v48  ;;  %v6515_v14 = vpop.f32.mrb[199].mxu0  ;;  %v4652_v25 = vsel %vm251_vm3, %v4643_v16, 0.0 }
0x18e6   :  { %4653 = vadd.xlane.f32.xlu0 %v4652_v25 }
0x18e7   :  { %v4644_v37 = vadd.f32 %v5238_v54, %v4629_v57 }
0x18e8   :  { %v4604_v10 = vpop.f32.mrb[200].mxu0 }
0x18e9   :  { %v4630_v11 = vadd.f32 %v4604_v10, %v8867_v61  ;;  %v6518_v58 = vpop.f32.mrb[201].mxu0  ;;  %v4655_v22 = vsel %vm251_vm3, %v4644_v37, 0.0 }
0x18ea   :  { %4656 = vadd.xlane.f32.xlu1 %v4655_v22  ;;  %v4772_v58 = vld [vmem:[%s9193_s23 + $0x18] sm:$0xff] }
0x18eb   :  { %v4645_v63 = vadd.f32 %v5238_v54, %v4630_v11  ;;  %v4771_v11 = vld [vmem:[%s9193_s23 + $0x10] sm:$0xff] }
0x18ec   :  { %v4609_v21 = vpop.f32.mrb[202].mxu0  ;;  %v6792_v22 = vpack.c.bf16 %v4772_v58, %v4771_v11 }
0x18ed   :  { %v4631_v31 = vadd.f32 %v4609_v21, %v8872_v7  ;;  %v6521_v41 = vpop.f32.mrb[203].mxu0  ;;  %v4658_v39 = vsel %vm251_vm3, %v4645_v63, 0.0 }
0x18ee   :  { %4659 = vadd.xlane.f32.xlu0 %v4658_v39 }
0x18ef   :  { %v4646_v48 = vadd.f32 %v5238_v54, %v4631_v31 }
0x18f0   :  { %v4614_v27 = vpop.f32.mrb[204].mxu0 }
0x18f1   :  { %v4632_v19 = vadd.f32 %v4614_v27, %v8877_v38  ;;  %v6524_v47 = vpop.f32.mrb[205].mxu0  ;;  %v4661_v15 = vsel %vm251_vm3, %v4646_v48, 0.0 }
0x18f2   :  { %4662 = vadd.xlane.f32.xlu1 %v4661_v15 }
0x18f3   :  { %v4647_v61 = vadd.f32 %v5238_v54, %v4632_v19 }
0x18f4   :  { %v4619_v6 = vpop.f32.mrb[206].mxu0 }
0x18f5   :  { %v4633_v43 = vadd.f32 %v4619_v6, %v8882_v28  ;;  %v6527_v49 = vpop.f32.mrb[207].mxu0  ;;  %v4664_v1 = vsel %vm251_vm3, %v4647_v61, 0.0  ;;  %v4769_v28 = vld [vmem:[%s9193_s23] sm:$0xff] }
0x18f6   :  { %4665 = vadd.xlane.f32.xlu0 %v4664_v1  ;;  %v6789_v40 = vpack.c.bf16 %v4770_v13, %v4769_v28 }
0x18f7   :  { %v4648_v7 = vadd.f32 %v5238_v54, %v4633_v43  ;;  %v5239_v43 = vld [vmem:[%s9194_s21] ss:$0 sm:$0xff] }
0x18f8   :  { %v4624_v24 = vpop.f32.mrb[208].mxu0  ;;  %6790 = vmatpush3.bf16.msra.mxu1 %v6789_v40 }
0x18f9   :  { %v4634_v42 = vadd.f32 %v4624_v24, %v8887_v56  ;;  %v6530_v36 = vpop.f32.mrb[209].mxu0  ;;  %v4667_v55 = vsel %vm251_vm3, %v4648_v7, 0.0  ;;  %6791 = vmatprep.subr.bf16.mxu1 %v6988_v59  ;;  %v5240_v24 = vld [vmem:[%s9195_s22] ss:$0 sm:$0xff] }
0x18fa   :  { %4668 = vadd.xlane.f32.xlu1 %v4667_v55 }
0x18fb   :  { %v4649_v38 = vadd.f32 %v5238_v54, %v4634_v42 }
0x18fc   :  { %6793 = vmatpush3.bf16.msra.mxu1 %v6792_v22 }
0x18fd   :  { %v4670_v53 = vsel %vm270_vm4, %v4649_v38, 0.0 }
0x18fe   :  { %4671 = vadd.xlane.f32.xlu0 %v4670_v53 }
0x1973   :  { %v4654_v56 = vpop.xlane.xlu0 %4653 }
0x1974   :  { %v4673_v2 = vmul.f32 0.03125, %v4654_v56 }
0x1976   :  { %v9075_v18 = vsub.f32 %v4643_v16, %v4673_v2 }
0x1977   :  { %v4657_v50 = vpop.xlane.xlu1 %4656 }
0x1978   :  { %v4674_v30 = vmul.f32 0.03125, %v4657_v50  ;;  %v4687_v20 = vmul.f32 %v9075_v18, %v9075_v18 }
0x197a   :  { %v9079_v44 = vsub.f32 %v4644_v37, %v4674_v30  ;;  %v4694_v8 = vsel %vm251_vm3, %v4687_v20, 0.0 }
0x197b   :  { %v4660_v45 = vpop.xlane.xlu0 %4659  ;;  %4695 = vadd.xlane.f32.xlu1 %v4694_v8 }
0x197c   :  { %v4675_v32 = vmul.f32 0.03125, %v4660_v45  ;;  %v4688_v35 = vmul.f32 %v9079_v44, %v9079_v44 }
0x197e   :  { %v9084_v59 = vsub.f32 %v4645_v63, %v4675_v32  ;;  %v4697_v12 = vsel %vm251_vm3, %v4688_v35, 0.0 }
0x197f   :  { %v4663_v29 = vpop.xlane.xlu1 %4662  ;;  %4698 = vadd.xlane.f32.xlu0 %v4697_v12 }
0x1980   :  { %v4676_v9 = vmul.f32 0.03125, %v4663_v29  ;;  %v4689_v33 = vmul.f32 %v9084_v59, %v9084_v59 }
0x1982   :  { %v9089_v5 = vsub.f32 %v4646_v48, %v4676_v9  ;;  %v4700_v3 = vsel %vm251_vm3, %v4689_v33, 0.0 }
0x1983   :  { %v4666_v52 = vpop.xlane.xlu0 %4665  ;;  %4701 = vadd.xlane.f32.xlu1 %v4700_v3 }
0x1984   :  { %v4677_v17 = vmul.f32 0.03125, %v4666_v52  ;;  %v4690_v46 = vmul.f32 %v9089_v5, %v9089_v5 }
0x1986   :  { %v9094_v51 = vsub.f32 %v4647_v61, %v4677_v17  ;;  %v4703_v34 = vsel %vm251_vm3, %v4690_v46, 0.0 }
0x1987   :  { %v4669_v62 = vpop.xlane.xlu1 %4668  ;;  %4704 = vadd.xlane.f32.xlu0 %v4703_v34 }
0x1988   :  { %v4678_v4 = vmul.f32 0.03125, %v4669_v62  ;;  %v4691_v54 = vmul.f32 %v9094_v51, %v9094_v51 }
0x198a   :  { %v9099_v60 = vsub.f32 %v4648_v7, %v4678_v4  ;;  %v4706_v26 = vsel %vm251_vm3, %v4691_v54, 0.0 }
0x198b   :  { %4707 = vadd.xlane.f32.xlu1 %v4706_v26  ;;  %v4672_v16 = vpop.xlane.xlu0 %4671 }
0x198c   :  { %v4679_v23 = vmul.f32 0.03125, %v4672_v16  ;;  %v4692_v57 = vmul.f32 %v9099_v60, %v9099_v60 }
0x198e   :  { %v9104_v14 = vsub.f32 %v4649_v38, %v4679_v23  ;;  %v4709_v25 = vsel %vm251_vm3, %v4692_v57, 0.0 }
0x198f   :  { %4710 = vadd.xlane.f32.xlu0 %v4709_v25 }
0x1990   :  { %v4693_v37 = vmul.f32 %v9104_v14, %v9104_v14 }
0x1992   :  { %v4712_v10 = vsel %vm270_vm4, %v4693_v37, 0.0 }
0x1993   :  { %4713 = vadd.xlane.f32.xlu1 %v4712_v10 }
0x1a08   :  { %v4696_v63 = vpop.xlane.xlu1 %4695 }
0x1a09   :  { %v4715_v21 = vmul.f32 0.03125, %v4696_v63 }
0x1a0b   :  { %v4722_v31 = vadd.f32 1e-06, %v4715_v21 }
0x1a0c   :  { %v4699_v41 = vpop.xlane.xlu0 %4698 }
0x1a0d   :  { %6965 = vrsqrt.f32 %v4722_v31  ;;  %v4716_v39 = vmul.f32 0.03125, %v4699_v41 }
0x1a0f   :  { %v4723_v48 = vadd.f32 1e-06, %v4716_v39 }
0x1a10   :  { %v4702_v27 = vpop.xlane.xlu1 %4701 }
0x1a11   :  { %6967 = vrsqrt.f32 %v4723_v48  ;;  %v4717_v19 = vmul.f32 0.03125, %v4702_v27 }
0x1a13   :  { %v4724_v47 = vadd.f32 1e-06, %v4717_v19 }
0x1a14   :  { %v4705_v15 = vpop.xlane.xlu0 %4704 }
0x1a15   :  { %6969 = vrsqrt.f32 %v4724_v47  ;;  %v4718_v61 = vmul.f32 0.03125, %v4705_v15 }
0x1a17   :  { %v6966_v6 = vpop.eup %6965  ;;  %v4725_v49 = vadd.f32 1e-06, %v4718_v61 }
0x1a18   :  { %v4736_v1 = vmul.f32 %v6966_v6, %v9075_v18  ;;  %v4708_v7 = vpop.xlane.xlu1 %4707 }
0x1a19   :  { %6971 = vrsqrt.f32 %v4725_v49  ;;  %v4719_v42 = vmul.f32 0.03125, %v4708_v7 }
0x1a1a   :  { %v4749_v36 = vmul.f32 %v5239_v43, %v4736_v1 }
0x1a1b   :  { %v6968_v55 = vpop.eup %6967  ;;  %v4726_v38 = vadd.f32 1e-06, %v4719_v42 }
0x1a1c   :  { %v4762_v53 = vadd.f32 %v5240_v24, %v4749_v36  ;;  %v4711_v28 = vpop.xlane.xlu0 %4710  ;;  %v4737_v13 = vmul.f32 %v6968_v55, %v9079_v44 }
0x1a1d   :  { %6973 = vrsqrt.f32 %v4726_v38  ;;  %v4720_v40 = vmul.f32 0.03125, %v4711_v28 }
0x1a1e   :  { %6540 = vmatmul.mubr.msk.f32.vlgmr.msra.gmra.mrb[196].mxu1 %vm251_vm3, %v4762_v53  ;;  %v4750_v56 = vmul.f32 %v5239_v43, %v4737_v13 }
0x1a1f   :  { %v6970_v2 = vpop.eup %6969  ;;  %v4727_v18 = vadd.f32 1e-06, %v4720_v40  ;;  %6542 = vmatprep.mubr.msk.f32.mxu1 %vm6987_vm2, %v6986_v0 }
0x1a20   :  { %v4714_v50 = vpop.xlane.xlu1 %4713  ;;  %v4763_v30 = vadd.f32 %v5240_v24, %v4750_v56  ;;  %v4738_v20 = vmul.f32 %v6970_v2, %v9084_v59 }
0x1a21   :  { %6975 = vrsqrt.f32 %v4727_v18  ;;  %v4721_v8 = vmul.f32 0.03125, %v4714_v50 }
0x1a22   :  { %6543 = vmatmul.mubr.msk.f32.gmra.mrb[198].mxu1 %vm251_vm3, %v4763_v30  ;;  %v4751_v45 = vmul.f32 %v5239_v43, %v4738_v20 }
0x1a23   :  { %v6972_v44 = vpop.eup %6971  ;;  %v4728_v32 = vadd.f32 1e-06, %v4721_v8  ;;  %6545 = vmatprep.mubr.msk.f32.mxu1 %vm6987_vm2, %v6986_v0 }
0x1a24   :  { %v4764_v35 = vadd.f32 %v5240_v24, %v4751_v45  ;;  %v4739_v12 = vmul.f32 %v6972_v44, %v9089_v5 }
0x1a25   :  { %6977 = vrsqrt.f32 %v4728_v32 }
0x1a26   :  { %6546 = vmatmul.mubr.msk.f32.gmra.mrb[200].mxu1 %vm251_vm3, %v4764_v35  ;;  %v4752_v29 = vmul.f32 %v5239_v43, %v4739_v12 }
0x1a27   :  { %v6974_v9 = vpop.eup %6973  ;;  %6548 = vmatprep.mubr.msk.f32.mxu1 %vm6987_vm2, %v6986_v0 }
0x1a28   :  { %v4765_v59 = vadd.f32 %v5240_v24, %v4752_v29  ;;  %v4740_v33 = vmul.f32 %v6974_v9, %v9094_v51 }
0x1a2a   :  { %6549 = vmatmul.mubr.msk.f32.gmra.mrb[202].mxu1 %vm251_vm3, %v4765_v59  ;;  %v4753_v3 = vmul.f32 %v5239_v43, %v4740_v33 }
0x1a2b   :  { %v6976_v52 = vpop.eup %6975  ;;  %6551 = vmatprep.mubr.msk.f32.mxu1 %vm6987_vm2, %v6986_v0 }
0x1a2c   :  { %v4766_v17 = vadd.f32 %v5240_v24, %v4753_v3  ;;  %v4741_v5 = vmul.f32 %v6976_v52, %v9099_v60  ;;  %v5241_v60 = vld [vmem:[%s9196_s24] ss:$0 sm:$0xff] }
0x1a2e   :  { %6552 = vmatmul.mubr.msk.f32.gmra.mrb[204].mxu1 %vm251_vm3, %v4766_v17  ;;  %v4754_v46 = vmul.f32 %v5239_v43, %v4741_v5 }
0x1a2f   :  { %v6978_v34 = vpop.eup %6977  ;;  %6554 = vmatprep.mubr.msk.f32.mxu1 %vm6987_vm2, %v6986_v0 }
0x1a30   :  { %v4767_v62 = vadd.f32 %v5240_v24, %v4754_v46  ;;  %v4742_v51 = vmul.f32 %v6978_v34, %v9104_v14 }
0x1a32   :  { %6555 = vmatmul.mubr.msk.f32.gmra.mrb[206].mxu1 %vm251_vm3, %v4767_v62  ;;  %v4755_v4 = vmul.f32 %v5239_v43, %v4742_v51 }
0x1a33   :  { %6557 = vmatprep.mubr.msk.f32.mxu1 %vm6987_vm2, %v6986_v0 }
0x1a34   :  { %v4768_v54 = vadd.f32 %v5240_v24, %v4755_v4 }
0x1a36   :  { %6558 = vmatmul.mubr.msk.f32.gmra.mrb[208].mxu1 %vm251_vm3, %v4768_v54 }
0x1af1   :  { %v4867_v26 = vpop.f32.mrb[196].mxu1 }
0x1af2   :  { %v4868_v16 = vadd.f32 %v5241_v60, %v4867_v26  ;;  %v6541_v23 = vpop.f32.mrb[197].mxu1 }
0x1af4   :  { %4901 = vst [vmem:[%s9230_s27] sm:$0xff] %v4868_v16 }
0x1af5   :  { %v4872_v57 = vpop.f32.mrb[198].mxu1 }
0x1af6   :  { %v4873_v14 = vadd.f32 %v5241_v60, %v4872_v57  ;;  %v6544_v25 = vpop.f32.mrb[199].mxu1 }
0x1af8   :  { %4902 = vst [vmem:[%s9230_s27 + $0x8] sm:$0xff] %v4873_v14 }
0x1af9   :  { %v4877_v0 = vpop.f32.mrb[200].mxu1 }
0x1afa   :  { %v4878_v37 = vadd.f32 %v5241_v60, %v4877_v0  ;;  %v6547_v10 = vpop.f32.mrb[201].mxu1 }
0x1afc   :  { %4903 = vst [vmem:[%s9230_s27 + $0x10] sm:$0xff] %v4878_v37 }
0x1afd   :  { %v4882_v11 = vpop.f32.mrb[202].mxu1 }
0x1afe   :  { %v4883_v58 = vadd.f32 %v5241_v60, %v4882_v11  ;;  %v6550_v22 = vpop.f32.mrb[203].mxu1 }
0x1b00   :  { %4904 = vst [vmem:[%s9230_s27 + $0x18] sm:$0xff] %v4883_v58 }
0x1b01   :  { %v4887_v63 = vpop.f32.mrb[204].mxu1 }
0x1b02   :  { %v4888_v21 = vadd.f32 %v5241_v60, %v4887_v63  ;;  %v6553_v31 = vpop.f32.mrb[205].mxu1 }
0x1b04   :  { %4905 = vst [vmem:[%s9230_s27 + $0x20] sm:$0xff] %v4888_v21 }
0x1b05   :  { %v4892_v41 = vpop.f32.mrb[206].mxu1 }
0x1b06   :  { %v4893_v39 = vadd.f32 %v5241_v60, %v4892_v41  ;;  %v6556_v48 = vpop.f32.mrb[207].mxu1 }
0x1b08   :  { %4906 = vst [vmem:[%s9230_s27 + $0x28] sm:$0xff] %v4893_v39 }
0x1b09   :  { %v4897_v27 = vpop.f32.mrb[208].mxu1 }
0x1b0a   :  { %v4898_v19 = vadd.f32 %v5241_v60, %v4897_v27  ;;  %v6559_v47 = vpop.f32.mrb[209].mxu1 }
0x1b0c   :  { %4907 = vst [vmem:[%s9230_s27 + $0x30] sm:$0x3] %v4898_v19 }

// kernel: _lambda_.5
= control target key start
LH: loop header
LB: loop body
LE: loop exit
PB: predicated region body
PF: predicated region fallthrough
CT: control target
= control target key end

     0   :  { %vm97_vm0 = vcmask 1042432   ;;  %vm90_vm1 = vcmask 23552   ;;  %vm186_vm2 = vcmask 261120   ;;  %vm190_vm3 = vcmask 254976   ;;  %s7119_s3 = inlined_call_operand.vmem [shape: f32[3,32], index: 3, kind: input, shape index: {}]   ;;  %s7120_s0 = inlined_call_operand.vmem [shape: f32[10,3], index: 0, kind: input, shape index: {}]   ;;  %s7121_s4 = inlined_call_operand.vmem [shape: f32[1,32], index: 4, kind: input, shape index: {}]   ;;  %s7122_s1 = inlined_call_operand.vmem [shape: f32[10,32], index: 1, kind: input, shape index: {}]   ;;  %s7123_s7 = inlined_call_operand.vmem [shape: f32[3,2,32,16], index: 7, kind: input, shape index: {}]   ;;  %s7124_s11 = inlined_call_operand.vmem [shape: f32[3,2,32,16], index: 11, kind: input, shape index: {}]   ;;  %s7125_s9 = inlined_call_operand.vmem [shape: f32[3,2,32,16], index: 9, kind: input, shape index: {}]   ;;  %s7126_s5 = inlined_call_operand.vmem [shape: f32[3,1,32], index: 5, kind: input, shape index: {}]   ;;  %s7127_s6 = inlined_call_operand.vmem [shape: f32[3,1,32], index: 6, kind: input, shape index: {}]   ;;  %s7128_s12 = inlined_call_operand.vmem [shape: f32[3,2,1,16], index: 12, kind: input, shape index: {}]   ;;  %s7129_s8 = inlined_call_operand.vmem [shape: f32[3,2,1,16], index: 8, kind: input, shape index: {}]   ;;  %s7130_s10 = inlined_call_operand.vmem [shape: f32[3,2,1,16], index: 10, kind: input, shape index: {}]   ;;  %s7131_s2 = inlined_call_operand.vmem [shape: f32[10,10], index: 2, kind: input, shape index: {}]   ;;  %s7132_s13 = inlined_call_operand.vmem [shape: f32[3,2,16,32], index: 13, kind: input, shape index: {}]   ;;  %s7133_s14 = inlined_call_operand.vmem [shape: f32[3,1,32], index: 14, kind: input, shape index: {}]   ;;  %s7134_s17 = inlined_call_operand.vmem [shape: f32[3,32,128], index: 17, kind: input, shape index: {}]   ;;  %s7135_s19 = inlined_call_operand.vmem [shape: f32[3,128,32], index: 19, kind: input, shape index: {}]   ;;  %s7136_s15 = inlined_call_operand.vmem [shape: f32[3,1,32], index: 15, kind: input, shape index: {}]   ;;  %s7137_s16 = inlined_call_operand.vmem [shape: f32[3,1,32], index: 16, kind: input, shape index: {}]   ;;  %s7138_s18 = inlined_call_operand.vmem [shape: f32[3,1,128], index: 18, kind: input, shape index: {}]   ;;  %s7139_s20 = inlined_call_operand.vmem [shape: f32[3,1,32], index: 20, kind: input, shape index: {}]   ;;  %s7140_s23 = inlined_call_operand.vmem [shape: f32[32,128], index: 23, kind: input, shape index: {}]   ;;  %s7141_s21 = inlined_call_operand.vmem [shape: f32[1,32], index: 21, kind: input, shape index: {}]   ;;  %s7142_s22 = inlined_call_operand.vmem [shape: f32[1,32], index: 22, kind: input, shape index: {}]   ;;  %s7143_s24 = inlined_call_operand.vmem [shape: f32[1,128], index: 24, kind: input, shape index: {}]   ;;  %s7144_s25 = inlined_call_operand.vmem [shape: f32[10,128], index: 25, kind: output, shape index: {}]  }
   0x1   :  { %7154 = sst [smem:[#allocation2_spill]] %s7119_s3  ;;  %vm495_vm4 = vcmask 130048   ;;  %vm617_vm5 = vcmask 1041408   ;;  %vm6025_vm7 = vmmov 1   ;;  %vm591_vm9 = vcmask 74752  }
   0x2   :  { %7155 = sst [smem:[#allocation3_spill]] %s7120_s0  ;;  %vm6275_vm6 = vmpackc.low %vm495_vm4, %vm495_vm4  ;;  %vm587_vm10 = vcmask 80896  }
   0x3   :  { %7156 = sst [smem:[#allocation4_spill]] %s7121_s4  ;;  %vm6280_vm8 = vmpackc.low %vm617_vm5, %vm6025_vm7 }
   0x4   :  { %7157 = sst [smem:[#allocation5_spill]] %s7122_s1  ;;  %s7166_s1 = sld [smem:[#allocation3_spill]] }
   0x5   :  { %7158 = sst [smem:[#allocation6_spill]] %s7123_s7  ;;  %s7167_s7 = sld [smem:[#allocation4_spill]] }
   0x6   :  { %7159 = sst [smem:[#allocation7_spill]] %s7124_s11  ;;  %s7168_s11 = sld [smem:[#allocation5_spill]] }
   0x7   :  { %7160 = sst [smem:[#allocation8_spill]] %s7125_s9  ;;  %s7165_s9 = sld [smem:[#allocation2_spill]] }
   0x8   :  { %7161 = sst [smem:[#allocation9_spill]] %s7126_s5  ;;  %s7169_s30 = sld [smem:[#allocation6_spill]] }
   0x9   :  { %7162 = sst [smem:[#allocation10_spill]] %s7127_s6  ;;  %s7170_s6 = sld [smem:[#allocation7_spill]] }
   0xa   :  { %7163 = sst [smem:[#allocation11_spill]] %s7128_s12  ;;  %v80_v1 = vld [vmem:[%s7166_s1] sm:$0xff]  ;;  %v81_v2 = vld [vmem:[%s7166_s1 + $0x8] sm:$0x3]  ;;  %s7171_s0 = sld [smem:[#allocation8_spill]] }
   0xb   :  { %7164 = sst [smem:[#allocation12_spill]] %s7144_s25  ;;  %5088 = vmatprep.mubr.msk.f32.mxu0 %vm90_vm1, %v80_v1  ;;  %v4542_v3 = vld [vmem:[%s7167_s7] ss:$0 sm:$0xff]  ;;  %s7173_s26 = sld [smem:[#allocation10_spill]] }
   0xc   :  { %v178_v8 = vld [vmem:[%s7168_s11] sm:$0xff]  ;;  %v179_v11 = vld [vmem:[%s7168_s11 + $0x8] sm:$0x3]  ;;  %s7174_s27 = sld [smem:[#allocation11_spill]] }
   0xd   :  { %v82_v0 = vld [vmem:[%s7165_s9] sm:$0x7]  ;;  %s7172_s9 = sld [smem:[#allocation9_spill]] }
   0xe   :  { %5086 = vmatprep.subr.msk.mxu0 %vm97_vm0, %v82_v0  ;;  %v231_v26 = vld [vmem:[%s7169_s30] sm:$0xff]  ;;  %v232_v27 = vld [vmem:[%s7169_s30 + $0x8] sm:$0xff]  ;;  %v233_v32 = vld [vmem:[%s7169_s30 + $0x10] sm:$0xff] }
   0xf   :  { %5087 = vmatpush3.msk.msra.mxu0 %vm97_vm0, %v82_v0  ;;  %v409_v28 = vld [vmem:[%s7170_s6] sm:$0xff]  ;;  %v5564_v29 = vpack.c.bf16 %v232_v27, %v231_v26  ;;  %v410_v30 = vld [vmem:[%s7170_s6 + $0x8] sm:$0xff]  ;;  %v234_v33 = vld [vmem:[%s7169_s30 + $0x18] sm:$0xff] }
  0x10   :  { %5089 = vmatmul.mubr.msk.f32.vlgmr.msra.gmra.mrb[0].mxu0 %vm90_vm1, %v81_v2  ;;  %v5580_v31 = vpack.c.bf16 %v410_v30, %v409_v28  ;;  %v411_v34 = vld [vmem:[%s7170_s6 + $0x10] sm:$0xff]  ;;  %v5568_v35 = vpack.c.bf16 %v234_v33, %v233_v32  ;;  %v412_v36 = vld [vmem:[%s7170_s6 + $0x18] sm:$0xff]  ;;  %v323_v38 = vld [vmem:[%s7171_s0] sm:$0xff] }
  0x11   :  { %5565 = vmatprep.subr.bf16.mxu0 %v5564_v29  ;;  %v5584_v37 = vpack.c.bf16 %v412_v36, %v411_v34  ;;  %v324_v39 = vld [vmem:[%s7171_s0 + $0x8] sm:$0xff]  ;;  %v4572_v40 = vld [vmem:[%s7171_s0 + $0x20] sm:$0xff]  ;;  %v325_v58 = vld [vmem:[%s7171_s0 + $0x10] sm:$0xff] }
  0x12   :  { %5581 = vmatprep.subr.bf16.mxu1 %v5580_v31  ;;  %5567 = vmatpush3.bf16.msra.mxu0 %v5564_v29  ;;  %v5572_v41 = vpack.c.bf16 %v324_v39, %v323_v38  ;;  %v4573_v42 = vld [vmem:[%s7171_s0 + $0x28] sm:$0xff]  ;;  %v4547_v53 = vld [vmem:[%s7173_s26] ss:$0 sm:$0xff]  ;;  %v326_v60 = vld [vmem:[%s7171_s0 + $0x18] sm:$0xff] }
  0x13   :  { %5583 = vmatpush3.bf16.msra.mxu1 %v5580_v31  ;;  %5569 = vmatprep.subr.bf16.mxu0 %v5568_v35  ;;  %v5608_v43 = vpack.c.bf16 %v4573_v42, %v4572_v40  ;;  %v4546_v51 = vld [vmem:[%s7172_s9] ss:$0 sm:$0xff]  ;;  %v4574_v61 = vld [vmem:[%s7171_s0 + $0x30] sm:$0xff]  ;;  %v4575_v62 = vld [vmem:[%s7171_s0 + $0x38] sm:$0xff]  ;;  %v5576_v0 = vpack.c.bf16 %v326_v60, %v325_v58 }
  0x14   :  { %5585 = vmatprep.subr.bf16.mxu1 %v5584_v37  ;;  %v5612_v1 = vpack.c.bf16 %v4575_v62, %v4574_v61  ;;  %v4554_v2 = vld [vmem:[%s7174_s27] ss:$0 sm:$0xff]  ;;  %v6300_v30 = vld [vmem:[%s7131_s2 + $0x8] sm:$0x3] }
  0x15   :  { %v6305_v33 = vld [vmem:[%s7131_s2] sm:$0xff] }
  0x16   :  { %5571 = vmatpush3.bf16.msra.mxu0 %v5568_v35  ;;  %v4580_v62 = vld [vmem:[%s7170_s6 + $0x20] sm:$0xff] }
  0x17   :  { %5587 = vmatpush3.bf16.msra.mxu1 %v5584_v37  ;;  %5573 = vmatprep.subr.bf16.mxu0 %v5572_v41  ;;  %v4759_v27 = vld [vmem:[%s7171_s0 + $0xa0] sm:$0xff] }
  0x18   :  { %5609 = vmatprep.subr.bf16.mxu1 %v5608_v43 }
  0xe3   :  { %v5090_v4 = vpop.f32.mrb[0].mxu0 }
  0xe4   :  { %v173_v5 = vadd.f32 %v5090_v4, %v4542_v3  ;;  %v167_v6 = vpop.f32.mrb[1].mxu0 }
  0xe5   :  { %v168_v7 = vadd.f32 %v4542_v3, %v167_v6  ;;  %v4548_v3 = vld [vmem:[%s7129_s8] ss:$0 sm:$0xff] }
  0xe6   :  { %v177_v9 = vmul.f32 5.656854, %v173_v5 }
  0xe7   :  { %v176_v10 = vmul.f32 5.656854, %v168_v7 }
  0xe8   :  { %v6176_v13 = vadd.f32 %v179_v11, %v177_v9 }
  0xe9   :  { %v6174_v12 = vadd.f32 %v178_v8, %v176_v10 }
  0xea   :  { %v191_v15 = vsel %vm190_vm3, %v6176_v13, 0.0 }
  0xeb   :  { %v187_v14 = vsel %vm186_vm2, %v6174_v12, 0.0 }
  0xec   :  { %188 = vadd.xlane.f32.xlu0 %v187_v14  ;;  %v4551_v14 = vld [vmem:[%s7130_s10] ss:$0 sm:$0xff] }
  0xf0   :  { %192 = vadd.xlane.f32.xlu0 %v191_v15  ;;  %v4577_v15 = vld [vmem:[%s7130_s10 + $0x1] ss:$0 sm:$0xff] }
 0x179   :  { %v189_v16 = vpop.xlane.xlu0 %188 }
 0x17a   :  { %v195_v17 = vmul.f32 0.03125, %v189_v16 }
 0x17c   :  { %v197_v18 = vsub.f32 %v6174_v12, %v195_v17 }
 0x17d   :  { %v193_v19 = vpop.xlane.xlu0 %192 }
 0x17e   :  { %v196_v20 = vmul.f32 0.03125, %v193_v19  ;;  %v199_v21 = vmul.f32 %v197_v18, %v197_v18 }
 0x180   :  { %v198_v22 = vsub.f32 %v6176_v13, %v196_v20  ;;  %v201_v23 = vsel %vm186_vm2, %v199_v21, 0.0 }
 0x181   :  { %202 = vadd.xlane.f32.xlu1 %v201_v23 }
 0x182   :  { %v200_v24 = vmul.f32 %v198_v22, %v198_v22 }
 0x184   :  { %v204_v25 = vsel %vm190_vm3, %v200_v24, 0.0 }
 0x185   :  { %205 = vadd.xlane.f32.xlu1 %v204_v25 }
 0x20e   :  { %v203_v44 = vpop.xlane.xlu1 %202 }
 0x20f   :  { %v207_v45 = vmul.f32 0.03125, %v203_v44 }
 0x211   :  { %v209_v46 = vadd.f32 1e-06, %v207_v45 }
 0x212   :  { %v206_v47 = vpop.xlane.xlu1 %205 }
 0x213   :  { %5939 = vrsqrt.f32 %v209_v46  ;;  %v208_v48 = vmul.f32 0.03125, %v206_v47 }
 0x215   :  { %v210_v49 = vadd.f32 1e-06, %v208_v48 }
 0x217   :  { %5941 = vrsqrt.f32 %v210_v49  ;;  %v4564_v49 = vld [vmem:[%s7169_s30 + $0x20] sm:$0xff] }
 0x21d   :  { %v5940_v50 = vpop.eup %5939 }
 0x21e   :  { %v213_v52 = vmul.f32 %v5940_v50, %v197_v18  ;;  %v4565_v50 = vld [vmem:[%s7169_s30 + $0x28] sm:$0xff] }
 0x220   :  { %v221_v54 = vmul.f32 %v4546_v51, %v213_v52 }
 0x221   :  { %v5942_v55 = vpop.eup %5941 }
 0x222   :  { %v6228_v56 = vadd.f32 %v4547_v53, %v221_v54  ;;  %v214_v57 = vmul.f32 %v5942_v55, %v198_v22  ;;  %v4566_v55 = vld [vmem:[%s7169_s30 + $0x30] sm:$0xff] }
 0x224   :  { %v222_v59 = vmul.f32 %v4546_v51, %v214_v57  ;;  %5099 = vmatprep.mubr.msk.f32.mxu0 %vm186_vm2, %v6228_v56  ;;  %5121 = vmatprep.mubr.msk.f32.mxu1 %vm186_vm2, %v6228_v56  ;;  %v5600_v51 = vpack.c.bf16 %v4565_v50, %v4564_v49  ;;  %v4567_v57 = vld [vmem:[%s7169_s30 + $0x38] sm:$0xff]  ;;  %v696_v49 = vld [vmem:[%s7132_s13] sm:$0xff]  ;;  %v697_v50 = vld [vmem:[%s7132_s13 + $0x8] sm:$0xff] }
 0x225   :  { %v5604_v61 = vpack.c.bf16 %v4567_v57, %v4566_v55  ;;  %v4601_v55 = vld [vmem:[%s7133_s14] ss:$0 sm:$0xff] }
 0x226   :  { %v6246_v63 = vadd.f32 %v4547_v53, %v222_v59 }
 0x228   :  { %5100 = vmatmul.mubr.msk.f32.vlgmr.msra.gmra.mrb[2].mxu0 %vm186_vm2, %v6246_v63  ;;  %5122 = vmatmul.mubr.msk.f32.vlgmr.msra.gmra.mrb[0].mxu1 %vm186_vm2, %v6246_v63 }
 0x229   :  { %5575 = vmatpush3.bf16.msra.mxu0 %v5572_v41  ;;  %5611 = vmatpush3.bf16.msra.mxu1 %v5608_v43 }
 0x22a   :  { %5110 = vmatprep.mubr.msk.f32.mxu0 %vm186_vm2, %v6228_v56  ;;  %5157 = vmatprep.mubr.msk.f32.mxu1 %vm186_vm2, %v6228_v56 }
 0x22b   :  { %5577 = vmatprep.subr.bf16.mxu0 %v5576_v0  ;;  %5613 = vmatprep.subr.bf16.mxu1 %v5612_v1 }
 0x22d   :  { %5579 = vmatpush3.bf16.msra.mxu0 %v5576_v0  ;;  %5615 = vmatpush3.bf16.msra.mxu1 %v5612_v1  ;;  %v4581_v0 = vld [vmem:[%s7170_s6 + $0x28] sm:$0xff] }
 0x22e   :  { %v5616_v1 = vpack.c.bf16 %v4581_v0, %v4580_v62 }
 0x230   :  { %5111 = vmatmul.mubr.msk.f32.vlgmr.msra.gmra.mrb[4].mxu0 %vm186_vm2, %v6246_v63  ;;  %5158 = vmatmul.mubr.msk.f32.vlgmr.msra.gmra.mrb[2].mxu1 %vm186_vm2, %v6246_v63 }
 0x2fb   :  { %v5101_v4 = vpop.f32.mrb[2].mxu0  ;;  %v5123_v5 = vpop.f32.mrb[0].mxu1 }
 0x2fc   :  { %v492_v6 = vadd.f32 %v5123_v5, %v4554_v2  ;;  %v314_v7 = vpop.f32.mrb[3].mxu0  ;;  %v486_v8 = vpop.f32.mrb[1].mxu1  ;;  %v320_v28 = vadd.f32 %v5101_v4, %v4548_v3 }
 0x2fd   :  { %v315_v9 = vadd.f32 %v4548_v3, %v314_v7  ;;  %v487_v10 = vadd.f32 %v4554_v2, %v486_v8  ;;  %v4582_v2 = vld [vmem:[%s7170_s6 + $0x30] sm:$0xff]  ;;  %v4583_v3 = vld [vmem:[%s7170_s6 + $0x38] sm:$0xff]  ;;  %v4569_v7 = vld [vmem:[%s7129_s8 + $0x1] ss:$0 sm:$0xff] }
 0x2fe   :  { %v5620_v4 = vpack.c.bf16 %v4583_v3, %v4582_v2 }
 0x2ff   :  { %v5594_v11 = vpack.c.bf16 %v492_v6, %v487_v10  ;;  %5128 = vmatprep.mubr.msk.f32.mxu0 %vm495_vm4, %v315_v9 }
 0x303   :  { %v5112_v16 = vpop.f32.mrb[4].mxu0  ;;  %v5159_v17 = vpop.f32.mrb[2].mxu1 }
 0x304   :  { %v406_v18 = vadd.f32 %v5112_v16, %v4551_v14  ;;  %v871_v19 = vadd.f32 %v5159_v17, %v4577_v15  ;;  %v400_v20 = vpop.f32.mrb[5].mxu0  ;;  %v865_v21 = vpop.f32.mrb[3].mxu1 }
 0x305   :  { %v401_v22 = vadd.f32 %v4551_v14, %v400_v20  ;;  %v866_v23 = vadd.f32 %v4577_v15, %v865_v21 }
 0x307   :  { %v5588_v25 = vpack.c.bf16 %v406_v18, %v401_v22  ;;  %v5624_v26 = vpack.c.bf16 %v871_v19, %v866_v23 }
 0x309   :  { %5590 = vmatprep.subr.msk.bf16.mxu0 %vm6275_vm6, %v5588_v25  ;;  %5626 = vmatprep.subr.msk.bf16.mxu1 %vm6275_vm6, %v5624_v26 }
 0x30a   :  { %5593 = vmatpush3.bf16.xpose.msk.msra.mxu0 %vm6275_vm6, %v5588_v25  ;;  %5629 = vmatpush3.bf16.xpose.msk.msra.mxu1 %vm6275_vm6, %v5624_v26 }
 0x30b   :  { %5596 = vmatprep.subr.msk.bf16.mxu0 %vm6280_vm8, %v5594_v11 }
 0x311   :  { %5129 = vmatmul.mubr.msk.f32.vlgmr.msra.gmra.mrb[6].mxu0 %vm495_vm4, %v320_v28 }
 0x312   :  { %5599 = vmatpush3.bf16.msk.msra.mxu0 %vm6280_vm8, %v5594_v11 }
 0x313   :  { %5601 = vmatprep.subr.bf16.mxu0 %v5600_v51 }
 0x3e4   :  { %v5130_v29 = vpop.f32.mrb[6].mxu0 }
 0x3e5   :  { %v584_v31 = vmul.f32 0.25, %v5130_v29  ;;  %v574_v32 = vpop.f32.mrb[7].mxu0 }
 0x3e6   :  { %v583_v34 = vmul.f32 0.25, %v574_v32 }
 0x3e7   :  { %v586_v35 = vadd.f32 %v584_v31, %v6300_v30 }
 0x3e8   :  { %v585_v36 = vadd.f32 %v583_v34, %v6305_v33 }
 0x3e9   :  { %v592_v37 = vsel %vm591_vm9, %v586_v35, -inf }
 0x3ea   :  { %593 = vmax.xlane.f32.xlu1 %v592_v37  ;;  %v588_v38 = vsel %vm587_vm10, %v585_v36, -inf }
 0x3eb   :  { %589 = vmax.xlane.f32.xlu0 %v588_v38 }
 0x477   :  { %v594_v39 = vpop.xlane.xlu1 %593 }
 0x478   :  { %v596_v40 = vsub.f32 %v586_v35, %v594_v39  ;;  %v590_v41 = vpop.xlane.xlu0 %589 }
 0x479   :  { %v595_v42 = vsub.f32 %v585_v36, %v590_v41  ;;  %v4596_v41 = vld [vmem:[%s7132_s13 + $0x18] sm:$0xff] }
 0x47a   :  { %v599_v43 = vmul.f32 1.442695, %v596_v40  ;;  %v4595_v40 = vld [vmem:[%s7132_s13 + $0x10] sm:$0xff] }
 0x47b   :  { %v597_v44 = vmul.f32 1.442695, %v595_v42  ;;  %v5636_v42 = vpack.c.bf16 %v4596_v41, %v4595_v40 }
 0x47c   :  { %5943 = vpow2.f32 %v599_v43 }
 0x47d   :  { %5945 = vpow2.f32 %v597_v44  ;;  %5637 = vmatprep.subr.bf16.mxu1 %v5636_v42 }
 0x486   :  { %v5944_v45 = vpop.eup %5943 }
 0x487   :  { %v5946_v46 = vpop.eup %5945  ;;  %v604_v47 = vsel %vm591_vm9, %v5944_v45, 0.0 }
 0x488   :  { %605 = vadd.xlane.f32.xlu1 %v604_v47  ;;  %v601_v48 = vsel %vm587_vm10, %v5946_v46, 0.0 }
 0x489   :  { %602 = vadd.xlane.f32.xlu0 %v601_v48 }
 0x515   :  { %v606_v52 = vpop.xlane.xlu1 %605 }
 0x516   :  { %5947 = vrcp.f32 %v606_v52  ;;  %v603_v53 = vpop.xlane.xlu0 %602 }
 0x517   :  { %5949 = vrcp.f32 %v603_v53 }
 0x520   :  { %v5948_v54 = vpop.eup %5947 }
 0x521   :  { %v5950_v58 = vpop.eup %5949  ;;  %v610_v60 = vmul.f32 %v5948_v54, %v5944_v45 }
 0x522   :  { %v609_v59 = vmul.f32 %v5950_v58, %v5946_v46 }
 0x524   :  { %5135 = vmatprep.mubr.msk.f32.mxu0 %vm587_vm10, %v609_v59 }
 0x525   :  { %5136 = vmatmul.mubr.msk.f32.vlgmr.msra.gmra.mrb[8].mxu0 %vm587_vm10, %v610_v60 }
 0x526   :  { %5603 = vmatpush3.bf16.msra.mxu0 %v5600_v51  ;;  %5146 = vmatprep.mubr.msk.f32.mxu0 %vm186_vm2, %v6228_v56  ;;  %v5640_v51 = vpack.c.bf16 %v697_v50, %v696_v49 }
 0x527   :  { %5605 = vmatprep.subr.bf16.mxu0 %v5604_v61 }
 0x52a   :  { %5607 = vmatpush3.bf16.msra.mxu0 %v5604_v61 }
 0x52b   :  { %5617 = vmatprep.subr.bf16.mxu0 %v5616_v1 }
 0x52d   :  { %5147 = vmatmul.mubr.msk.f32.vlgmr.msra.gmra.mrb[10].mxu0 %vm186_vm2, %v6246_v63 }
 0x52e   :  { %5619 = vmatpush3.bf16.msra.mxu0 %v5616_v1  ;;  %5168 = vmatprep.mubr.msk.f32.mxu0 %vm186_vm2, %v6228_v56  ;;  %v4585_v56 = vld [vmem:[%s7174_s27 + $0x1] ss:$0 sm:$0xff] }
 0x52f   :  { %5621 = vmatprep.subr.bf16.mxu0 %v5620_v4 }
 0x532   :  { %5623 = vmatpush3.bf16.msra.mxu0 %v5620_v4 }
 0x535   :  { %5169 = vmatmul.mubr.msk.f32.vlgmr.msra.gmra.mrb[12].mxu0 %vm186_vm2, %v6246_v63 }
 0x5f8   :  { %v6347_v5 = vpop.f32.mrb[8].mxu0 }
 0x5f9   :  { %v6349_v6 = vpop.f32.mrb[9].mxu0 }
 0x600   :  { %v5148_v8 = vpop.f32.mrb[10].mxu0 }
 0x601   :  { %v777_v9 = vpop.f32.mrb[11].mxu0  ;;  %v783_v11 = vadd.f32 %v5148_v8, %v4569_v7 }
 0x602   :  { %v778_v10 = vadd.f32 %v4569_v7, %v777_v9  ;;  %v1379_v9 = vld [vmem:[%s7134_s17] sm:$0xff] }
 0x604   :  { %5175 = vmatprep.mubr.msk.f32.mxu1 %vm495_vm4, %v778_v10  ;;  %v1380_v10 = vld [vmem:[%s7134_s17 + $0x8] sm:$0xff] }
 0x605   :  { %5176 = vmatmul.mubr.msk.f32.vlgmr.msra.gmra.mrb[4].mxu1 %vm495_vm4, %v783_v11  ;;  %v5644_v11 = vpack.c.bf16 %v1380_v10, %v1379_v9 }
 0x606   :  { %5639 = vmatpush3.bf16.msra.mxu1 %v5636_v42 }
 0x607   :  { %5641 = vmatprep.subr.bf16.mxu1 %v5640_v51 }
 0x608   :  { %v5170_v63 = vpop.f32.mrb[12].mxu0 }
 0x609   :  { %v959_v14 = vadd.f32 %v5170_v63, %v4585_v56  ;;  %v953_v15 = vpop.f32.mrb[13].mxu0  ;;  %v1382_v63 = vld [vmem:[%s7134_s17 + $0x18] sm:$0xff] }
 0x60a   :  { %v954_v16 = vadd.f32 %v4585_v56, %v953_v15  ;;  %v1381_v56 = vld [vmem:[%s7134_s17 + $0x10] sm:$0xff]  ;;  %v1473_v15 = vld [vmem:[%s7135_s19] sm:$0xff] }
 0x60c   :  { %v5630_v17 = vpack.c.bf16 %v959_v14, %v954_v16  ;;  %v5648_v14 = vpack.c.bf16 %v1382_v63, %v1381_v56  ;;  %v1474_v16 = vld [vmem:[%s7135_s19 + $0x8] sm:$0xff] }
 0x60e   :  { %5632 = vmatprep.subr.msk.bf16.mxu0 %vm6280_vm8, %v5630_v17 }
 0x60f   :  { %5635 = vmatpush3.bf16.msk.msra.mxu0 %vm6280_vm8, %v5630_v17  ;;  %v1475_v17 = vld [vmem:[%s7135_s19 + $0x10] sm:$0xff] }
 0x610   :  { %5645 = vmatprep.subr.bf16.mxu0 %v5644_v11 }
 0x6d8   :  { %v5177_v18 = vpop.f32.mrb[4].mxu1 }
 0x6d9   :  { %v1050_v19 = vmul.f32 0.25, %v5177_v18  ;;  %v1040_v20 = vpop.f32.mrb[5].mxu1  ;;  %v5652_v18 = vpack.c.bf16 %v1474_v16, %v1473_v15 }
 0x6da   :  { %v1049_v21 = vmul.f32 0.25, %v1040_v20 }
 0x6db   :  { %v1052_v22 = vadd.f32 %v1050_v19, %v6300_v30  ;;  %v1476_v19 = vld [vmem:[%s7135_s19 + $0x18] sm:$0xff] }
 0x6dc   :  { %v1051_v23 = vadd.f32 %v1049_v21, %v6305_v33  ;;  %v5656_v20 = vpack.c.bf16 %v1476_v19, %v1475_v17  ;;  %v1477_v21 = vld [vmem:[%s7135_s19 + $0x20] sm:$0xff] }
 0x6dd   :  { %v1056_v25 = vsel %vm591_vm9, %v1052_v22, -inf }
 0x6de   :  { %1057 = vmax.xlane.f32.xlu1 %v1056_v25  ;;  %v1053_v26 = vsel %vm587_vm10, %v1051_v23, -inf  ;;  %v1479_v25 = vld [vmem:[%s7135_s19 + $0x30] sm:$0xff] }
 0x6df   :  { %1054 = vmax.xlane.f32.xlu0 %v1053_v26  ;;  %v1480_v26 = vld [vmem:[%s7135_s19 + $0x38] sm:$0xff] }
 0x76b   :  { %v1058_v28 = vpop.xlane.xlu1 %1057 }
 0x76c   :  { %v1060_v29 = vsub.f32 %v1052_v22, %v1058_v28  ;;  %v1055_v31 = vpop.xlane.xlu0 %1054  ;;  %v1478_v22 = vld [vmem:[%s7135_s19 + $0x28] sm:$0xff]  ;;  %v5664_v28 = vpack.c.bf16 %v1480_v26, %v1479_v25  ;;  %v4614_v25 = vld [vmem:[%s7169_s30 + $0x50] sm:$0xff]  ;;  %v4615_v26 = vld [vmem:[%s7169_s30 + $0x58] sm:$0xff] }
 0x76d   :  { %v1059_v32 = vsub.f32 %v1051_v23, %v1055_v31  ;;  %v5660_v23 = vpack.c.bf16 %v1478_v22, %v1477_v21  ;;  %v1482_v31 = vld [vmem:[%s7135_s19 + $0x48] sm:$0xff]  ;;  %v4612_v21 = vld [vmem:[%s7169_s30 + $0x40] sm:$0xff] }
 0x76e   :  { %v1063_v34 = vmul.f32 1.442695, %v1060_v29  ;;  %v1481_v29 = vld [vmem:[%s7135_s19 + $0x40] sm:$0xff]  ;;  %v4613_v22 = vld [vmem:[%s7169_s30 + $0x48] sm:$0xff] }
 0x76f   :  { %v1061_v35 = vmul.f32 1.442695, %v1059_v32  ;;  %v5668_v32 = vpack.c.bf16 %v1482_v31, %v1481_v29  ;;  %v4620_v29 = vld [vmem:[%s7171_s0 + $0x40] sm:$0xff]  ;;  %v4621_v31 = vld [vmem:[%s7171_s0 + $0x48] sm:$0xff] }
 0x770   :  { %5951 = vpow2.f32 %v1063_v34  ;;  %v1483_v34 = vld [vmem:[%s7135_s19 + $0x50] sm:$0xff] }
 0x771   :  { %5953 = vpow2.f32 %v1061_v35  ;;  %v1484_v35 = vld [vmem:[%s7135_s19 + $0x58] sm:$0xff] }
 0x77a   :  { %v5952_v36 = vpop.eup %5951 }
 0x77b   :  { %v5954_v37 = vpop.eup %5953  ;;  %v1068_v38 = vsel %vm591_vm9, %v5952_v36, 0.0 }
 0x77c   :  { %1069 = vadd.xlane.f32.xlu1 %v1068_v38  ;;  %v1065_v39 = vsel %vm587_vm10, %v5954_v37, 0.0  ;;  %v1486_v38 = vld [vmem:[%s7135_s19 + $0x68] sm:$0xff] }
 0x77d   :  { %1066 = vadd.xlane.f32.xlu0 %v1065_v39 }
 0x809   :  { %v1070_v43 = vpop.xlane.xlu1 %1069 }
 0x80a   :  { %5955 = vrcp.f32 %v1070_v43  ;;  %v1067_v44 = vpop.xlane.xlu0 %1066 }
 0x80b   :  { %5957 = vrcp.f32 %v1067_v44 }
 0x814   :  { %v5956_v45 = vpop.eup %5955 }
 0x815   :  { %v5958_v46 = vpop.eup %5957  ;;  %v1074_v48 = vmul.f32 %v5956_v45, %v5952_v36  ;;  %v5672_v36 = vpack.c.bf16 %v1484_v35, %v1483_v34 }
 0x816   :  { %v1073_v47 = vmul.f32 %v5958_v46, %v5954_v37  ;;  %v1485_v37 = vld [vmem:[%s7135_s19 + $0x60] sm:$0xff] }
 0x817   :  { %v5676_v39 = vpack.c.bf16 %v1486_v38, %v1485_v37 }
 0x818   :  { %5182 = vmatprep.mubr.msk.f32.mxu0 %vm587_vm10, %v1073_v47  ;;  %v4602_v47 = vld [vmem:[%s7136_s15] ss:$0 sm:$0xff] }
 0x819   :  { %5183 = vmatmul.mubr.msk.f32.vlgmr.msra.gmra.mrb[14].mxu0 %vm587_vm10, %v1074_v48 }
 0x81a   :  { %5647 = vmatpush3.bf16.msra.mxu0 %v5644_v11 }
 0x81b   :  { %5649 = vmatprep.subr.bf16.mxu0 %v5648_v14 }
 0x81e   :  { %5651 = vmatpush3.bf16.msra.mxu0 %v5648_v14 }
 0x8ec   :  { %v5184_v52 = vpop.f32.mrb[14].mxu0 }
 0x8ed   :  { %v1150_v53 = vpop.f32.mrb[15].mxu0 }
 0x8ee   :  { %5189 = vmatprep.mubr.msk.f32.mxu1 %vm495_vm4, %v1150_v53 }
 0x8ef   :  { %5190 = vmatmul.mubr.msk.f32.vlgmr.msra.gmra.mrb[6].mxu1 %vm495_vm4, %v5184_v52 }
 0x8f0   :  { %5643 = vmatpush3.bf16.msra.mxu1 %v5640_v51  ;;  %5196 = vmatprep.mubr.msk.f32.mxu1 %vm495_vm4, %v6349_v6  ;;  %v4603_v51 = vld [vmem:[%s7137_s16] ss:$0 sm:$0xff] }
 0x8f1   :  { %5653 = vmatprep.subr.bf16.mxu1 %v5652_v18 }
 0x8f7   :  { %5197 = vmatmul.mubr.msk.f32.vlgmr.msra.gmra.mrb[6].mxu1 %vm495_vm4, %v6347_v5 }
 0x8f8   :  { %5655 = vmatpush3.bf16.msra.mxu1 %v5652_v18 }
 0x8f9   :  { %5657 = vmatprep.subr.bf16.mxu1 %v5656_v20 }
 0x8fc   :  { %5659 = vmatpush3.bf16.msra.mxu1 %v5656_v20 }
 0x8fd   :  { %5661 = vmatprep.subr.bf16.mxu1 %v5660_v23 }
 0x900   :  { %5663 = vmatpush3.bf16.msra.mxu1 %v5660_v23  ;;  %v5684_v23 = vpack.c.bf16 %v4613_v22, %v4612_v21  ;;  %v4662_v21 = vld [vmem:[%s7170_s6 + $0x68] sm:$0xff] }
 0x901   :  { %5665 = vmatprep.subr.bf16.mxu1 %v5664_v28 }
 0x902   :  { %5685 = vmatprep.subr.bf16.mxu0 %v5684_v23 }
 0x904   :  { %5667 = vmatpush3.bf16.msra.mxu1 %v5664_v28  ;;  %v5688_v28 = vpack.c.bf16 %v4615_v26, %v4614_v25  ;;  %v4664_v25 = vld [vmem:[%s7170_s6 + $0x78] sm:$0xff] }
 0x905   :  { %5669 = vmatprep.subr.bf16.mxu1 %v5668_v32 }
 0x908   :  { %5671 = vmatpush3.bf16.msra.mxu1 %v5668_v32  ;;  %v5692_v32 = vpack.c.bf16 %v4621_v31, %v4620_v29 }
 0x909   :  { %5673 = vmatprep.subr.bf16.mxu1 %v5672_v36 }
 0x90c   :  { %5675 = vmatpush3.bf16.msra.mxu1 %v5672_v36 }
 0x90d   :  { %5677 = vmatprep.subr.bf16.mxu1 %v5676_v39 }
 0x910   :  { %5679 = vmatpush3.bf16.msra.mxu1 %v5676_v39 }
 0x9ca   :  { %v5198_v54 = vpop.f32.mrb[6].mxu1 }
 0x9cb   :  { %v1325_v57 = vadd.f32 %v5198_v54, %v6176_v13  ;;  %v1315_v58 = vpop.f32.mrb[7].mxu1 }
 0x9cc   :  { %v1324_v59 = vadd.f32 %v1315_v58, %v6174_v12  ;;  %v1488_v58 = vld [vmem:[%s7135_s19 + $0x78] sm:$0xff] }
 0x9cd   :  { %v6394_v60 = vadd.f32 %v4601_v55, %v1325_v57  ;;  %v1487_v57 = vld [vmem:[%s7135_s19 + $0x70] sm:$0xff] }
 0x9ce   :  { %v6396_v61 = vadd.f32 %v4601_v55, %v1324_v59  ;;  %v5680_v59 = vpack.c.bf16 %v1488_v58, %v1487_v57  ;;  %v4630_v57 = vld [vmem:[%s7170_s6 + $0x50] sm:$0xff]  ;;  %v4631_v58 = vld [vmem:[%s7170_s6 + $0x58] sm:$0xff] }
 0x9cf   :  { %v1340_v62 = vsel %vm190_vm3, %v6394_v60, 0.0 }
 0x9d0   :  { %1341 = vadd.xlane.f32.xlu1 %v1340_v62  ;;  %v1337_v0 = vsel %vm186_vm2, %v6396_v61, 0.0  ;;  %5681 = vmatprep.subr.bf16.mxu1 %v5680_v59  ;;  %v4604_v62 = vld [vmem:[%s7138_s18] ss:$0 sm:$0xff] }
 0x9d1   :  { %1338 = vadd.xlane.f32.xlu0 %v1337_v0  ;;  %5683 = vmatpush3.bf16.msra.mxu1 %v5680_v59  ;;  %v5704_v59 = vpack.c.bf16 %v4631_v58, %v4630_v57 }
 0xa5d   :  { %v1342_v1 = vpop.xlane.xlu1 %1341 }
 0xa5e   :  { %v1344_v2 = vmul.f32 0.03125, %v1342_v1  ;;  %v1339_v3 = vpop.xlane.xlu0 %1338 }
 0xa5f   :  { %v1343_v4 = vmul.f32 0.03125, %v1339_v3 }
 0xa60   :  { %v6403_v13 = vsub.f32 %v6394_v60, %v1344_v2 }
 0xa61   :  { %v6406_v12 = vsub.f32 %v6396_v61, %v1343_v4 }
 0xa62   :  { %v1348_v5 = vmul.f32 %v6403_v13, %v6403_v13 }
 0xa63   :  { %v1347_v6 = vmul.f32 %v6406_v12, %v6406_v12 }
 0xa64   :  { %v1352_v7 = vsel %vm190_vm3, %v1348_v5, 0.0  ;;  %v4607_v5 = vld [vmem:[%s7139_s20] ss:$0 sm:$0xff] }
 0xa65   :  { %1353 = vadd.xlane.f32.xlu1 %v1352_v7  ;;  %v1349_v8 = vsel %vm186_vm2, %v1347_v6, 0.0 }
 0xa66   :  { %1350 = vadd.xlane.f32.xlu0 %v1349_v8 }
 0xaf2   :  { %v1354_v40 = vpop.xlane.xlu1 %1353 }
 0xaf3   :  { %v1356_v41 = vmul.f32 0.03125, %v1354_v40  ;;  %v1351_v42 = vpop.xlane.xlu0 %1350 }
 0xaf4   :  { %v1355_v43 = vmul.f32 0.03125, %v1351_v42 }
 0xaf5   :  { %v1358_v44 = vadd.f32 1e-06, %v1356_v41  ;;  %v4610_v41 = vld [vmem:[%s7172_s9 + $0x1] ss:$0 sm:$0xff] }
 0xaf6   :  { %v1357_v45 = vadd.f32 1e-06, %v1355_v43 }
 0xaf7   :  { %5959 = vrsqrt.f32 %v1358_v44 }
 0xaf8   :  { %5961 = vrsqrt.f32 %v1357_v45  ;;  %v4611_v45 = vld [vmem:[%s7173_s26 + $0x1] ss:$0 sm:$0xff] }
 0xb01   :  { %v5960_v46 = vpop.eup %5959 }
 0xb02   :  { %v5962_v48 = vpop.eup %5961  ;;  %v1362_v49 = vmul.f32 %v5960_v46, %v6403_v13 }
 0xb03   :  { %v1361_v50 = vmul.f32 %v5962_v48, %v6406_v12  ;;  %v4622_v48 = vld [vmem:[%s7171_s0 + $0x50] sm:$0xff] }
 0xb04   :  { %v1370_v52 = vmul.f32 %v4602_v47, %v1362_v49  ;;  %v4623_v49 = vld [vmem:[%s7171_s0 + $0x58] sm:$0xff] }
 0xb05   :  { %v1369_v53 = vmul.f32 %v4602_v47, %v1361_v50 }
 0xb06   :  { %v1378_v55 = vadd.f32 %v4603_v51, %v1370_v52  ;;  %v5696_v52 = vpack.c.bf16 %v4623_v49, %v4622_v48 }
 0xb07   :  { %v1377_v54 = vadd.f32 %v4603_v51, %v1369_v53  ;;  %v4628_v53 = vld [vmem:[%s7170_s6 + $0x40] sm:$0xff] }
 0xb09   :  { %5207 = vmatprep.mubr.msk.f32.mxu0 %vm186_vm2, %v1377_v54  ;;  %v4629_v54 = vld [vmem:[%s7170_s6 + $0x48] sm:$0xff] }
 0xb0a   :  { %5208 = vmatmul.mubr.msk.f32.vlgmr.msra.gmra.mrb[16].mxu0 %vm186_vm2, %v1378_v55  ;;  %v5700_v55 = vpack.c.bf16 %v4629_v54, %v4628_v53 }
 0xb0b   :  { %5687 = vmatpush3.bf16.msra.mxu0 %v5684_v23  ;;  %v4663_v23 = vld [vmem:[%s7170_s6 + $0x70] sm:$0xff] }
 0xb0c   :  { %5689 = vmatprep.subr.bf16.mxu0 %v5688_v28  ;;  %v5740_v26 = vpack.c.bf16 %v4664_v25, %v4663_v23 }
 0xb0f   :  { %5691 = vmatpush3.bf16.msra.mxu0 %v5688_v28 }
 0xb10   :  { %5693 = vmatprep.subr.bf16.mxu0 %v5692_v32 }
 0xbdd   :  { %v5209_v0 = vpop.f32.mrb[16].mxu0 }
 0xbde   :  { %v1468_v1 = vadd.f32 %v5209_v0, %v4604_v62  ;;  %v1462_v2 = vpop.f32.mrb[17].mxu0 }
 0xbdf   :  { %v1463_v3 = vadd.f32 %v4604_v62, %v1462_v2  ;;  %v4617_v62 = vld [vmem:[%s7129_s8 + $0x2] ss:$0 sm:$0xff] }
 0xbe0   :  { %v1472_v13 = vmax.f32 %v1468_v1, 0.0 }
 0xbe1   :  { %v1471_v4 = vmax.f32 %v1463_v3, 0.0  ;;  %v4625_v3 = vld [vmem:[%s7130_s10 + $0x2] ss:$0 sm:$0xff] }
 0xbe3   :  { %5242 = vmatprep.mubr.f32.mxu1 %v1471_v4 }
 0xbe4   :  { %5243 = vmatmul.mubr.f32.vlgmr.msra.gmra.mrb[8].mxu1 %v1472_v13 }
 0xcb7   :  { %v5244_v12 = vpop.f32.mrb[8].mxu1 }
 0xcb8   :  { %v1565_v6 = vadd.f32 %v5244_v12, %v6394_v60  ;;  %v1555_v7 = vpop.f32.mrb[9].mxu1 }
 0xcb9   :  { %v1564_v8 = vadd.f32 %v1555_v7, %v6396_v61 }
 0xcba   :  { %v6492_v9 = vadd.f32 %v4607_v5, %v1565_v6  ;;  %v4646_v6 = vld [vmem:[%s7169_s30 + $0x68] sm:$0xff] }
 0xcbb   :  { %v6494_v10 = vadd.f32 %v4607_v5, %v1564_v8  ;;  %v4645_v5 = vld [vmem:[%s7169_s30 + $0x60] sm:$0xff] }
 0xcbc   :  { %v1582_v11 = vsel %vm190_vm3, %v6492_v9, 0.0 }
 0xcbd   :  { %1583 = vadd.xlane.f32.xlu1 %v1582_v11  ;;  %v1579_v56 = vsel %vm186_vm2, %v6494_v10, 0.0  ;;  %v5720_v11 = vpack.c.bf16 %v4646_v6, %v4645_v5  ;;  %v4656_v5 = vld [vmem:[%s7171_s0 + $0x78] sm:$0xff] }
 0xcbe   :  { %1580 = vadd.xlane.f32.xlu0 %v1579_v56  ;;  %v4633_v56 = vld [vmem:[%s7174_s27 + $0x2] ss:$0 sm:$0xff] }
 0xd4a   :  { %v1584_v63 = vpop.xlane.xlu1 %1583 }
 0xd4b   :  { %v1586_v14 = vmul.f32 0.03125, %v1584_v63  ;;  %v1581_v15 = vpop.xlane.xlu0 %1580 }
 0xd4c   :  { %v1585_v16 = vmul.f32 0.03125, %v1581_v15 }
 0xd4d   :  { %v1588_v60 = vsub.f32 %v6492_v9, %v1586_v14 }
 0xd4e   :  { %v1587_v61 = vsub.f32 %v6494_v10, %v1585_v16  ;;  %v4647_v16 = vld [vmem:[%s7169_s30 + $0x70] sm:$0xff] }
 0xd4f   :  { %v1590_v17 = vmul.f32 %v1588_v60, %v1588_v60 }
 0xd50   :  { %v1589_v18 = vmul.f32 %v1587_v61, %v1587_v61 }
 0xd51   :  { %v1594_v19 = vsel %vm190_vm3, %v1590_v17, 0.0 }
 0xd52   :  { %1595 = vadd.xlane.f32.xlu1 %v1594_v19  ;;  %v1591_v20 = vsel %vm186_vm2, %v1589_v18, 0.0 }
 0xd53   :  { %1592 = vadd.xlane.f32.xlu0 %v1591_v20  ;;  %v4661_v20 = vld [vmem:[%s7170_s6 + $0x60] sm:$0xff] }
 0xd54   :  { %v5736_v22 = vpack.c.bf16 %v4662_v21, %v4661_v20 }
 0xddf   :  { %v1596_v34 = vpop.xlane.xlu1 %1595 }
 0xde0   :  { %v1598_v35 = vmul.f32 0.03125, %v1596_v34  ;;  %v1593_v36 = vpop.xlane.xlu0 %1592 }
 0xde1   :  { %v1597_v37 = vmul.f32 0.03125, %v1593_v36 }
 0xde2   :  { %v1600_v38 = vadd.f32 1e-06, %v1598_v35 }
 0xde3   :  { %v1599_v39 = vadd.f32 1e-06, %v1597_v37 }
 0xde4   :  { %5963 = vrsqrt.f32 %v1600_v38  ;;  %v4650_v38 = vld [vmem:[%s7129_s8 + $0x3] ss:$0 sm:$0xff] }
 0xde5   :  { %5965 = vrsqrt.f32 %v1599_v39 }
 0xdee   :  { %v5964_v40 = vpop.eup %5963 }
 0xdef   :  { %v5966_v42 = vpop.eup %5965  ;;  %v1604_v43 = vmul.f32 %v5964_v40, %v1588_v60  ;;  %v4648_v60 = vld [vmem:[%s7169_s30 + $0x78] sm:$0xff] }
 0xdf0   :  { %v1603_v44 = vmul.f32 %v5966_v42, %v1587_v61  ;;  %v5724_v19 = vpack.c.bf16 %v4648_v60, %v4647_v16  ;;  %v4666_v42 = vld [vmem:[%s7174_s27 + $0x3] ss:$0 sm:$0xff] }
 0xdf1   :  { %v1612_v46 = vmul.f32 %v4610_v41, %v1604_v43 }
 0xdf2   :  { %v1611_v47 = vmul.f32 %v4610_v41, %v1603_v44 }
 0xdf3   :  { %v6536_v51 = vadd.f32 %v4611_v45, %v1612_v46 }
 0xdf4   :  { %v6534_v50 = vadd.f32 %v4611_v45, %v1611_v47 }
 0xdf6   :  { %5253 = vmatprep.mubr.msk.f32.mxu0 %vm186_vm2, %v6534_v50 }
 0xdf7   :  { %5254 = vmatmul.mubr.msk.f32.vlgmr.msra.gmra.mrb[18].mxu0 %vm186_vm2, %v6536_v51 }
 0xdf8   :  { %5695 = vmatpush3.bf16.msra.mxu0 %v5692_v32  ;;  %5264 = vmatprep.mubr.msk.f32.mxu0 %vm186_vm2, %v6534_v50 }
 0xdf9   :  { %5697 = vmatprep.subr.bf16.mxu0 %v5696_v52 }
 0xdfc   :  { %5699 = vmatpush3.bf16.msra.mxu0 %v5696_v52 }
 0xdfd   :  { %5701 = vmatprep.subr.bf16.mxu0 %v5700_v55 }
 0xdff   :  { %5265 = vmatmul.mubr.msk.f32.vlgmr.msra.gmra.mrb[20].mxu0 %vm186_vm2, %v6536_v51 }
 0xe00   :  { %5703 = vmatpush3.bf16.msra.mxu0 %v5700_v55  ;;  %5275 = vmatprep.mubr.msk.f32.mxu0 %vm186_vm2, %v6534_v50 }
 0xe01   :  { %5705 = vmatprep.subr.bf16.mxu0 %v5704_v59 }
 0xe04   :  { %5707 = vmatpush3.bf16.msra.mxu0 %v5704_v59 }
 0xe07   :  { %5276 = vmatmul.mubr.msk.f32.vlgmr.msra.gmra.mrb[22].mxu0 %vm186_vm2, %v6536_v51 }
 0xeca   :  { %v5255_v0 = vpop.f32.mrb[18].mxu0 }
 0xecb   :  { %v1706_v1 = vpop.f32.mrb[19].mxu0  ;;  %v1712_v17 = vadd.f32 %v5255_v0, %v4617_v62  ;;  %v4653_v0 = vld [vmem:[%s7171_s0 + $0x60] sm:$0xff] }
 0xecc   :  { %v1707_v2 = vadd.f32 %v4617_v62, %v1706_v1  ;;  %v4654_v1 = vld [vmem:[%s7171_s0 + $0x68] sm:$0xff] }
 0xece   :  { %5282 = vmatprep.mubr.msk.f32.mxu0 %vm495_vm4, %v1707_v2  ;;  %v5728_v2 = vpack.c.bf16 %v4654_v1, %v4653_v0 }
 0xed2   :  { %v5266_v4 = vpop.f32.mrb[20].mxu0 }
 0xed3   :  { %v1800_v13 = vadd.f32 %v5266_v4, %v4625_v3  ;;  %v1794_v12 = vpop.f32.mrb[21].mxu0 }
 0xed4   :  { %v1795_v7 = vadd.f32 %v4625_v3, %v1794_v12  ;;  %v4655_v12 = vld [vmem:[%s7171_s0 + $0x70] sm:$0xff] }
 0xed6   :  { %v5708_v8 = vpack.c.bf16 %v1800_v13, %v1795_v7 }
 0xed8   :  { %5710 = vmatprep.subr.msk.bf16.mxu0 %vm6275_vm6, %v5708_v8 }
 0xed9   :  { %5713 = vmatpush3.bf16.xpose.msk.msra.mxu0 %vm6275_vm6, %v5708_v8 }
 0xeda   :  { %v5277_v63 = vpop.f32.mrb[22].mxu0  ;;  %5721 = vmatprep.subr.bf16.mxu0 %v5720_v11 }
 0xedb   :  { %v1888_v14 = vadd.f32 %v5277_v63, %v4633_v56  ;;  %v1882_v15 = vpop.f32.mrb[23].mxu0 }
 0xedc   :  { %v1883_v61 = vadd.f32 %v4633_v56, %v1882_v15  ;;  %v4658_v15 = vld [vmem:[%s7130_s10 + $0x3] ss:$0 sm:$0xff] }
 0xede   :  { %v5714_v18 = vpack.c.bf16 %v1888_v14, %v1883_v61 }
 0xee0   :  { %5283 = vmatmul.mubr.msk.f32.vlgmr.msra.gmra.mrb[24].mxu0 %vm495_vm4, %v1712_v17  ;;  %5716 = vmatprep.subr.msk.bf16.mxu1 %vm6280_vm8, %v5714_v18 }
 0xee1   :  { %5719 = vmatpush3.bf16.msk.msra.mxu1 %vm6280_vm8, %v5714_v18  ;;  %5723 = vmatpush3.bf16.msra.mxu0 %v5720_v11  ;;  %v5732_v11 = vpack.c.bf16 %v4656_v5, %v4655_v12 }
 0xee2   :  { %5300 = vmatprep.mubr.msk.f32.mxu0 %vm186_vm2, %v6534_v50  ;;  %5725 = vmatprep.subr.bf16.mxu0 %v5724_v19 }
 0xee3   :  { %5729 = vmatprep.subr.bf16.mxu1 %v5728_v2 }
 0xee5   :  { %5727 = vmatpush3.bf16.msra.mxu0 %v5724_v19 }
 0xee6   :  { %5737 = vmatprep.subr.bf16.mxu0 %v5736_v22 }
 0xee8   :  { %5301 = vmatmul.mubr.msk.f32.vlgmr.msra.gmra.mrb[26].mxu0 %vm186_vm2, %v6536_v51 }
 0xee9   :  { %5739 = vmatpush3.bf16.msra.mxu0 %v5736_v22  ;;  %5322 = vmatprep.mubr.msk.f32.mxu0 %vm186_vm2, %v6534_v50 }
 0xeea   :  { %5741 = vmatprep.subr.bf16.mxu0 %v5740_v26 }
 0xeed   :  { %5743 = vmatpush3.bf16.msra.mxu0 %v5740_v26 }
 0xef0   :  { %5323 = vmatmul.mubr.msk.f32.vlgmr.msra.gmra.mrb[28].mxu0 %vm186_vm2, %v6536_v51 }
 0xfb3   :  { %v5284_v28 = vpop.f32.mrb[24].mxu0 }
 0xfb4   :  { %v1979_v29 = vmul.f32 0.25, %v5284_v28  ;;  %v1969_v31 = vpop.f32.mrb[25].mxu0 }
 0xfb5   :  { %v1978_v32 = vmul.f32 0.25, %v1969_v31 }
 0xfb6   :  { %v1981_v34 = vadd.f32 %v1979_v29, %v6300_v30 }
 0xfb7   :  { %v1980_v35 = vadd.f32 %v1978_v32, %v6305_v33 }
 0xfb8   :  { %v1985_v36 = vsel %vm591_vm9, %v1981_v34, -inf }
 0xfb9   :  { %1986 = vmax.xlane.f32.xlu1 %v1985_v36  ;;  %v1982_v37 = vsel %vm587_vm10, %v1980_v35, -inf }
 0xfba   :  { %1983 = vmax.xlane.f32.xlu0 %v1982_v37  ;;  %v4676_v37 = vld [vmem:[%s7132_s13 + $0x30] sm:$0xff] }
 0xfbb   :  { %v5302_v39 = vpop.f32.mrb[26].mxu0 }
 0xfbc   :  { %v2176_v40 = vadd.f32 %v5302_v39, %v4650_v38  ;;  %v2170_v41 = vpop.f32.mrb[27].mxu0 }
 0xfbd   :  { %v2171_v56 = vadd.f32 %v4650_v38, %v2170_v41  ;;  %v4677_v38 = vld [vmem:[%s7132_s13 + $0x38] sm:$0xff] }
 0xfbe   :  { %v5756_v39 = vpack.c.bf16 %v4677_v38, %v4676_v37 }
 0xfc3   :  { %v5324_v43 = vpop.f32.mrb[28].mxu0 }
 0xfc4   :  { %v2352_v44 = vadd.f32 %v5324_v43, %v4666_v42  ;;  %v2346_v45 = vpop.f32.mrb[29].mxu0 }
 0xfc5   :  { %v2347_v46 = vadd.f32 %v4666_v42, %v2346_v45 }
 0xfc7   :  { %v5750_v47 = vpack.c.bf16 %v2352_v44, %v2347_v46  ;;  %v4643_v46 = vld [vmem:[%s7132_s13 + $0x20] sm:$0xff] }
 0xfc9   :  { %5752 = vmatprep.subr.msk.bf16.mxu0 %vm6280_vm8, %v5750_v47 }
 0xfca   :  { %5755 = vmatpush3.bf16.msk.msra.mxu0 %vm6280_vm8, %v5750_v47  ;;  %v4644_v47 = vld [vmem:[%s7132_s13 + $0x28] sm:$0xff] }
0x1046   :  { %v1987_v48 = vpop.xlane.xlu1 %1986 }
0x1047   :  { %v1989_v49 = vsub.f32 %v1981_v34, %v1987_v48  ;;  %v1984_v52 = vpop.xlane.xlu0 %1983  ;;  %v5760_v48 = vpack.c.bf16 %v4644_v47, %v4643_v46  ;;  %v4687_v46 = vld [vmem:[%s7137_s16 + $0x1] ss:$0 sm:$0xff] }
0x1048   :  { %v1988_v53 = vsub.f32 %v1980_v35, %v1984_v52 }
0x1049   :  { %v1992_v54 = vmul.f32 1.442695, %v1989_v49 }
0x104a   :  { %v1990_v55 = vmul.f32 1.442695, %v1988_v53 }
0x104b   :  { %5967 = vpow2.f32 %v1992_v54  ;;  %v4683_v54 = vld [vmem:[%s7133_s14 + $0x1] ss:$0 sm:$0xff] }
0x104c   :  { %5969 = vpow2.f32 %v1990_v55 }
0x1055   :  { %v5968_v57 = vpop.eup %5967 }
0x1056   :  { %v5970_v58 = vpop.eup %5969  ;;  %v1997_v59 = vsel %vm591_vm9, %v5968_v57, 0.0 }
0x1057   :  { %1998 = vadd.xlane.f32.xlu1 %v1997_v59  ;;  %v1994_v62 = vsel %vm587_vm10, %v5970_v58, 0.0 }
0x1058   :  { %1995 = vadd.xlane.f32.xlu0 %v1994_v62 }
0x10e4   :  { %v1999_v3 = vpop.xlane.xlu1 %1998 }
0x10e5   :  { %5971 = vrcp.f32 %v1999_v3  ;;  %v1996_v4 = vpop.xlane.xlu0 %1995 }
0x10e6   :  { %5973 = vrcp.f32 %v1996_v4 }
0x10ef   :  { %v5972_v13 = vpop.eup %5971 }
0x10f0   :  { %v5974_v6 = vpop.eup %5973  ;;  %v2003_v8 = vmul.f32 %v5972_v13, %v5968_v57 }
0x10f1   :  { %v2002_v7 = vmul.f32 %v5974_v6, %v5970_v58 }
0x10f3   :  { %5289 = vmatprep.mubr.msk.f32.mxu1 %vm587_vm10, %v2002_v7 }
0x10f4   :  { %5290 = vmatmul.mubr.msk.f32.vlgmr.msra.gmra.mrb[10].mxu1 %vm587_vm10, %v2003_v8  ;;  %v4688_v8 = vld [vmem:[%s7134_s17 + $0x20] sm:$0xff] }
0x10f5   :  { %5731 = vmatpush3.bf16.msra.mxu1 %v5728_v2  ;;  %5311 = vmatprep.mubr.msk.f32.mxu1 %vm186_vm2, %v6534_v50 }
0x10f6   :  { %5733 = vmatprep.subr.bf16.mxu1 %v5732_v11 }
0x10f9   :  { %5735 = vmatpush3.bf16.msra.mxu1 %v5732_v11  ;;  %v4689_v11 = vld [vmem:[%s7134_s17 + $0x28] sm:$0xff] }
0x10fc   :  { %5312 = vmatmul.mubr.msk.f32.vlgmr.msra.gmra.mrb[12].mxu1 %vm186_vm2, %v6536_v51 }
0x10fd   :  { %5329 = vmatprep.mubr.msk.f32.mxu1 %vm495_vm4, %v2171_v56  ;;  %v5764_v56 = vpack.c.bf16 %v4689_v11, %v4688_v8 }
0x10ff   :  { %5765 = vmatprep.subr.bf16.mxu0 %v5764_v56 }
0x11c7   :  { %v5291_v63 = vpop.f32.mrb[10].mxu1 }
0x11c8   :  { %v2079_v14 = vpop.f32.mrb[11].mxu1 }
0x11cf   :  { %v5313_v16 = vpop.f32.mrb[12].mxu1 }
0x11d0   :  { %v2264_v60 = vadd.f32 %v5313_v16, %v4658_v15  ;;  %v2258_v61 = vpop.f32.mrb[13].mxu1  ;;  %v4696_v16 = vld [vmem:[%s7135_s19 + $0x80] sm:$0xff] }
0x11d1   :  { %v2259_v17 = vadd.f32 %v4658_v15, %v2258_v61  ;;  %v4698_v61 = vld [vmem:[%s7135_s19 + $0x90] sm:$0xff] }
0x11d3   :  { %v5744_v18 = vpack.c.bf16 %v2264_v60, %v2259_v17  ;;  %v4697_v60 = vld [vmem:[%s7135_s19 + $0x88] sm:$0xff] }
0x11d4   :  { %v5772_v17 = vpack.c.bf16 %v4697_v60, %v4696_v16 }
0x11d5   :  { %5746 = vmatprep.subr.msk.bf16.mxu1 %vm6275_vm6, %v5744_v18 }
0x11d6   :  { %5749 = vmatpush3.bf16.xpose.msk.msra.mxu1 %vm6275_vm6, %v5744_v18  ;;  %v4699_v18 = vld [vmem:[%s7135_s19 + $0x98] sm:$0xff] }
0x11d7   :  { %5757 = vmatprep.subr.bf16.mxu1 %v5756_v39 }
0x11dd   :  { %5330 = vmatmul.mubr.msk.f32.vlgmr.msra.gmra.mrb[14].mxu1 %vm495_vm4, %v2176_v40 }
0x11de   :  { %5759 = vmatpush3.bf16.msra.mxu1 %v5756_v39 }
0x11df   :  { %5761 = vmatprep.subr.bf16.mxu1 %v5760_v48 }
0x12b0   :  { %v5331_v50 = vpop.f32.mrb[14].mxu1 }
0x12b1   :  { %v2443_v51 = vmul.f32 0.25, %v5331_v50  ;;  %v2433_v19 = vpop.f32.mrb[15].mxu1  ;;  %v5776_v50 = vpack.c.bf16 %v4699_v18, %v4698_v61  ;;  %v4718_v18 = vld [vmem:[%s7169_s30 + $0x80] sm:$0xff] }
0x12b2   :  { %v2442_v20 = vmul.f32 0.25, %v2433_v19  ;;  %v4701_v19 = vld [vmem:[%s7135_s19 + $0xa8] sm:$0xff] }
0x12b3   :  { %v2445_v21 = vadd.f32 %v2443_v51, %v6300_v30  ;;  %v4700_v51 = vld [vmem:[%s7135_s19 + $0xa0] sm:$0xff] }
0x12b4   :  { %v2444_v22 = vadd.f32 %v2442_v20, %v6305_v33  ;;  %v5780_v20 = vpack.c.bf16 %v4701_v19, %v4700_v51  ;;  %v4720_v19 = vld [vmem:[%s7169_s30 + $0x90] sm:$0xff] }
0x12b5   :  { %v2449_v23 = vsel %vm591_vm9, %v2445_v21, -inf }
0x12b6   :  { %2450 = vmax.xlane.f32.xlu1 %v2449_v23  ;;  %v2446_v25 = vsel %vm587_vm10, %v2444_v22, -inf }
0x12b7   :  { %2447 = vmax.xlane.f32.xlu0 %v2446_v25  ;;  %v4704_v25 = vld [vmem:[%s7135_s19 + $0xc0] sm:$0xff] }
0x1343   :  { %v2451_v26 = vpop.xlane.xlu1 %2450 }
0x1344   :  { %v2453_v28 = vsub.f32 %v2445_v21, %v2451_v26  ;;  %v2448_v29 = vpop.xlane.xlu0 %2447  ;;  %v4702_v21 = vld [vmem:[%s7135_s19 + $0xb0] sm:$0xff]  ;;  %v4705_v26 = vld [vmem:[%s7135_s19 + $0xc8] sm:$0xff] }
0x1345   :  { %v2452_v31 = vsub.f32 %v2444_v22, %v2448_v29  ;;  %v4703_v22 = vld [vmem:[%s7135_s19 + $0xb8] sm:$0xff]  ;;  %v4706_v29 = vld [vmem:[%s7135_s19 + $0xd0] sm:$0xff] }
0x1346   :  { %v2456_v32 = vmul.f32 1.442695, %v2453_v28  ;;  %v5784_v23 = vpack.c.bf16 %v4703_v22, %v4702_v21  ;;  %v5788_v28 = vpack.c.bf16 %v4705_v26, %v4704_v25  ;;  %v4726_v22 = vld [vmem:[%s7171_s0 + $0x80] sm:$0xff] }
0x1347   :  { %v2454_v34 = vmul.f32 1.442695, %v2452_v31  ;;  %v4707_v31 = vld [vmem:[%s7135_s19 + $0xd8] sm:$0xff] }
0x1348   :  { %5975 = vpow2.f32 %v2456_v32  ;;  %v5792_v32 = vpack.c.bf16 %v4707_v31, %v4706_v29 }
0x1349   :  { %5977 = vpow2.f32 %v2454_v34  ;;  %v4708_v34 = vld [vmem:[%s7135_s19 + $0xe0] sm:$0xff] }
0x1352   :  { %v5976_v35 = vpop.eup %5975 }
0x1353   :  { %v5978_v36 = vpop.eup %5977  ;;  %v2461_v30 = vsel %vm591_vm9, %v5976_v35, 0.0 }
0x1354   :  { %2462 = vadd.xlane.f32.xlu1 %v2461_v30  ;;  %v2458_v33 = vsel %vm587_vm10, %v5978_v36, 0.0 }
0x1355   :  { %2459 = vadd.xlane.f32.xlu0 %v2458_v33 }
0x13e1   :  { %v2463_v40 = vpop.xlane.xlu1 %2462 }
0x13e2   :  { %5979 = vrcp.f32 %v2463_v40  ;;  %v2460_v41 = vpop.xlane.xlu0 %2459 }
0x13e3   :  { %5981 = vrcp.f32 %v2460_v41 }
0x13ec   :  { %v5980_v42 = vpop.eup %5979 }
0x13ed   :  { %v5982_v43 = vpop.eup %5981  ;;  %v2467_v45 = vmul.f32 %v5980_v42, %v5976_v35  ;;  %v4709_v35 = vld [vmem:[%s7135_s19 + $0xe8] sm:$0xff]  ;;  %v4686_v42 = vld [vmem:[%s7136_s15 + $0x1] ss:$0 sm:$0xff] }
0x13ee   :  { %v2466_v44 = vmul.f32 %v5982_v43, %v5978_v36  ;;  %v5796_v36 = vpack.c.bf16 %v4709_v35, %v4708_v34 }
0x13f0   :  { %5336 = vmatprep.mubr.msk.f32.mxu0 %vm587_vm10, %v2466_v44 }
0x13f1   :  { %5337 = vmatmul.mubr.msk.f32.vlgmr.msra.gmra.mrb[30].mxu0 %vm587_vm10, %v2467_v45 }
0x13f2   :  { %5767 = vmatpush3.bf16.msra.mxu0 %v5764_v56 }
0x14c4   :  { %v5338_v49 = vpop.f32.mrb[30].mxu0 }
0x14c5   :  { %v2543_v52 = vpop.f32.mrb[31].mxu0 }
0x14c6   :  { %5343 = vmatprep.mubr.msk.f32.mxu1 %vm495_vm4, %v2543_v52 }
0x14c7   :  { %5344 = vmatmul.mubr.msk.f32.vlgmr.msra.gmra.mrb[16].mxu1 %vm495_vm4, %v5338_v49 }
0x14c8   :  { %5763 = vmatpush3.bf16.msra.mxu1 %v5760_v48  ;;  %5350 = vmatprep.mubr.msk.f32.mxu1 %vm495_vm4, %v2079_v14  ;;  %v4691_v14 = vld [vmem:[%s7134_s17 + $0x38] sm:$0xff] }
0x14c9   :  { %5773 = vmatprep.subr.bf16.mxu1 %v5772_v17 }
0x14cf   :  { %5351 = vmatmul.mubr.msk.f32.vlgmr.msra.gmra.mrb[16].mxu1 %vm495_vm4, %v5291_v63  ;;  %v4690_v63 = vld [vmem:[%s7134_s17 + $0x30] sm:$0xff] }
0x14d0   :  { %v5768_v15 = vpack.c.bf16 %v4691_v14, %v4690_v63  ;;  %5775 = vmatpush3.bf16.msra.mxu1 %v5772_v17 }
0x14d1   :  { %5777 = vmatprep.subr.bf16.mxu1 %v5776_v50 }
0x14d2   :  { %5769 = vmatprep.subr.bf16.mxu0 %v5768_v15 }
0x14d3   :  { %5771 = vmatpush3.bf16.msra.mxu0 %v5768_v15 }
0x14d4   :  { %5779 = vmatpush3.bf16.msra.mxu1 %v5776_v50  ;;  %v4719_v50 = vld [vmem:[%s7169_s30 + $0x88] sm:$0xff] }
0x14d5   :  { %5781 = vmatprep.subr.bf16.mxu1 %v5780_v20  ;;  %v5804_v51 = vpack.c.bf16 %v4719_v50, %v4718_v18  ;;  %v4769_v18 = vld [vmem:[%s7170_s6 + $0xb0] sm:$0xff]  ;;  %v4770_v50 = vld [vmem:[%s7170_s6 + $0xb8] sm:$0xff] }
0x14d7   :  { %5805 = vmatprep.subr.bf16.mxu0 %v5804_v51 }
0x14d8   :  { %5783 = vmatpush3.bf16.msra.mxu1 %v5780_v20  ;;  %v4721_v20 = vld [vmem:[%s7169_s30 + $0x98] sm:$0xff] }
0x14d9   :  { %5785 = vmatprep.subr.bf16.mxu1 %v5784_v23  ;;  %v5808_v21 = vpack.c.bf16 %v4721_v20, %v4720_v19 }
0x14dc   :  { %5787 = vmatpush3.bf16.msra.mxu1 %v5784_v23  ;;  %v4727_v23 = vld [vmem:[%s7171_s0 + $0x88] sm:$0xff] }
0x14dd   :  { %5789 = vmatprep.subr.bf16.mxu1 %v5788_v28  ;;  %v5812_v25 = vpack.c.bf16 %v4727_v23, %v4726_v22  ;;  %v6907_v23 = vld [vmem:[%s7131_s2 + $0x8] sm:$0x3] }
0x14e0   :  { %5791 = vmatpush3.bf16.msra.mxu1 %v5788_v28 }
0x14e1   :  { %5793 = vmatprep.subr.bf16.mxu1 %v5792_v32 }
0x14e4   :  { %5795 = vmatpush3.bf16.msra.mxu1 %v5792_v32 }
0x14e5   :  { %5797 = vmatprep.subr.bf16.mxu1 %v5796_v36 }
0x14e8   :  { %5799 = vmatpush3.bf16.msra.mxu1 %v5796_v36  ;;  %v4716_v36 = vld [vmem:[%s7172_s9 + $0x2] ss:$0 sm:$0xff] }
0x15a2   :  { %v5352_v53 = vpop.f32.mrb[16].mxu1 }
0x15a3   :  { %v2718_v55 = vadd.f32 %v5352_v53, %v6492_v9  ;;  %v2708_v57 = vpop.f32.mrb[17].mxu1  ;;  %v4710_v53 = vld [vmem:[%s7135_s19 + $0xf0] sm:$0xff] }
0x15a4   :  { %v2717_v58 = vadd.f32 %v2708_v57, %v6494_v10  ;;  %v4693_v57 = vld [vmem:[%s7138_s18 + $0x1] ss:$0 sm:$0xff] }
0x15a5   :  { %v6685_v59 = vadd.f32 %v4683_v54, %v2718_v55 }
0x15a6   :  { %v6687_v62 = vadd.f32 %v4683_v54, %v2717_v58  ;;  %v4711_v54 = vld [vmem:[%s7135_s19 + $0xf8] sm:$0xff] }
0x15a7   :  { %v2736_v0 = vsel %vm190_vm3, %v6685_v59, 0.0  ;;  %v5800_v55 = vpack.c.bf16 %v4711_v54, %v4710_v53  ;;  %v4723_v54 = vld [vmem:[%s7129_s8 + $0x4] ss:$0 sm:$0xff] }
0x15a8   :  { %2737 = vadd.xlane.f32.xlu1 %v2736_v0  ;;  %v2733_v1 = vsel %vm186_vm2, %v6687_v62, 0.0 }
0x15a9   :  { %2734 = vadd.xlane.f32.xlu0 %v2733_v1  ;;  %5801 = vmatprep.subr.bf16.mxu1 %v5800_v55 }
0x15aa   :  { %5803 = vmatpush3.bf16.msra.mxu1 %v5800_v55 }
0x1635   :  { %v2738_v2 = vpop.xlane.xlu1 %2737 }
0x1636   :  { %v2740_v3 = vmul.f32 0.03125, %v2738_v2  ;;  %v2735_v4 = vpop.xlane.xlu0 %2734 }
0x1637   :  { %v2739_v13 = vmul.f32 0.03125, %v2735_v4 }
0x1638   :  { %v6694_v9 = vsub.f32 %v6685_v59, %v2740_v3 }
0x1639   :  { %v6697_v10 = vsub.f32 %v6687_v62, %v2739_v13 }
0x163a   :  { %v2744_v12 = vmul.f32 %v6694_v9, %v6694_v9 }
0x163b   :  { %v2743_v5 = vmul.f32 %v6697_v10, %v6697_v10 }
0x163c   :  { %v2748_v6 = vsel %vm190_vm3, %v2744_v12, 0.0 }
0x163d   :  { %2749 = vadd.xlane.f32.xlu1 %v2748_v6  ;;  %v2745_v7 = vsel %vm186_vm2, %v2743_v5, 0.0 }
0x163e   :  { %2746 = vadd.xlane.f32.xlu0 %v2745_v7 }
0x16ca   :  { %v2750_v30 = vpop.xlane.xlu1 %2749 }
0x16cb   :  { %v2752_v33 = vmul.f32 0.03125, %v2750_v30  ;;  %v2747_v37 = vpop.xlane.xlu0 %2746 }
0x16cc   :  { %v2751_v38 = vmul.f32 0.03125, %v2747_v37 }
0x16cd   :  { %v2754_v39 = vadd.f32 1e-06, %v2752_v33 }
0x16ce   :  { %v2753_v40 = vadd.f32 1e-06, %v2751_v38  ;;  %v4717_v38 = vld [vmem:[%s7173_s26 + $0x2] ss:$0 sm:$0xff] }
0x16cf   :  { %5983 = vrsqrt.f32 %v2754_v39 }
0x16d0   :  { %5985 = vrsqrt.f32 %v2753_v40 }
0x16d9   :  { %v5984_v41 = vpop.eup %5983 }
0x16da   :  { %v5986_v43 = vpop.eup %5985  ;;  %v2758_v44 = vmul.f32 %v5984_v41, %v6694_v9  ;;  %v4713_v9 = vld [vmem:[%s7139_s20 + $0x1] ss:$0 sm:$0xff]  ;;  %v4728_v41 = vld [vmem:[%s7171_s0 + $0x90] sm:$0xff] }
0x16db   :  { %v2757_v45 = vmul.f32 %v5986_v43, %v6697_v10 }
0x16dc   :  { %v2766_v47 = vmul.f32 %v4686_v42, %v2758_v44 }
0x16dd   :  { %v2765_v48 = vmul.f32 %v4686_v42, %v2757_v45  ;;  %v4729_v42 = vld [vmem:[%s7171_s0 + $0x98] sm:$0xff] }
0x16de   :  { %v2774_v52 = vadd.f32 %v4687_v46, %v2766_v47  ;;  %v5816_v45 = vpack.c.bf16 %v4729_v42, %v4728_v41  ;;  %v4735_v47 = vld [vmem:[%s7170_s6 + $0x88] sm:$0xff] }
0x16df   :  { %v2773_v49 = vadd.f32 %v4687_v46, %v2765_v48  ;;  %v4734_v46 = vld [vmem:[%s7170_s6 + $0x80] sm:$0xff] }
0x16e0   :  { %v5820_v48 = vpack.c.bf16 %v4735_v47, %v4734_v46 }
0x16e1   :  { %5361 = vmatprep.mubr.msk.f32.mxu0 %vm186_vm2, %v2773_v49  ;;  %v4736_v49 = vld [vmem:[%s7170_s6 + $0x90] sm:$0xff] }
0x16e2   :  { %5362 = vmatmul.mubr.msk.f32.vlgmr.msra.gmra.mrb[32].mxu0 %vm186_vm2, %v2774_v52  ;;  %v4737_v52 = vld [vmem:[%s7170_s6 + $0x98] sm:$0xff] }
0x16e3   :  { %5807 = vmatpush3.bf16.msra.mxu0 %v5804_v51  ;;  %v5824_v53 = vpack.c.bf16 %v4737_v52, %v4736_v49  ;;  %v5860_v51 = vpack.c.bf16 %v4770_v50, %v4769_v18 }
0x16e4   :  { %5809 = vmatprep.subr.bf16.mxu0 %v5808_v21 }
0x16e7   :  { %5811 = vmatpush3.bf16.msra.mxu0 %v5808_v21 }
0x16e8   :  { %5813 = vmatprep.subr.bf16.mxu0 %v5812_v25 }
0x17b5   :  { %v5363_v58 = vpop.f32.mrb[32].mxu0 }
0x17b6   :  { %v2866_v0 = vadd.f32 %v5363_v58, %v4693_v57  ;;  %v2860_v1 = vpop.f32.mrb[33].mxu0 }
0x17b7   :  { %v2861_v2 = vadd.f32 %v4693_v57, %v2860_v1 }
0x17b8   :  { %v2870_v4 = vmax.f32 %v2866_v0, 0.0  ;;  %v4731_v0 = vld [vmem:[%s7130_s10 + $0x4] ss:$0 sm:$0xff] }
0x17b9   :  { %v2869_v3 = vmax.f32 %v2861_v2, 0.0 }
0x17bb   :  { %5396 = vmatprep.mubr.f32.mxu1 %v2869_v3 }
0x17bc   :  { %5397 = vmatmul.mubr.f32.vlgmr.msra.gmra.mrb[18].mxu1 %v2870_v4  ;;  %v4751_v4 = vld [vmem:[%s7169_s30 + $0xa0] sm:$0xff] }
0x188f   :  { %v5398_v13 = vpop.f32.mrb[18].mxu1 }
0x1890   :  { %v2964_v10 = vadd.f32 %v5398_v13, %v6685_v59  ;;  %v2954_v12 = vpop.f32.mrb[19].mxu1  ;;  %v4752_v13 = vld [vmem:[%s7169_s30 + $0xa8] sm:$0xff] }
0x1891   :  { %v2963_v5 = vadd.f32 %v2954_v12, %v6687_v62  ;;  %v5840_v12 = vpack.c.bf16 %v4752_v13, %v4751_v4 }
0x1892   :  { %v6783_v6 = vadd.f32 %v4713_v9, %v2964_v10 }
0x1893   :  { %v6785_v7 = vadd.f32 %v4713_v9, %v2963_v5  ;;  %v4739_v5 = vld [vmem:[%s7174_s27 + $0x4] ss:$0 sm:$0xff] }
0x1894   :  { %v2982_v8 = vsel %vm190_vm3, %v6783_v6, 0.0 }
0x1895   :  { %2983 = vadd.xlane.f32.xlu1 %v2982_v8  ;;  %v2979_v11 = vsel %vm186_vm2, %v6785_v7, 0.0 }
0x1896   :  { %2980 = vadd.xlane.f32.xlu0 %v2979_v11 }
0x1922   :  { %v2984_v56 = vpop.xlane.xlu1 %2983 }
0x1923   :  { %v2986_v63 = vmul.f32 0.03125, %v2984_v56  ;;  %v2981_v14 = vpop.xlane.xlu0 %2980 }
0x1924   :  { %v2985_v15 = vmul.f32 0.03125, %v2981_v14  ;;  %v4754_v14 = vld [vmem:[%s7169_s30 + $0xb8] sm:$0xff] }
0x1925   :  { %v2988_v59 = vsub.f32 %v6783_v6, %v2986_v63  ;;  %v4753_v63 = vld [vmem:[%s7169_s30 + $0xb0] sm:$0xff] }
0x1926   :  { %v2987_v62 = vsub.f32 %v6785_v7, %v2985_v15 }
0x1927   :  { %v2990_v16 = vmul.f32 %v2988_v59, %v2988_v59 }
0x1928   :  { %v2989_v60 = vmul.f32 %v2987_v62, %v2987_v62 }
0x1929   :  { %v2994_v61 = vsel %vm190_vm3, %v2990_v16, 0.0  ;;  %v5844_v16 = vpack.c.bf16 %v4754_v14, %v4753_v63 }
0x192a   :  { %2995 = vadd.xlane.f32.xlu1 %v2994_v61  ;;  %v2991_v17 = vsel %vm186_vm2, %v2989_v60, 0.0  ;;  %v4767_v60 = vld [vmem:[%s7170_s6 + $0xa0] sm:$0xff]  ;;  %v4768_v61 = vld [vmem:[%s7170_s6 + $0xa8] sm:$0xff] }
0x192b   :  { %2992 = vadd.xlane.f32.xlu0 %v2991_v17  ;;  %v5856_v17 = vpack.c.bf16 %v4768_v61, %v4767_v60 }
0x19b7   :  { %v2996_v26 = vpop.xlane.xlu1 %2995 }
0x19b8   :  { %v2998_v28 = vmul.f32 0.03125, %v2996_v26  ;;  %v2993_v29 = vpop.xlane.xlu0 %2992  ;;  %v6913_v26 = vld [vmem:[%s7131_s2] sm:$0xff] }
0x19b9   :  { %v2997_v31 = vmul.f32 0.03125, %v2993_v29 }
0x19ba   :  { %v3000_v32 = vadd.f32 1e-06, %v2998_v28 }
0x19bb   :  { %v2999_v34 = vadd.f32 1e-06, %v2997_v31 }
0x19bc   :  { %5987 = vrsqrt.f32 %v3000_v32  ;;  %v4756_v32 = vld [vmem:[%s7129_s8 + $0x5] ss:$0 sm:$0xff] }
0x19bd   :  { %5989 = vrsqrt.f32 %v2999_v34 }
0x19c6   :  { %v5988_v35 = vpop.eup %5987 }
0x19c7   :  { %v5990_v30 = vpop.eup %5989  ;;  %v3004_v33 = vmul.f32 %v5988_v35, %v2988_v59 }
0x19c8   :  { %v3003_v37 = vmul.f32 %v5990_v30, %v2987_v62  ;;  %v4772_v30 = vld [vmem:[%s7174_s27 + $0x5] ss:$0 sm:$0xff] }
0x19c9   :  { %v3012_v39 = vmul.f32 %v4716_v36, %v3004_v33 }
0x19ca   :  { %v3011_v40 = vmul.f32 %v4716_v36, %v3003_v37 }
0x19cb   :  { %v6827_v44 = vadd.f32 %v4717_v38, %v3012_v39 }
0x19cc   :  { %v6825_v43 = vadd.f32 %v4717_v38, %v3011_v40 }
0x19ce   :  { %5407 = vmatprep.mubr.msk.f32.mxu0 %vm186_vm2, %v6825_v43 }
0x19cf   :  { %5408 = vmatmul.mubr.msk.f32.vlgmr.msra.gmra.mrb[34].mxu0 %vm186_vm2, %v6827_v44 }
0x19d0   :  { %5815 = vmatpush3.bf16.msra.mxu0 %v5812_v25  ;;  %5418 = vmatprep.mubr.msk.f32.mxu0 %vm186_vm2, %v6825_v43 }
0x19d1   :  { %5817 = vmatprep.subr.bf16.mxu0 %v5816_v45 }
0x19d4   :  { %5819 = vmatpush3.bf16.msra.mxu0 %v5816_v45 }
0x19d5   :  { %5821 = vmatprep.subr.bf16.mxu0 %v5820_v48 }
0x19d7   :  { %5419 = vmatmul.mubr.msk.f32.vlgmr.msra.gmra.mrb[36].mxu0 %vm186_vm2, %v6827_v44 }
0x19d8   :  { %5823 = vmatpush3.bf16.msra.mxu0 %v5820_v48  ;;  %5429 = vmatprep.mubr.msk.f32.mxu0 %vm186_vm2, %v6825_v43 }
0x19d9   :  { %5825 = vmatprep.subr.bf16.mxu0 %v5824_v53 }
0x19dc   :  { %5827 = vmatpush3.bf16.msra.mxu0 %v5824_v53 }
0x19df   :  { %5430 = vmatmul.mubr.msk.f32.vlgmr.msra.gmra.mrb[38].mxu0 %vm186_vm2, %v6827_v44 }
0x1aa2   :  { %v5409_v55 = vpop.f32.mrb[34].mxu0 }
0x1aa3   :  { %v3106_v57 = vpop.f32.mrb[35].mxu0  ;;  %v3112_v59 = vadd.f32 %v5409_v55, %v4723_v54  ;;  %v4760_v55 = vld [vmem:[%s7171_s0 + $0xa8] sm:$0xff] }
0x1aa4   :  { %v3107_v58 = vadd.f32 %v4723_v54, %v3106_v57  ;;  %v5848_v57 = vpack.c.bf16 %v4760_v55, %v4759_v27 }
0x1aa6   :  { %5436 = vmatprep.mubr.msk.f32.mxu0 %vm495_vm4, %v3107_v58 }
0x1aaa   :  { %v5420_v1 = vpop.f32.mrb[36].mxu0 }
0x1aab   :  { %v3200_v2 = vadd.f32 %v5420_v1, %v4731_v0  ;;  %v3194_v3 = vpop.f32.mrb[37].mxu0 }
0x1aac   :  { %v3195_v9 = vadd.f32 %v4731_v0, %v3194_v3  ;;  %v4762_v3 = vld [vmem:[%s7171_s0 + $0xb8] sm:$0xff] }
0x1aae   :  { %v5828_v10 = vpack.c.bf16 %v3200_v2, %v3195_v9  ;;  %v4761_v2 = vld [vmem:[%s7171_s0 + $0xb0] sm:$0xff] }
0x1ab0   :  { %5830 = vmatprep.subr.msk.bf16.mxu0 %vm6275_vm6, %v5828_v10 }
0x1ab1   :  { %5833 = vmatpush3.bf16.xpose.msk.msra.mxu0 %vm6275_vm6, %v5828_v10  ;;  %v5852_v10 = vpack.c.bf16 %v4762_v3, %v4761_v2 }
0x1ab2   :  { %v5431_v8 = vpop.f32.mrb[38].mxu0  ;;  %5841 = vmatprep.subr.bf16.mxu0 %v5840_v12 }
0x1ab3   :  { %v3288_v11 = vadd.f32 %v5431_v8, %v4739_v5  ;;  %v3282_v56 = vpop.f32.mrb[39].mxu0 }
0x1ab4   :  { %v3283_v15 = vadd.f32 %v4739_v5, %v3282_v56 }
0x1ab6   :  { %v5834_v62 = vpack.c.bf16 %v3288_v11, %v3283_v15  ;;  %v4764_v11 = vld [vmem:[%s7130_s10 + $0x5] ss:$0 sm:$0xff] }
0x1ab8   :  { %5437 = vmatmul.mubr.msk.f32.vlgmr.msra.gmra.mrb[40].mxu0 %vm495_vm4, %v3112_v59  ;;  %5836 = vmatprep.subr.msk.bf16.mxu1 %vm6280_vm8, %v5834_v62 }
0x1ab9   :  { %5839 = vmatpush3.bf16.msk.msra.mxu1 %vm6280_vm8, %v5834_v62  ;;  %5843 = vmatpush3.bf16.msra.mxu0 %v5840_v12 }
0x1aba   :  { %5454 = vmatprep.mubr.msk.f32.mxu0 %vm186_vm2, %v6825_v43  ;;  %5845 = vmatprep.subr.bf16.mxu0 %v5844_v16 }
0x1abb   :  { %5849 = vmatprep.subr.bf16.mxu1 %v5848_v57 }
0x1abd   :  { %5847 = vmatpush3.bf16.msra.mxu0 %v5844_v16 }
0x1abe   :  { %5857 = vmatprep.subr.bf16.mxu0 %v5856_v17 }
0x1ac0   :  { %5455 = vmatmul.mubr.msk.f32.vlgmr.msra.gmra.mrb[42].mxu0 %vm186_vm2, %v6827_v44 }
0x1ac1   :  { %5859 = vmatpush3.bf16.msra.mxu0 %v5856_v17  ;;  %5476 = vmatprep.mubr.msk.f32.mxu0 %vm186_vm2, %v6825_v43 }
0x1ac2   :  { %5861 = vmatprep.subr.bf16.mxu0 %v5860_v51 }
0x1ac5   :  { %5863 = vmatpush3.bf16.msra.mxu0 %v5860_v51 }
0x1ac8   :  { %5477 = vmatmul.mubr.msk.f32.vlgmr.msra.gmra.mrb[44].mxu0 %vm186_vm2, %v6827_v44 }
0x1b8b   :  { %v5438_v19 = vpop.f32.mrb[40].mxu0 }
0x1b8c   :  { %v3379_v20 = vmul.f32 0.25, %v5438_v19  ;;  %v3369_v21 = vpop.f32.mrb[41].mxu0 }
0x1b8d   :  { %v3378_v22 = vmul.f32 0.25, %v3369_v21 }
0x1b8e   :  { %v3381_v25 = vadd.f32 %v6907_v23, %v3379_v20 }
0x1b8f   :  { %v3380_v28 = vadd.f32 %v6913_v26, %v3378_v22 }
0x1b90   :  { %v3385_v29 = vsel %vm591_vm9, %v3381_v25, -inf }
0x1b91   :  { %3386 = vmax.xlane.f32.xlu1 %v3385_v29  ;;  %v3382_v31 = vsel %vm587_vm10, %v3380_v28, -inf  ;;  %v4783_v29 = vld [vmem:[%s7132_s13 + $0x58] sm:$0xff] }
0x1b92   :  { %3383 = vmax.xlane.f32.xlu0 %v3382_v31 }
0x1b93   :  { %v5456_v34 = vpop.f32.mrb[42].mxu0 }
0x1b94   :  { %v3576_v35 = vadd.f32 %v5456_v34, %v4756_v32  ;;  %v3570_v36 = vpop.f32.mrb[43].mxu0 }
0x1b95   :  { %v3571_v12 = vadd.f32 %v4756_v32, %v3570_v36 }
0x1b9b   :  { %v5478_v33 = vpop.f32.mrb[44].mxu0 }
0x1b9c   :  { %v3752_v37 = vadd.f32 %v5478_v33, %v4772_v30  ;;  %v3746_v38 = vpop.f32.mrb[45].mxu0 }
0x1b9d   :  { %v3747_v39 = vadd.f32 %v4772_v30, %v3746_v38  ;;  %v4750_v38 = vld [vmem:[%s7132_s13 + $0x48] sm:$0xff] }
0x1b9f   :  { %v5870_v40 = vpack.c.bf16 %v3752_v37, %v3747_v39  ;;  %v4749_v37 = vld [vmem:[%s7132_s13 + $0x40] sm:$0xff] }
0x1ba0   :  { %v5880_v39 = vpack.c.bf16 %v4750_v38, %v4749_v37 }
0x1ba1   :  { %5872 = vmatprep.subr.msk.bf16.mxu0 %vm6280_vm8, %v5870_v40 }
0x1ba2   :  { %5875 = vmatpush3.bf16.msk.msra.mxu0 %vm6280_vm8, %v5870_v40 }
0x1c1e   :  { %v3387_v41 = vpop.xlane.xlu1 %3386 }
0x1c1f   :  { %v3389_v42 = vsub.f32 %v3381_v25, %v3387_v41  ;;  %v3384_v45 = vpop.xlane.xlu0 %3383 }
0x1c20   :  { %v3388_v46 = vsub.f32 %v3380_v28, %v3384_v45  ;;  %v4782_v28 = vld [vmem:[%s7132_s13 + $0x50] sm:$0xff]  ;;  %v4789_v45 = vld [vmem:[%s7133_s14 + $0x2] ss:$0 sm:$0xff] }
0x1c21   :  { %v3392_v47 = vmul.f32 1.442695, %v3389_v42  ;;  %v5876_v31 = vpack.c.bf16 %v4783_v29, %v4782_v28 }
0x1c22   :  { %v3390_v48 = vmul.f32 1.442695, %v3388_v46 }
0x1c23   :  { %5991 = vpow2.f32 %v3392_v47 }
0x1c24   :  { %5993 = vpow2.f32 %v3390_v48 }
0x1c2d   :  { %v5992_v49 = vpop.eup %5991 }
0x1c2e   :  { %v5994_v52 = vpop.eup %5993  ;;  %v3397_v53 = vsel %vm591_vm9, %v5992_v49, 0.0 }
0x1c2f   :  { %3398 = vadd.xlane.f32.xlu1 %v3397_v53  ;;  %v3394_v54 = vsel %vm587_vm10, %v5994_v52, 0.0 }
0x1c30   :  { %3395 = vadd.xlane.f32.xlu0 %v3394_v54 }
0x1cbc   :  { %v3399_v58 = vpop.xlane.xlu1 %3398 }
0x1cbd   :  { %5995 = vrcp.f32 %v3399_v58  ;;  %v3396_v0 = vpop.xlane.xlu0 %3395 }
0x1cbe   :  { %5997 = vrcp.f32 %v3396_v0 }
0x1cc7   :  { %v5996_v1 = vpop.eup %5995 }
0x1cc8   :  { %v5998_v4 = vpop.eup %5997  ;;  %v3403_v9 = vmul.f32 %v5996_v1, %v5992_v49 }
0x1cc9   :  { %v3402_v13 = vmul.f32 %v5998_v4, %v5994_v52  ;;  %v4794_v4 = vld [vmem:[%s7134_s17 + $0x40] sm:$0xff] }
0x1ccb   :  { %5443 = vmatprep.mubr.msk.f32.mxu1 %vm587_vm10, %v3402_v13  ;;  %v4795_v13 = vld [vmem:[%s7134_s17 + $0x48] sm:$0xff] }
0x1ccc   :  { %5444 = vmatmul.mubr.msk.f32.vlgmr.msra.gmra.mrb[20].mxu1 %vm587_vm10, %v3403_v9  ;;  %v5884_v9 = vpack.c.bf16 %v4795_v13, %v4794_v4 }
0x1ccd   :  { %5851 = vmatpush3.bf16.msra.mxu1 %v5848_v57  ;;  %5465 = vmatprep.mubr.msk.f32.mxu1 %vm186_vm2, %v6825_v43 }
0x1cce   :  { %5853 = vmatprep.subr.bf16.mxu1 %v5852_v10  ;;  %5885 = vmatprep.subr.bf16.mxu0 %v5884_v9 }
0x1cd1   :  { %5855 = vmatpush3.bf16.msra.mxu1 %v5852_v10  ;;  %v4796_v10 = vld [vmem:[%s7134_s17 + $0x50] sm:$0xff] }
0x1cd4   :  { %5466 = vmatmul.mubr.msk.f32.vlgmr.msra.gmra.mrb[22].mxu1 %vm186_vm2, %v6827_v44 }
0x1cd5   :  { %5483 = vmatprep.mubr.msk.f32.mxu1 %vm495_vm4, %v3571_v12  ;;  %v4797_v12 = vld [vmem:[%s7134_s17 + $0x58] sm:$0xff] }
0x1d9f   :  { %v5445_v5 = vpop.f32.mrb[20].mxu1 }
0x1da0   :  { %v3479_v8 = vpop.f32.mrb[21].mxu1 }
0x1da7   :  { %v5467_v56 = vpop.f32.mrb[22].mxu1 }
0x1da8   :  { %v3664_v63 = vadd.f32 %v5467_v56, %v4764_v11  ;;  %v3658_v14 = vpop.f32.mrb[23].mxu1  ;;  %v4804_v56 = vld [vmem:[%s7135_s19 + $0x110] sm:$0xff] }
0x1da9   :  { %v3659_v15 = vadd.f32 %v4764_v11, %v3658_v14  ;;  %v4803_v11 = vld [vmem:[%s7135_s19 + $0x108] sm:$0xff]  ;;  %v4805_v14 = vld [vmem:[%s7135_s19 + $0x118] sm:$0xff] }
0x1dab   :  { %v5864_v59 = vpack.c.bf16 %v3664_v63, %v3659_v15  ;;  %v5896_v15 = vpack.c.bf16 %v4805_v14, %v4804_v56  ;;  %v4419_v56 = vld [vmem:[%s7140_s23] sm:$0xff] }
0x1dad   :  { %5866 = vmatprep.subr.msk.bf16.mxu1 %vm6275_vm6, %v5864_v59 }
0x1dae   :  { %5869 = vmatpush3.bf16.xpose.msk.msra.mxu1 %vm6275_vm6, %v5864_v59  ;;  %v4806_v59 = vld [vmem:[%s7135_s19 + $0x120] sm:$0xff] }
0x1daf   :  { %5877 = vmatprep.subr.bf16.mxu1 %v5876_v31 }
0x1db5   :  { %5484 = vmatmul.mubr.msk.f32.vlgmr.msra.gmra.mrb[24].mxu1 %vm495_vm4, %v3576_v35 }
0x1db6   :  { %5879 = vmatpush3.bf16.msra.mxu1 %v5876_v31 }
0x1db7   :  { %5881 = vmatprep.subr.bf16.mxu1 %v5880_v39 }
0x1e88   :  { %v5485_v43 = vpop.f32.mrb[24].mxu1 }
0x1e89   :  { %v3843_v44 = vmul.f32 0.25, %v5485_v43  ;;  %v3833_v62 = vpop.f32.mrb[25].mxu1  ;;  %v4807_v43 = vld [vmem:[%s7135_s19 + $0x128] sm:$0xff] }
0x1e8a   :  { %v3842_v16 = vmul.f32 0.25, %v3833_v62  ;;  %v4808_v62 = vld [vmem:[%s7135_s19 + $0x130] sm:$0xff] }
0x1e8b   :  { %v3845_v60 = vadd.f32 %v6907_v23, %v3843_v44  ;;  %v5900_v44 = vpack.c.bf16 %v4807_v43, %v4806_v59  ;;  %v4422_v59 = vld [vmem:[%s7140_s23 + $0x18] sm:$0xff] }
0x1e8c   :  { %v3844_v61 = vadd.f32 %v6913_v26, %v3842_v16  ;;  %v4809_v16 = vld [vmem:[%s7135_s19 + $0x138] sm:$0xff] }
0x1e8d   :  { %v3849_v17 = vsel %vm591_vm9, %v3845_v60, -inf }
0x1e8e   :  { %3850 = vmax.xlane.f32.xlu1 %v3849_v17  ;;  %v3846_v18 = vsel %vm587_vm10, %v3844_v61, -inf  ;;  %v4811_v17 = vld [vmem:[%s7135_s19 + $0x148] sm:$0xff] }
0x1e8f   :  { %3847 = vmax.xlane.f32.xlu0 %v3846_v18 }
0x1f1b   :  { %v3851_v50 = vpop.xlane.xlu1 %3850 }
0x1f1c   :  { %v3853_v51 = vsub.f32 %v3845_v60, %v3851_v50  ;;  %v3848_v24 = vpop.xlane.xlu0 %3847  ;;  %v5904_v60 = vpack.c.bf16 %v4809_v16, %v4808_v62  ;;  %v4812_v50 = vld [vmem:[%s7135_s19 + $0x150] sm:$0xff] }
0x1f1d   :  { %v3852_v19 = vsub.f32 %v3844_v61, %v3848_v24  ;;  %v4810_v61 = vld [vmem:[%s7135_s19 + $0x140] sm:$0xff] }
0x1f1e   :  { %v3856_v20 = vmul.f32 1.442695, %v3853_v51  ;;  %v5908_v18 = vpack.c.bf16 %v4811_v17, %v4810_v61  ;;  %v4813_v51 = vld [vmem:[%s7135_s19 + $0x158] sm:$0xff] }
0x1f1f   :  { %v3854_v21 = vmul.f32 1.442695, %v3852_v19  ;;  %v5912_v24 = vpack.c.bf16 %v4813_v51, %v4812_v50  ;;  %v4814_v19 = vld [vmem:[%s7135_s19 + $0x160] sm:$0xff] }
0x1f20   :  { %5999 = vpow2.f32 %v3856_v20  ;;  %v4815_v20 = vld [vmem:[%s7135_s19 + $0x168] sm:$0xff]  ;;  %v4820_v50 = vld [vmem:[%s7141_s21] ss:$0 sm:$0xff] }
0x1f21   :  { %6001 = vpow2.f32 %v3854_v21  ;;  %v5916_v21 = vpack.c.bf16 %v4815_v20, %v4814_v19  ;;  %v4821_v20 = vld [vmem:[%s7142_s22] ss:$0 sm:$0xff] }
0x1f2a   :  { %v6000_v22 = vpop.eup %5999 }
0x1f2b   :  { %v6002_v25 = vpop.eup %6001  ;;  %v3861_v23 = vsel %vm591_vm9, %v6000_v22, 0.0 }
0x1f2c   :  { %3862 = vadd.xlane.f32.xlu1 %v3861_v23  ;;  %v3858_v26 = vsel %vm587_vm10, %v6002_v25, 0.0 }
0x1f2d   :  { %3859 = vadd.xlane.f32.xlu0 %v3858_v26 }
0x1fb9   :  { %v3863_v32 = vpop.xlane.xlu1 %3862 }
0x1fba   :  { %6003 = vrcp.f32 %v3863_v32  ;;  %v3860_v34 = vpop.xlane.xlu0 %3859  ;;  %v4792_v32 = vld [vmem:[%s7136_s15 + $0x2] ss:$0 sm:$0xff] }
0x1fbb   :  { %6005 = vrcp.f32 %v3860_v34 }
0x1fc4   :  { %v6004_v35 = vpop.eup %6003 }
0x1fc5   :  { %v6006_v36 = vpop.eup %6005  ;;  %v3867_v33 = vmul.f32 %v6004_v35, %v6000_v22 }
0x1fc6   :  { %v3866_v30 = vmul.f32 %v6006_v36, %v6002_v25 }
0x1fc8   :  { %5490 = vmatprep.mubr.msk.f32.mxu0 %vm587_vm10, %v3866_v30  ;;  %v4793_v30 = vld [vmem:[%s7137_s16 + $0x2] ss:$0 sm:$0xff] }
0x1fc9   :  { %5491 = vmatmul.mubr.msk.f32.vlgmr.msra.gmra.mrb[46].mxu0 %vm587_vm10, %v3867_v33 }
0x1fca   :  { %5887 = vmatpush3.bf16.msra.mxu0 %v5884_v9 }
0x209c   :  { %v5492_v40 = vpop.f32.mrb[46].mxu0 }
0x209d   :  { %v3943_v41 = vpop.f32.mrb[47].mxu0 }
0x209e   :  { %5497 = vmatprep.mubr.msk.f32.mxu1 %vm495_vm4, %v3943_v41  ;;  %v4817_v41 = vld [vmem:[%s7135_s19 + $0x178] sm:$0xff] }
0x209f   :  { %5498 = vmatmul.mubr.msk.f32.vlgmr.msra.gmra.mrb[26].mxu1 %vm495_vm4, %v5492_v40  ;;  %v4816_v40 = vld [vmem:[%s7135_s19 + $0x170] sm:$0xff] }
0x20a0   :  { %5883 = vmatpush3.bf16.msra.mxu1 %v5880_v39  ;;  %5504 = vmatprep.mubr.msk.f32.mxu1 %vm495_vm4, %v3479_v8  ;;  %v4802_v8 = vld [vmem:[%s7135_s19 + $0x100] sm:$0xff] }
0x20a1   :  { %v5892_v63 = vpack.c.bf16 %v4803_v11, %v4802_v8 }
0x20a3   :  { %5893 = vmatprep.subr.bf16.mxu1 %v5892_v63 }
0x20a7   :  { %5505 = vmatmul.mubr.msk.f32.vlgmr.msra.gmra.mrb[26].mxu1 %vm495_vm4, %v5445_v5  ;;  %v5888_v5 = vpack.c.bf16 %v4797_v12, %v4796_v10 }
0x20a8   :  { %5895 = vmatpush3.bf16.msra.mxu1 %v5892_v63  ;;  %v4420_v63 = vld [vmem:[%s7140_s23 + $0x8] sm:$0xff] }
0x20a9   :  { %5889 = vmatprep.subr.bf16.mxu0 %v5888_v5  ;;  %5897 = vmatprep.subr.bf16.mxu1 %v5896_v15  ;;  %v5924_v14 = vpack.c.bf16 %v4420_v63, %v4419_v56 }
0x20aa   :  { %5891 = vmatpush3.bf16.msra.mxu0 %v5888_v5 }
0x20ab   :  { %5925 = vmatprep.subr.bf16.mxu0 %v5924_v14 }
0x20ac   :  { %5899 = vmatpush3.bf16.msra.mxu1 %v5896_v15  ;;  %v4421_v15 = vld [vmem:[%s7140_s23 + $0x10] sm:$0xff] }
0x20ad   :  { %5901 = vmatprep.subr.bf16.mxu1 %v5900_v44  ;;  %v5928_v43 = vpack.c.bf16 %v4422_v59, %v4421_v15 }
0x20b0   :  { %5903 = vmatpush3.bf16.msra.mxu1 %v5900_v44 }
0x20b1   :  { %5905 = vmatprep.subr.bf16.mxu1 %v5904_v60 }
0x20b4   :  { %5907 = vmatpush3.bf16.msra.mxu1 %v5904_v60 }
0x20b5   :  { %5909 = vmatprep.subr.bf16.mxu1 %v5908_v18 }
0x20b8   :  { %5911 = vmatpush3.bf16.msra.mxu1 %v5908_v18 }
0x20b9   :  { %5913 = vmatprep.subr.bf16.mxu1 %v5912_v24 }
0x20bc   :  { %5915 = vmatpush3.bf16.msra.mxu1 %v5912_v24 }
0x20bd   :  { %5917 = vmatprep.subr.bf16.mxu1 %v5916_v21 }
0x20c0   :  { %5919 = vmatpush3.bf16.msra.mxu1 %v5916_v21 }
0x217a   :  { %v5506_v42 = vpop.f32.mrb[26].mxu1 }
0x217b   :  { %v4118_v46 = vadd.f32 %v5506_v42, %v6783_v6  ;;  %v4108_v47 = vpop.f32.mrb[27].mxu1  ;;  %v5920_v42 = vpack.c.bf16 %v4817_v41, %v4816_v40 }
0x217c   :  { %v4117_v48 = vadd.f32 %v4108_v47, %v6785_v7 }
0x217d   :  { %v6986_v49 = vadd.f32 %v4789_v45, %v4118_v46  ;;  %5921 = vmatprep.subr.bf16.mxu1 %v5920_v42 }
0x217e   :  { %v6988_v52 = vadd.f32 %v4789_v45, %v4117_v48  ;;  %5923 = vmatpush3.bf16.msra.mxu1 %v5920_v42  ;;  %v4799_v45 = vld [vmem:[%s7138_s18 + $0x2] ss:$0 sm:$0xff] }
0x217f   :  { %v4136_v53 = vsel %vm190_vm3, %v6986_v49, 0.0 }
0x2180   :  { %4137 = vadd.xlane.f32.xlu1 %v4136_v53  ;;  %v4133_v54 = vsel %vm186_vm2, %v6988_v52, 0.0 }
0x2181   :  { %4134 = vadd.xlane.f32.xlu0 %v4133_v54 }
0x220d   :  { %v4138_v27 = vpop.xlane.xlu1 %4137 }
0x220e   :  { %v4140_v55 = vmul.f32 0.03125, %v4138_v27  ;;  %v4135_v57 = vpop.xlane.xlu0 %4134 }
0x220f   :  { %v4139_v58 = vmul.f32 0.03125, %v4135_v57  ;;  %v4819_v57 = vld [vmem:[%s7139_s20 + $0x2] ss:$0 sm:$0xff] }
0x2210   :  { %v6995_v6 = vsub.f32 %v6986_v49, %v4140_v55 }
0x2211   :  { %v6998_v7 = vsub.f32 %v6988_v52, %v4139_v58 }
0x2212   :  { %v4144_v0 = vmul.f32 %v6995_v6, %v6995_v6 }
0x2213   :  { %v4143_v1 = vmul.f32 %v6998_v7, %v6998_v7 }
0x2214   :  { %v4148_v2 = vsel %vm190_vm3, %v4144_v0, 0.0 }
0x2215   :  { %4149 = vadd.xlane.f32.xlu1 %v4148_v2  ;;  %v4145_v3 = vsel %vm186_vm2, %v4143_v1, 0.0 }
0x2216   :  { %4146 = vadd.xlane.f32.xlu0 %v4145_v3 }
0x22a2   :  { %v4150_v22 = vpop.xlane.xlu1 %4149 }
0x22a3   :  { %v4152_v25 = vmul.f32 0.03125, %v4150_v22  ;;  %v4147_v23 = vpop.xlane.xlu0 %4146 }
0x22a4   :  { %v4151_v26 = vmul.f32 0.03125, %v4147_v23 }
0x22a5   :  { %v4154_v28 = vadd.f32 1e-06, %v4152_v25 }
0x22a6   :  { %v4153_v29 = vadd.f32 1e-06, %v4151_v26  ;;  %v4511_v26 = vlaneseq }
0x22a7   :  { %6007 = vrsqrt.f32 %v4154_v28 }
0x22a8   :  { %6009 = vrsqrt.f32 %v4153_v29  ;;  %v4512_v28 = vand.u32 127, %v4511_v26  ;;  %v4822_v29 = vld [vmem:[%s7143_s24] ss:$0 sm:$0xff]  ;;  %s7179_s24 = sld [smem:[#allocation12_spill]] }
0x22aa   :  { %vm4513_vm11 = vcmp.lt.s32.totalorder %v4512_v28, 2 }
0x22b1   :  { %v6008_v31 = vpop.eup %6007 }
0x22b2   :  { %v6010_v34 = vpop.eup %6009  ;;  %v4158_v35 = vmul.f32 %v6008_v31, %v6995_v6 }
0x22b3   :  { %v4157_v36 = vmul.f32 %v6010_v34, %v6998_v7 }
0x22b4   :  { %v4166_v33 = vmul.f32 %v4792_v32, %v4158_v35 }
0x22b5   :  { %v4165_v37 = vmul.f32 %v4792_v32, %v4157_v36 }
0x22b6   :  { %v4174_v39 = vadd.f32 %v4793_v30, %v4166_v33 }
0x22b7   :  { %v4173_v38 = vadd.f32 %v4793_v30, %v4165_v37 }
0x22b9   :  { %5515 = vmatprep.mubr.msk.f32.mxu0 %vm186_vm2, %v4173_v38 }
0x22ba   :  { %5516 = vmatmul.mubr.msk.f32.vlgmr.msra.gmra.mrb[48].mxu0 %vm186_vm2, %v4174_v39 }
0x22bb   :  { %5927 = vmatpush3.bf16.msra.mxu0 %v5924_v14 }
0x22bc   :  { %5929 = vmatprep.subr.bf16.mxu0 %v5928_v43 }
0x22bf   :  { %5931 = vmatpush3.bf16.msra.mxu0 %v5928_v43 }
0x238d   :  { %v5517_v46 = vpop.f32.mrb[48].mxu0 }
0x238e   :  { %v4266_v47 = vadd.f32 %v5517_v46, %v4799_v45  ;;  %v4260_v48 = vpop.f32.mrb[49].mxu0 }
0x238f   :  { %v4261_v53 = vadd.f32 %v4799_v45, %v4260_v48 }
0x2390   :  { %v4270_v27 = vmax.f32 %v4266_v47, 0.0 }
0x2391   :  { %v4269_v54 = vmax.f32 %v4261_v53, 0.0 }
0x2393   :  { %5550 = vmatprep.mubr.f32.mxu1 %v4269_v54 }
0x2394   :  { %5551 = vmatmul.mubr.f32.vlgmr.msra.gmra.mrb[28].mxu1 %v4270_v27 }
0x2467   :  { %v5552_v55 = vpop.f32.mrb[28].mxu1 }
0x2468   :  { %v4364_v58 = vadd.f32 %v5552_v55, %v6986_v49  ;;  %v4354_v6 = vpop.f32.mrb[29].mxu1 }
0x2469   :  { %v4363_v7 = vadd.f32 %v4354_v6, %v6988_v52 }
0x246a   :  { %v4374_v0 = vadd.f32 %v4819_v57, %v4364_v58 }
0x246b   :  { %v4373_v1 = vadd.f32 %v4819_v57, %v4363_v7 }
0x246c   :  { %v4380_v2 = vsel %vm190_vm3, %v4374_v0, 0.0 }
0x246d   :  { %4381 = vadd.xlane.f32.xlu1 %v4380_v2  ;;  %v4377_v3 = vsel %vm186_vm2, %v4373_v1, 0.0 }
0x246e   :  { %4378 = vadd.xlane.f32.xlu0 %v4377_v3 }
0x24fa   :  { %v4382_v4 = vpop.xlane.xlu1 %4381 }
0x24fb   :  { %v4384_v13 = vmul.f32 0.03125, %v4382_v4  ;;  %v4379_v9 = vpop.xlane.xlu0 %4378 }
0x24fc   :  { %v4383_v10 = vmul.f32 0.03125, %v4379_v9 }
0x24fd   :  { %v4386_v12 = vsub.f32 %v4374_v0, %v4384_v13 }
0x24fe   :  { %v4385_v5 = vsub.f32 %v4373_v1, %v4383_v10 }
0x24ff   :  { %v4388_v8 = vmul.f32 %v4386_v12, %v4386_v12 }
0x2500   :  { %v4387_v11 = vmul.f32 %v4385_v5, %v4385_v5 }
0x2501   :  { %v4392_v49 = vsel %vm190_vm3, %v4388_v8, 0.0 }
0x2502   :  { %4393 = vadd.xlane.f32.xlu1 %v4392_v49  ;;  %v4389_v52 = vsel %vm186_vm2, %v4387_v11, 0.0 }
0x2503   :  { %4390 = vadd.xlane.f32.xlu0 %v4389_v52 }
0x258f   :  { %v4394_v44 = vpop.xlane.xlu1 %4393 }
0x2590   :  { %v4396_v62 = vmul.f32 0.03125, %v4394_v44  ;;  %v4391_v16 = vpop.xlane.xlu0 %4390 }
0x2591   :  { %v4395_v60 = vmul.f32 0.03125, %v4391_v16 }
0x2592   :  { %v4398_v61 = vadd.f32 1e-06, %v4396_v62 }
0x2593   :  { %v4397_v17 = vadd.f32 1e-06, %v4395_v60 }
0x2594   :  { %6011 = vrsqrt.f32 %v4398_v61 }
0x2595   :  { %6013 = vrsqrt.f32 %v4397_v17 }
0x259e   :  { %v6012_v18 = vpop.eup %6011 }
0x259f   :  { %v6014_v51 = vpop.eup %6013  ;;  %v4402_v24 = vmul.f32 %v6012_v18, %v4386_v12 }
0x25a0   :  { %v4401_v19 = vmul.f32 %v6014_v51, %v4385_v5 }
0x25a1   :  { %v4410_v21 = vmul.f32 %v4820_v50, %v4402_v24 }
0x25a2   :  { %v4409_v22 = vmul.f32 %v4820_v50, %v4401_v19 }
0x25a3   :  { %v4418_v23 = vadd.f32 %v4821_v20, %v4410_v21 }
0x25a4   :  { %v4417_v25 = vadd.f32 %v4821_v20, %v4409_v22 }
0x25a6   :  { %5561 = vmatprep.mubr.msk.f32.mxu0 %vm186_vm2, %v4417_v25 }
0x25a7   :  { %5562 = vmatmul.mubr.msk.f32.vlgmr.msra.gmra.mrb[50].mxu0 %vm186_vm2, %v4418_v23 }
0x267a   :  { %v5563_v31 = vpop.f32.mrb[50].mxu0 }
0x267b   :  { %v4508_v32 = vadd.f32 %v5563_v31, %v4822_v29  ;;  %v4502_v34 = vpop.f32.mrb[51].mxu0 }
0x267c   :  { %v4503_v35 = vadd.f32 %v4822_v29, %v4502_v34 }
0x267d   :  { %v4515_v36 = vsel %vm4513_vm11, %v4508_v32, -1e+30 }
0x267e   :  { %v4518_v30 = vsel %vm617_vm5, %v4515_v36, -inf  ;;  %v4514_v33 = vsel %vm4513_vm11, %v4503_v35, -1e+30 }
0x267f   :  { %4519 = vmax.xlane.f32.xlu0 %v4518_v30  ;;  %4516 = vmax.xlane.f32.xlu1 %v4514_v33 }
0x270c   :  { %v4520_v37 = vpop.xlane.xlu0 %4519  ;;  %v4517_v38 = vpop.xlane.xlu1 %4516 }
0x270d   :  { %v4522_v39 = vsub.f32 %v4515_v36, %v4520_v37  ;;  %v4521_v40 = vsub.f32 %v4514_v33, %v4517_v38 }
0x270f   :  { %v4525_v41 = vmul.f32 1.442695, %v4522_v39  ;;  %v4523_v42 = vmul.f32 1.442695, %v4521_v40 }
0x2711   :  { %6015 = vpow2.f32 %v4525_v41 }
0x2712   :  { %6017 = vpow2.f32 %v4523_v42 }
0x271b   :  { %v6016_v45 = vpop.eup %6015 }
0x271c   :  { %v6018_v46 = vpop.eup %6017  ;;  %v4529_v47 = vsel %vm617_vm5, %v6016_v45, 0.0 }
0x271d   :  { %4527 = vadd.xlane.f32.xlu0 %v6018_v46  ;;  %4530 = vadd.xlane.f32.xlu1 %v4529_v47 }
0x27aa   :  { %v4528_v48 = vpop.xlane.xlu0 %4527  ;;  %v4531_v53 = vpop.xlane.xlu1 %4530 }
0x27ab   :  { %6019 = vrcp.f32 %v4528_v48 }
0x27ac   :  { %6021 = vrcp.f32 %v4531_v53 }
0x27b5   :  { %v6020_v54 = vpop.eup %6019 }
0x27b6   :  { %v6022_v27 = vpop.eup %6021  ;;  %v4534_v55 = vmul.f32 %v6020_v54, %v6018_v46 }
0x27b7   :  { %v4535_v57 = vmul.f32 %v6022_v27, %v6016_v45 }
0x27b8   :  { %4536 = vst [vmem:[%s7179_s24] sm:$0xff] %v4534_v55 }
0x27b9   :  { %4537 = vst [vmem:[%s7179_s24 + $0x8] sm:$0x3] %v4535_v57 }

</bundles_post_ra>
